<compile_context>
chip_gen: v7x
topology: tpu7x:2x2x1
jax: 0.10.0
libtpu: 0.0.40
codegen_flags: <defaults>
</compile_context>

<pallas_src>
import jax
import jax.numpy as jnp
from jax import lax
from jax.experimental import pallas as pl
from jax.experimental.pallas import tpu as pltpu


def _elu(v):
    # ELU(alpha=1); exp goes to the EUP slot.
    return jnp.where(v > 0, v, jnp.exp(jnp.minimum(v, 0.0)) - 1.0)


def eegnet_kernel(x_ref, band1_ref, b1_ref, band23_ref, b3_ref, pool2_ref, out_ref):
    """One batch tile.  All heavy lifting is MXU matmuls against host-prefolded matrices.

    x_ref      (Nb, C*T)        flattened input, lane index = c*T + t
    band1_ref  (C*T, F1D*T)     temporal conv (x) spatial depthwise conv (x) BN1/BN2 scales
    b1_ref     (1, F1D*T)       folded block-1 bias (conv biases + BN1 + BN2), pre-broadcast over T
    band23_ref (F1D*T, F2*T1)   AvgPool(1,P1) (x) depthwise conv3 (x) pointwise conv4 (x) BN3 scale
    b3_ref     (1, F2*T1)       folded block-2 bias (conv3/conv4 biases + BN3), pre-broadcast over T1
    pool2_ref  (F2*T1, F2*T2)   AvgPool(1,P2) (block-diag over F2)
    out_ref    (Nb, F2*T2)      lane-dense output, lane index = f2*T2 + t2
    """
    # Block 1: temporal conv + BN1, depthwise spatial conv + BN2, ELU.
    h = jnp.dot(x_ref[...], band1_ref[...], preferred_element_type=jnp.float32)
    h = _elu(h + b1_ref[...])                                                # (Nb, F1D*T)
    # AvgPool(1,P1) + separable conv (depthwise + pointwise) + BN3 -> one fused matmul.
    h = jnp.dot(h, band23_ref[...], preferred_element_type=jnp.float32)      # (Nb, F2*T1)
    h = _elu(h + b3_ref[...])
    # AvgPool(1,P2) -> lane-dense store.
    out_ref[...] = jnp.dot(h, pool2_ref[...], preferred_element_type=jnp.float32)
    # TODO(synk): dropout / training-mode BatchNorm not implemented (inference: identity / running stats)


def _toeplitz_band(taps, t_len, left_pad):
    """taps (..., K) -> (..., t_len, t_len) with M[..., tin, tout] = taps[..., tin - tout + left_pad]
    (zero when the tap index falls outside [0, K)).  Implements 'same' cross-correlation as a matmul."""
    K = taps.shape[-1]
    tin = jnp.arange(t_len)[:, None]
    tout = jnp.arange(t_len)[None, :]
    k = tin - tout + left_pad
    valid = (k >= 0) & (k < K)
    kc = jnp.clip(k, 0, K - 1)
    band = jnp.take(taps, kc.reshape(-1), axis=-1)
    band = band.reshape(taps.shape[:-1] + (t_len, t_len))
    return jnp.where(valid, band, 0.0).astype(jnp.float32)


def _avgpool_matrix(t_in, p):
    """(t_in, t_in // p) matrix implementing AvgPool(kernel=stride=p) over time as a matmul."""
    t_out = t_in // p
    rows = jnp.arange(t_in)[:, None]
    cols = jnp.arange(t_out)[None, :]
    return jnp.where(rows // p == cols, 1.0 / p, 0.0).astype(jnp.float32)


def _pick_batch_tile(n):
    for nb in (128, 64, 32, 16, 8):
        if n % nb == 0:
            return nb
    return n  # whole batch (block == full array dim, so the (8,128) rule is satisfied)


def eegnet_pallas(x, p, cfg):
    N, depth, C, T = x.shape
    assert depth == 1
    F1, D, F2 = cfg["filter_1"], cfg["D"], cfg["filter_2"]
    F1D = F1 * D
    K1 = cfg["c_kernel_1"][1]
    K3 = cfg["c_kernel_3"][1]
    P1 = cfg["p_kernel_1"][1]
    P2 = cfg["p_kernel_2"][1]
    eps = 1e-5

    # Shape assumptions the fused kernel relies on.
    assert cfg["c_kernel_1"][0] == 1
    assert tuple(cfg["c_kernel_2"]) == (C, 1), "spatial kernel must span all EEG channels"
    assert cfg["c_kernel_3"][0] == 1
    assert T % P1 == 0, "T must divide by first pooling factor"
    T1 = T // P1
    assert T1 % P2 == 0, "T//P1 must divide by second pooling factor"
    T2 = T1 // P2
    assert cfg.get("activation", "elu") == "elu"

    # torch padding='same' (stride 1): left = (k-1)//2, right = (k-1) - left.
    L1 = (K1 - 1) // 2
    L3 = (K3 - 1) // 2

    # ---- fold eval-mode BatchNorm + conv biases (all host-side, zero kernel cost) ----
    s1 = p["g1"] / jnp.sqrt(p["v1"] + eps)                 # (F1,)
    b1f = s1 * (p["b1"] - p["m1"]) + p["be1"]              # post-BN1 bias per F1 channel
    s2 = p["g2"] / jnp.sqrt(p["v2"] + eps)                 # (F1D,)
    s3 = p["g3"] / jnp.sqrt(p["v3"] + eps)                 # (F2,)

    w1_2d = p["w1"].reshape(F1, K1)
    w2_2d = p["w2"].reshape(F1D, C)
    w3_2d = p["w3"].reshape(F1D, K3)
    w4_2d = p["w4"].reshape(F2, F1D)

    grp = jnp.arange(F1D) // D                             # output channel g -> its F1 group

    # Block 1 fused: h[n,g,t] = sum_{c,k} taps1[g,c,k] * x[n,c,t+k-L1] + bias1[g]
    taps1 = (s2[:, None, None] * s1[grp][:, None, None]
             * w2_2d[:, :, None] * w1_2d[grp][:, None, :])                     # (F1D, C, K1)
    band1 = _toeplitz_band(taps1, T, L1)                                       # (F1D, C, T, T)
    band1 = band1.transpose(1, 2, 0, 3).reshape(C * T, F1D * T)                # rows (c,t_in), cols (g,t_out)
    bias1 = s2 * (w2_2d.sum(1) * b1f[grp] + p["b2"] - p["m2"]) + p["be2"]      # (F1D,)
    b1_flat = jnp.broadcast_to(bias1[:, None], (F1D, T)).reshape(1, F1D * T)

    # Block 2 fused (all linear stages between the two ELUs):
    #   AvgPool1 ∘ depthwise conv3 'same' ∘ pointwise conv4 ∘ BN3-scale -> one (F1D*T, F2*T1) matrix.
    pm1 = _avgpool_matrix(T, P1)                                               # (T, T1)
    c3 = _toeplitz_band(w3_2d, T1, L3)                                         # (F1D, T1, T1)
    poolconv3 = jnp.einsum("tu,guv->gtv", pm1, c3)                             # (F1D, T, T1)
    w4s = s3[:, None] * w4_2d                                                  # (F2, F1D)
    band23 = jnp.einsum("gtv,fg->gtfv", poolconv3, w4s)                        # (F1D, T, F2, T1)
    band23 = band23.reshape(F1D * T, F2 * T1)
    bias3 = s3 * (w4_2d @ p["b3"] + p["b4"] - p["m3"]) + p["be3"]              # (F2,)
    b3_flat = jnp.broadcast_to(bias3[:, None], (F2, T1)).reshape(1, F2 * T1)

    # AvgPool2, block-diagonal over F2.
    pm2 = _avgpool_matrix(T1, P2)                                              # (T1, T2)
    pool2 = jnp.einsum("fh,uv->fuhv", jnp.eye(F2, dtype=jnp.float32), pm2)
    pool2 = pool2.reshape(F2 * T1, F2 * T2)

    x_flat = x.reshape(N, C * T).astype(jnp.float32)

    # Batch grid: pipelines the input DMA, bounds per-step VMEM, and lets v7x shard batch tiles
    # over its 2 TensorCores.
    Nb = _pick_batch_tile(N)
    grid = (N // Nb,)

    out = pl.pallas_call(
        eegnet_kernel,
        out_shape=jax.ShapeDtypeStruct((N, F2 * T2), jnp.float32),
        grid=grid,
        in_specs=[
            pl.BlockSpec((Nb, C * T), lambda i: (i, 0)),          # x: blocked over batch
            pl.BlockSpec((C * T, F1D * T), lambda i: (0, 0)),     # weights: constant block (fetched once)
            pl.BlockSpec((1, F1D * T), lambda i: (0, 0)),
            pl.BlockSpec((F1D * T, F2 * T1), lambda i: (0, 0)),
            pl.BlockSpec((1, F2 * T1), lambda i: (0, 0)),
            pl.BlockSpec((F2 * T1, F2 * T2), lambda i: (0, 0)),
        ],
        out_specs=pl.BlockSpec((Nb, F2 * T2), lambda i: (i, 0)),
        compiler_params=pltpu.CompilerParams(
            dimension_semantics=("parallel",),
            # ~8.2 MB of folded weights, double-buffered ~16.5 MB + activation tiles:
            # within the 32 MiB scoped limit on v5e/v6e/v7x.
            vmem_limit_bytes=32 * 1024 * 1024,
        ),
    )(x_flat, band1, b1_flat, band23, b3_flat, pool2)

    if cfg.get("flatten_output", False):
        return out                              # (N, F2*T2) == flatten(1) of the NCHW output
    return out.reshape(N, F2, 1, T2)            # PyTorch NCHW


def eegnet_reference(x, p, cfg):
    """Independent pure-JAX (lax.conv) reference matching the PyTorch module in eval mode."""
    eps = 1e-5
    F1 = cfg["filter_1"]
    F1D = F1 * cfg["D"]
    K1 = cfg["c_kernel_1"][1]
    K3 = cfg["c_kernel_3"][1]
    P1 = cfg["p_kernel_1"][1]
    P2 = cfg["p_kernel_2"][1]
    L1, R1 = (K1 - 1) // 2, (K1 - 1) - (K1 - 1) // 2
    L3, R3 = (K3 - 1) // 2, (K3 - 1) - (K3 - 1) // 2

    def conv(h, w, padding, groups=1):
        return lax.conv_general_dilated(
            h, w, window_strides=(1, 1), padding=padding,
            dimension_numbers=("NCHW", "OIHW", "NCHW"),
            feature_group_count=groups, precision=lax.Precision.HIGHEST)

    def bn(h, g, be, m, v):
        return ((g * lax.rsqrt(v + eps))[None, :, None, None] * (h - m[None, :, None, None])
                + be[None, :, None, None])

    def pool_w(h, pp):
        n_, c_, hh, ww = h.shape
        return h.reshape(n_, c_, hh, ww // pp, pp).mean(-1)

    h = conv(x, p["w1"], [(0, 0), (L1, R1)]) + p["b1"][None, :, None, None]
    h = bn(h, p["g1"], p["be1"], p["m1"], p["v1"])
    h = conv(h, p["w2"], [(0, 0), (0, 0)], groups=F1) + p["b2"][None, :, None, None]
    h = bn(h, p["g2"], p["be2"], p["m2"], p["v2"])
    h = jax.nn.elu(h)
    h = pool_w(h, P1)
    h = conv(h, p["w3"], [(0, 0), (L3, R3)], groups=F1D) + p["b3"][None, :, None, None]
    h = conv(h, p["w4"], [(0, 0), (0, 0)]) + p["b4"][None, :, None, None]
    h = bn(h, p["g3"], p["be3"], p["m3"], p["v3"])
    h = jax.nn.elu(h)
    h = pool_w(h, P2)
    if cfg.get("flatten_output", False):
        h = h.reshape(h.shape[0], -1)
    return h


if __name__ == "__main__":
    cfg = dict(C=4, T=128, filter_1=8, filter_2=16, D=2,
               c_kernel_1=(1, 16), c_kernel_2=(4, 1), c_kernel_3=(1, 8),
               p_kernel_1=(1, 4), p_kernel_2=(1, 8),
               use_bias=True, activation="elu", prob_dropout=0.5,
               use_dropout_2d=False, flatten_output=False)
    F1, D, F2, C = cfg["filter_1"], cfg["D"], cfg["filter_2"], cfg["C"]
    F1D = F1 * D
    K1, K3 = cfg["c_kernel_1"][1], cfg["c_kernel_3"][1]

    ks = jax.random.split(jax.random.PRNGKey(0), 20)
    params = dict(
        w1=0.3 * jax.random.normal(ks[0], (F1, 1, 1, K1), jnp.float32),
        b1=0.1 * jax.random.normal(ks[1], (F1,), jnp.float32),
        g1=1.0 + 0.1 * jax.random.normal(ks[2], (F1,), jnp.float32),
        be1=0.1 * jax.random.normal(ks[3], (F1,), jnp.float32),
        m1=0.1 * jax.random.normal(ks[4], (F1,), jnp.float32),
        v1=jax.random.uniform(ks[5], (F1,), jnp.float32, 0.5, 1.5),
        w2=0.3 * jax.random.normal(ks[6], (F1D, 1, C, 1), jnp.float32),
        b2=0.1 * jax.random.normal(ks[7], (F1D,), jnp.float32),
        g2=1.0 + 0.1 * jax.random.normal(ks[8], (F1D,), jnp.float32),
        be2=0.1 * jax.random.normal(ks[9], (F1D,), jnp.float32),
        m2=0.1 * jax.random.normal(ks[10], (F1D,), jnp.float32),
        v2=jax.random.uniform(ks[11], (F1D,), jnp.float32, 0.5, 1.5),
        w3=0.3 * jax.random.normal(ks[12], (F1D, 1, 1, K3), jnp.float32),
        b3=0.1 * jax.random.normal(ks[13], (F1D,), jnp.float32),
        w4=0.2 * jax.random.normal(ks[14], (F2, F1D, 1, 1), jnp.float32),
        b4=0.1 * jax.random.normal(ks[15], (F2,), jnp.float32),
        g3=1.0 + 0.1 * jax.random.normal(ks[16], (F2,), jnp.float32),
        be3=0.1 * jax.random.normal(ks[17], (F2,), jnp.float32),
        m3=0.1 * jax.random.normal(ks[18], (F2,), jnp.float32),
        v3=jax.random.uniform(ks[19], (F2,), jnp.float32, 0.5, 1.5),
    )
    x = jax.random.normal(jax.random.PRNGKey(1), (2, 1, C, cfg["T"]), jnp.float32)

    out = jax.block_until_ready(eegnet_pallas(x, params, cfg))
    ref = jax.block_until_ready(eegnet_reference(x, params, cfg))
    assert out.shape == ref.shape, (out.shape, ref.shape)
    # Default-precision MXU matmuls (f32 accumulate): expected relative error vs the all-f32
    # reference is ~1e-3; 1e-2 leaves a comfortable margin.
    if not jnp.allclose(out, ref, rtol=1e-2, atol=1e-2):
        raise SystemExit("mismatch: max abs err = %g" % float(jnp.max(jnp.abs(out - ref))))
    print("KERNEL_OK")
</pallas_src>

<mosaic_0001>
module attributes {stable_mosaic.version = 11 : i64} {
  func.func @eegnet_kernel(%arg0: i32, %arg1: memref<2x512xf32, #tpu.memory_space<vmem>>, %arg2: memref<512x2048xf32, #tpu.memory_space<vmem>>, %arg3: memref<1x2048xf32, #tpu.memory_space<vmem>>, %arg4: memref<2048x512xf32, #tpu.memory_space<vmem>>, %arg5: memref<1x512xf32, #tpu.memory_space<vmem>>, %arg6: memref<512x64xf32, #tpu.memory_space<vmem>>, %arg7: memref<2x64xf32, #tpu.memory_space<vmem>>) attributes {dimension_semantics = [#tpu.dimension_semantics<parallel>], iteration_bounds = array<i64: 1>, scalar_prefetch = 0 : i64, scratch_operands = 0 : i64, tpu.core_type = #tpu.core_type<tc>, window_params = [{transform_indices = @transform_0, window_bounds = array<i64: 2, 512>}, {pipeline_mode = #tpu.pipeline_mode<synchronous>, transform_indices = @transform_1, window_bounds = array<i64: 512, 2048>}, {pipeline_mode = #tpu.pipeline_mode<synchronous>, transform_indices = @transform_2, window_bounds = array<i64: 1, 2048>}, {pipeline_mode = #tpu.pipeline_mode<synchronous>, transform_indices = @transform_3, window_bounds = array<i64: 2048, 512>}, {pipeline_mode = #tpu.pipeline_mode<synchronous>, transform_indices = @transform_4, window_bounds = array<i64: 1, 512>}, {pipeline_mode = #tpu.pipeline_mode<synchronous>, transform_indices = @transform_5, window_bounds = array<i64: 512, 64>}, {transform_indices = @transform_6, window_bounds = array<i64: 2, 64>}]} {
    %c0 = arith.constant 0 : index
    %c0_0 = arith.constant 0 : index
    %0 = vector.load %arg1[%c0, %c0_0] : memref<2x512xf32, #tpu.memory_space<vmem>>, vector<2x512xf32>
    %c0_1 = arith.constant 0 : index
    %c0_2 = arith.constant 0 : index
    %1 = vector.load %arg2[%c0_1, %c0_2] : memref<512x2048xf32, #tpu.memory_space<vmem>>, vector<512x2048xf32>
    %cst = arith.constant dense<0.000000e+00> : vector<2x2048xf32>
    %2 = tpu.matmul %0, %1, %cst {dimension_numbers = #tpu.dot_dimension_numbers<[1], [0], [0], [1], [0, 0, 1, 1], [], []>} : vector<2x512xf32>, vector<512x2048xf32>, vector<2x2048xf32> -> vector<2x2048xf32>
    %c0_3 = arith.constant 0 : index
    %c0_4 = arith.constant 0 : index
    %3 = vector.load %arg3[%c0_3, %c0_4] : memref<1x2048xf32, #tpu.memory_space<vmem>>, vector<1x2048xf32>
    %4 = vector.broadcast %3 : vector<1x2048xf32> to vector<2x2048xf32>
    %5 = arith.addf %2, %4 : vector<2x2048xf32>
    %cst_5 = arith.constant 0.000000e+00 : f32
    %6 = vector.broadcast %cst_5 : f32 to vector<2x2048xf32>
    %7 = arith.cmpf ogt, %5, %6 : vector<2x2048xf32>
    %cst_6 = arith.constant 0.000000e+00 : f32
    %8 = vector.broadcast %cst_6 : f32 to vector<2x2048xf32>
    %9 = arith.minimumf %5, %8 : vector<2x2048xf32>
    %10 = math.exp %9 : vector<2x2048xf32>
    %cst_7 = arith.constant 1.000000e+00 : f32
    %11 = vector.broadcast %cst_7 : f32 to vector<2x2048xf32>
    %12 = arith.subf %10, %11 : vector<2x2048xf32>
    %13 = arith.select %7, %5, %12 : vector<2x2048xi1>, vector<2x2048xf32>
    %c0_8 = arith.constant 0 : index
    %c0_9 = arith.constant 0 : index
    %14 = vector.load %arg4[%c0_8, %c0_9] : memref<2048x512xf32, #tpu.memory_space<vmem>>, vector<2048x512xf32>
    %cst_10 = arith.constant dense<0.000000e+00> : vector<2x512xf32>
    %15 = tpu.matmul %13, %14, %cst_10 {dimension_numbers = #tpu.dot_dimension_numbers<[1], [0], [0], [1], [0, 0, 1, 1], [], []>} : vector<2x2048xf32>, vector<2048x512xf32>, vector<2x512xf32> -> vector<2x512xf32>
    %c0_11 = arith.constant 0 : index
    %c0_12 = arith.constant 0 : index
    %16 = vector.load %arg5[%c0_11, %c0_12] : memref<1x512xf32, #tpu.memory_space<vmem>>, vector<1x512xf32>
    %17 = vector.broadcast %16 : vector<1x512xf32> to vector<2x512xf32>
    %18 = arith.addf %15, %17 : vector<2x512xf32>
    %cst_13 = arith.constant 0.000000e+00 : f32
    %19 = vector.broadcast %cst_13 : f32 to vector<2x512xf32>
    %20 = arith.cmpf ogt, %18, %19 : vector<2x512xf32>
    %cst_14 = arith.constant 0.000000e+00 : f32
    %21 = vector.broadcast %cst_14 : f32 to vector<2x512xf32>
    %22 = arith.minimumf %18, %21 : vector<2x512xf32>
    %23 = math.exp %22 : vector<2x512xf32>
    %cst_15 = arith.constant 1.000000e+00 : f32
    %24 = vector.broadcast %cst_15 : f32 to vector<2x512xf32>
    %25 = arith.subf %23, %24 : vector<2x512xf32>
    %26 = arith.select %20, %18, %25 : vector<2x512xi1>, vector<2x512xf32>
    %c0_16 = arith.constant 0 : index
    %c0_17 = arith.constant 0 : index
    %27 = vector.load %arg6[%c0_16, %c0_17] : memref<512x64xf32, #tpu.memory_space<vmem>>, vector<512x64xf32>
    %cst_18 = arith.constant dense<0.000000e+00> : vector<2x64xf32>
    %28 = tpu.matmul %26, %27, %cst_18 {dimension_numbers = #tpu.dot_dimension_numbers<[1], [0], [0], [1], [0, 0, 1, 1], [], []>} : vector<2x512xf32>, vector<512x64xf32>, vector<2x64xf32> -> vector<2x64xf32>
    %c0_19 = arith.constant 0 : index
    %c0_20 = arith.constant 0 : index
    %29 = vector.load %arg7[%c0_19, %c0_20] : memref<2x64xf32, #tpu.memory_space<vmem>>, vector<2x64xf32>
    tpu.vector_store %arg7[%c0_19, %c0_20], %28 {strides = array<i32>} : memref<2x64xf32, #tpu.memory_space<vmem>>, vector<2x64xf32>,
    return
  }
  func.func @transform_0(%arg0: i32) -> (i32, i32) {
    %c0_i32 = arith.constant 0 : i32
    %c0_i32_0 = arith.constant 0 : i32
    return %arg0, %c0_i32 : i32, i32
  }
  func.func @transform_1(%arg0: i32) -> (i32, i32) {
    %c0_i32 = arith.constant 0 : i32
    %c0_i32_0 = arith.constant 0 : i32
    %c0_i32_1 = arith.constant 0 : i32
    return %c0_i32, %c0_i32_0 : i32, i32
  }
  func.func @transform_2(%arg0: i32) -> (i32, i32) {
    %c0_i32 = arith.constant 0 : i32
    %c0_i32_0 = arith.constant 0 : i32
    %c0_i32_1 = arith.constant 0 : i32
    return %c0_i32, %c0_i32_0 : i32, i32
  }
  func.func @transform_3(%arg0: i32) -> (i32, i32) {
    %c0_i32 = arith.constant 0 : i32
    %c0_i32_0 = arith.constant 0 : i32
    %c0_i32_1 = arith.constant 0 : i32
    return %c0_i32, %c0_i32_0 : i32, i32
  }
  func.func @transform_4(%arg0: i32) -> (i32, i32) {
    %c0_i32 = arith.constant 0 : i32
    %c0_i32_0 = arith.constant 0 : i32
    %c0_i32_1 = arith.constant 0 : i32
    return %c0_i32, %c0_i32_0 : i32, i32
  }
  func.func @transform_5(%arg0: i32) -> (i32, i32) {
    %c0_i32 = arith.constant 0 : i32
    %c0_i32_0 = arith.constant 0 : i32
    %c0_i32_1 = arith.constant 0 : i32
    return %c0_i32, %c0_i32_0 : i32, i32
  }
  func.func @transform_6(%arg0: i32) -> (i32, i32) {
    %c0_i32 = arith.constant 0 : i32
    %c0_i32_0 = arith.constant 0 : i32
    return %arg0, %c0_i32 : i32, i32
  }
}

</mosaic_0001>

<bundles_post_ra>
// kernel: tpu_custom_call.1
= control target key start
LH: loop header
LB: loop body
LE: loop exit
PB: predicated region body
PF: predicated region fallthrough
CT: control target
= control target key end

     0   :  { %11 = vsyncpa [#allocation3], 0  ;;  %s7900_s0 = inlined_call_operand.hbm [shape: f32[2,512], index: 0, kind: input, shape index: {}]   ;;  %s7901_s1 = inlined_call_operand.hbm [shape: f32[512,2048], index: 1, kind: input, shape index: {}]   ;;  %s7902_s2 = inlined_call_operand.hbm [shape: f32[1,2048], index: 2, kind: input, shape index: {}]   ;;  %s7903_s3 = inlined_call_operand.hbm [shape: f32[2048,512], index: 3, kind: input, shape index: {}]   ;;  %s7904_s4 = inlined_call_operand.hbm [shape: f32[1,512], index: 4, kind: input, shape index: {}]   ;;  %s7905_s5 = inlined_call_operand.vmem [shape: f32[512,64], index: 5, kind: input, shape index: {}]   ;;  %s7906_s6 = inlined_call_operand.hbm [shape: f32[2,64], index: 6, kind: output, shape index: {}]  }
   0x1   :  { %12 = vsyncpa [#allocation6], 0 }
   0x2   :  { %13 = vsyncpa [#allocation9], 0 }
   0x3   :  { %14 = vsyncpa [#allocation4], 0  ;;  %s7340_s21 = smov [#allocation5]   ;;  %s7200_s25 = scalar_lea.hbm %s7901_s1, 131072 }
   0x4   :  { %s30_s22 = sshll.u32 %s7340_s21, 4  ;;  %p7201_p0 = scmp.ne.s32.totalorder %s7901_s1, %s7200_s25  ;;  %s31_s22 = int_to_ptr.vmem [resolvable:$true] %s30_s22 }
   0x5   :  { %p7204_p1 = scmp.lt.u32.totalorder %s7200_s25, %s7901_s1 }
   0x7   :  { %p7206_p2 = pnand %p7204_p1, %p7201_p0 }
   0x9   :  { %7209 = shalt.err (!%p7206_p2)
}
   0xa   :  { %s7210_s30 = scalar_lea.vmem %s31_s22, 131072  ;;  %p7215_p4 = scmp.lt.s32.totalorder %s31_s22, %s31_s22 }
   0xb   :  { %p7211_p3 = scmp.ne.s32.totalorder %s31_s22, %s7210_s30  ;;  %p7216_p5 = scmp.lt.s32.totalorder %s7210_s30, %s7210_s30 }
   0xd   :  { %p7217_p6 = por %p7216_p5, %p7215_p4 }
   0xf   :  { %p7218_p7 = pnand %p7217_p6, %p7211_p3 }
  0x11   :  { %7221 = shalt.err (!%p7218_p7)
}
  0x12   :  { %s7341_s7 = smov 2048   ;;  %s7342_s8 = smov 128  }
  0x13   :  { %36 = dma.hbm_to_vmem [thread:$0]  %s7901_s1, 131072, %s31_s22, [#allocation6], %s7341_s7, %s7341_s7, %s7342_s8  }
  0x14   :  { %s7343_s11 = smov [#allocation8]   ;;  %s7222_s15 = scalar_lea.hbm %s7903_s3, 131072 }
  0x15   :  { %s52_s12 = sshll.u32 %s7343_s11, 4  ;;  %p7223_p8 = scmp.ne.s32.totalorder %s7903_s3, %s7222_s15  ;;  %s53_s12 = int_to_ptr.vmem [resolvable:$true] %s52_s12 }
  0x16   :  { %p7226_p9 = scmp.lt.u32.totalorder %s7222_s15, %s7903_s3 }
  0x18   :  { %p7228_p10 = pnand %p7226_p9, %p7223_p8 }
  0x1a   :  { %7231 = shalt.err (!%p7228_p10)
}
  0x1b   :  { %s7232_s20 = scalar_lea.vmem %s53_s12, 131072  ;;  %p7237_p12 = scmp.lt.s32.totalorder %s53_s12, %s53_s12 }
  0x1c   :  { %p7233_p11 = scmp.ne.s32.totalorder %s53_s12, %s7232_s20  ;;  %p7238_p13 = scmp.lt.s32.totalorder %s7232_s20, %s7232_s20 }
  0x1e   :  { %p7239_p0 = por %p7238_p13, %p7237_p12 }
  0x20   :  { %p7240_p1 = pnand %p7239_p0, %p7233_p11 }
  0x22   :  { %7243 = shalt.err (!%p7240_p1)
}
  0x23   :  { %s7344_s1 = smov 512   ;;  %s7345_s21 = smov 32  }
  0x24   :  { %58 = dma.hbm_to_vmem [thread:$0]  %s7903_s3, 131072, %s53_s12, [#allocation9], %s7344_s1, %s7344_s1, %s7345_s21  }
  0x25   :  { %s7346_s24 = smov [#allocation2]   ;;  %s7347_s26 = smov [#allocation7]  }
  0x26   :  { %s21_s25 = sshll.u32 %s7346_s24, 4  ;;  %s43_s27 = sshll.u32 %s7347_s26, 4  ;;  %s22_s25 = int_to_ptr.vmem [resolvable:$true] %s21_s25  ;;  %s44_s27 = int_to_ptr.vmem [resolvable:$true] %s43_s27 }
  0x27   :  { %s7244_s30 = scalar_lea.hbm %s7900_s0, 128 }
  0x28   :  { %p7245_p2 = scmp.ne.s32.totalorder %s7900_s0, %s7244_s30  ;;  %p7248_p3 = scmp.lt.u32.totalorder %s7244_s30, %s7900_s0 }
  0x2a   :  { %p7250_p4 = pnand %p7248_p3, %p7245_p2 }
  0x2c   :  { %7253 = shalt.err (!%p7250_p4)
}
  0x2d   :  { %s7254_s3 = scalar_lea.vmem %s22_s25, 128  ;;  %p7259_p6 = scmp.lt.s32.totalorder %s22_s25, %s22_s25 }
  0x2e   :  { %p7255_p5 = scmp.ne.s32.totalorder %s22_s25, %s7254_s3  ;;  %p7260_p7 = scmp.lt.s32.totalorder %s7254_s3, %s7254_s3 }
  0x30   :  { %p7261_p8 = por %p7260_p7, %p7259_p6 }
  0x32   :  { %p7262_p9 = pnand %p7261_p8, %p7255_p5 }
  0x34   :  { %7265 = shalt.err (!%p7262_p9)
}
  0x35   :  { %24 = dma.hbm_to_vmem [thread:$0]  %s7900_s0, 128, %s22_s25, [#allocation3]  }
  0x36   :  { %s7266_s15 = scalar_lea.hbm %s7902_s2, 256 }
  0x37   :  { %p7267_p10 = scmp.ne.s32.totalorder %s7902_s2, %s7266_s15  ;;  %p7270_p11 = scmp.lt.u32.totalorder %s7266_s15, %s7902_s2 }
  0x39   :  { %p7272_p12 = pnand %p7270_p11, %p7267_p10 }
  0x3b   :  { %7275 = shalt.err (!%p7272_p12)
}
  0x3c   :  { %s7276_s20 = scalar_lea.vmem %s44_s27, 256  ;;  %p7281_p0 = scmp.lt.s32.totalorder %s44_s27, %s44_s27 }
  0x3d   :  { %p7277_p13 = scmp.ne.s32.totalorder %s44_s27, %s7276_s20  ;;  %p7282_p1 = scmp.lt.s32.totalorder %s7276_s20, %s7276_s20 }
  0x3f   :  { %p7283_p2 = por %p7282_p1, %p7281_p0 }
  0x41   :  { %p7284_p3 = pnand %p7283_p2, %p7277_p13 }
  0x43   :  { %7287 = shalt.err (!%p7284_p3)
}
  0x44   :  { %46 = dma.hbm_to_vmem [thread:$0]  %s7902_s2, 256, %s44_s27, [#allocation6]  }
  0x45   :  { %s7348_s21 = smov [#allocation10]   ;;  %s7288_s25 = scalar_lea.hbm %s7904_s4, 64 }
  0x46   :  { %s65_s22 = sshll.u32 %s7348_s21, 4  ;;  %p7289_p4 = scmp.ne.s32.totalorder %s7904_s4, %s7288_s25  ;;  %s66_s22 = int_to_ptr.vmem [resolvable:$true] %s65_s22 }
  0x47   :  { %p7292_p5 = scmp.lt.u32.totalorder %s7288_s25, %s7904_s4 }
  0x49   :  { %p7294_p6 = pnand %p7292_p5, %p7289_p4 }
  0x4b   :  { %7297 = shalt.err (!%p7294_p6)
}
  0x4c   :  { %s7298_s7 = scalar_lea.vmem %s66_s22, 64  ;;  %p7303_p8 = scmp.lt.s32.totalorder %s66_s22, %s66_s22 }
  0x4d   :  { %p7299_p7 = scmp.ne.s32.totalorder %s66_s22, %s7298_s7  ;;  %p7304_p9 = scmp.lt.s32.totalorder %s7298_s7, %s7298_s7 }
  0x4f   :  { %p7305_p10 = por %p7304_p9, %p7303_p8 }
  0x51   :  { %p7306_p11 = pnand %p7305_p10, %p7299_p7 }
  0x53   :  { %7309 = shalt.err (!%p7306_p11)
}
  0x54   :  { %68 = dma.hbm_to_vmem [thread:$0]  %s7904_s4, 64, %s66_s22, [#allocation9]  }
  0x55   :  { %7332 = dma.done.wait [#allocation3], 128  }
  0x56   :  { %7333 = vsyncadd [#allocation3], 4294967168 }
  0x57   :  { %7334 = dma.done.wait [#allocation6], 131328  }
  0x58   :  { %7335 = vsyncadd [#allocation6], 4294835968 }
  0x59   :  { %7336 = dma.done.wait [#allocation9], 131136  }
  0x5a   :  { %7337 = vsyncadd [#allocation9], 4294836160  ;;  %v88_v0 = vld [vmem:[#allocation5 + $0x8] sm:$0xff]  ;;  %v90_v2 = vld [vmem:[#allocation5 + $0x18] sm:$0xff] }
  0x5b   :  { %v104_v1 = vld [vmem:[#allocation5 + $0x88] sm:$0xff]  ;;  %v106_v4 = vld [vmem:[#allocation5 + $0x98] sm:$0xff]  ;;  %v87_v5 = vld [vmem:[#allocation5] sm:$0xff] }
  0x5c   :  { %v4968_v3 = vpack.c.bf16 %v104_v1, %v88_v0  ;;  %v103_v6 = vld [vmem:[#allocation5 + $0x80] sm:$0xff]  ;;  %v5096_v7 = vpack.c.bf16 %v106_v4, %v90_v2  ;;  %v89_v9 = vld [vmem:[#allocation5 + $0x10] sm:$0xff]  ;;  %v120_v11 = vld [vmem:[#allocation5 + $0x108] sm:$0xff] }
  0x5d   :  { %v4970_v8 = vpack.c.bf16 %v103_v6, %v87_v5  ;;  %v105_v10 = vld [vmem:[#allocation5 + $0x90] sm:$0xff]  ;;  %v136_v13 = vld [vmem:[#allocation5 + $0x188] sm:$0xff]  ;;  %v122_v14 = vld [vmem:[#allocation5 + $0x118] sm:$0xff] }
  0x5e   :  { %4969 = vmatprep.subr.bf16.mxu0 %v4968_v3  ;;  %v5098_v12 = vpack.c.bf16 %v105_v10, %v89_v9  ;;  %v138_v15 = vld [vmem:[#allocation5 + $0x198] sm:$0xff]  ;;  %5097 = vmatprep.subr.bf16.mxu1 %v5096_v7  ;;  %v4972_v16 = vpack.c.bf16 %v136_v13, %v120_v11  ;;  %v119_v18 = vld [vmem:[#allocation5 + $0x100] sm:$0xff]  ;;  %v121_v20 = vld [vmem:[#allocation5 + $0x110] sm:$0xff] }
  0x5f   :  { %4971 = vmatpush1.bf16.msra.mxu0 %v4970_v8  ;;  %v5100_v17 = vpack.c.bf16 %v138_v15, %v122_v14  ;;  %v135_v19 = vld [vmem:[#allocation5 + $0x180] sm:$0xff]  ;;  %v137_v22 = vld [vmem:[#allocation5 + $0x190] sm:$0xff]  ;;  %v152_v23 = vld [vmem:[#allocation5 + $0x208] sm:$0xff] }
  0x60   :  { %5099 = vmatpush1.bf16.msra.mxu1 %v5098_v12  ;;  %v4974_v21 = vpack.c.bf16 %v135_v19, %v119_v18  ;;  %v168_v24 = vld [vmem:[#allocation5 + $0x288] sm:$0xff]  ;;  %4973 = vmatprep.subr.bf16.mxu0 %v4972_v16  ;;  %v5102_v25 = vpack.c.bf16 %v137_v22, %v121_v20  ;;  %v154_v27 = vld [vmem:[#allocation5 + $0x218] sm:$0xff]  ;;  %v151_v29 = vld [vmem:[#allocation5 + $0x200] sm:$0xff] }
  0x61   :  { %5101 = vmatprep.subr.bf16.mxu1 %v5100_v17  ;;  %v4976_v26 = vpack.c.bf16 %v168_v24, %v152_v23  ;;  %v170_v28 = vld [vmem:[#allocation5 + $0x298] sm:$0xff]  ;;  %v167_v31 = vld [vmem:[#allocation5 + $0x280] sm:$0xff]  ;;  %v153_v32 = vld [vmem:[#allocation5 + $0x210] sm:$0xff] }
  0x62   :  { %v5104_v30 = vpack.c.bf16 %v170_v28, %v154_v27  ;;  %v169_v33 = vld [vmem:[#allocation5 + $0x290] sm:$0xff]  ;;  %v4978_v34 = vpack.c.bf16 %v167_v31, %v151_v29  ;;  %v184_v35 = vld [vmem:[#allocation5 + $0x308] sm:$0xff]  ;;  %v186_v37 = vld [vmem:[#allocation5 + $0x318] sm:$0xff] }
  0x63   :  { %4975 = vmatpush1.bf16.msra.mxu0 %v4974_v21  ;;  %v200_v36 = vld [vmem:[#allocation5 + $0x388] sm:$0xff]  ;;  %v5106_v38 = vpack.c.bf16 %v169_v33, %v153_v32  ;;  %v202_v40 = vld [vmem:[#allocation5 + $0x398] sm:$0xff]  ;;  %v183_v41 = vld [vmem:[#allocation5 + $0x300] sm:$0xff] }
  0x64   :  { %5103 = vmatpush1.bf16.msra.mxu1 %v5102_v25  ;;  %4977 = vmatprep.subr.bf16.mxu0 %v4976_v26  ;;  %v4980_v39 = vpack.c.bf16 %v200_v36, %v184_v35  ;;  %v199_v42 = vld [vmem:[#allocation5 + $0x380] sm:$0xff]  ;;  %v5108_v43 = vpack.c.bf16 %v202_v40, %v186_v37  ;;  %v185_v44 = vld [vmem:[#allocation5 + $0x310] sm:$0xff]  ;;  %v216_v46 = vld [vmem:[#allocation5 + $0x408] sm:$0xff] }
  0x65   :  { %5105 = vmatprep.subr.bf16.mxu1 %v5104_v30  ;;  %v201_v45 = vld [vmem:[#allocation5 + $0x390] sm:$0xff]  ;;  %v232_v47 = vld [vmem:[#allocation5 + $0x488] sm:$0xff]  ;;  %v218_v48 = vld [vmem:[#allocation5 + $0x418] sm:$0xff]  ;;  %v4982_v50 = vpack.c.bf16 %v199_v42, %v183_v41 }
  0x66   :  { %v234_v49 = vld [vmem:[#allocation5 + $0x498] sm:$0xff]  ;;  %v5110_v51 = vpack.c.bf16 %v201_v45, %v185_v44  ;;  %v4984_v52 = vpack.c.bf16 %v232_v47, %v216_v46  ;;  %v215_v53 = vld [vmem:[#allocation5 + $0x400] sm:$0xff]  ;;  %v217_v55 = vld [vmem:[#allocation5 + $0x410] sm:$0xff]  ;;  %v1115_v46 = vlaneseq  ;;  %v7349_v47 = vmov 1983009808  }
  0x67   :  { %4979 = vmatpush1.bf16.msra.mxu0 %v4978_v34  ;;  %v231_v54 = vld [vmem:[#allocation5 + $0x480] sm:$0xff]  ;;  %v5112_v56 = vpack.c.bf16 %v234_v49, %v218_v48  ;;  %v233_v57 = vld [vmem:[#allocation5 + $0x490] sm:$0xff]  ;;  %v248_v58 = vld [vmem:[#allocation5 + $0x508] sm:$0xff]  ;;  %v1198_v48 = vunpack.c.l.s4 %v7349_v47 }
  0x68   :  { %5107 = vmatpush1.bf16.msra.mxu1 %v5106_v38  ;;  %4981 = vmatprep.subr.bf16.mxu0 %v4980_v39  ;;  %v264_v59 = vld [vmem:[#allocation5 + $0x588] sm:$0xff]  ;;  %v250_v60 = vld [vmem:[#allocation5 + $0x518] sm:$0xff]  ;;  %v4986_v62 = vpack.c.bf16 %v231_v54, %v215_v53  ;;  %v5114_v63 = vpack.c.bf16 %v233_v57, %v217_v55  ;;  %v247_v1 = vld [vmem:[#allocation5 + $0x500] sm:$0xff] }
  0x69   :  { %5109 = vmatprep.subr.bf16.mxu1 %v5108_v43  ;;  %v266_v61 = vld [vmem:[#allocation5 + $0x598] sm:$0xff]  ;;  %v4988_v0 = vpack.c.bf16 %v264_v59, %v248_v58  ;;  %v263_v2 = vld [vmem:[#allocation5 + $0x580] sm:$0xff]  ;;  %v249_v3 = vld [vmem:[#allocation5 + $0x510] sm:$0xff] }
  0x6a   :  { %v5116_v4 = vpack.c.bf16 %v266_v61, %v250_v60  ;;  %v265_v5 = vld [vmem:[#allocation5 + $0x590] sm:$0xff]  ;;  %v280_v6 = vld [vmem:[#allocation5 + $0x608] sm:$0xff]  ;;  %v282_v8 = vld [vmem:[#allocation5 + $0x618] sm:$0xff]  ;;  %v4990_v10 = vpack.c.bf16 %v263_v2, %v247_v1  ;;  %v7446_v61 = vshrl.u32 %v1115_v46, 7 }
  0x6b   :  { %4983 = vmatpush1.bf16.msra.mxu0 %v4982_v50  ;;  %v296_v7 = vld [vmem:[#allocation5 + $0x688] sm:$0xff]  ;;  %v298_v9 = vld [vmem:[#allocation5 + $0x698] sm:$0xff]  ;;  %v5118_v11 = vpack.c.bf16 %v265_v5, %v249_v3  ;;  %v279_v13 = vld [vmem:[#allocation5 + $0x600] sm:$0xff] }
  0x6c   :  { %5111 = vmatpush1.bf16.msra.mxu1 %v5110_v51  ;;  %4985 = vmatprep.subr.bf16.mxu0 %v4984_v52  ;;  %v4992_v12 = vpack.c.bf16 %v296_v7, %v280_v6  ;;  %v295_v14 = vld [vmem:[#allocation5 + $0x680] sm:$0xff]  ;;  %v281_v15 = vld [vmem:[#allocation5 + $0x610] sm:$0xff]  ;;  %v5120_v16 = vpack.c.bf16 %v298_v9, %v282_v8  ;;  %v312_v18 = vld [vmem:[#allocation5 + $0x708] sm:$0xff] }
  0x6d   :  { %5113 = vmatprep.subr.bf16.mxu1 %v5112_v56  ;;  %v297_v17 = vld [vmem:[#allocation5 + $0x690] sm:$0xff]  ;;  %v328_v19 = vld [vmem:[#allocation5 + $0x788] sm:$0xff]  ;;  %v314_v20 = vld [vmem:[#allocation5 + $0x718] sm:$0xff]  ;;  %v4994_v22 = vpack.c.bf16 %v295_v14, %v279_v13 }
  0x6e   :  { %v330_v21 = vld [vmem:[#allocation5 + $0x798] sm:$0xff]  ;;  %v5122_v23 = vpack.c.bf16 %v297_v17, %v281_v15  ;;  %v4996_v24 = vpack.c.bf16 %v328_v19, %v312_v18  ;;  %v311_v25 = vld [vmem:[#allocation5 + $0x700] sm:$0xff]  ;;  %v313_v27 = vld [vmem:[#allocation5 + $0x710] sm:$0xff] }
  0x6f   :  { %4987 = vmatpush1.bf16.msra.mxu0 %v4986_v62  ;;  %v327_v26 = vld [vmem:[#allocation5 + $0x780] sm:$0xff]  ;;  %v5124_v28 = vpack.c.bf16 %v330_v21, %v314_v20  ;;  %v329_v29 = vld [vmem:[#allocation5 + $0x790] sm:$0xff]  ;;  %v344_v30 = vld [vmem:[#allocation5 + $0x808] sm:$0xff]  ;;  %v1199_v62 = vunpack.c.0.s8 %v1198_v48 }
  0x70   :  { %5115 = vmatpush1.bf16.msra.mxu1 %v5114_v63  ;;  %4989 = vmatprep.subr.bf16.mxu0 %v4988_v0  ;;  %v360_v31 = vld [vmem:[#allocation5 + $0x888] sm:$0xff]  ;;  %v346_v32 = vld [vmem:[#allocation5 + $0x818] sm:$0xff]  ;;  %v4998_v34 = vpack.c.bf16 %v327_v26, %v311_v25  ;;  %v5126_v35 = vpack.c.bf16 %v329_v29, %v313_v27  ;;  %v343_v37 = vld [vmem:[#allocation5 + $0x800] sm:$0xff] }
  0x71   :  { %5117 = vmatprep.subr.bf16.mxu1 %v5116_v4  ;;  %v362_v33 = vld [vmem:[#allocation5 + $0x898] sm:$0xff]  ;;  %v5000_v36 = vpack.c.bf16 %v360_v31, %v344_v30  ;;  %v359_v38 = vld [vmem:[#allocation5 + $0x880] sm:$0xff]  ;;  %v345_v39 = vld [vmem:[#allocation5 + $0x810] sm:$0xff] }
  0x72   :  { %v5128_v40 = vpack.c.bf16 %v362_v33, %v346_v32  ;;  %v361_v41 = vld [vmem:[#allocation5 + $0x890] sm:$0xff]  ;;  %v376_v42 = vld [vmem:[#allocation5 + $0x908] sm:$0xff]  ;;  %v378_v44 = vld [vmem:[#allocation5 + $0x918] sm:$0xff]  ;;  %v5002_v49 = vpack.c.bf16 %v359_v38, %v343_v37 }
  0x73   :  { %4991 = vmatpush1.bf16.msra.mxu0 %v4990_v10  ;;  %v392_v43 = vld [vmem:[#allocation5 + $0x988] sm:$0xff]  ;;  %v394_v45 = vld [vmem:[#allocation5 + $0x998] sm:$0xff]  ;;  %v5130_v50 = vpack.c.bf16 %v361_v41, %v345_v39  ;;  %v375_v52 = vld [vmem:[#allocation5 + $0x900] sm:$0xff] }
  0x74   :  { %5119 = vmatpush1.bf16.msra.mxu1 %v5118_v11  ;;  %4993 = vmatprep.subr.bf16.mxu0 %v4992_v12  ;;  %v5004_v51 = vpack.c.bf16 %v392_v43, %v376_v42  ;;  %v391_v53 = vld [vmem:[#allocation5 + $0x980] sm:$0xff]  ;;  %v377_v54 = vld [vmem:[#allocation5 + $0x910] sm:$0xff]  ;;  %v5132_v55 = vpack.c.bf16 %v394_v45, %v378_v44  ;;  %v408_v57 = vld [vmem:[#allocation5 + $0xa08] sm:$0xff]  ;;  %v7449_v11 = vsub.s32 %v1199_v62, %v7446_v61 }
  0x75   :  { %5121 = vmatprep.subr.bf16.mxu1 %v5120_v16  ;;  %v393_v56 = vld [vmem:[#allocation5 + $0x990] sm:$0xff]  ;;  %v424_v58 = vld [vmem:[#allocation5 + $0xa88] sm:$0xff]  ;;  %v410_v59 = vld [vmem:[#allocation5 + $0xa18] sm:$0xff]  ;;  %v5006_v63 = vpack.c.bf16 %v391_v53, %v375_v52 }
  0x76   :  { %v426_v60 = vld [vmem:[#allocation5 + $0xa98] sm:$0xff]  ;;  %v5134_v0 = vpack.c.bf16 %v393_v56, %v377_v54  ;;  %v5008_v1 = vpack.c.bf16 %v424_v58, %v408_v57  ;;  %v407_v2 = vld [vmem:[#allocation5 + $0xa00] sm:$0xff]  ;;  %v409_v4 = vld [vmem:[#allocation5 + $0xa10] sm:$0xff] }
  0x77   :  { %4995 = vmatpush1.bf16.msra.mxu0 %v4994_v22  ;;  %v423_v3 = vld [vmem:[#allocation5 + $0xa80] sm:$0xff]  ;;  %v5136_v5 = vpack.c.bf16 %v426_v60, %v410_v59  ;;  %v425_v6 = vld [vmem:[#allocation5 + $0xa90] sm:$0xff]  ;;  %v440_v7 = vld [vmem:[#allocation5 + $0xb08] sm:$0xff] }
  0x78   :  { %5123 = vmatpush1.bf16.msra.mxu1 %v5122_v23  ;;  %4997 = vmatprep.subr.bf16.mxu0 %v4996_v24  ;;  %v456_v8 = vld [vmem:[#allocation5 + $0xb88] sm:$0xff]  ;;  %v442_v9 = vld [vmem:[#allocation5 + $0xb18] sm:$0xff]  ;;  %v5010_v12 = vpack.c.bf16 %v423_v3, %v407_v2  ;;  %v439_v13 = vld [vmem:[#allocation5 + $0xb00] sm:$0xff]  ;;  %v5138_v14 = vpack.c.bf16 %v425_v6, %v409_v4 }
  0x79   :  { %5125 = vmatprep.subr.bf16.mxu1 %v5124_v28  ;;  %v458_v10 = vld [vmem:[#allocation5 + $0xb98] sm:$0xff]  ;;  %v5012_v15 = vpack.c.bf16 %v456_v8, %v440_v7  ;;  %v455_v16 = vld [vmem:[#allocation5 + $0xb80] sm:$0xff]  ;;  %v441_v17 = vld [vmem:[#allocation5 + $0xb10] sm:$0xff] }
  0x7a   :  { %v457_v18 = vld [vmem:[#allocation5 + $0xb90] sm:$0xff]  ;;  %v5140_v19 = vpack.c.bf16 %v458_v10, %v442_v9  ;;  %v472_v20 = vld [vmem:[#allocation5 + $0xc08] sm:$0xff]  ;;  %v7451_v22 = vld [vmem:[#allocation2] sm:$0xff]  ;;  %v5014_v26 = vpack.c.bf16 %v455_v16, %v439_v13 }
  0x7b   :  { %4999 = vmatpush1.bf16.msra.mxu0 %v4998_v34  ;;  %v488_v21 = vld [vmem:[#allocation5 + $0xc88] sm:$0xff]  ;;  %v474_v23 = vld [vmem:[#allocation5 + $0xc18] sm:$0xff]  ;;  %v7455_v25 = vrot.slane %v7451_v22, %v7449_v11  ;;  %v5142_v27 = vpack.c.bf16 %v457_v18, %v441_v17  ;;  %v471_v29 = vld [vmem:[#allocation5 + $0xc00] sm:$0xff]  ;;  %v1196_v10 = vcombine.high %v7451_v22, %v7451_v22 }
  0x7c   :  { %5127 = vmatpush1.bf16.msra.mxu1 %v5126_v35  ;;  %5001 = vmatprep.subr.bf16.mxu0 %v5000_v36  ;;  %v490_v24 = vld [vmem:[#allocation5 + $0xc98] sm:$0xff]  ;;  %v5016_v28 = vpack.c.bf16 %v488_v21, %v472_v20  ;;  %v487_v30 = vld [vmem:[#allocation5 + $0xc80] sm:$0xff]  ;;  %v473_v31 = vld [vmem:[#allocation5 + $0xc10] sm:$0xff] }
  0x7d   :  { %5129 = vmatprep.subr.bf16.mxu1 %v5128_v40  ;;  %v7459_v32 = vcombine.high %v7455_v25, %v7455_v25  ;;  %v5144_v33 = vpack.c.bf16 %v490_v24, %v474_v23  ;;  %v489_v34 = vld [vmem:[#allocation5 + $0xc90] sm:$0xff]  ;;  %v504_v35 = vld [vmem:[#allocation5 + $0xd08] sm:$0xff]  ;;  %v506_v37 = vld [vmem:[#allocation5 + $0xd18] sm:$0xff]  ;;  %v5018_v39 = vpack.c.bf16 %v487_v30, %v471_v29 }
  0x7e   :  { %v520_v36 = vld [vmem:[#allocation5 + $0xd88] sm:$0xff]  ;;  %v522_v38 = vld [vmem:[#allocation5 + $0xd98] sm:$0xff]  ;;  %v5146_v40 = vpack.c.bf16 %v489_v34, %v473_v31  ;;  %v503_v42 = vld [vmem:[#allocation5 + $0xd00] sm:$0xff] }
  0x7f   :  { %5003 = vmatpush1.bf16.msra.mxu0 %v5002_v49  ;;  %1281 = vmatprep.mubr.f32.mxu0 %v7459_v32  ;;  %v5020_v41 = vpack.c.bf16 %v520_v36, %v504_v35  ;;  %v519_v43 = vld [vmem:[#allocation5 + $0xd80] sm:$0xff]  ;;  %v505_v44 = vld [vmem:[#allocation5 + $0xd10] sm:$0xff]  ;;  %v5148_v45 = vpack.c.bf16 %v522_v38, %v506_v37  ;;  %v536_v47 = vld [vmem:[#allocation5 + $0xe08] sm:$0xff] }
  0x80   :  { %5131 = vmatpush1.bf16.msra.mxu1 %v5130_v50  ;;  %5005 = vmatprep.subr.bf16.mxu0 %v5004_v51  ;;  %v521_v46 = vld [vmem:[#allocation5 + $0xd90] sm:$0xff]  ;;  %v552_v48 = vld [vmem:[#allocation5 + $0xe88] sm:$0xff]  ;;  %v538_v49 = vld [vmem:[#allocation5 + $0xe18] sm:$0xff]  ;;  %v5022_v51 = vpack.c.bf16 %v519_v43, %v503_v42 }
  0x81   :  { %5133 = vmatprep.subr.bf16.mxu1 %v5132_v55  ;;  %1423 = vmatprep.mubr.f32.mxu1 %v7459_v32  ;;  %v554_v50 = vld [vmem:[#allocation5 + $0xe98] sm:$0xff]  ;;  %v5150_v52 = vpack.c.bf16 %v521_v46, %v505_v44  ;;  %v5024_v53 = vpack.c.bf16 %v552_v48, %v536_v47  ;;  %v535_v54 = vld [vmem:[#allocation5 + $0xe00] sm:$0xff]  ;;  %v537_v56 = vld [vmem:[#allocation5 + $0xe10] sm:$0xff] }
  0x82   :  { %v551_v55 = vld [vmem:[#allocation5 + $0xe80] sm:$0xff]  ;;  %v5152_v57 = vpack.c.bf16 %v554_v50, %v538_v49  ;;  %v553_v58 = vld [vmem:[#allocation5 + $0xe90] sm:$0xff]  ;;  %v568_v59 = vld [vmem:[#allocation5 + $0xf08] sm:$0xff] }
  0x83   :  { %5007 = vmatpush1.bf16.msra.mxu0 %v5006_v63  ;;  %v584_v60 = vld [vmem:[#allocation5 + $0xf88] sm:$0xff]  ;;  %v570_v62 = vld [vmem:[#allocation5 + $0xf18] sm:$0xff]  ;;  %v567_v3 = vld [vmem:[#allocation5 + $0xf00] sm:$0xff] }
  0x84   :  { %5135 = vmatpush1.bf16.msra.mxu1 %v5134_v0  ;;  %5009 = vmatprep.subr.bf16.mxu0 %v5008_v1  ;;  %v586_v63 = vld [vmem:[#allocation5 + $0xf98] sm:$0xff]  ;;  %v5026_v0 = vpack.c.bf16 %v551_v55, %v535_v54  ;;  %v5154_v1 = vpack.c.bf16 %v553_v58, %v537_v56  ;;  %v5028_v2 = vpack.c.bf16 %v584_v60, %v568_v59  ;;  %v583_v4 = vld [vmem:[#allocation5 + $0xf80] sm:$0xff]  ;;  %v585_v7 = vld [vmem:[#allocation5 + $0xf90] sm:$0xff] }
  0x85   :  { %5137 = vmatprep.subr.bf16.mxu1 %v5136_v5  ;;  %v569_v5 = vld [vmem:[#allocation5 + $0xf10] sm:$0xff]  ;;  %v5156_v6 = vpack.c.bf16 %v586_v63, %v570_v62  ;;  %v600_v8 = vld [vmem:[#allocation5 + $0x1008] sm:$0xff]  ;;  %v618_v13 = vld [vmem:[#allocation5 + $0x1098] sm:$0xff] }
  0x86   :  { %v616_v9 = vld [vmem:[#allocation5 + $0x1088] sm:$0xff]  ;;  %v599_v17 = vld [vmem:[#allocation5 + $0x1000] sm:$0xff]  ;;  %v617_v21 = vld [vmem:[#allocation5 + $0x1090] sm:$0xff] }
  0x87   :  { %5011 = vmatpush1.bf16.msra.mxu0 %v5010_v12  ;;  %v602_v12 = vld [vmem:[#allocation5 + $0x1018] sm:$0xff]  ;;  %v5032_v16 = vpack.c.bf16 %v616_v9, %v600_v8  ;;  %v615_v18 = vld [vmem:[#allocation5 + $0x1080] sm:$0xff]  ;;  %v632_v23 = vld [vmem:[#allocation5 + $0x1108] sm:$0xff] }
  0x88   :  { %5139 = vmatpush1.bf16.msra.mxu1 %v5138_v14  ;;  %5013 = vmatprep.subr.bf16.mxu0 %v5012_v15  ;;  %v5030_v14 = vpack.c.bf16 %v583_v4, %v567_v3  ;;  %v5158_v15 = vpack.c.bf16 %v585_v7, %v569_v5  ;;  %v5160_v20 = vpack.c.bf16 %v618_v13, %v602_v12  ;;  %v648_v24 = vld [vmem:[#allocation5 + $0x1188] sm:$0xff]  ;;  %v634_v22 = vld [vmem:[#allocation5 + $0x1118] sm:$0xff]  ;;  %v631_v31 = vld [vmem:[#allocation5 + $0x1100] sm:$0xff] }
  0x89   :  { %5141 = vmatprep.subr.bf16.mxu1 %v5140_v19  ;;  %v601_v19 = vld [vmem:[#allocation5 + $0x1010] sm:$0xff]  ;;  %v5036_v30 = vpack.c.bf16 %v648_v24, %v632_v23  ;;  %v664_v37 = vld [vmem:[#allocation5 + $0x1208] sm:$0xff]  ;;  %v663_v44 = vld [vmem:[#allocation5 + $0x1200] sm:$0xff] }
  0x8a   :  { %v5162_v29 = vpack.c.bf16 %v617_v21, %v601_v19  ;;  %v633_v34 = vld [vmem:[#allocation5 + $0x1110] sm:$0xff]  ;;  %v680_v38 = vld [vmem:[#allocation5 + $0x1288] sm:$0xff]  ;;  %v695_v56 = vld [vmem:[#allocation5 + $0x1300] sm:$0xff] }
  0x8b   :  { %5015 = vmatpush1.bf16.msra.mxu0 %v5014_v26  ;;  %v7466_v26 = vrot.slane %v1196_v10, %v7449_v11  ;;  %v649_v36 = vld [vmem:[#allocation5 + $0x1190] sm:$0xff]  ;;  %v5040_v43 = vpack.c.bf16 %v680_v38, %v664_v37  ;;  %v696_v49 = vld [vmem:[#allocation5 + $0x1308] sm:$0xff]  ;;  %v727_v5 = vld [vmem:[#allocation5 + $0x1400] sm:$0xff] }
  0x8c   :  { %5143 = vmatpush1.bf16.msra.mxu1 %v5142_v27  ;;  %5017 = vmatprep.subr.bf16.mxu0 %v5016_v28  ;;  %v650_v27 = vld [vmem:[#allocation5 + $0x1198] sm:$0xff]  ;;  %v5034_v28 = vpack.c.bf16 %v615_v18, %v599_v17  ;;  %v5166_v42 = vpack.c.bf16 %v649_v36, %v633_v34  ;;  %v665_v46 = vld [vmem:[#allocation5 + $0x1210] sm:$0xff]  ;;  %v712_v50 = vld [vmem:[#allocation5 + $0x1388] sm:$0xff] }
  0x8d   :  { %5145 = vmatprep.subr.bf16.mxu1 %v5144_v33  ;;  %v647_v33 = vld [vmem:[#allocation5 + $0x1180] sm:$0xff]  ;;  %v5164_v35 = vpack.c.bf16 %v650_v27, %v634_v22  ;;  %v7470_v11 = vcombine.high %v7466_v26, %v7466_v26  ;;  %v681_v48 = vld [vmem:[#allocation5 + $0x1290] sm:$0xff]  ;;  %v5044_v55 = vpack.c.bf16 %v712_v50, %v696_v49  ;;  %v728_v62 = vld [vmem:[#allocation5 + $0x1408] sm:$0xff] }
  0x8e   :  { %v5170_v54 = vpack.c.bf16 %v681_v48, %v665_v46  ;;  %v697_v58 = vld [vmem:[#allocation5 + $0x1310] sm:$0xff]  ;;  %v744_v63 = vld [vmem:[#allocation5 + $0x1488] sm:$0xff]  ;;  %v762_v13 = vld [vmem:[#allocation5 + $0x1518] sm:$0xff] }
  0x8f   :  { %5019 = vmatpush1.bf16.msra.mxu0 %v5018_v39  ;;  %v666_v39 = vld [vmem:[#allocation5 + $0x1218] sm:$0xff]  ;;  %v713_v60 = vld [vmem:[#allocation5 + $0x1390] sm:$0xff]  ;;  %v5048_v4 = vpack.c.bf16 %v744_v63, %v728_v62  ;;  %v760_v10 = vld [vmem:[#allocation5 + $0x1508] sm:$0xff] }
  0x90   :  { %5147 = vmatpush1.bf16.msra.mxu1 %v5146_v40  ;;  %5021 = vmatprep.subr.bf16.mxu0 %v5020_v41  ;;  %v682_v40 = vld [vmem:[#allocation5 + $0x1298] sm:$0xff]  ;;  %v5038_v41 = vpack.c.bf16 %v647_v33, %v631_v31  ;;  %v5174_v3 = vpack.c.bf16 %v713_v60, %v697_v58  ;;  %v729_v7 = vld [vmem:[#allocation5 + $0x1410] sm:$0xff]  ;;  %v776_v12 = vld [vmem:[#allocation5 + $0x1588] sm:$0xff] }
  0x91   :  { %5149 = vmatprep.subr.bf16.mxu1 %v5148_v45  ;;  %v679_v45 = vld [vmem:[#allocation5 + $0x1280] sm:$0xff]  ;;  %v5168_v47 = vpack.c.bf16 %v682_v40, %v666_v39  ;;  %v745_v9 = vld [vmem:[#allocation5 + $0x1490] sm:$0xff]  ;;  %v5052_v17 = vpack.c.bf16 %v776_v12, %v760_v10  ;;  %v792_v24 = vld [vmem:[#allocation5 + $0x1608] sm:$0xff] }
  0x92   :  { %v759_v18 = vld [vmem:[#allocation5 + $0x1500] sm:$0xff]  ;;  %v777_v23 = vld [vmem:[#allocation5 + $0x1590] sm:$0xff]  ;;  %v808_v22 = vld [vmem:[#allocation5 + $0x1688] sm:$0xff] }
  0x93   :  { %5023 = vmatpush1.bf16.msra.mxu0 %v5022_v51  ;;  %v698_v51 = vld [vmem:[#allocation5 + $0x1318] sm:$0xff]  ;;  %v775_v19 = vld [vmem:[#allocation5 + $0x1580] sm:$0xff]  ;;  %v5056_v31 = vpack.c.bf16 %v808_v22, %v792_v24  ;;  %v809_v37 = vld [vmem:[#allocation5 + $0x1690] sm:$0xff] }
  0x94   :  { %5151 = vmatpush1.bf16.msra.mxu1 %v5150_v52  ;;  %5025 = vmatprep.subr.bf16.mxu0 %v5024_v53  ;;  %v714_v52 = vld [vmem:[#allocation5 + $0x1398] sm:$0xff]  ;;  %v5042_v53 = vpack.c.bf16 %v679_v45, %v663_v44  ;;  %v791_v33 = vld [vmem:[#allocation5 + $0x1600] sm:$0xff]  ;;  %v824_v38 = vld [vmem:[#allocation5 + $0x1708] sm:$0xff] }
  0x95   :  { %5153 = vmatprep.subr.bf16.mxu1 %v5152_v57  ;;  %v711_v57 = vld [vmem:[#allocation5 + $0x1380] sm:$0xff]  ;;  %v5172_v59 = vpack.c.bf16 %v714_v52, %v698_v51  ;;  %v794_v27 = vld [vmem:[#allocation5 + $0x1618] sm:$0xff]  ;;  %v840_v39 = vld [vmem:[#allocation5 + $0x1788] sm:$0xff] }
  0x96   :  { %v807_v34 = vld [vmem:[#allocation5 + $0x1680] sm:$0xff]  ;;  %v826_v40 = vld [vmem:[#allocation5 + $0x1718] sm:$0xff]  ;;  %v5060_v44 = vpack.c.bf16 %v840_v39, %v824_v38  ;;  %v841_v49 = vld [vmem:[#allocation5 + $0x1790] sm:$0xff] }
  0x97   :  { %5027 = vmatpush1.bf16.msra.mxu0 %v5026_v0  ;;  %v730_v0 = vld [vmem:[#allocation5 + $0x1418] sm:$0xff]  ;;  %v823_v45 = vld [vmem:[#allocation5 + $0x1700] sm:$0xff]  ;;  %v856_v50 = vld [vmem:[#allocation5 + $0x1808] sm:$0xff] }
  0x98   :  { %5155 = vmatpush1.bf16.msra.mxu1 %v5154_v1  ;;  %5029 = vmatprep.subr.bf16.mxu0 %v5028_v2  ;;  %v746_v1 = vld [vmem:[#allocation5 + $0x1498] sm:$0xff]  ;;  %v5046_v2 = vpack.c.bf16 %v711_v57, %v695_v56  ;;  %v839_v46 = vld [vmem:[#allocation5 + $0x1780] sm:$0xff]  ;;  %v872_v51 = vld [vmem:[#allocation5 + $0x1888] sm:$0xff] }
  0x99   :  { %5157 = vmatprep.subr.bf16.mxu1 %v5156_v6  ;;  %v743_v6 = vld [vmem:[#allocation5 + $0x1480] sm:$0xff]  ;;  %v5176_v8 = vpack.c.bf16 %v746_v1, %v730_v0  ;;  %v858_v52 = vld [vmem:[#allocation5 + $0x1818] sm:$0xff]  ;;  %v5064_v56 = vpack.c.bf16 %v872_v51, %v856_v50  ;;  %v873_v62 = vld [vmem:[#allocation5 + $0x1890] sm:$0xff] }
  0x9a   :  { %v855_v57 = vld [vmem:[#allocation5 + $0x1800] sm:$0xff]  ;;  %v888_v63 = vld [vmem:[#allocation5 + $0x1908] sm:$0xff]  ;;  %v890_v1 = vld [vmem:[#allocation5 + $0x1918] sm:$0xff] }
  0x9b   :  { %5031 = vmatpush1.bf16.msra.mxu0 %v5030_v14  ;;  %v778_v14 = vld [vmem:[#allocation5 + $0x1598] sm:$0xff]  ;;  %v871_v58 = vld [vmem:[#allocation5 + $0x1880] sm:$0xff]  ;;  %v904_v0 = vld [vmem:[#allocation5 + $0x1988] sm:$0xff] }
  0x9c   :  { %5159 = vmatpush1.bf16.msra.mxu1 %v5158_v15  ;;  %5033 = vmatprep.subr.bf16.mxu0 %v5032_v16  ;;  %v5050_v15 = vpack.c.bf16 %v743_v6, %v727_v5  ;;  %v5178_v16 = vpack.c.bf16 %v745_v9, %v729_v7  ;;  %v5180_v21 = vpack.c.bf16 %v778_v14, %v762_v13  ;;  %v887_v6 = vld [vmem:[#allocation5 + $0x1900] sm:$0xff]  ;;  %v905_v10 = vld [vmem:[#allocation5 + $0x1990] sm:$0xff]  ;;  %v920_v12 = vld [vmem:[#allocation5 + $0x1a08] sm:$0xff] }
  0x9d   :  { %5161 = vmatprep.subr.bf16.mxu1 %v5160_v20  ;;  %v761_v20 = vld [vmem:[#allocation5 + $0x1510] sm:$0xff]  ;;  %v5068_v5 = vpack.c.bf16 %v904_v0, %v888_v63  ;;  %v903_v7 = vld [vmem:[#allocation5 + $0x1980] sm:$0xff]  ;;  %v936_v13 = vld [vmem:[#allocation5 + $0x1a88] sm:$0xff] }
  0x9e   :  { %1282 = vmatmul.mubr.f32.vlgmr.msra.gmra.mrb[0].mxu0 %v7455_v25  ;;  %v922_v14 = vld [vmem:[#allocation5 + $0x1a18] sm:$0xff]  ;;  %v937_v24 = vld [vmem:[#allocation5 + $0x1a90] sm:$0xff]  ;;  %v952_v22 = vld [vmem:[#allocation5 + $0x1b08] sm:$0xff] }
  0x9f   :  { %5035 = vmatpush1.bf16.msra.mxu0 %v5034_v28  ;;  %1424 = vmatmul.mubr.f32.vlgmr.msra.gmra.mrb[0].mxu1 %v7455_v25  ;;  %v810_v28 = vld [vmem:[#allocation5 + $0x1698] sm:$0xff]  ;;  %v969_v38 = vld [vmem:[#allocation5 + $0x1b90] sm:$0xff]  ;;  %v984_v39 = vld [vmem:[#allocation5 + $0x1c08] sm:$0xff] }
  0xa0   :  { %5163 = vmatpush1.bf16.msra.mxu1 %v5162_v29  ;;  %5037 = vmatprep.subr.bf16.mxu0 %v5036_v30  ;;  %v5054_v29 = vpack.c.bf16 %v775_v19, %v759_v18  ;;  %v5182_v30 = vpack.c.bf16 %v777_v23, %v761_v20  ;;  %v5184_v36 = vpack.c.bf16 %v810_v28, %v794_v27  ;;  %v919_v19 = vld [vmem:[#allocation5 + $0x1a00] sm:$0xff]  ;;  %v968_v27 = vld [vmem:[#allocation5 + $0x1b88] sm:$0xff]  ;;  %v954_v28 = vld [vmem:[#allocation5 + $0x1b18] sm:$0xff] }
  0xa1   :  { %5165 = vmatprep.subr.bf16.mxu1 %v5164_v35  ;;  %1352 = vmatprep.mubr.f32.mxu0 %v7470_v11  ;;  %v793_v35 = vld [vmem:[#allocation5 + $0x1610] sm:$0xff]  ;;  %v5072_v18 = vpack.c.bf16 %v936_v13, %v920_v12  ;;  %v935_v20 = vld [vmem:[#allocation5 + $0x1a80] sm:$0xff]  ;;  %v1016_v51 = vld [vmem:[#allocation5 + $0x1d08] sm:$0xff] }
  0xa2   :  { %1494 = vmatprep.mubr.f32.mxu1 %v7470_v11  ;;  %v1001_v50 = vld [vmem:[#allocation5 + $0x1c90] sm:$0xff]  ;;  %v1048_v0 = vld [vmem:[#allocation5 + $0x1e08] sm:$0xff] }
  0xa3   :  { %5039 = vmatpush1.bf16.msra.mxu0 %v5038_v41  ;;  %v842_v41 = vld [vmem:[#allocation5 + $0x1798] sm:$0xff]  ;;  %v1033_v63 = vld [vmem:[#allocation5 + $0x1d90] sm:$0xff]  ;;  %v1080_v13 = vld [vmem:[#allocation5 + $0x1f08] sm:$0xff] }
  0xa4   :  { %5167 = vmatpush1.bf16.msra.mxu1 %v5166_v42  ;;  %5041 = vmatprep.subr.bf16.mxu0 %v5040_v43  ;;  %v5058_v42 = vpack.c.bf16 %v807_v34, %v791_v33  ;;  %v5186_v43 = vpack.c.bf16 %v809_v37, %v793_v35  ;;  %v5188_v48 = vpack.c.bf16 %v842_v41, %v826_v40  ;;  %v951_v34 = vld [vmem:[#allocation5 + $0x1b00] sm:$0xff]  ;;  %v1000_v40 = vld [vmem:[#allocation5 + $0x1c88] sm:$0xff]  ;;  %v986_v41 = vld [vmem:[#allocation5 + $0x1c18] sm:$0xff] }
  0xa5   :  { %5169 = vmatprep.subr.bf16.mxu1 %v5168_v47  ;;  %v825_v47 = vld [vmem:[#allocation5 + $0x1710] sm:$0xff]  ;;  %v5076_v33 = vpack.c.bf16 %v968_v27, %v952_v22  ;;  %v967_v35 = vld [vmem:[#allocation5 + $0x1b80] sm:$0xff]  ;;  %v92_v27 = vld [vmem:[#allocation5 + $0x28] sm:$0xff] }
  0xa6   :  { %v1065_v12 = vld [vmem:[#allocation5 + $0x1e90] sm:$0xff] }
  0xa7   :  { %5043 = vmatpush1.bf16.msra.mxu0 %v5042_v53  ;;  %v874_v53 = vld [vmem:[#allocation5 + $0x1898] sm:$0xff]  ;;  %v1097_v22 = vld [vmem:[#allocation5 + $0x1f90] sm:$0xff] }
  0xa8   :  { %5171 = vmatpush1.bf16.msra.mxu1 %v5170_v54  ;;  %5045 = vmatprep.subr.bf16.mxu0 %v5044_v55  ;;  %v5062_v54 = vpack.c.bf16 %v839_v46, %v823_v45  ;;  %v5190_v55 = vpack.c.bf16 %v841_v49, %v825_v47  ;;  %v5192_v60 = vpack.c.bf16 %v874_v53, %v858_v52  ;;  %v983_v46 = vld [vmem:[#allocation5 + $0x1c00] sm:$0xff]  ;;  %v1032_v52 = vld [vmem:[#allocation5 + $0x1d88] sm:$0xff]  ;;  %v1018_v53 = vld [vmem:[#allocation5 + $0x1d18] sm:$0xff] }
  0xa9   :  { %5173 = vmatprep.subr.bf16.mxu1 %v5172_v59  ;;  %v857_v59 = vld [vmem:[#allocation5 + $0x1810] sm:$0xff]  ;;  %v5080_v45 = vpack.c.bf16 %v1000_v40, %v984_v39  ;;  %v999_v47 = vld [vmem:[#allocation5 + $0x1c80] sm:$0xff]  ;;  %v124_v40 = vld [vmem:[#allocation5 + $0x128] sm:$0xff] }
  0xaa   :  { %v109_v39 = vld [vmem:[#allocation5 + $0xb0] sm:$0xff] }
  0xab   :  { %5047 = vmatpush1.bf16.msra.mxu0 %v5046_v2  ;;  %v906_v2 = vld [vmem:[#allocation5 + $0x1998] sm:$0xff] }
  0xac   :  { %5175 = vmatpush1.bf16.msra.mxu1 %v5174_v3  ;;  %5049 = vmatprep.subr.bf16.mxu0 %v5048_v4  ;;  %v5066_v3 = vpack.c.bf16 %v871_v58, %v855_v57  ;;  %v5194_v4 = vpack.c.bf16 %v873_v62, %v857_v59  ;;  %v5196_v9 = vpack.c.bf16 %v906_v2, %v890_v1  ;;  %v1015_v58 = vld [vmem:[#allocation5 + $0x1d00] sm:$0xff]  ;;  %v1064_v1 = vld [vmem:[#allocation5 + $0x1e88] sm:$0xff]  ;;  %v1050_v2 = vld [vmem:[#allocation5 + $0x1e18] sm:$0xff] }
  0xad   :  { %5177 = vmatprep.subr.bf16.mxu1 %v5176_v8  ;;  %v889_v8 = vld [vmem:[#allocation5 + $0x1910] sm:$0xff]  ;;  %v5084_v57 = vpack.c.bf16 %v1032_v52, %v1016_v51  ;;  %v1031_v59 = vld [vmem:[#allocation5 + $0x1d80] sm:$0xff]  ;;  %v156_v52 = vld [vmem:[#allocation5 + $0x228] sm:$0xff] }
  0xae   :  { %v141_v51 = vld [vmem:[#allocation5 + $0x1b0] sm:$0xff] }
  0xaf   :  { %5051 = vmatpush1.bf16.msra.mxu0 %v5050_v15  ;;  %v938_v15 = vld [vmem:[#allocation5 + $0x1a98] sm:$0xff] }
  0xb0   :  { %5179 = vmatpush1.bf16.msra.mxu1 %v5178_v16  ;;  %5053 = vmatprep.subr.bf16.mxu0 %v5052_v17  ;;  %v5070_v16 = vpack.c.bf16 %v903_v7, %v887_v6  ;;  %v5198_v17 = vpack.c.bf16 %v905_v10, %v889_v8  ;;  %v5200_v23 = vpack.c.bf16 %v938_v15, %v922_v14  ;;  %v1047_v7 = vld [vmem:[#allocation5 + $0x1e00] sm:$0xff]  ;;  %v1096_v14 = vld [vmem:[#allocation5 + $0x1f88] sm:$0xff]  ;;  %v1082_v15 = vld [vmem:[#allocation5 + $0x1f18] sm:$0xff] }
  0xb1   :  { %5181 = vmatprep.subr.bf16.mxu1 %v5180_v21  ;;  %v921_v21 = vld [vmem:[#allocation5 + $0x1a10] sm:$0xff]  ;;  %v5088_v6 = vpack.c.bf16 %v1064_v1, %v1048_v0  ;;  %v1063_v8 = vld [vmem:[#allocation5 + $0x1e80] sm:$0xff]  ;;  %v188_v1 = vld [vmem:[#allocation5 + $0x328] sm:$0xff] }
  0xb2   :  { %v173_v0 = vld [vmem:[#allocation5 + $0x2b0] sm:$0xff] }
  0xb3   :  { %5055 = vmatpush1.bf16.msra.mxu0 %v5054_v29  ;;  %v970_v29 = vld [vmem:[#allocation5 + $0x1b98] sm:$0xff] }
  0xb4   :  { %5183 = vmatpush1.bf16.msra.mxu1 %v5182_v30  ;;  %5057 = vmatprep.subr.bf16.mxu0 %v5056_v31  ;;  %v5074_v30 = vpack.c.bf16 %v935_v20, %v919_v19  ;;  %v5202_v31 = vpack.c.bf16 %v937_v24, %v921_v21  ;;  %v5204_v37 = vpack.c.bf16 %v970_v29, %v954_v28  ;;  %v1079_v20 = vld [vmem:[#allocation5 + $0x1f00] sm:$0xff]  ;;  %v108_v28 = vld [vmem:[#allocation5 + $0xa8] sm:$0xff]  ;;  %v94_v29 = vld [vmem:[#allocation5 + $0x38] sm:$0xff] }
  0xb5   :  { %5185 = vmatprep.subr.bf16.mxu1 %v5184_v36  ;;  %v953_v36 = vld [vmem:[#allocation5 + $0x1b10] sm:$0xff]  ;;  %v5092_v19 = vpack.c.bf16 %v1096_v14, %v1080_v13  ;;  %v1095_v21 = vld [vmem:[#allocation5 + $0x1f80] sm:$0xff]  ;;  %v220_v14 = vld [vmem:[#allocation5 + $0x428] sm:$0xff] }
  0xb6   :  { %v205_v13 = vld [vmem:[#allocation5 + $0x3b0] sm:$0xff] }
  0xb7   :  { %5059 = vmatpush1.bf16.msra.mxu0 %v5058_v42  ;;  %v1002_v42 = vld [vmem:[#allocation5 + $0x1c98] sm:$0xff] }
  0xb8   :  { %5187 = vmatpush1.bf16.msra.mxu1 %v5186_v43  ;;  %5061 = vmatprep.subr.bf16.mxu0 %v5060_v44  ;;  %v5078_v43 = vpack.c.bf16 %v967_v35, %v951_v34  ;;  %v5206_v44 = vpack.c.bf16 %v969_v38, %v953_v36  ;;  %v5208_v49 = vpack.c.bf16 %v1002_v42, %v986_v41  ;;  %v91_v35 = vld [vmem:[#allocation5 + $0x20] sm:$0xff]  ;;  %v140_v41 = vld [vmem:[#allocation5 + $0x1a8] sm:$0xff]  ;;  %v126_v42 = vld [vmem:[#allocation5 + $0x138] sm:$0xff] }
  0xb9   :  { %5189 = vmatprep.subr.bf16.mxu1 %v5188_v48  ;;  %v985_v48 = vld [vmem:[#allocation5 + $0x1c10] sm:$0xff]  ;;  %v5224_v34 = vpack.c.bf16 %v108_v28, %v92_v27  ;;  %v107_v36 = vld [vmem:[#allocation5 + $0xa0] sm:$0xff]  ;;  %v252_v28 = vld [vmem:[#allocation5 + $0x528] sm:$0xff] }
  0xba   :  { %v237_v27 = vld [vmem:[#allocation5 + $0x4b0] sm:$0xff] }
  0xbb   :  { %5063 = vmatpush1.bf16.msra.mxu0 %v5062_v54  ;;  %v1034_v54 = vld [vmem:[#allocation5 + $0x1d98] sm:$0xff] }
  0xbc   :  { %5191 = vmatpush1.bf16.msra.mxu1 %v5190_v55  ;;  %5065 = vmatprep.subr.bf16.mxu0 %v5064_v56  ;;  %v5082_v55 = vpack.c.bf16 %v999_v47, %v983_v46  ;;  %v5210_v56 = vpack.c.bf16 %v1001_v50, %v985_v48  ;;  %v5212_v62 = vpack.c.bf16 %v1034_v54, %v1018_v53  ;;  %v123_v47 = vld [vmem:[#allocation5 + $0x120] sm:$0xff]  ;;  %v172_v53 = vld [vmem:[#allocation5 + $0x2a8] sm:$0xff]  ;;  %v158_v54 = vld [vmem:[#allocation5 + $0x238] sm:$0xff] }
  0xbd   :  { %5193 = vmatprep.subr.bf16.mxu1 %v5192_v60  ;;  %v1017_v60 = vld [vmem:[#allocation5 + $0x1d10] sm:$0xff]  ;;  %v5228_v46 = vpack.c.bf16 %v140_v41, %v124_v40  ;;  %v139_v48 = vld [vmem:[#allocation5 + $0x1a0] sm:$0xff]  ;;  %v284_v41 = vld [vmem:[#allocation5 + $0x628] sm:$0xff] }
  0xbe   :  { %v269_v40 = vld [vmem:[#allocation5 + $0x5b0] sm:$0xff] }
  0xbf   :  { %5067 = vmatpush1.bf16.msra.mxu0 %v5066_v3  ;;  %v1066_v3 = vld [vmem:[#allocation5 + $0x1e98] sm:$0xff] }
  0xc0   :  { %5195 = vmatpush1.bf16.msra.mxu1 %v5194_v4  ;;  %5069 = vmatprep.subr.bf16.mxu0 %v5068_v5  ;;  %v5086_v4 = vpack.c.bf16 %v1031_v59, %v1015_v58  ;;  %v5214_v5 = vpack.c.bf16 %v1033_v63, %v1017_v60  ;;  %v5216_v10 = vpack.c.bf16 %v1066_v3, %v1050_v2  ;;  %v155_v59 = vld [vmem:[#allocation5 + $0x220] sm:$0xff]  ;;  %v204_v2 = vld [vmem:[#allocation5 + $0x3a8] sm:$0xff]  ;;  %v190_v3 = vld [vmem:[#allocation5 + $0x338] sm:$0xff] }
  0xc1   :  { %5197 = vmatprep.subr.bf16.mxu1 %v5196_v9  ;;  %v1049_v9 = vld [vmem:[#allocation5 + $0x1e10] sm:$0xff]  ;;  %v5232_v58 = vpack.c.bf16 %v172_v53, %v156_v52  ;;  %v171_v60 = vld [vmem:[#allocation5 + $0x2a0] sm:$0xff]  ;;  %v316_v53 = vld [vmem:[#allocation5 + $0x728] sm:$0xff] }
  0xc2   :  { %v301_v52 = vld [vmem:[#allocation5 + $0x6b0] sm:$0xff] }
  0xc3   :  { %5071 = vmatpush1.bf16.msra.mxu0 %v5070_v16  ;;  %v1098_v16 = vld [vmem:[#allocation5 + $0x1f98] sm:$0xff] }
  0xc4   :  { %5199 = vmatpush1.bf16.msra.mxu1 %v5198_v17  ;;  %5073 = vmatprep.subr.bf16.mxu0 %v5072_v18  ;;  %v5090_v17 = vpack.c.bf16 %v1063_v8, %v1047_v7  ;;  %v5218_v18 = vpack.c.bf16 %v1065_v12, %v1049_v9  ;;  %v5220_v24 = vpack.c.bf16 %v1098_v16, %v1082_v15  ;;  %v187_v8 = vld [vmem:[#allocation5 + $0x320] sm:$0xff]  ;;  %v236_v15 = vld [vmem:[#allocation5 + $0x4a8] sm:$0xff]  ;;  %v222_v16 = vld [vmem:[#allocation5 + $0x438] sm:$0xff] }
  0xc5   :  { %5201 = vmatprep.subr.bf16.mxu1 %v5200_v23  ;;  %v1081_v23 = vld [vmem:[#allocation5 + $0x1f10] sm:$0xff]  ;;  %v5236_v7 = vpack.c.bf16 %v204_v2, %v188_v1  ;;  %v203_v9 = vld [vmem:[#allocation5 + $0x3a0] sm:$0xff]  ;;  %v348_v2 = vld [vmem:[#allocation5 + $0x828] sm:$0xff] }
  0xc6   :  { %v333_v1 = vld [vmem:[#allocation5 + $0x7b0] sm:$0xff] }
  0xc7   :  { %5075 = vmatpush1.bf16.msra.mxu0 %v5074_v30  ;;  %v110_v30 = vld [vmem:[#allocation5 + $0xb8] sm:$0xff] }
  0xc8   :  { %5203 = vmatpush1.bf16.msra.mxu1 %v5202_v31  ;;  %5077 = vmatprep.subr.bf16.mxu0 %v5076_v33  ;;  %v5094_v31 = vpack.c.bf16 %v1095_v21, %v1079_v20  ;;  %v5222_v33 = vpack.c.bf16 %v1097_v22, %v1081_v23  ;;  %v5352_v38 = vpack.c.bf16 %v110_v30, %v94_v29  ;;  %v219_v21 = vld [vmem:[#allocation5 + $0x420] sm:$0xff]  ;;  %v268_v29 = vld [vmem:[#allocation5 + $0x5a8] sm:$0xff]  ;;  %v254_v30 = vld [vmem:[#allocation5 + $0x538] sm:$0xff] }
  0xc9   :  { %5205 = vmatprep.subr.bf16.mxu1 %v5204_v37  ;;  %v93_v37 = vld [vmem:[#allocation5 + $0x30] sm:$0xff]  ;;  %v5240_v20 = vpack.c.bf16 %v236_v15, %v220_v14  ;;  %v235_v23 = vld [vmem:[#allocation5 + $0x4a0] sm:$0xff]  ;;  %v380_v15 = vld [vmem:[#allocation5 + $0x928] sm:$0xff] }
  0xca   :  { %v365_v14 = vld [vmem:[#allocation5 + $0x8b0] sm:$0xff] }
  0xcb   :  { %5079 = vmatpush1.bf16.msra.mxu0 %v5078_v43  ;;  %v142_v43 = vld [vmem:[#allocation5 + $0x1b8] sm:$0xff] }
  0xcc   :  { %5207 = vmatpush1.bf16.msra.mxu1 %v5206_v44  ;;  %5081 = vmatprep.subr.bf16.mxu0 %v5080_v45  ;;  %v5226_v44 = vpack.c.bf16 %v107_v36, %v91_v35  ;;  %v5354_v45 = vpack.c.bf16 %v109_v39, %v93_v37  ;;  %v5356_v50 = vpack.c.bf16 %v142_v43, %v126_v42  ;;  %v251_v36 = vld [vmem:[#allocation5 + $0x520] sm:$0xff]  ;;  %v300_v42 = vld [vmem:[#allocation5 + $0x6a8] sm:$0xff]  ;;  %v286_v43 = vld [vmem:[#allocation5 + $0x638] sm:$0xff] }
  0xcd   :  { %5209 = vmatprep.subr.bf16.mxu1 %v5208_v49  ;;  %v125_v49 = vld [vmem:[#allocation5 + $0x130] sm:$0xff]  ;;  %v5244_v35 = vpack.c.bf16 %v268_v29, %v252_v28  ;;  %v267_v37 = vld [vmem:[#allocation5 + $0x5a0] sm:$0xff]  ;;  %v412_v29 = vld [vmem:[#allocation5 + $0xa28] sm:$0xff] }
  0xce   :  { %v397_v28 = vld [vmem:[#allocation5 + $0x9b0] sm:$0xff] }
  0xcf   :  { %5083 = vmatpush1.bf16.msra.mxu0 %v5082_v55  ;;  %v174_v55 = vld [vmem:[#allocation5 + $0x2b8] sm:$0xff] }
  0xd0   :  { %5211 = vmatpush1.bf16.msra.mxu1 %v5210_v56  ;;  %5085 = vmatprep.subr.bf16.mxu0 %v5084_v57  ;;  %v5230_v56 = vpack.c.bf16 %v139_v48, %v123_v47  ;;  %v5358_v57 = vpack.c.bf16 %v141_v51, %v125_v49  ;;  %v5360_v63 = vpack.c.bf16 %v174_v55, %v158_v54  ;;  %v283_v48 = vld [vmem:[#allocation5 + $0x620] sm:$0xff]  ;;  %v332_v54 = vld [vmem:[#allocation5 + $0x7a8] sm:$0xff]  ;;  %v318_v55 = vld [vmem:[#allocation5 + $0x738] sm:$0xff] }
  0xd1   :  { %5213 = vmatprep.subr.bf16.mxu1 %v5212_v62  ;;  %v157_v62 = vld [vmem:[#allocation5 + $0x230] sm:$0xff]  ;;  %v5248_v47 = vpack.c.bf16 %v300_v42, %v284_v41  ;;  %v299_v49 = vld [vmem:[#allocation5 + $0x6a0] sm:$0xff]  ;;  %v444_v42 = vld [vmem:[#allocation5 + $0xb28] sm:$0xff] }
  0xd2   :  { %v429_v41 = vld [vmem:[#allocation5 + $0xab0] sm:$0xff] }
  0xd3   :  { %5087 = vmatpush1.bf16.msra.mxu0 %v5086_v4  ;;  %v206_v4 = vld [vmem:[#allocation5 + $0x3b8] sm:$0xff] }
  0xd4   :  { %5215 = vmatpush1.bf16.msra.mxu1 %v5214_v5  ;;  %5089 = vmatprep.subr.bf16.mxu0 %v5088_v6  ;;  %v5234_v5 = vpack.c.bf16 %v171_v60, %v155_v59  ;;  %v5362_v6 = vpack.c.bf16 %v173_v0, %v157_v62  ;;  %v5364_v12 = vpack.c.bf16 %v206_v4, %v190_v3  ;;  %v315_v60 = vld [vmem:[#allocation5 + $0x720] sm:$0xff]  ;;  %v364_v3 = vld [vmem:[#allocation5 + $0x8a8] sm:$0xff]  ;;  %v350_v4 = vld [vmem:[#allocation5 + $0x838] sm:$0xff] }
  0xd5   :  { %5217 = vmatprep.subr.bf16.mxu1 %v5216_v10  ;;  %v189_v10 = vld [vmem:[#allocation5 + $0x330] sm:$0xff]  ;;  %v5252_v59 = vpack.c.bf16 %v332_v54, %v316_v53  ;;  %v331_v62 = vld [vmem:[#allocation5 + $0x7a0] sm:$0xff]  ;;  %v476_v54 = vld [vmem:[#allocation5 + $0xc28] sm:$0xff] }
  0xd6   :  { %v461_v53 = vld [vmem:[#allocation5 + $0xbb0] sm:$0xff] }
  0xd7   :  { %5091 = vmatpush1.bf16.msra.mxu0 %v5090_v17  ;;  %v238_v17 = vld [vmem:[#allocation5 + $0x4b8] sm:$0xff] }
  0xd8   :  { %5219 = vmatpush1.bf16.msra.mxu1 %v5218_v18  ;;  %5093 = vmatprep.subr.bf16.mxu0 %v5092_v19  ;;  %v5238_v18 = vpack.c.bf16 %v203_v9, %v187_v8  ;;  %v5366_v19 = vpack.c.bf16 %v205_v13, %v189_v10  ;;  %v5368_v22 = vpack.c.bf16 %v238_v17, %v222_v16  ;;  %v347_v9 = vld [vmem:[#allocation5 + $0x820] sm:$0xff]  ;;  %v396_v16 = vld [vmem:[#allocation5 + $0x9a8] sm:$0xff]  ;;  %v382_v17 = vld [vmem:[#allocation5 + $0x938] sm:$0xff] }
  0xd9   :  { %5221 = vmatprep.subr.bf16.mxu1 %v5220_v24  ;;  %v221_v24 = vld [vmem:[#allocation5 + $0x430] sm:$0xff]  ;;  %v5256_v8 = vpack.c.bf16 %v364_v3, %v348_v2  ;;  %v363_v10 = vld [vmem:[#allocation5 + $0x8a0] sm:$0xff]  ;;  %v508_v3 = vld [vmem:[#allocation5 + $0xd28] sm:$0xff] }
  0xda   :  { %v493_v2 = vld [vmem:[#allocation5 + $0xcb0] sm:$0xff] }
  0xdb   :  { %5095 = vmatpush1.bf16.msra.mxu0 %v5094_v31  ;;  %v270_v31 = vld [vmem:[#allocation5 + $0x5b8] sm:$0xff] }
  0xdc   :  { %5223 = vmatpush1.bf16.msra.mxu1 %v5222_v33  ;;  %5225 = vmatprep.subr.bf16.mxu0 %v5224_v34  ;;  %v5242_v33 = vpack.c.bf16 %v235_v23, %v219_v21  ;;  %v5370_v34 = vpack.c.bf16 %v237_v27, %v221_v24  ;;  %v5372_v39 = vpack.c.bf16 %v270_v31, %v254_v30  ;;  %v379_v23 = vld [vmem:[#allocation5 + $0x920] sm:$0xff]  ;;  %v428_v30 = vld [vmem:[#allocation5 + $0xaa8] sm:$0xff]  ;;  %v414_v31 = vld [vmem:[#allocation5 + $0xa38] sm:$0xff] }
  0xdd   :  { %5353 = vmatprep.subr.bf16.mxu1 %v5352_v38  ;;  %v253_v38 = vld [vmem:[#allocation5 + $0x530] sm:$0xff]  ;;  %v5260_v21 = vpack.c.bf16 %v396_v16, %v380_v15  ;;  %v395_v24 = vld [vmem:[#allocation5 + $0x9a0] sm:$0xff]  ;;  %v540_v16 = vld [vmem:[#allocation5 + $0xe28] sm:$0xff] }
  0xde   :  { %1353 = vmatmul.mubr.f32.vlgmr.msra.gmra.mrb[0].mxu0 %v7466_v26  ;;  %v525_v15 = vld [vmem:[#allocation5 + $0xdb0] sm:$0xff] }
  0xdf   :  { %1495 = vmatmul.mubr.f32.vlgmr.msra.gmra.mrb[0].mxu1 %v7466_v26  ;;  %5227 = vmatpush1.bf16.msra.mxu0 %v5226_v44  ;;  %v302_v44 = vld [vmem:[#allocation5 + $0x6b8] sm:$0xff] }
  0xe0   :  { %5355 = vmatpush1.bf16.msra.mxu1 %v5354_v45  ;;  %5229 = vmatprep.subr.bf16.mxu0 %v5228_v46  ;;  %v5246_v45 = vpack.c.bf16 %v267_v37, %v251_v36  ;;  %v5374_v46 = vpack.c.bf16 %v269_v40, %v253_v38  ;;  %v5376_v51 = vpack.c.bf16 %v302_v44, %v286_v43  ;;  %v411_v37 = vld [vmem:[#allocation5 + $0xa20] sm:$0xff]  ;;  %v460_v43 = vld [vmem:[#allocation5 + $0xba8] sm:$0xff]  ;;  %v446_v44 = vld [vmem:[#allocation5 + $0xb38] sm:$0xff] }
  0xe1   :  { %5357 = vmatprep.subr.bf16.mxu1 %v5356_v50  ;;  %1565 = vmatprep.mubr.f32.mxu0 %v7459_v32  ;;  %v285_v50 = vld [vmem:[#allocation5 + $0x630] sm:$0xff]  ;;  %v5264_v36 = vpack.c.bf16 %v428_v30, %v412_v29  ;;  %v427_v38 = vld [vmem:[#allocation5 + $0xaa0] sm:$0xff]  ;;  %v572_v30 = vld [vmem:[#allocation5 + $0xf28] sm:$0xff] }
  0xe2   :  { %1707 = vmatprep.mubr.f32.mxu1 %v7459_v32  ;;  %v557_v29 = vld [vmem:[#allocation5 + $0xeb0] sm:$0xff] }
  0xe3   :  { %5231 = vmatpush1.bf16.msra.mxu0 %v5230_v56  ;;  %v334_v56 = vld [vmem:[#allocation5 + $0x7b8] sm:$0xff] }
  0xe4   :  { %5359 = vmatpush1.bf16.msra.mxu1 %v5358_v57  ;;  %5233 = vmatprep.subr.bf16.mxu0 %v5232_v58  ;;  %v5250_v57 = vpack.c.bf16 %v299_v49, %v283_v48  ;;  %v5378_v58 = vpack.c.bf16 %v301_v52, %v285_v50  ;;  %v5380_v0 = vpack.c.bf16 %v334_v56, %v318_v55  ;;  %v443_v49 = vld [vmem:[#allocation5 + $0xb20] sm:$0xff]  ;;  %v492_v55 = vld [vmem:[#allocation5 + $0xca8] sm:$0xff]  ;;  %v478_v56 = vld [vmem:[#allocation5 + $0xc38] sm:$0xff] }
  0xe5   :  { %5361 = vmatprep.subr.bf16.mxu1 %v5360_v63  ;;  %v317_v63 = vld [vmem:[#allocation5 + $0x730] sm:$0xff]  ;;  %v5268_v48 = vpack.c.bf16 %v460_v43, %v444_v42  ;;  %v459_v50 = vld [vmem:[#allocation5 + $0xba0] sm:$0xff]  ;;  %v604_v43 = vld [vmem:[#allocation5 + $0x1028] sm:$0xff] }
  0xe6   :  { %v589_v42 = vld [vmem:[#allocation5 + $0xfb0] sm:$0xff] }
  0xe7   :  { %5235 = vmatpush1.bf16.msra.mxu0 %v5234_v5  ;;  %v366_v5 = vld [vmem:[#allocation5 + $0x8b8] sm:$0xff] }
  0xe8   :  { %5363 = vmatpush1.bf16.msra.mxu1 %v5362_v6  ;;  %5237 = vmatprep.subr.bf16.mxu0 %v5236_v7  ;;  %v5254_v6 = vpack.c.bf16 %v331_v62, %v315_v60  ;;  %v5382_v7 = vpack.c.bf16 %v333_v1, %v317_v63  ;;  %v5384_v13 = vpack.c.bf16 %v366_v5, %v350_v4  ;;  %v475_v62 = vld [vmem:[#allocation5 + $0xc20] sm:$0xff]  ;;  %v524_v4 = vld [vmem:[#allocation5 + $0xda8] sm:$0xff]  ;;  %v510_v5 = vld [vmem:[#allocation5 + $0xd38] sm:$0xff] }
  0xe9   :  { %5365 = vmatprep.subr.bf16.mxu1 %v5364_v12  ;;  %v349_v12 = vld [vmem:[#allocation5 + $0x830] sm:$0xff]  ;;  %v5272_v60 = vpack.c.bf16 %v492_v55, %v476_v54  ;;  %v491_v63 = vld [vmem:[#allocation5 + $0xca0] sm:$0xff]  ;;  %v636_v55 = vld [vmem:[#allocation5 + $0x1128] sm:$0xff] }
  0xea   :  { %v621_v54 = vld [vmem:[#allocation5 + $0x10b0] sm:$0xff] }
  0xeb   :  { %5239 = vmatpush1.bf16.msra.mxu0 %v5238_v18  ;;  %v398_v18 = vld [vmem:[#allocation5 + $0x9b8] sm:$0xff] }
  0xec   :  { %5367 = vmatpush1.bf16.msra.mxu1 %v5366_v19  ;;  %5241 = vmatprep.subr.bf16.mxu0 %v5240_v20  ;;  %v5258_v19 = vpack.c.bf16 %v363_v10, %v347_v9  ;;  %v5386_v20 = vpack.c.bf16 %v365_v14, %v349_v12  ;;  %v5388_v27 = vpack.c.bf16 %v398_v18, %v382_v17  ;;  %v507_v10 = vld [vmem:[#allocation5 + $0xd20] sm:$0xff]  ;;  %v556_v17 = vld [vmem:[#allocation5 + $0xea8] sm:$0xff]  ;;  %v542_v18 = vld [vmem:[#allocation5 + $0xe38] sm:$0xff] }
  0xed   :  { %5369 = vmatprep.subr.bf16.mxu1 %v5368_v22  ;;  %v381_v22 = vld [vmem:[#allocation5 + $0x930] sm:$0xff]  ;;  %v5276_v9 = vpack.c.bf16 %v524_v4, %v508_v3  ;;  %v523_v12 = vld [vmem:[#allocation5 + $0xda0] sm:$0xff]  ;;  %v668_v4 = vld [vmem:[#allocation5 + $0x1228] sm:$0xff] }
  0xee   :  { %v653_v3 = vld [vmem:[#allocation5 + $0x11b0] sm:$0xff] }
  0xef   :  { %5243 = vmatpush1.bf16.msra.mxu0 %v5242_v33  ;;  %v430_v33 = vld [vmem:[#allocation5 + $0xab8] sm:$0xff] }
  0xf0   :  { %5371 = vmatpush1.bf16.msra.mxu1 %v5370_v34  ;;  %5245 = vmatprep.subr.bf16.mxu0 %v5244_v35  ;;  %v5262_v34 = vpack.c.bf16 %v395_v24, %v379_v23  ;;  %v5390_v35 = vpack.c.bf16 %v397_v28, %v381_v22  ;;  %v5392_v40 = vpack.c.bf16 %v430_v33, %v414_v31  ;;  %v539_v24 = vld [vmem:[#allocation5 + $0xe20] sm:$0xff]  ;;  %v588_v31 = vld [vmem:[#allocation5 + $0xfa8] sm:$0xff]  ;;  %v574_v33 = vld [vmem:[#allocation5 + $0xf38] sm:$0xff] }
  0xf1   :  { %5373 = vmatprep.subr.bf16.mxu1 %v5372_v39  ;;  %v413_v39 = vld [vmem:[#allocation5 + $0xa30] sm:$0xff]  ;;  %v5280_v23 = vpack.c.bf16 %v556_v17, %v540_v16  ;;  %v555_v22 = vld [vmem:[#allocation5 + $0xea0] sm:$0xff]  ;;  %v700_v17 = vld [vmem:[#allocation5 + $0x1328] sm:$0xff] }
  0xf2   :  { %v685_v16 = vld [vmem:[#allocation5 + $0x12b0] sm:$0xff] }
  0xf3   :  { %5247 = vmatpush1.bf16.msra.mxu0 %v5246_v45  ;;  %v462_v45 = vld [vmem:[#allocation5 + $0xbb8] sm:$0xff] }
  0xf4   :  { %5375 = vmatpush1.bf16.msra.mxu1 %v5374_v46  ;;  %5249 = vmatprep.subr.bf16.mxu0 %v5248_v47  ;;  %v5266_v46 = vpack.c.bf16 %v427_v38, %v411_v37  ;;  %v5394_v47 = vpack.c.bf16 %v429_v41, %v413_v39  ;;  %v5396_v52 = vpack.c.bf16 %v462_v45, %v446_v44  ;;  %v571_v38 = vld [vmem:[#allocation5 + $0xf20] sm:$0xff]  ;;  %v620_v44 = vld [vmem:[#allocation5 + $0x10a8] sm:$0xff]  ;;  %v606_v45 = vld [vmem:[#allocation5 + $0x1038] sm:$0xff] }
  0xf5   :  { %5377 = vmatprep.subr.bf16.mxu1 %v5376_v51  ;;  %v445_v51 = vld [vmem:[#allocation5 + $0xb30] sm:$0xff]  ;;  %v5284_v37 = vpack.c.bf16 %v588_v31, %v572_v30  ;;  %v587_v39 = vld [vmem:[#allocation5 + $0xfa0] sm:$0xff]  ;;  %v732_v31 = vld [vmem:[#allocation5 + $0x1428] sm:$0xff] }
  0xf6   :  { %v717_v30 = vld [vmem:[#allocation5 + $0x13b0] sm:$0xff] }
  0xf7   :  { %5251 = vmatpush1.bf16.msra.mxu0 %v5250_v57  ;;  %v494_v57 = vld [vmem:[#allocation5 + $0xcb8] sm:$0xff] }
  0xf8   :  { %5379 = vmatpush1.bf16.msra.mxu1 %v5378_v58  ;;  %5253 = vmatprep.subr.bf16.mxu0 %v5252_v59  ;;  %v5270_v58 = vpack.c.bf16 %v459_v50, %v443_v49  ;;  %v5398_v59 = vpack.c.bf16 %v461_v53, %v445_v51  ;;  %v5400_v1 = vpack.c.bf16 %v494_v57, %v478_v56  ;;  %v603_v50 = vld [vmem:[#allocation5 + $0x1020] sm:$0xff]  ;;  %v652_v56 = vld [vmem:[#allocation5 + $0x11a8] sm:$0xff]  ;;  %v638_v57 = vld [vmem:[#allocation5 + $0x1138] sm:$0xff] }
  0xf9   :  { %5381 = vmatprep.subr.bf16.mxu1 %v5380_v0  ;;  %v477_v0 = vld [vmem:[#allocation5 + $0xc30] sm:$0xff]  ;;  %v5288_v49 = vpack.c.bf16 %v620_v44, %v604_v43  ;;  %v619_v51 = vld [vmem:[#allocation5 + $0x10a0] sm:$0xff]  ;;  %v764_v44 = vld [vmem:[#allocation5 + $0x1528] sm:$0xff] }
  0xfa   :  { %v749_v43 = vld [vmem:[#allocation5 + $0x14b0] sm:$0xff] }
  0xfb   :  { %5255 = vmatpush1.bf16.msra.mxu0 %v5254_v6  ;;  %v526_v6 = vld [vmem:[#allocation5 + $0xdb8] sm:$0xff] }
  0xfc   :  { %5383 = vmatpush1.bf16.msra.mxu1 %v5382_v7  ;;  %5257 = vmatprep.subr.bf16.mxu0 %v5256_v8  ;;  %v5274_v7 = vpack.c.bf16 %v491_v63, %v475_v62  ;;  %v5402_v8 = vpack.c.bf16 %v493_v2, %v477_v0  ;;  %v5404_v14 = vpack.c.bf16 %v526_v6, %v510_v5  ;;  %v635_v63 = vld [vmem:[#allocation5 + $0x1120] sm:$0xff]  ;;  %v684_v5 = vld [vmem:[#allocation5 + $0x12a8] sm:$0xff]  ;;  %v670_v6 = vld [vmem:[#allocation5 + $0x1238] sm:$0xff] }
  0xfd   :  { %5385 = vmatprep.subr.bf16.mxu1 %v5384_v13  ;;  %v509_v13 = vld [vmem:[#allocation5 + $0xd30] sm:$0xff]  ;;  %v5292_v62 = vpack.c.bf16 %v652_v56, %v636_v55  ;;  %v651_v0 = vld [vmem:[#allocation5 + $0x11a0] sm:$0xff]  ;;  %v796_v56 = vld [vmem:[#allocation5 + $0x1628] sm:$0xff] }
  0xfe   :  { %v781_v55 = vld [vmem:[#allocation5 + $0x15b0] sm:$0xff] }
  0xff   :  { %5259 = vmatpush1.bf16.msra.mxu0 %v5258_v19  ;;  %v558_v19 = vld [vmem:[#allocation5 + $0xeb8] sm:$0xff] }
 0x100   :  { %5387 = vmatpush1.bf16.msra.mxu1 %v5386_v20  ;;  %5261 = vmatprep.subr.bf16.mxu0 %v5260_v21  ;;  %v5278_v20 = vpack.c.bf16 %v523_v12, %v507_v10  ;;  %v5406_v21 = vpack.c.bf16 %v525_v15, %v509_v13  ;;  %v5408_v28 = vpack.c.bf16 %v558_v19, %v542_v18  ;;  %v667_v12 = vld [vmem:[#allocation5 + $0x1220] sm:$0xff]  ;;  %v716_v18 = vld [vmem:[#allocation5 + $0x13a8] sm:$0xff]  ;;  %v702_v19 = vld [vmem:[#allocation5 + $0x1338] sm:$0xff] }
 0x101   :  { %5389 = vmatprep.subr.bf16.mxu1 %v5388_v27  ;;  %v541_v27 = vld [vmem:[#allocation5 + $0xe30] sm:$0xff]  ;;  %v5296_v10 = vpack.c.bf16 %v684_v5, %v668_v4  ;;  %v683_v13 = vld [vmem:[#allocation5 + $0x12a0] sm:$0xff]  ;;  %v828_v5 = vld [vmem:[#allocation5 + $0x1728] sm:$0xff] }
 0x102   :  { %v813_v4 = vld [vmem:[#allocation5 + $0x16b0] sm:$0xff] }
 0x103   :  { %5263 = vmatpush1.bf16.msra.mxu0 %v5262_v34  ;;  %v590_v34 = vld [vmem:[#allocation5 + $0xfb8] sm:$0xff] }
 0x104   :  { %5391 = vmatpush1.bf16.msra.mxu1 %v5390_v35  ;;  %5265 = vmatprep.subr.bf16.mxu0 %v5264_v36  ;;  %v5282_v35 = vpack.c.bf16 %v555_v22, %v539_v24  ;;  %v5410_v36 = vpack.c.bf16 %v557_v29, %v541_v27  ;;  %v5412_v41 = vpack.c.bf16 %v590_v34, %v574_v33  ;;  %v699_v22 = vld [vmem:[#allocation5 + $0x1320] sm:$0xff]  ;;  %v748_v33 = vld [vmem:[#allocation5 + $0x14a8] sm:$0xff]  ;;  %v734_v34 = vld [vmem:[#allocation5 + $0x1438] sm:$0xff] }
 0x105   :  { %5393 = vmatprep.subr.bf16.mxu1 %v5392_v40  ;;  %v573_v40 = vld [vmem:[#allocation5 + $0xf30] sm:$0xff]  ;;  %v5300_v24 = vpack.c.bf16 %v716_v18, %v700_v17  ;;  %v715_v27 = vld [vmem:[#allocation5 + $0x13a0] sm:$0xff]  ;;  %v860_v18 = vld [vmem:[#allocation5 + $0x1828] sm:$0xff] }
 0x106   :  { %v845_v17 = vld [vmem:[#allocation5 + $0x17b0] sm:$0xff] }
 0x107   :  { %5267 = vmatpush1.bf16.msra.mxu0 %v5266_v46  ;;  %v622_v46 = vld [vmem:[#allocation5 + $0x10b8] sm:$0xff] }
 0x108   :  { %5395 = vmatpush1.bf16.msra.mxu1 %v5394_v47  ;;  %5269 = vmatprep.subr.bf16.mxu0 %v5268_v48  ;;  %v5286_v47 = vpack.c.bf16 %v587_v39, %v571_v38  ;;  %v5414_v48 = vpack.c.bf16 %v589_v42, %v573_v40  ;;  %v5416_v53 = vpack.c.bf16 %v622_v46, %v606_v45  ;;  %v731_v39 = vld [vmem:[#allocation5 + $0x1420] sm:$0xff]  ;;  %v780_v45 = vld [vmem:[#allocation5 + $0x15a8] sm:$0xff]  ;;  %v766_v46 = vld [vmem:[#allocation5 + $0x1538] sm:$0xff] }
 0x109   :  { %5397 = vmatprep.subr.bf16.mxu1 %v5396_v52  ;;  %v605_v52 = vld [vmem:[#allocation5 + $0x1030] sm:$0xff]  ;;  %v5304_v38 = vpack.c.bf16 %v748_v33, %v732_v31  ;;  %v747_v40 = vld [vmem:[#allocation5 + $0x14a0] sm:$0xff]  ;;  %v892_v33 = vld [vmem:[#allocation5 + $0x1928] sm:$0xff] }
 0x10a   :  { %v877_v31 = vld [vmem:[#allocation5 + $0x18b0] sm:$0xff] }
 0x10b   :  { %5271 = vmatpush1.bf16.msra.mxu0 %v5270_v58  ;;  %v654_v58 = vld [vmem:[#allocation5 + $0x11b8] sm:$0xff] }
 0x10c   :  { %5399 = vmatpush1.bf16.msra.mxu1 %v5398_v59  ;;  %5273 = vmatprep.subr.bf16.mxu0 %v5272_v60  ;;  %v5290_v59 = vpack.c.bf16 %v619_v51, %v603_v50  ;;  %v5418_v60 = vpack.c.bf16 %v621_v54, %v605_v52  ;;  %v5420_v2 = vpack.c.bf16 %v654_v58, %v638_v57  ;;  %v763_v51 = vld [vmem:[#allocation5 + $0x1520] sm:$0xff]  ;;  %v812_v57 = vld [vmem:[#allocation5 + $0x16a8] sm:$0xff]  ;;  %v798_v58 = vld [vmem:[#allocation5 + $0x1638] sm:$0xff] }
 0x10d   :  { %5401 = vmatprep.subr.bf16.mxu1 %v5400_v1  ;;  %v637_v1 = vld [vmem:[#allocation5 + $0x1130] sm:$0xff]  ;;  %v5308_v50 = vpack.c.bf16 %v780_v45, %v764_v44  ;;  %v779_v52 = vld [vmem:[#allocation5 + $0x15a0] sm:$0xff]  ;;  %v924_v45 = vld [vmem:[#allocation5 + $0x1a28] sm:$0xff] }
 0x10e   :  { %v909_v44 = vld [vmem:[#allocation5 + $0x19b0] sm:$0xff] }
 0x10f   :  { %5275 = vmatpush1.bf16.msra.mxu0 %v5274_v7  ;;  %v686_v7 = vld [vmem:[#allocation5 + $0x12b8] sm:$0xff] }
 0x110   :  { %5403 = vmatpush1.bf16.msra.mxu1 %v5402_v8  ;;  %5277 = vmatprep.subr.bf16.mxu0 %v5276_v9  ;;  %v5294_v8 = vpack.c.bf16 %v651_v0, %v635_v63  ;;  %v5422_v9 = vpack.c.bf16 %v653_v3, %v637_v1  ;;  %v5424_v15 = vpack.c.bf16 %v686_v7, %v670_v6  ;;  %v795_v0 = vld [vmem:[#allocation5 + $0x1620] sm:$0xff]  ;;  %v844_v6 = vld [vmem:[#allocation5 + $0x17a8] sm:$0xff]  ;;  %v830_v7 = vld [vmem:[#allocation5 + $0x1738] sm:$0xff] }
 0x111   :  { %5405 = vmatprep.subr.bf16.mxu1 %v5404_v14  ;;  %v669_v14 = vld [vmem:[#allocation5 + $0x1230] sm:$0xff]  ;;  %v5312_v63 = vpack.c.bf16 %v812_v57, %v796_v56  ;;  %v811_v1 = vld [vmem:[#allocation5 + $0x16a0] sm:$0xff]  ;;  %v956_v57 = vld [vmem:[#allocation5 + $0x1b28] sm:$0xff] }
 0x112   :  { %v941_v56 = vld [vmem:[#allocation5 + $0x1ab0] sm:$0xff] }
 0x113   :  { %5279 = vmatpush1.bf16.msra.mxu0 %v5278_v20  ;;  %v718_v20 = vld [vmem:[#allocation5 + $0x13b8] sm:$0xff] }
 0x114   :  { %5407 = vmatpush1.bf16.msra.mxu1 %v5406_v21  ;;  %5281 = vmatprep.subr.bf16.mxu0 %v5280_v23  ;;  %v5298_v21 = vpack.c.bf16 %v683_v13, %v667_v12  ;;  %v5426_v23 = vpack.c.bf16 %v685_v16, %v669_v14  ;;  %v5428_v29 = vpack.c.bf16 %v718_v20, %v702_v19  ;;  %v827_v13 = vld [vmem:[#allocation5 + $0x1720] sm:$0xff]  ;;  %v876_v19 = vld [vmem:[#allocation5 + $0x18a8] sm:$0xff]  ;;  %v862_v20 = vld [vmem:[#allocation5 + $0x1838] sm:$0xff] }
 0x115   :  { %5409 = vmatprep.subr.bf16.mxu1 %v5408_v28  ;;  %v701_v28 = vld [vmem:[#allocation5 + $0x1330] sm:$0xff]  ;;  %v5316_v12 = vpack.c.bf16 %v844_v6, %v828_v5  ;;  %v843_v14 = vld [vmem:[#allocation5 + $0x17a0] sm:$0xff]  ;;  %v988_v6 = vld [vmem:[#allocation5 + $0x1c28] sm:$0xff] }
 0x116   :  { %v973_v5 = vld [vmem:[#allocation5 + $0x1bb0] sm:$0xff] }
 0x117   :  { %5283 = vmatpush1.bf16.msra.mxu0 %v5282_v35  ;;  %v750_v35 = vld [vmem:[#allocation5 + $0x14b8] sm:$0xff] }
 0x118   :  { %5411 = vmatpush1.bf16.msra.mxu1 %v5410_v36  ;;  %5285 = vmatprep.subr.bf16.mxu0 %v5284_v37  ;;  %v5302_v36 = vpack.c.bf16 %v715_v27, %v699_v22  ;;  %v5430_v37 = vpack.c.bf16 %v717_v30, %v701_v28  ;;  %v5432_v42 = vpack.c.bf16 %v750_v35, %v734_v34  ;;  %v859_v27 = vld [vmem:[#allocation5 + $0x1820] sm:$0xff]  ;;  %v908_v34 = vld [vmem:[#allocation5 + $0x19a8] sm:$0xff]  ;;  %v894_v35 = vld [vmem:[#allocation5 + $0x1938] sm:$0xff] }
 0x119   :  { %5413 = vmatprep.subr.bf16.mxu1 %v5412_v41  ;;  %v733_v41 = vld [vmem:[#allocation5 + $0x1430] sm:$0xff]  ;;  %v5320_v22 = vpack.c.bf16 %v876_v19, %v860_v18  ;;  %v875_v28 = vld [vmem:[#allocation5 + $0x18a0] sm:$0xff]  ;;  %v1020_v19 = vld [vmem:[#allocation5 + $0x1d28] sm:$0xff] }
 0x11a   :  { %v1005_v18 = vld [vmem:[#allocation5 + $0x1cb0] sm:$0xff] }
 0x11b   :  { %5287 = vmatpush1.bf16.msra.mxu0 %v5286_v47  ;;  %v782_v47 = vld [vmem:[#allocation5 + $0x15b8] sm:$0xff] }
 0x11c   :  { %5415 = vmatpush1.bf16.msra.mxu1 %v5414_v48  ;;  %5289 = vmatprep.subr.bf16.mxu0 %v5288_v49  ;;  %v5306_v48 = vpack.c.bf16 %v747_v40, %v731_v39  ;;  %v5434_v49 = vpack.c.bf16 %v749_v43, %v733_v41  ;;  %v5436_v54 = vpack.c.bf16 %v782_v47, %v766_v46  ;;  %v891_v40 = vld [vmem:[#allocation5 + $0x1920] sm:$0xff]  ;;  %v940_v46 = vld [vmem:[#allocation5 + $0x1aa8] sm:$0xff]  ;;  %v926_v47 = vld [vmem:[#allocation5 + $0x1a38] sm:$0xff] }
 0x11d   :  { %5417 = vmatprep.subr.bf16.mxu1 %v5416_v53  ;;  %v765_v53 = vld [vmem:[#allocation5 + $0x1530] sm:$0xff]  ;;  %v5324_v39 = vpack.c.bf16 %v908_v34, %v892_v33  ;;  %v907_v41 = vld [vmem:[#allocation5 + $0x19a0] sm:$0xff]  ;;  %v1052_v34 = vld [vmem:[#allocation5 + $0x1e28] sm:$0xff] }
 0x11e   :  { %1566 = vmatmul.mubr.f32.vlgmr.msra.gmra.mrb[2].mxu0 %v7455_v25  ;;  %v1037_v33 = vld [vmem:[#allocation5 + $0x1db0] sm:$0xff] }
 0x11f   :  { %5291 = vmatpush1.bf16.msra.mxu0 %v5290_v59  ;;  %1708 = vmatmul.mubr.f32.vlgmr.msra.gmra.mrb[2].mxu1 %v7455_v25  ;;  %v814_v59 = vld [vmem:[#allocation5 + $0x16b8] sm:$0xff] }
 0x120   :  { %5419 = vmatpush1.bf16.msra.mxu1 %v5418_v60  ;;  %5293 = vmatprep.subr.bf16.mxu0 %v5292_v62  ;;  %v5310_v60 = vpack.c.bf16 %v779_v52, %v763_v51  ;;  %v5438_v62 = vpack.c.bf16 %v781_v55, %v765_v53  ;;  %v5440_v3 = vpack.c.bf16 %v814_v59, %v798_v58  ;;  %v923_v52 = vld [vmem:[#allocation5 + $0x1a20] sm:$0xff]  ;;  %v972_v58 = vld [vmem:[#allocation5 + $0x1ba8] sm:$0xff]  ;;  %v958_v59 = vld [vmem:[#allocation5 + $0x1b38] sm:$0xff] }
 0x121   :  { %5421 = vmatprep.subr.bf16.mxu1 %v5420_v2  ;;  %1636 = vmatprep.mubr.f32.mxu0 %v7470_v11  ;;  %v797_v2 = vld [vmem:[#allocation5 + $0x1630] sm:$0xff]  ;;  %v5328_v51 = vpack.c.bf16 %v940_v46, %v924_v45  ;;  %v939_v53 = vld [vmem:[#allocation5 + $0x1aa0] sm:$0xff]  ;;  %v1084_v46 = vld [vmem:[#allocation5 + $0x1f28] sm:$0xff] }
 0x122   :  { %1778 = vmatprep.mubr.f32.mxu1 %v7470_v11  ;;  %v1069_v45 = vld [vmem:[#allocation5 + $0x1eb0] sm:$0xff] }
 0x123   :  { %5295 = vmatpush1.bf16.msra.mxu0 %v5294_v8  ;;  %v846_v8 = vld [vmem:[#allocation5 + $0x17b8] sm:$0xff] }
 0x124   :  { %5423 = vmatpush1.bf16.msra.mxu1 %v5422_v9  ;;  %5297 = vmatprep.subr.bf16.mxu0 %v5296_v10  ;;  %v5314_v9 = vpack.c.bf16 %v811_v1, %v795_v0  ;;  %v5442_v10 = vpack.c.bf16 %v813_v4, %v797_v2  ;;  %v5444_v16 = vpack.c.bf16 %v846_v8, %v830_v7  ;;  %v955_v1 = vld [vmem:[#allocation5 + $0x1b20] sm:$0xff]  ;;  %v1004_v7 = vld [vmem:[#allocation5 + $0x1ca8] sm:$0xff]  ;;  %v990_v8 = vld [vmem:[#allocation5 + $0x1c38] sm:$0xff] }
 0x125   :  { %5425 = vmatprep.subr.bf16.mxu1 %v5424_v15  ;;  %v829_v15 = vld [vmem:[#allocation5 + $0x1730] sm:$0xff]  ;;  %v5332_v0 = vpack.c.bf16 %v972_v58, %v956_v57  ;;  %v971_v2 = vld [vmem:[#allocation5 + $0x1ba0] sm:$0xff]  ;;  %v96_v58 = vld [vmem:[#allocation5 + $0x48] sm:$0xff] }
 0x126   :  { %v1101_v57 = vld [vmem:[#allocation5 + $0x1fb0] sm:$0xff] }
 0x127   :  { %5299 = vmatpush1.bf16.msra.mxu0 %v5298_v21  ;;  %v878_v21 = vld [vmem:[#allocation5 + $0x18b8] sm:$0xff] }
 0x128   :  { %5427 = vmatpush1.bf16.msra.mxu1 %v5426_v23  ;;  %5301 = vmatprep.subr.bf16.mxu0 %v5300_v24  ;;  %v5318_v23 = vpack.c.bf16 %v843_v14, %v827_v13  ;;  %v5446_v24 = vpack.c.bf16 %v845_v17, %v829_v15  ;;  %v5448_v30 = vpack.c.bf16 %v878_v21, %v862_v20  ;;  %v987_v14 = vld [vmem:[#allocation5 + $0x1c20] sm:$0xff]  ;;  %v1036_v20 = vld [vmem:[#allocation5 + $0x1da8] sm:$0xff]  ;;  %v1022_v21 = vld [vmem:[#allocation5 + $0x1d38] sm:$0xff] }
 0x129   :  { %5429 = vmatprep.subr.bf16.mxu1 %v5428_v29  ;;  %v861_v29 = vld [vmem:[#allocation5 + $0x1830] sm:$0xff]  ;;  %v5336_v13 = vpack.c.bf16 %v1004_v7, %v988_v6  ;;  %v1003_v15 = vld [vmem:[#allocation5 + $0x1ca0] sm:$0xff]  ;;  %v128_v7 = vld [vmem:[#allocation5 + $0x148] sm:$0xff] }
 0x12a   :  { %v113_v6 = vld [vmem:[#allocation5 + $0xd0] sm:$0xff] }
 0x12b   :  { %5303 = vmatpush1.bf16.msra.mxu0 %v5302_v36  ;;  %v910_v36 = vld [vmem:[#allocation5 + $0x19b8] sm:$0xff] }
 0x12c   :  { %5431 = vmatpush1.bf16.msra.mxu1 %v5430_v37  ;;  %5305 = vmatprep.subr.bf16.mxu0 %v5304_v38  ;;  %v5322_v37 = vpack.c.bf16 %v875_v28, %v859_v27  ;;  %v5450_v38 = vpack.c.bf16 %v877_v31, %v861_v29  ;;  %v5452_v43 = vpack.c.bf16 %v910_v36, %v894_v35  ;;  %v1019_v28 = vld [vmem:[#allocation5 + $0x1d20] sm:$0xff]  ;;  %v1068_v35 = vld [vmem:[#allocation5 + $0x1ea8] sm:$0xff]  ;;  %v1054_v36 = vld [vmem:[#allocation5 + $0x1e38] sm:$0xff] }
 0x12d   :  { %5433 = vmatprep.subr.bf16.mxu1 %v5432_v42  ;;  %v893_v42 = vld [vmem:[#allocation5 + $0x1930] sm:$0xff]  ;;  %v5340_v27 = vpack.c.bf16 %v1036_v20, %v1020_v19  ;;  %v1035_v29 = vld [vmem:[#allocation5 + $0x1da0] sm:$0xff]  ;;  %v160_v20 = vld [vmem:[#allocation5 + $0x248] sm:$0xff] }
 0x12e   :  { %v145_v19 = vld [vmem:[#allocation5 + $0x1d0] sm:$0xff] }
 0x12f   :  { %5307 = vmatpush1.bf16.msra.mxu0 %v5306_v48  ;;  %v942_v48 = vld [vmem:[#allocation5 + $0x1ab8] sm:$0xff] }
 0x130   :  { %5435 = vmatpush1.bf16.msra.mxu1 %v5434_v49  ;;  %5309 = vmatprep.subr.bf16.mxu0 %v5308_v50  ;;  %v5326_v49 = vpack.c.bf16 %v907_v41, %v891_v40  ;;  %v5454_v50 = vpack.c.bf16 %v909_v44, %v893_v42  ;;  %v5456_v55 = vpack.c.bf16 %v942_v48, %v926_v47  ;;  %v1051_v41 = vld [vmem:[#allocation5 + $0x1e20] sm:$0xff]  ;;  %v1100_v47 = vld [vmem:[#allocation5 + $0x1fa8] sm:$0xff]  ;;  %v1086_v48 = vld [vmem:[#allocation5 + $0x1f38] sm:$0xff] }
 0x131   :  { %5437 = vmatprep.subr.bf16.mxu1 %v5436_v54  ;;  %v925_v54 = vld [vmem:[#allocation5 + $0x1a30] sm:$0xff]  ;;  %v5344_v40 = vpack.c.bf16 %v1068_v35, %v1052_v34  ;;  %v1067_v42 = vld [vmem:[#allocation5 + $0x1ea0] sm:$0xff]  ;;  %v192_v35 = vld [vmem:[#allocation5 + $0x348] sm:$0xff] }
 0x132   :  { %v177_v34 = vld [vmem:[#allocation5 + $0x2d0] sm:$0xff] }
 0x133   :  { %5311 = vmatpush1.bf16.msra.mxu0 %v5310_v60  ;;  %v974_v60 = vld [vmem:[#allocation5 + $0x1bb8] sm:$0xff] }
 0x134   :  { %5439 = vmatpush1.bf16.msra.mxu1 %v5438_v62  ;;  %5313 = vmatprep.subr.bf16.mxu0 %v5312_v63  ;;  %v5330_v62 = vpack.c.bf16 %v939_v53, %v923_v52  ;;  %v5458_v63 = vpack.c.bf16 %v941_v56, %v925_v54  ;;  %v5460_v4 = vpack.c.bf16 %v974_v60, %v958_v59  ;;  %v1083_v53 = vld [vmem:[#allocation5 + $0x1f20] sm:$0xff]  ;;  %v112_v59 = vld [vmem:[#allocation5 + $0xc8] sm:$0xff]  ;;  %v98_v60 = vld [vmem:[#allocation5 + $0x58] sm:$0xff] }
 0x135   :  { %5441 = vmatprep.subr.bf16.mxu1 %v5440_v3  ;;  %v957_v3 = vld [vmem:[#allocation5 + $0x1b30] sm:$0xff]  ;;  %v5348_v52 = vpack.c.bf16 %v1100_v47, %v1084_v46  ;;  %v1099_v54 = vld [vmem:[#allocation5 + $0x1fa0] sm:$0xff]  ;;  %v224_v47 = vld [vmem:[#allocation5 + $0x448] sm:$0xff] }
 0x136   :  { %v209_v46 = vld [vmem:[#allocation5 + $0x3d0] sm:$0xff] }
 0x137   :  { %5315 = vmatpush1.bf16.msra.mxu0 %v5314_v9  ;;  %v1006_v9 = vld [vmem:[#allocation5 + $0x1cb8] sm:$0xff] }
 0x138   :  { %5443 = vmatpush1.bf16.msra.mxu1 %v5442_v10  ;;  %5317 = vmatprep.subr.bf16.mxu0 %v5316_v12  ;;  %v5334_v10 = vpack.c.bf16 %v971_v2, %v955_v1  ;;  %v5462_v12 = vpack.c.bf16 %v973_v5, %v957_v3  ;;  %v5464_v17 = vpack.c.bf16 %v1006_v9, %v990_v8  ;;  %v95_v2 = vld [vmem:[#allocation5 + $0x40] sm:$0xff]  ;;  %v144_v8 = vld [vmem:[#allocation5 + $0x1c8] sm:$0xff]  ;;  %v130_v9 = vld [vmem:[#allocation5 + $0x158] sm:$0xff] }
 0x139   :  { %5445 = vmatprep.subr.bf16.mxu1 %v5444_v16  ;;  %v989_v16 = vld [vmem:[#allocation5 + $0x1c30] sm:$0xff]  ;;  %v5480_v1 = vpack.c.bf16 %v112_v59, %v96_v58  ;;  %v111_v3 = vld [vmem:[#allocation5 + $0xc0] sm:$0xff]  ;;  %v256_v59 = vld [vmem:[#allocation5 + $0x548] sm:$0xff] }
 0x13a   :  { %v241_v58 = vld [vmem:[#allocation5 + $0x4d0] sm:$0xff] }
 0x13b   :  { %5319 = vmatpush1.bf16.msra.mxu0 %v5318_v23  ;;  %v1038_v23 = vld [vmem:[#allocation5 + $0x1db8] sm:$0xff] }
 0x13c   :  { %5447 = vmatpush1.bf16.msra.mxu1 %v5446_v24  ;;  %5321 = vmatprep.subr.bf16.mxu0 %v5320_v22  ;;  %v5338_v24 = vpack.c.bf16 %v1003_v15, %v987_v14  ;;  %v5466_v22 = vpack.c.bf16 %v1005_v18, %v989_v16  ;;  %v5468_v31 = vpack.c.bf16 %v1038_v23, %v1022_v21  ;;  %v127_v15 = vld [vmem:[#allocation5 + $0x140] sm:$0xff]  ;;  %v176_v21 = vld [vmem:[#allocation5 + $0x2c8] sm:$0xff]  ;;  %v162_v23 = vld [vmem:[#allocation5 + $0x258] sm:$0xff] }
 0x13d   :  { %5449 = vmatprep.subr.bf16.mxu1 %v5448_v30  ;;  %v1021_v30 = vld [vmem:[#allocation5 + $0x1d30] sm:$0xff]  ;;  %v5484_v14 = vpack.c.bf16 %v144_v8, %v128_v7  ;;  %v143_v16 = vld [vmem:[#allocation5 + $0x1c0] sm:$0xff]  ;;  %v288_v8 = vld [vmem:[#allocation5 + $0x648] sm:$0xff] }
 0x13e   :  { %v273_v7 = vld [vmem:[#allocation5 + $0x5d0] sm:$0xff] }
 0x13f   :  { %5323 = vmatpush1.bf16.msra.mxu0 %v5322_v37  ;;  %v1070_v37 = vld [vmem:[#allocation5 + $0x1eb8] sm:$0xff] }
 0x140   :  { %5451 = vmatpush1.bf16.msra.mxu1 %v5450_v38  ;;  %5325 = vmatprep.subr.bf16.mxu0 %v5324_v39  ;;  %v5342_v38 = vpack.c.bf16 %v1035_v29, %v1019_v28  ;;  %v5470_v39 = vpack.c.bf16 %v1037_v33, %v1021_v30  ;;  %v5472_v44 = vpack.c.bf16 %v1070_v37, %v1054_v36  ;;  %v159_v29 = vld [vmem:[#allocation5 + $0x240] sm:$0xff]  ;;  %v208_v36 = vld [vmem:[#allocation5 + $0x3c8] sm:$0xff]  ;;  %v194_v37 = vld [vmem:[#allocation5 + $0x358] sm:$0xff] }
 0x141   :  { %5453 = vmatprep.subr.bf16.mxu1 %v5452_v43  ;;  %v1053_v43 = vld [vmem:[#allocation5 + $0x1e30] sm:$0xff]  ;;  %v5488_v28 = vpack.c.bf16 %v176_v21, %v160_v20  ;;  %v175_v30 = vld [vmem:[#allocation5 + $0x2c0] sm:$0xff]  ;;  %v320_v21 = vld [vmem:[#allocation5 + $0x748] sm:$0xff] }
 0x142   :  { %v305_v20 = vld [vmem:[#allocation5 + $0x6d0] sm:$0xff] }
 0x143   :  { %5327 = vmatpush1.bf16.msra.mxu0 %v5326_v49  ;;  %v1102_v49 = vld [vmem:[#allocation5 + $0x1fb8] sm:$0xff] }
 0x144   :  { %5455 = vmatpush1.bf16.msra.mxu1 %v5454_v50  ;;  %5329 = vmatprep.subr.bf16.mxu0 %v5328_v51  ;;  %v5346_v50 = vpack.c.bf16 %v1067_v42, %v1051_v41  ;;  %v5474_v51 = vpack.c.bf16 %v1069_v45, %v1053_v43  ;;  %v5476_v56 = vpack.c.bf16 %v1102_v49, %v1086_v48  ;;  %v191_v42 = vld [vmem:[#allocation5 + $0x340] sm:$0xff]  ;;  %v240_v48 = vld [vmem:[#allocation5 + $0x4c8] sm:$0xff]  ;;  %v226_v49 = vld [vmem:[#allocation5 + $0x458] sm:$0xff] }
 0x145   :  { %5457 = vmatprep.subr.bf16.mxu1 %v5456_v55  ;;  %v1085_v55 = vld [vmem:[#allocation5 + $0x1f30] sm:$0xff]  ;;  %v5492_v41 = vpack.c.bf16 %v208_v36, %v192_v35  ;;  %v207_v43 = vld [vmem:[#allocation5 + $0x3c0] sm:$0xff]  ;;  %v352_v36 = vld [vmem:[#allocation5 + $0x848] sm:$0xff] }
 0x146   :  { %v337_v35 = vld [vmem:[#allocation5 + $0x7d0] sm:$0xff] }
 0x147   :  { %5331 = vmatpush1.bf16.msra.mxu0 %v5330_v62  ;;  %v114_v62 = vld [vmem:[#allocation5 + $0xd8] sm:$0xff] }
 0x148   :  { %5459 = vmatpush1.bf16.msra.mxu1 %v5458_v63  ;;  %5333 = vmatprep.subr.bf16.mxu0 %v5332_v0  ;;  %v5350_v63 = vpack.c.bf16 %v1099_v54, %v1083_v53  ;;  %v5478_v0 = vpack.c.bf16 %v1101_v57, %v1085_v55  ;;  %v5608_v5 = vpack.c.bf16 %v114_v62, %v98_v60  ;;  %v223_v54 = vld [vmem:[#allocation5 + $0x440] sm:$0xff]  ;;  %v272_v60 = vld [vmem:[#allocation5 + $0x5c8] sm:$0xff]  ;;  %v258_v62 = vld [vmem:[#allocation5 + $0x558] sm:$0xff] }
 0x149   :  { %5461 = vmatprep.subr.bf16.mxu1 %v5460_v4  ;;  %v97_v4 = vld [vmem:[#allocation5 + $0x50] sm:$0xff]  ;;  %v5496_v53 = vpack.c.bf16 %v240_v48, %v224_v47  ;;  %v239_v55 = vld [vmem:[#allocation5 + $0x4c0] sm:$0xff]  ;;  %v384_v48 = vld [vmem:[#allocation5 + $0x948] sm:$0xff] }
 0x14a   :  { %v369_v47 = vld [vmem:[#allocation5 + $0x8d0] sm:$0xff] }
 0x14b   :  { %5335 = vmatpush1.bf16.msra.mxu0 %v5334_v10  ;;  %v146_v10 = vld [vmem:[#allocation5 + $0x1d8] sm:$0xff] }
 0x14c   :  { %5463 = vmatpush1.bf16.msra.mxu1 %v5462_v12  ;;  %5337 = vmatprep.subr.bf16.mxu0 %v5336_v13  ;;  %v5482_v12 = vpack.c.bf16 %v111_v3, %v95_v2  ;;  %v5610_v13 = vpack.c.bf16 %v113_v6, %v97_v4  ;;  %v5612_v18 = vpack.c.bf16 %v146_v10, %v130_v9  ;;  %v255_v3 = vld [vmem:[#allocation5 + $0x540] sm:$0xff]  ;;  %v304_v9 = vld [vmem:[#allocation5 + $0x6c8] sm:$0xff]  ;;  %v290_v10 = vld [vmem:[#allocation5 + $0x658] sm:$0xff] }
 0x14d   :  { %5465 = vmatprep.subr.bf16.mxu1 %v5464_v17  ;;  %v129_v17 = vld [vmem:[#allocation5 + $0x150] sm:$0xff]  ;;  %v5500_v2 = vpack.c.bf16 %v272_v60, %v256_v59  ;;  %v271_v4 = vld [vmem:[#allocation5 + $0x5c0] sm:$0xff]  ;;  %v416_v60 = vld [vmem:[#allocation5 + $0xa48] sm:$0xff] }
 0x14e   :  { %v401_v59 = vld [vmem:[#allocation5 + $0x9d0] sm:$0xff] }
 0x14f   :  { %5339 = vmatpush1.bf16.msra.mxu0 %v5338_v24  ;;  %v178_v24 = vld [vmem:[#allocation5 + $0x2d8] sm:$0xff] }
 0x150   :  { %5467 = vmatpush1.bf16.msra.mxu1 %v5466_v22  ;;  %5341 = vmatprep.subr.bf16.mxu0 %v5340_v27  ;;  %v5486_v22 = vpack.c.bf16 %v143_v16, %v127_v15  ;;  %v5614_v27 = vpack.c.bf16 %v145_v19, %v129_v17  ;;  %v5616_v33 = vpack.c.bf16 %v178_v24, %v162_v23  ;;  %v287_v16 = vld [vmem:[#allocation5 + $0x640] sm:$0xff]  ;;  %v336_v23 = vld [vmem:[#allocation5 + $0x7c8] sm:$0xff]  ;;  %v322_v24 = vld [vmem:[#allocation5 + $0x758] sm:$0xff] }
 0x151   :  { %5469 = vmatprep.subr.bf16.mxu1 %v5468_v31  ;;  %v161_v31 = vld [vmem:[#allocation5 + $0x250] sm:$0xff]  ;;  %v5504_v15 = vpack.c.bf16 %v304_v9, %v288_v8  ;;  %v303_v17 = vld [vmem:[#allocation5 + $0x6c0] sm:$0xff]  ;;  %v448_v9 = vld [vmem:[#allocation5 + $0xb48] sm:$0xff] }
 0x152   :  { %v433_v8 = vld [vmem:[#allocation5 + $0xad0] sm:$0xff] }
 0x153   :  { %5343 = vmatpush1.bf16.msra.mxu0 %v5342_v38  ;;  %v210_v38 = vld [vmem:[#allocation5 + $0x3d8] sm:$0xff] }
 0x154   :  { %5471 = vmatpush1.bf16.msra.mxu1 %v5470_v39  ;;  %5345 = vmatprep.subr.bf16.mxu0 %v5344_v40  ;;  %v5490_v39 = vpack.c.bf16 %v175_v30, %v159_v29  ;;  %v5618_v40 = vpack.c.bf16 %v177_v34, %v161_v31  ;;  %v5620_v45 = vpack.c.bf16 %v210_v38, %v194_v37  ;;  %v319_v30 = vld [vmem:[#allocation5 + $0x740] sm:$0xff]  ;;  %v368_v37 = vld [vmem:[#allocation5 + $0x8c8] sm:$0xff]  ;;  %v354_v38 = vld [vmem:[#allocation5 + $0x858] sm:$0xff] }
 0x155   :  { %5473 = vmatprep.subr.bf16.mxu1 %v5472_v44  ;;  %v193_v44 = vld [vmem:[#allocation5 + $0x350] sm:$0xff]  ;;  %v5508_v29 = vpack.c.bf16 %v336_v23, %v320_v21  ;;  %v335_v31 = vld [vmem:[#allocation5 + $0x7c0] sm:$0xff]  ;;  %v480_v23 = vld [vmem:[#allocation5 + $0xc48] sm:$0xff] }
 0x156   :  { %v465_v21 = vld [vmem:[#allocation5 + $0xbd0] sm:$0xff] }
 0x157   :  { %5347 = vmatpush1.bf16.msra.mxu0 %v5346_v50  ;;  %v242_v50 = vld [vmem:[#allocation5 + $0x4d8] sm:$0xff] }
 0x158   :  { %5475 = vmatpush1.bf16.msra.mxu1 %v5474_v51  ;;  %5349 = vmatprep.subr.bf16.mxu0 %v5348_v52  ;;  %v5494_v51 = vpack.c.bf16 %v207_v43, %v191_v42  ;;  %v5622_v52 = vpack.c.bf16 %v209_v46, %v193_v44  ;;  %v5624_v57 = vpack.c.bf16 %v242_v50, %v226_v49  ;;  %v351_v43 = vld [vmem:[#allocation5 + $0x840] sm:$0xff]  ;;  %v400_v49 = vld [vmem:[#allocation5 + $0x9c8] sm:$0xff]  ;;  %v386_v50 = vld [vmem:[#allocation5 + $0x958] sm:$0xff] }
 0x159   :  { %5477 = vmatprep.subr.bf16.mxu1 %v5476_v56  ;;  %v225_v56 = vld [vmem:[#allocation5 + $0x450] sm:$0xff]  ;;  %v5512_v42 = vpack.c.bf16 %v368_v37, %v352_v36  ;;  %v367_v44 = vld [vmem:[#allocation5 + $0x8c0] sm:$0xff]  ;;  %v512_v37 = vld [vmem:[#allocation5 + $0xd48] sm:$0xff] }
 0x15a   :  { %v497_v36 = vld [vmem:[#allocation5 + $0xcd0] sm:$0xff] }
 0x15b   :  { %5351 = vmatpush1.bf16.msra.mxu0 %v5350_v63  ;;  %v274_v63 = vld [vmem:[#allocation5 + $0x5d8] sm:$0xff] }
 0x15c   :  { %5479 = vmatpush1.bf16.msra.mxu1 %v5478_v0  ;;  %5481 = vmatprep.subr.bf16.mxu0 %v5480_v1  ;;  %v5498_v0 = vpack.c.bf16 %v239_v55, %v223_v54  ;;  %v5626_v1 = vpack.c.bf16 %v241_v58, %v225_v56  ;;  %v5628_v6 = vpack.c.bf16 %v274_v63, %v258_v62  ;;  %v383_v55 = vld [vmem:[#allocation5 + $0x940] sm:$0xff]  ;;  %v432_v62 = vld [vmem:[#allocation5 + $0xac8] sm:$0xff]  ;;  %v418_v63 = vld [vmem:[#allocation5 + $0xa58] sm:$0xff] }
 0x15d   :  { %5609 = vmatprep.subr.bf16.mxu1 %v5608_v5  ;;  %v257_v5 = vld [vmem:[#allocation5 + $0x550] sm:$0xff]  ;;  %v5516_v54 = vpack.c.bf16 %v400_v49, %v384_v48  ;;  %v399_v56 = vld [vmem:[#allocation5 + $0x9c0] sm:$0xff]  ;;  %v544_v49 = vld [vmem:[#allocation5 + $0xe48] sm:$0xff] }
 0x15e   :  { %1637 = vmatmul.mubr.f32.vlgmr.msra.gmra.mrb[2].mxu0 %v7466_v26  ;;  %v529_v48 = vld [vmem:[#allocation5 + $0xdd0] sm:$0xff] }
 0x15f   :  { %1779 = vmatmul.mubr.f32.vlgmr.msra.gmra.mrb[2].mxu1 %v7466_v26  ;;  %5483 = vmatpush1.bf16.msra.mxu0 %v5482_v12  ;;  %v306_v12 = vld [vmem:[#allocation5 + $0x6d8] sm:$0xff] }
 0x160   :  { %5611 = vmatpush1.bf16.msra.mxu1 %v5610_v13  ;;  %5485 = vmatprep.subr.bf16.mxu0 %v5484_v14  ;;  %v5502_v13 = vpack.c.bf16 %v271_v4, %v255_v3  ;;  %v5630_v14 = vpack.c.bf16 %v273_v7, %v257_v5  ;;  %v5632_v19 = vpack.c.bf16 %v306_v12, %v290_v10  ;;  %v415_v4 = vld [vmem:[#allocation5 + $0xa40] sm:$0xff]  ;;  %v464_v10 = vld [vmem:[#allocation5 + $0xbc8] sm:$0xff]  ;;  %v450_v12 = vld [vmem:[#allocation5 + $0xb58] sm:$0xff] }
 0x161   :  { %5613 = vmatprep.subr.bf16.mxu1 %v5612_v18  ;;  %1849 = vmatprep.mubr.f32.mxu0 %v7459_v32  ;;  %v289_v18 = vld [vmem:[#allocation5 + $0x650] sm:$0xff]  ;;  %v5520_v3 = vpack.c.bf16 %v432_v62, %v416_v60  ;;  %v431_v5 = vld [vmem:[#allocation5 + $0xac0] sm:$0xff]  ;;  %v576_v62 = vld [vmem:[#allocation5 + $0xf48] sm:$0xff] }
 0x162   :  { %1991 = vmatprep.mubr.f32.mxu1 %v7459_v32  ;;  %v561_v60 = vld [vmem:[#allocation5 + $0xed0] sm:$0xff] }
 0x163   :  { %5487 = vmatpush1.bf16.msra.mxu0 %v5486_v22  ;;  %v338_v22 = vld [vmem:[#allocation5 + $0x7d8] sm:$0xff] }
 0x164   :  { %5615 = vmatpush1.bf16.msra.mxu1 %v5614_v27  ;;  %5489 = vmatprep.subr.bf16.mxu0 %v5488_v28  ;;  %v5506_v27 = vpack.c.bf16 %v303_v17, %v287_v16  ;;  %v5634_v28 = vpack.c.bf16 %v305_v20, %v289_v18  ;;  %v5636_v34 = vpack.c.bf16 %v338_v22, %v322_v24  ;;  %v447_v17 = vld [vmem:[#allocation5 + $0xb40] sm:$0xff]  ;;  %v496_v24 = vld [vmem:[#allocation5 + $0xcc8] sm:$0xff]  ;;  %v482_v22 = vld [vmem:[#allocation5 + $0xc58] sm:$0xff] }
 0x165   :  { %5617 = vmatprep.subr.bf16.mxu1 %v5616_v33  ;;  %v321_v33 = vld [vmem:[#allocation5 + $0x750] sm:$0xff]  ;;  %v5524_v16 = vpack.c.bf16 %v464_v10, %v448_v9  ;;  %v463_v18 = vld [vmem:[#allocation5 + $0xbc0] sm:$0xff]  ;;  %v608_v10 = vld [vmem:[#allocation5 + $0x1048] sm:$0xff] }
 0x166   :  { %v593_v9 = vld [vmem:[#allocation5 + $0xfd0] sm:$0xff] }
 0x167   :  { %5491 = vmatpush1.bf16.msra.mxu0 %v5490_v39  ;;  %v370_v39 = vld [vmem:[#allocation5 + $0x8d8] sm:$0xff] }
 0x168   :  { %5619 = vmatpush1.bf16.msra.mxu1 %v5618_v40  ;;  %5493 = vmatprep.subr.bf16.mxu0 %v5492_v41  ;;  %v5510_v40 = vpack.c.bf16 %v335_v31, %v319_v30  ;;  %v5638_v41 = vpack.c.bf16 %v337_v35, %v321_v33  ;;  %v5640_v46 = vpack.c.bf16 %v370_v39, %v354_v38  ;;  %v479_v31 = vld [vmem:[#allocation5 + $0xc40] sm:$0xff]  ;;  %v528_v38 = vld [vmem:[#allocation5 + $0xdc8] sm:$0xff]  ;;  %v514_v39 = vld [vmem:[#allocation5 + $0xd58] sm:$0xff] }
 0x169   :  { %5621 = vmatprep.subr.bf16.mxu1 %v5620_v45  ;;  %v353_v45 = vld [vmem:[#allocation5 + $0x850] sm:$0xff]  ;;  %v5528_v30 = vpack.c.bf16 %v496_v24, %v480_v23  ;;  %v495_v33 = vld [vmem:[#allocation5 + $0xcc0] sm:$0xff]  ;;  %v640_v24 = vld [vmem:[#allocation5 + $0x1148] sm:$0xff] }
 0x16a   :  { %v625_v23 = vld [vmem:[#allocation5 + $0x10d0] sm:$0xff] }
 0x16b   :  { %5495 = vmatpush1.bf16.msra.mxu0 %v5494_v51  ;;  %v402_v51 = vld [vmem:[#allocation5 + $0x9d8] sm:$0xff] }
 0x16c   :  { %5623 = vmatpush1.bf16.msra.mxu1 %v5622_v52  ;;  %5497 = vmatprep.subr.bf16.mxu0 %v5496_v53  ;;  %v5514_v52 = vpack.c.bf16 %v367_v44, %v351_v43  ;;  %v5642_v53 = vpack.c.bf16 %v369_v47, %v353_v45  ;;  %v5644_v58 = vpack.c.bf16 %v402_v51, %v386_v50  ;;  %v511_v44 = vld [vmem:[#allocation5 + $0xd40] sm:$0xff]  ;;  %v560_v50 = vld [vmem:[#allocation5 + $0xec8] sm:$0xff]  ;;  %v546_v51 = vld [vmem:[#allocation5 + $0xe58] sm:$0xff] }
 0x16d   :  { %5625 = vmatprep.subr.bf16.mxu1 %v5624_v57  ;;  %v385_v57 = vld [vmem:[#allocation5 + $0x950] sm:$0xff]  ;;  %v5532_v43 = vpack.c.bf16 %v528_v38, %v512_v37  ;;  %v527_v45 = vld [vmem:[#allocation5 + $0xdc0] sm:$0xff]  ;;  %v672_v38 = vld [vmem:[#allocation5 + $0x1248] sm:$0xff] }
 0x16e   :  { %v657_v37 = vld [vmem:[#allocation5 + $0x11d0] sm:$0xff] }
 0x16f   :  { %5499 = vmatpush1.bf16.msra.mxu0 %v5498_v0  ;;  %v434_v0 = vld [vmem:[#allocation5 + $0xad8] sm:$0xff] }
 0x170   :  { %5627 = vmatpush1.bf16.msra.mxu1 %v5626_v1  ;;  %5501 = vmatprep.subr.bf16.mxu0 %v5500_v2  ;;  %v5518_v1 = vpack.c.bf16 %v399_v56, %v383_v55  ;;  %v5646_v2 = vpack.c.bf16 %v401_v59, %v385_v57  ;;  %v5648_v7 = vpack.c.bf16 %v434_v0, %v418_v63  ;;  %v543_v56 = vld [vmem:[#allocation5 + $0xe40] sm:$0xff]  ;;  %v592_v63 = vld [vmem:[#allocation5 + $0xfc8] sm:$0xff]  ;;  %v578_v0 = vld [vmem:[#allocation5 + $0xf58] sm:$0xff] }
 0x171   :  { %5629 = vmatprep.subr.bf16.mxu1 %v5628_v6  ;;  %v417_v6 = vld [vmem:[#allocation5 + $0xa50] sm:$0xff]  ;;  %v5536_v55 = vpack.c.bf16 %v560_v50, %v544_v49  ;;  %v559_v57 = vld [vmem:[#allocation5 + $0xec0] sm:$0xff]  ;;  %v704_v50 = vld [vmem:[#allocation5 + $0x1348] sm:$0xff] }
 0x172   :  { %v689_v49 = vld [vmem:[#allocation5 + $0x12d0] sm:$0xff] }
 0x173   :  { %5503 = vmatpush1.bf16.msra.mxu0 %v5502_v13  ;;  %v466_v13 = vld [vmem:[#allocation5 + $0xbd8] sm:$0xff] }
 0x174   :  { %5631 = vmatpush1.bf16.msra.mxu1 %v5630_v14  ;;  %5505 = vmatprep.subr.bf16.mxu0 %v5504_v15  ;;  %v5522_v14 = vpack.c.bf16 %v431_v5, %v415_v4  ;;  %v5650_v15 = vpack.c.bf16 %v433_v8, %v417_v6  ;;  %v5652_v20 = vpack.c.bf16 %v466_v13, %v450_v12  ;;  %v575_v5 = vld [vmem:[#allocation5 + $0xf40] sm:$0xff]  ;;  %v624_v12 = vld [vmem:[#allocation5 + $0x10c8] sm:$0xff]  ;;  %v610_v13 = vld [vmem:[#allocation5 + $0x1058] sm:$0xff] }
 0x175   :  { %5633 = vmatprep.subr.bf16.mxu1 %v5632_v19  ;;  %v449_v19 = vld [vmem:[#allocation5 + $0xb50] sm:$0xff]  ;;  %v5540_v4 = vpack.c.bf16 %v592_v63, %v576_v62  ;;  %v591_v6 = vld [vmem:[#allocation5 + $0xfc0] sm:$0xff]  ;;  %v736_v63 = vld [vmem:[#allocation5 + $0x1448] sm:$0xff] }
 0x176   :  { %v721_v62 = vld [vmem:[#allocation5 + $0x13d0] sm:$0xff] }
 0x177   :  { %5507 = vmatpush1.bf16.msra.mxu0 %v5506_v27  ;;  %v498_v27 = vld [vmem:[#allocation5 + $0xcd8] sm:$0xff] }
 0x178   :  { %5635 = vmatpush1.bf16.msra.mxu1 %v5634_v28  ;;  %5509 = vmatprep.subr.bf16.mxu0 %v5508_v29  ;;  %v5526_v28 = vpack.c.bf16 %v463_v18, %v447_v17  ;;  %v5654_v29 = vpack.c.bf16 %v465_v21, %v449_v19  ;;  %v5656_v35 = vpack.c.bf16 %v498_v27, %v482_v22  ;;  %v607_v18 = vld [vmem:[#allocation5 + $0x1040] sm:$0xff]  ;;  %v656_v22 = vld [vmem:[#allocation5 + $0x11c8] sm:$0xff]  ;;  %v642_v27 = vld [vmem:[#allocation5 + $0x1158] sm:$0xff] }
 0x179   :  { %5637 = vmatprep.subr.bf16.mxu1 %v5636_v34  ;;  %v481_v34 = vld [vmem:[#allocation5 + $0xc50] sm:$0xff]  ;;  %v5544_v17 = vpack.c.bf16 %v624_v12, %v608_v10  ;;  %v623_v19 = vld [vmem:[#allocation5 + $0x10c0] sm:$0xff]  ;;  %v768_v12 = vld [vmem:[#allocation5 + $0x1548] sm:$0xff] }
 0x17a   :  { %v753_v10 = vld [vmem:[#allocation5 + $0x14d0] sm:$0xff] }
 0x17b   :  { %5511 = vmatpush1.bf16.msra.mxu0 %v5510_v40  ;;  %v530_v40 = vld [vmem:[#allocation5 + $0xdd8] sm:$0xff] }
 0x17c   :  { %5639 = vmatpush1.bf16.msra.mxu1 %v5638_v41  ;;  %5513 = vmatprep.subr.bf16.mxu0 %v5512_v42  ;;  %v5530_v41 = vpack.c.bf16 %v495_v33, %v479_v31  ;;  %v5658_v42 = vpack.c.bf16 %v497_v36, %v481_v34  ;;  %v5660_v47 = vpack.c.bf16 %v530_v40, %v514_v39  ;;  %v639_v33 = vld [vmem:[#allocation5 + $0x1140] sm:$0xff]  ;;  %v688_v39 = vld [vmem:[#allocation5 + $0x12c8] sm:$0xff]  ;;  %v674_v40 = vld [vmem:[#allocation5 + $0x1258] sm:$0xff] }
 0x17d   :  { %5641 = vmatprep.subr.bf16.mxu1 %v5640_v46  ;;  %v513_v46 = vld [vmem:[#allocation5 + $0xd50] sm:$0xff]  ;;  %v5548_v31 = vpack.c.bf16 %v656_v22, %v640_v24  ;;  %v655_v34 = vld [vmem:[#allocation5 + $0x11c0] sm:$0xff]  ;;  %v800_v22 = vld [vmem:[#allocation5 + $0x1648] sm:$0xff] }
 0x17e   :  { %v785_v24 = vld [vmem:[#allocation5 + $0x15d0] sm:$0xff] }
 0x17f   :  { %5515 = vmatpush1.bf16.msra.mxu0 %v5514_v52  ;;  %v562_v52 = vld [vmem:[#allocation5 + $0xed8] sm:$0xff] }
 0x180   :  { %5643 = vmatpush1.bf16.msra.mxu1 %v5642_v53  ;;  %5517 = vmatprep.subr.bf16.mxu0 %v5516_v54  ;;  %v5534_v53 = vpack.c.bf16 %v527_v45, %v511_v44  ;;  %v5662_v54 = vpack.c.bf16 %v529_v48, %v513_v46  ;;  %v5664_v59 = vpack.c.bf16 %v562_v52, %v546_v51  ;;  %v671_v45 = vld [vmem:[#allocation5 + $0x1240] sm:$0xff]  ;;  %v720_v51 = vld [vmem:[#allocation5 + $0x13c8] sm:$0xff]  ;;  %v706_v52 = vld [vmem:[#allocation5 + $0x1358] sm:$0xff] }
 0x181   :  { %5645 = vmatprep.subr.bf16.mxu1 %v5644_v58  ;;  %v545_v58 = vld [vmem:[#allocation5 + $0xe50] sm:$0xff]  ;;  %v5552_v44 = vpack.c.bf16 %v688_v39, %v672_v38  ;;  %v687_v46 = vld [vmem:[#allocation5 + $0x12c0] sm:$0xff] }
 0x182   :  { %v817_v39 = vld [vmem:[#allocation5 + $0x16d0] sm:$0xff] }
 0x183   :  { %5519 = vmatpush1.bf16.msra.mxu0 %v5518_v1  ;;  %v594_v1 = vld [vmem:[#allocation5 + $0xfd8] sm:$0xff] }
 0x184   :  { %5647 = vmatpush1.bf16.msra.mxu1 %v5646_v2  ;;  %5521 = vmatprep.subr.bf16.mxu0 %v5520_v3  ;;  %v5538_v2 = vpack.c.bf16 %v559_v57, %v543_v56  ;;  %v5666_v3 = vpack.c.bf16 %v561_v60, %v545_v58  ;;  %v5668_v8 = vpack.c.bf16 %v594_v1, %v578_v0  ;;  %v703_v57 = vld [vmem:[#allocation5 + $0x1340] sm:$0xff]  ;;  %v752_v0 = vld [vmem:[#allocation5 + $0x14c8] sm:$0xff]  ;;  %v738_v1 = vld [vmem:[#allocation5 + $0x1458] sm:$0xff] }
 0x185   :  { %5649 = vmatprep.subr.bf16.mxu1 %v5648_v7  ;;  %v577_v7 = vld [vmem:[#allocation5 + $0xf50] sm:$0xff]  ;;  %v5556_v56 = vpack.c.bf16 %v720_v51, %v704_v50  ;;  %v719_v58 = vld [vmem:[#allocation5 + $0x13c0] sm:$0xff] }
 0x186   :  { %v831_v50 = vld [vmem:[#allocation5 + $0x1740] sm:$0xff] }
 0x187   :  { %5523 = vmatpush1.bf16.msra.mxu0 %v5522_v14  ;;  %v626_v14 = vld [vmem:[#allocation5 + $0x10d8] sm:$0xff]  ;;  %v847_v51 = vld [vmem:[#allocation5 + $0x17c0] sm:$0xff] }
 0x188   :  { %5651 = vmatpush1.bf16.msra.mxu1 %v5650_v15  ;;  %5525 = vmatprep.subr.bf16.mxu0 %v5524_v16  ;;  %v5542_v15 = vpack.c.bf16 %v591_v6, %v575_v5  ;;  %v5670_v16 = vpack.c.bf16 %v593_v9, %v577_v7  ;;  %v5672_v21 = vpack.c.bf16 %v626_v14, %v610_v13  ;;  %v735_v6 = vld [vmem:[#allocation5 + $0x1440] sm:$0xff]  ;;  %v784_v13 = vld [vmem:[#allocation5 + $0x15c8] sm:$0xff]  ;;  %v770_v14 = vld [vmem:[#allocation5 + $0x1558] sm:$0xff] }
 0x189   :  { %5653 = vmatprep.subr.bf16.mxu1 %v5652_v20  ;;  %v609_v20 = vld [vmem:[#allocation5 + $0x1050] sm:$0xff]  ;;  %v5560_v5 = vpack.c.bf16 %v752_v0, %v736_v63  ;;  %v751_v7 = vld [vmem:[#allocation5 + $0x14c0] sm:$0xff] }
 0x18a   :  { %v863_v63 = vld [vmem:[#allocation5 + $0x1840] sm:$0xff] }
 0x18b   :  { %5527 = vmatpush1.bf16.msra.mxu0 %v5526_v28  ;;  %v658_v28 = vld [vmem:[#allocation5 + $0x11d8] sm:$0xff]  ;;  %v879_v0 = vld [vmem:[#allocation5 + $0x18c0] sm:$0xff] }
 0x18c   :  { %5655 = vmatpush1.bf16.msra.mxu1 %v5654_v29  ;;  %5529 = vmatprep.subr.bf16.mxu0 %v5528_v30  ;;  %v5546_v29 = vpack.c.bf16 %v623_v19, %v607_v18  ;;  %v5674_v30 = vpack.c.bf16 %v625_v23, %v609_v20  ;;  %v5676_v36 = vpack.c.bf16 %v658_v28, %v642_v27  ;;  %v767_v19 = vld [vmem:[#allocation5 + $0x1540] sm:$0xff]  ;;  %v816_v27 = vld [vmem:[#allocation5 + $0x16c8] sm:$0xff]  ;;  %v802_v28 = vld [vmem:[#allocation5 + $0x1658] sm:$0xff] }
 0x18d   :  { %5657 = vmatprep.subr.bf16.mxu1 %v5656_v35  ;;  %v641_v35 = vld [vmem:[#allocation5 + $0x1150] sm:$0xff]  ;;  %v5564_v18 = vpack.c.bf16 %v784_v13, %v768_v12  ;;  %v783_v20 = vld [vmem:[#allocation5 + $0x15c0] sm:$0xff] }
 0x18e   :  { %v895_v12 = vld [vmem:[#allocation5 + $0x1940] sm:$0xff] }
 0x18f   :  { %5531 = vmatpush1.bf16.msra.mxu0 %v5530_v41  ;;  %v690_v41 = vld [vmem:[#allocation5 + $0x12d8] sm:$0xff]  ;;  %v911_v13 = vld [vmem:[#allocation5 + $0x19c0] sm:$0xff] }
 0x190   :  { %5659 = vmatpush1.bf16.msra.mxu1 %v5658_v42  ;;  %5533 = vmatprep.subr.bf16.mxu0 %v5532_v43  ;;  %v5550_v42 = vpack.c.bf16 %v655_v34, %v639_v33  ;;  %v5678_v43 = vpack.c.bf16 %v657_v37, %v641_v35  ;;  %v5680_v48 = vpack.c.bf16 %v690_v41, %v674_v40  ;;  %v799_v34 = vld [vmem:[#allocation5 + $0x1640] sm:$0xff]  ;;  %v832_v40 = vld [vmem:[#allocation5 + $0x1748] sm:$0xff] }
 0x191   :  { %5661 = vmatprep.subr.bf16.mxu1 %v5660_v47  ;;  %v673_v47 = vld [vmem:[#allocation5 + $0x1250] sm:$0xff]  ;;  %v5568_v33 = vpack.c.bf16 %v816_v27, %v800_v22  ;;  %v815_v35 = vld [vmem:[#allocation5 + $0x16c0] sm:$0xff]  ;;  %v848_v41 = vld [vmem:[#allocation5 + $0x17c8] sm:$0xff] }
 0x192   :  { %v927_v22 = vld [vmem:[#allocation5 + $0x1a40] sm:$0xff] }
 0x193   :  { %5535 = vmatpush1.bf16.msra.mxu0 %v5534_v53  ;;  %v722_v53 = vld [vmem:[#allocation5 + $0x13d8] sm:$0xff]  ;;  %v943_v27 = vld [vmem:[#allocation5 + $0x1ac0] sm:$0xff] }
 0x194   :  { %5663 = vmatpush1.bf16.msra.mxu1 %v5662_v54  ;;  %5537 = vmatprep.subr.bf16.mxu0 %v5536_v55  ;;  %v5554_v54 = vpack.c.bf16 %v687_v46, %v671_v45  ;;  %v5682_v55 = vpack.c.bf16 %v689_v49, %v673_v47  ;;  %v5684_v60 = vpack.c.bf16 %v722_v53, %v706_v52  ;;  %v850_v45 = vld [vmem:[#allocation5 + $0x17d8] sm:$0xff]  ;;  %v833_v52 = vld [vmem:[#allocation5 + $0x1750] sm:$0xff] }
 0x195   :  { %5665 = vmatprep.subr.bf16.mxu1 %v5664_v59  ;;  %v705_v59 = vld [vmem:[#allocation5 + $0x1350] sm:$0xff]  ;;  %v5570_v47 = vpack.c.bf16 %v815_v35, %v799_v34  ;;  %v5572_v49 = vpack.c.bf16 %v848_v41, %v832_v40  ;;  %v962_v34 = vld [vmem:[#allocation5 + $0x1b58] sm:$0xff]  ;;  %v959_v40 = vld [vmem:[#allocation5 + $0x1b40] sm:$0xff] }
 0x196   :  { %v978_v35 = vld [vmem:[#allocation5 + $0x1bd8] sm:$0xff]  ;;  %v975_v41 = vld [vmem:[#allocation5 + $0x1bc0] sm:$0xff] }
 0x197   :  { %5539 = vmatpush1.bf16.msra.mxu0 %v5538_v2  ;;  %v754_v2 = vld [vmem:[#allocation5 + $0x14d8] sm:$0xff] }
 0x198   :  { %5667 = vmatpush1.bf16.msra.mxu1 %v5666_v3  ;;  %5541 = vmatprep.subr.bf16.mxu0 %v5540_v4  ;;  %v5558_v3 = vpack.c.bf16 %v719_v58, %v703_v57  ;;  %v5686_v4 = vpack.c.bf16 %v721_v62, %v705_v59  ;;  %v5688_v9 = vpack.c.bf16 %v754_v2, %v738_v1  ;;  %v866_v57 = vld [vmem:[#allocation5 + $0x1858] sm:$0xff]  ;;  %v865_v1 = vld [vmem:[#allocation5 + $0x1850] sm:$0xff] }
 0x199   :  { %5669 = vmatprep.subr.bf16.mxu1 %v5668_v8  ;;  %v737_v8 = vld [vmem:[#allocation5 + $0x1450] sm:$0xff]  ;;  %v882_v58 = vld [vmem:[#allocation5 + $0x18d8] sm:$0xff]  ;;  %v5574_v59 = vpack.c.bf16 %v847_v51, %v831_v50 }
 0x19a   :  { %v5704_v2 = vpack.c.bf16 %v882_v58, %v866_v57  ;;  %v994_v50 = vld [vmem:[#allocation5 + $0x1c58] sm:$0xff]  ;;  %v993_v57 = vld [vmem:[#allocation5 + $0x1c50] sm:$0xff] }
 0x19b   :  { %5543 = vmatpush1.bf16.msra.mxu0 %v5542_v15  ;;  %v786_v15 = vld [vmem:[#allocation5 + $0x15d8] sm:$0xff] }
 0x19c   :  { %5671 = vmatpush1.bf16.msra.mxu1 %v5670_v16  ;;  %5545 = vmatprep.subr.bf16.mxu0 %v5544_v17  ;;  %v5562_v16 = vpack.c.bf16 %v751_v7, %v735_v6  ;;  %v5690_v17 = vpack.c.bf16 %v753_v10, %v737_v8  ;;  %v5692_v23 = vpack.c.bf16 %v786_v15, %v770_v14  ;;  %v898_v6 = vld [vmem:[#allocation5 + $0x1958] sm:$0xff]  ;;  %v897_v14 = vld [vmem:[#allocation5 + $0x1950] sm:$0xff] }
 0x19d   :  { %5673 = vmatprep.subr.bf16.mxu1 %v5672_v21  ;;  %v769_v21 = vld [vmem:[#allocation5 + $0x1550] sm:$0xff]  ;;  %v914_v7 = vld [vmem:[#allocation5 + $0x19d8] sm:$0xff]  ;;  %v5578_v8 = vpack.c.bf16 %v879_v0, %v863_v63 }
 0x19e   :  { %1850 = vmatmul.mubr.f32.vlgmr.msra.gmra.mrb[4].mxu0 %v7455_v25  ;;  %v5708_v15 = vpack.c.bf16 %v914_v7, %v898_v6  ;;  %v1010_v51 = vld [vmem:[#allocation5 + $0x1cd8] sm:$0xff]  ;;  %v1025_v6 = vld [vmem:[#allocation5 + $0x1d50] sm:$0xff] }
 0x19f   :  { %5547 = vmatpush1.bf16.msra.mxu0 %v5546_v29  ;;  %1992 = vmatmul.mubr.f32.vlgmr.msra.gmra.mrb[4].mxu1 %v7455_v25  ;;  %v818_v29 = vld [vmem:[#allocation5 + $0x16d8] sm:$0xff]  ;;  %v5720_v58 = vpack.c.bf16 %v1010_v51, %v994_v50  ;;  %v101_v50 = vld [vmem:[#allocation5 + $0x70] sm:$0xff] }
 0x1a0   :  { %5675 = vmatpush1.bf16.msra.mxu1 %v5674_v30  ;;  %5549 = vmatprep.subr.bf16.mxu0 %v5548_v31  ;;  %v5566_v30 = vpack.c.bf16 %v783_v20, %v767_v19  ;;  %v5694_v31 = vpack.c.bf16 %v785_v24, %v769_v21  ;;  %v5696_v38 = vpack.c.bf16 %v818_v29, %v802_v28  ;;  %v930_v19 = vld [vmem:[#allocation5 + $0x1a58] sm:$0xff]  ;;  %v929_v28 = vld [vmem:[#allocation5 + $0x1a50] sm:$0xff] }
 0x1a1   :  { %5677 = vmatprep.subr.bf16.mxu1 %v5676_v36  ;;  %1920 = vmatprep.mubr.f32.mxu0 %v7470_v11  ;;  %v801_v36 = vld [vmem:[#allocation5 + $0x1650] sm:$0xff]  ;;  %v946_v20 = vld [vmem:[#allocation5 + $0x1ad8] sm:$0xff]  ;;  %v5582_v21 = vpack.c.bf16 %v911_v13, %v895_v12 }
 0x1a2   :  { %2062 = vmatprep.mubr.f32.mxu1 %v7470_v11  ;;  %v5712_v29 = vpack.c.bf16 %v946_v20, %v930_v19  ;;  %v1026_v63 = vld [vmem:[#allocation5 + $0x1d58] sm:$0xff]  ;;  %v1057_v19 = vld [vmem:[#allocation5 + $0x1e50] sm:$0xff] }
 0x1a3   :  { %5551 = vmatpush1.bf16.msra.mxu0 %v5550_v42  ;;  %v1042_v0 = vld [vmem:[#allocation5 + $0x1dd8] sm:$0xff] }
 0x1a4   :  { %5679 = vmatpush1.bf16.msra.mxu1 %v5678_v43  ;;  %5553 = vmatprep.subr.bf16.mxu0 %v5552_v44  ;;  %v834_v44 = vld [vmem:[#allocation5 + $0x1758] sm:$0xff]  ;;  %v5724_v7 = vpack.c.bf16 %v1042_v0, %v1026_v63  ;;  %v133_v63 = vld [vmem:[#allocation5 + $0x170] sm:$0xff] }
 0x1a5   :  { %5681 = vmatprep.subr.bf16.mxu1 %v5680_v48  ;;  %v5698_v48 = vpack.c.bf16 %v817_v39, %v801_v36  ;;  %v5700_v53 = vpack.c.bf16 %v850_v45, %v834_v44  ;;  %v5586_v36 = vpack.c.bf16 %v943_v27, %v927_v22  ;;  %v961_v44 = vld [vmem:[#allocation5 + $0x1b50] sm:$0xff]  ;;  %v5716_v45 = vpack.c.bf16 %v978_v35, %v962_v34  ;;  %v1058_v12 = vld [vmem:[#allocation5 + $0x1e58] sm:$0xff] }
 0x1a6   :  { %v1074_v13 = vld [vmem:[#allocation5 + $0x1ed8] sm:$0xff]  ;;  %v1089_v34 = vld [vmem:[#allocation5 + $0x1f50] sm:$0xff] }
 0x1a7   :  { %5555 = vmatpush1.bf16.msra.mxu0 %v5554_v54  ;;  %v849_v54 = vld [vmem:[#allocation5 + $0x17d0] sm:$0xff]  ;;  %v5728_v20 = vpack.c.bf16 %v1074_v13, %v1058_v12  ;;  %v1090_v22 = vld [vmem:[#allocation5 + $0x1f58] sm:$0xff] }
 0x1a8   :  { %5683 = vmatpush1.bf16.msra.mxu1 %v5682_v55  ;;  %5557 = vmatprep.subr.bf16.mxu0 %v5556_v56  ;;  %v864_v55 = vld [vmem:[#allocation5 + $0x1848] sm:$0xff]  ;;  %v1106_v27 = vld [vmem:[#allocation5 + $0x1fd8] sm:$0xff]  ;;  %v165_v12 = vld [vmem:[#allocation5 + $0x270] sm:$0xff] }
 0x1a9   :  { %5685 = vmatprep.subr.bf16.mxu1 %v5684_v60  ;;  %v880_v56 = vld [vmem:[#allocation5 + $0x18c8] sm:$0xff]  ;;  %v5702_v60 = vpack.c.bf16 %v849_v54, %v833_v52  ;;  %v5590_v52 = vpack.c.bf16 %v975_v41, %v959_v40  ;;  %v5732_v35 = vpack.c.bf16 %v1106_v27, %v1090_v22  ;;  %v102_v40 = vld [vmem:[#allocation5 + $0x78] sm:$0xff]  ;;  %v197_v22 = vld [vmem:[#allocation5 + $0x370] sm:$0xff] }
 0x1aa   :  { %v5576_v62 = vpack.c.bf16 %v880_v56, %v864_v55  ;;  %v991_v55 = vld [vmem:[#allocation5 + $0x1c40] sm:$0xff]  ;;  %v118_v41 = vld [vmem:[#allocation5 + $0xf8] sm:$0xff] }
 0x1ab   :  { %5559 = vmatpush1.bf16.msra.mxu0 %v5558_v3  ;;  %v881_v3 = vld [vmem:[#allocation5 + $0x18d0] sm:$0xff]  ;;  %v1007_v56 = vld [vmem:[#allocation5 + $0x1cc0] sm:$0xff]  ;;  %v5864_v51 = vpack.c.bf16 %v118_v41, %v102_v40 }
 0x1ac   :  { %5687 = vmatpush1.bf16.msra.mxu1 %v5686_v4  ;;  %5561 = vmatprep.subr.bf16.mxu0 %v5560_v5  ;;  %v896_v4 = vld [vmem:[#allocation5 + $0x1948] sm:$0xff]  ;;  %v245_v41 = vld [vmem:[#allocation5 + $0x4f0] sm:$0xff] }
 0x1ad   :  { %5689 = vmatprep.subr.bf16.mxu1 %v5688_v9  ;;  %v912_v5 = vld [vmem:[#allocation5 + $0x19c8] sm:$0xff]  ;;  %v5706_v9 = vpack.c.bf16 %v881_v3, %v865_v1  ;;  %v5594_v1 = vpack.c.bf16 %v1007_v56, %v991_v55  ;;  %v134_v55 = vld [vmem:[#allocation5 + $0x178] sm:$0xff] }
 0x1ae   :  { %v5580_v10 = vpack.c.bf16 %v912_v5, %v896_v4  ;;  %v1023_v4 = vld [vmem:[#allocation5 + $0x1d40] sm:$0xff]  ;;  %v150_v56 = vld [vmem:[#allocation5 + $0x1f8] sm:$0xff] }
 0x1af   :  { %5563 = vmatpush1.bf16.msra.mxu0 %v5562_v16  ;;  %v913_v16 = vld [vmem:[#allocation5 + $0x19d0] sm:$0xff]  ;;  %v1039_v5 = vld [vmem:[#allocation5 + $0x1dc0] sm:$0xff]  ;;  %v5868_v0 = vpack.c.bf16 %v150_v56, %v134_v55 }
 0x1b0   :  { %5691 = vmatpush1.bf16.msra.mxu1 %v5690_v17  ;;  %5565 = vmatprep.subr.bf16.mxu0 %v5564_v18  ;;  %v928_v17 = vld [vmem:[#allocation5 + $0x1a48] sm:$0xff]  ;;  %v277_v56 = vld [vmem:[#allocation5 + $0x5f0] sm:$0xff] }
 0x1b1   :  { %v7492_v37 = vpop.f32.mrb[0].mxu0  ;;  %5693 = vmatprep.subr.bf16.mxu1 %v5692_v23  ;;  %v944_v18 = vld [vmem:[#allocation5 + $0x1ac8] sm:$0xff]  ;;  %v5710_v23 = vpack.c.bf16 %v913_v16, %v897_v14  ;;  %v5598_v14 = vpack.c.bf16 %v1039_v5, %v1023_v4  ;;  %v166_v4 = vld [vmem:[#allocation5 + $0x278] sm:$0xff] }
 0x1b2   :  { %v7494_v42 = vpop.f32.mrb[0].mxu1  ;;  %v7496_v43 = vpop.f32.mrb[1].mxu0  ;;  %v5584_v24 = vpack.c.bf16 %v944_v18, %v928_v17  ;;  %v1055_v17 = vld [vmem:[#allocation5 + $0x1e40] sm:$0xff]  ;;  %v182_v5 = vld [vmem:[#allocation5 + $0x2f8] sm:$0xff] }
 0x1b3   :  { %v7498_v46 = vpop.f32.mrb[1].mxu1  ;;  %5567 = vmatpush1.bf16.msra.mxu0 %v5566_v30  ;;  %v945_v30 = vld [vmem:[#allocation5 + $0x1ad0] sm:$0xff]  ;;  %v1071_v18 = vld [vmem:[#allocation5 + $0x1ec0] sm:$0xff]  ;;  %v5872_v13 = vpack.c.bf16 %v182_v5, %v166_v4 }
 0x1b4   :  { %5695 = vmatpush1.bf16.msra.mxu1 %v5694_v31  ;;  %5569 = vmatprep.subr.bf16.mxu0 %v5568_v33  ;;  %v960_v31 = vld [vmem:[#allocation5 + $0x1b48] sm:$0xff]  ;;  %v309_v5 = vld [vmem:[#allocation5 + $0x6f0] sm:$0xff] }
 0x1b5   :  { %5697 = vmatprep.subr.bf16.mxu1 %v5696_v38  ;;  %v976_v33 = vld [vmem:[#allocation5 + $0x1bc8] sm:$0xff]  ;;  %v5714_v38 = vpack.c.bf16 %v945_v30, %v929_v28  ;;  %v5602_v28 = vpack.c.bf16 %v1071_v18, %v1055_v17  ;;  %v198_v17 = vld [vmem:[#allocation5 + $0x378] sm:$0xff] }
 0x1b6   :  { %v5588_v39 = vpack.c.bf16 %v976_v33, %v960_v31  ;;  %v1087_v31 = vld [vmem:[#allocation5 + $0x1f40] sm:$0xff]  ;;  %v214_v18 = vld [vmem:[#allocation5 + $0x3f8] sm:$0xff] }
 0x1b7   :  { %5571 = vmatpush1.bf16.msra.mxu0 %v5570_v47  ;;  %v977_v47 = vld [vmem:[#allocation5 + $0x1bd0] sm:$0xff]  ;;  %v1103_v33 = vld [vmem:[#allocation5 + $0x1fc0] sm:$0xff]  ;;  %v5876_v27 = vpack.c.bf16 %v214_v18, %v198_v17 }
 0x1b8   :  { %5699 = vmatpush1.bf16.msra.mxu1 %v5698_v48  ;;  %5573 = vmatprep.subr.bf16.mxu0 %v5572_v49  ;;  %v992_v48 = vld [vmem:[#allocation5 + $0x1c48] sm:$0xff]  ;;  %v341_v18 = vld [vmem:[#allocation5 + $0x7f0] sm:$0xff] }
 0x1b9   :  { %5701 = vmatprep.subr.bf16.mxu1 %v5700_v53  ;;  %v1008_v49 = vld [vmem:[#allocation5 + $0x1cc8] sm:$0xff]  ;;  %v5718_v53 = vpack.c.bf16 %v977_v47, %v961_v44  ;;  %v5606_v44 = vpack.c.bf16 %v1103_v33, %v1087_v31  ;;  %v230_v31 = vld [vmem:[#allocation5 + $0x478] sm:$0xff] }
 0x1ba   :  { %v5592_v54 = vpack.c.bf16 %v1008_v49, %v992_v48  ;;  %v99_v48 = vld [vmem:[#allocation5 + $0x60] sm:$0xff]  ;;  %v246_v33 = vld [vmem:[#allocation5 + $0x4f8] sm:$0xff] }
 0x1bb   :  { %5575 = vmatpush1.bf16.msra.mxu0 %v5574_v59  ;;  %v1009_v59 = vld [vmem:[#allocation5 + $0x1cd0] sm:$0xff]  ;;  %v115_v49 = vld [vmem:[#allocation5 + $0xe0] sm:$0xff]  ;;  %v5880_v40 = vpack.c.bf16 %v246_v33, %v230_v31 }
 0x1bc   :  { %5703 = vmatpush1.bf16.msra.mxu1 %v5702_v60  ;;  %5577 = vmatprep.subr.bf16.mxu0 %v5576_v62  ;;  %v1024_v60 = vld [vmem:[#allocation5 + $0x1d48] sm:$0xff]  ;;  %v373_v33 = vld [vmem:[#allocation5 + $0x8f0] sm:$0xff] }
 0x1bd   :  { %5705 = vmatprep.subr.bf16.mxu1 %v5704_v2  ;;  %v1040_v62 = vld [vmem:[#allocation5 + $0x1dc8] sm:$0xff]  ;;  %v5722_v2 = vpack.c.bf16 %v1009_v59, %v993_v57  ;;  %v5738_v57 = vpack.c.bf16 %v115_v49, %v99_v48  ;;  %v278_v48 = vld [vmem:[#allocation5 + $0x5f8] sm:$0xff] }
 0x1be   :  { %v5596_v3 = vpack.c.bf16 %v1040_v62, %v1024_v60  ;;  %v131_v60 = vld [vmem:[#allocation5 + $0x160] sm:$0xff] }
 0x1bf   :  { %5579 = vmatpush1.bf16.msra.mxu0 %v5578_v8  ;;  %v1041_v8 = vld [vmem:[#allocation5 + $0x1dd0] sm:$0xff]  ;;  %v147_v62 = vld [vmem:[#allocation5 + $0x1e0] sm:$0xff] }
 0x1c0   :  { %5707 = vmatpush1.bf16.msra.mxu1 %v5706_v9  ;;  %5581 = vmatprep.subr.bf16.mxu0 %v5580_v10  ;;  %v1056_v9 = vld [vmem:[#allocation5 + $0x1e48] sm:$0xff] }
 0x1c1   :  { %5709 = vmatprep.subr.bf16.mxu1 %v5708_v15  ;;  %v1072_v10 = vld [vmem:[#allocation5 + $0x1ec8] sm:$0xff]  ;;  %v5726_v15 = vpack.c.bf16 %v1041_v8, %v1025_v6  ;;  %v5742_v6 = vpack.c.bf16 %v147_v62, %v131_v60  ;;  %v310_v60 = vld [vmem:[#allocation5 + $0x6f8] sm:$0xff] }
 0x1c2   :  { %v5600_v16 = vpack.c.bf16 %v1072_v10, %v1056_v9  ;;  %v163_v9 = vld [vmem:[#allocation5 + $0x260] sm:$0xff] }
 0x1c3   :  { %5583 = vmatpush1.bf16.msra.mxu0 %v5582_v21  ;;  %v1073_v21 = vld [vmem:[#allocation5 + $0x1ed0] sm:$0xff]  ;;  %v179_v10 = vld [vmem:[#allocation5 + $0x2e0] sm:$0xff] }
 0x1c4   :  { %5711 = vmatpush1.bf16.msra.mxu1 %v5710_v23  ;;  %5585 = vmatprep.subr.bf16.mxu0 %v5584_v24  ;;  %v1088_v23 = vld [vmem:[#allocation5 + $0x1f48] sm:$0xff] }
 0x1c5   :  { %5713 = vmatprep.subr.bf16.mxu1 %v5712_v29  ;;  %v1104_v24 = vld [vmem:[#allocation5 + $0x1fc8] sm:$0xff]  ;;  %v5730_v29 = vpack.c.bf16 %v1073_v21, %v1057_v19  ;;  %v5746_v19 = vpack.c.bf16 %v179_v10, %v163_v9  ;;  %v342_v9 = vld [vmem:[#allocation5 + $0x7f8] sm:$0xff] }
 0x1c6   :  { %v5604_v30 = vpack.c.bf16 %v1104_v24, %v1088_v23  ;;  %v195_v23 = vld [vmem:[#allocation5 + $0x360] sm:$0xff] }
 0x1c7   :  { %5587 = vmatpush1.bf16.msra.mxu0 %v5586_v36  ;;  %v1105_v36 = vld [vmem:[#allocation5 + $0x1fd0] sm:$0xff]  ;;  %v211_v24 = vld [vmem:[#allocation5 + $0x3e0] sm:$0xff] }
 0x1c8   :  { %5715 = vmatpush1.bf16.msra.mxu1 %v5714_v38  ;;  %5589 = vmatprep.subr.bf16.mxu0 %v5588_v39  ;;  %v100_v38 = vld [vmem:[#allocation5 + $0x68] sm:$0xff] }
 0x1c9   :  { %5717 = vmatprep.subr.bf16.mxu1 %v5716_v45  ;;  %v116_v39 = vld [vmem:[#allocation5 + $0xe8] sm:$0xff]  ;;  %v5734_v45 = vpack.c.bf16 %v1105_v36, %v1089_v34  ;;  %v5750_v34 = vpack.c.bf16 %v211_v24, %v195_v23  ;;  %v227_v36 = vld [vmem:[#allocation5 + $0x460] sm:$0xff]  ;;  %v374_v23 = vld [vmem:[#allocation5 + $0x8f8] sm:$0xff] }
 0x1ca   :  { %v5736_v47 = vpack.c.bf16 %v116_v39, %v100_v38  ;;  %v243_v38 = vld [vmem:[#allocation5 + $0x4e0] sm:$0xff]  ;;  %v229_v39 = vld [vmem:[#allocation5 + $0x470] sm:$0xff] }
 0x1cb   :  { %5591 = vmatpush1.bf16.msra.mxu0 %v5590_v52  ;;  %v117_v52 = vld [vmem:[#allocation5 + $0xf0] sm:$0xff]  ;;  %v5754_v49 = vpack.c.bf16 %v243_v38, %v227_v36  ;;  %v406_v36 = vld [vmem:[#allocation5 + $0x9f8] sm:$0xff] }
 0x1cc   :  { %5719 = vmatpush1.bf16.msra.mxu1 %v5718_v53  ;;  %5593 = vmatprep.subr.bf16.mxu0 %v5592_v54  ;;  %v132_v53 = vld [vmem:[#allocation5 + $0x168] sm:$0xff] }
 0x1cd   :  { %5721 = vmatprep.subr.bf16.mxu1 %v5720_v58  ;;  %v148_v54 = vld [vmem:[#allocation5 + $0x1e8] sm:$0xff]  ;;  %v5866_v58 = vpack.c.bf16 %v117_v52, %v101_v50  ;;  %v5882_v50 = vpack.c.bf16 %v245_v41, %v229_v39  ;;  %v259_v52 = vld [vmem:[#allocation5 + $0x560] sm:$0xff] }
 0x1ce   :  { %v5740_v59 = vpack.c.bf16 %v148_v54, %v132_v53  ;;  %v275_v53 = vld [vmem:[#allocation5 + $0x5e0] sm:$0xff]  ;;  %v261_v54 = vld [vmem:[#allocation5 + $0x570] sm:$0xff] }
 0x1cf   :  { %5595 = vmatpush1.bf16.msra.mxu0 %v5594_v1  ;;  %v149_v1 = vld [vmem:[#allocation5 + $0x1f0] sm:$0xff]  ;;  %v5758_v62 = vpack.c.bf16 %v275_v53, %v259_v52  ;;  %v387_v41 = vld [vmem:[#allocation5 + $0x960] sm:$0xff]  ;;  %v438_v52 = vld [vmem:[#allocation5 + $0xaf8] sm:$0xff] }
 0x1d0   :  { %5723 = vmatpush1.bf16.msra.mxu1 %v5722_v2  ;;  %5597 = vmatprep.subr.bf16.mxu0 %v5596_v3  ;;  %v164_v2 = vld [vmem:[#allocation5 + $0x268] sm:$0xff] }
 0x1d1   :  { %5725 = vmatprep.subr.bf16.mxu1 %v5724_v7  ;;  %v180_v3 = vld [vmem:[#allocation5 + $0x2e8] sm:$0xff]  ;;  %v5870_v7 = vpack.c.bf16 %v149_v1, %v133_v63  ;;  %v5886_v63 = vpack.c.bf16 %v277_v56, %v261_v54  ;;  %v291_v1 = vld [vmem:[#allocation5 + $0x660] sm:$0xff] }
 0x1d2   :  { %v5744_v8 = vpack.c.bf16 %v180_v3, %v164_v2  ;;  %v307_v2 = vld [vmem:[#allocation5 + $0x6e0] sm:$0xff]  ;;  %v293_v3 = vld [vmem:[#allocation5 + $0x670] sm:$0xff] }
 0x1d3   :  { %5599 = vmatpush1.bf16.msra.mxu0 %v5598_v14  ;;  %v181_v14 = vld [vmem:[#allocation5 + $0x2f0] sm:$0xff]  ;;  %v5762_v10 = vpack.c.bf16 %v307_v2, %v291_v1  ;;  %v419_v56 = vld [vmem:[#allocation5 + $0xa60] sm:$0xff]  ;;  %v470_v1 = vld [vmem:[#allocation5 + $0xbf8] sm:$0xff] }
 0x1d4   :  { %5727 = vmatpush1.bf16.msra.mxu1 %v5726_v15  ;;  %5601 = vmatprep.subr.bf16.mxu0 %v5600_v16  ;;  %v196_v15 = vld [vmem:[#allocation5 + $0x368] sm:$0xff] }
 0x1d5   :  { %5729 = vmatprep.subr.bf16.mxu1 %v5728_v20  ;;  %v212_v16 = vld [vmem:[#allocation5 + $0x3e8] sm:$0xff]  ;;  %v5874_v20 = vpack.c.bf16 %v181_v14, %v165_v12  ;;  %v5890_v12 = vpack.c.bf16 %v309_v5, %v293_v3  ;;  %v323_v14 = vld [vmem:[#allocation5 + $0x760] sm:$0xff] }
 0x1d6   :  { %v5748_v21 = vpack.c.bf16 %v212_v16, %v196_v15  ;;  %v339_v15 = vld [vmem:[#allocation5 + $0x7e0] sm:$0xff]  ;;  %v325_v16 = vld [vmem:[#allocation5 + $0x770] sm:$0xff] }
 0x1d7   :  { %5603 = vmatpush1.bf16.msra.mxu0 %v5602_v28  ;;  %v213_v28 = vld [vmem:[#allocation5 + $0x3f0] sm:$0xff]  ;;  %v5766_v24 = vpack.c.bf16 %v339_v15, %v323_v14  ;;  %v451_v5 = vld [vmem:[#allocation5 + $0xb60] sm:$0xff]  ;;  %v502_v14 = vld [vmem:[#allocation5 + $0xcf8] sm:$0xff] }
 0x1d8   :  { %5731 = vmatpush1.bf16.msra.mxu1 %v5730_v29  ;;  %5605 = vmatprep.subr.bf16.mxu0 %v5604_v30  ;;  %v228_v29 = vld [vmem:[#allocation5 + $0x468] sm:$0xff] }
 0x1d9   :  { %5733 = vmatprep.subr.bf16.mxu1 %v5732_v35  ;;  %v244_v30 = vld [vmem:[#allocation5 + $0x4e8] sm:$0xff] }
 0x1da   :  { %v5752_v35 = vpack.c.bf16 %v244_v30, %v228_v29  ;;  %v371_v29 = vld [vmem:[#allocation5 + $0x8e0] sm:$0xff]  ;;  %v357_v30 = vld [vmem:[#allocation5 + $0x870] sm:$0xff] }
 0x1db   :  { %5607 = vmatpush1.bf16.msra.mxu0 %v5606_v44  ;;  %v260_v44 = vld [vmem:[#allocation5 + $0x568] sm:$0xff]  ;;  %v5898_v39 = vpack.c.bf16 %v373_v33, %v357_v30  ;;  %v515_v33 = vld [vmem:[#allocation5 + $0xd60] sm:$0xff] }
 0x1dc   :  { %5735 = vmatpush1.bf16.msra.mxu1 %v5734_v45  ;;  %5737 = vmatprep.subr.bf16.mxu0 %v5736_v47  ;;  %v276_v45 = vld [vmem:[#allocation5 + $0x5e8] sm:$0xff]  ;;  %v262_v47 = vld [vmem:[#allocation5 + $0x578] sm:$0xff] }
 0x1dd   :  { %5865 = vmatprep.subr.bf16.mxu1 %v5864_v51  ;;  %v5756_v51 = vpack.c.bf16 %v276_v45, %v260_v44  ;;  %v5884_v55 = vpack.c.bf16 %v278_v48, %v262_v47  ;;  %v403_v44 = vld [vmem:[#allocation5 + $0x9e0] sm:$0xff]  ;;  %v389_v45 = vld [vmem:[#allocation5 + $0x970] sm:$0xff] }
 0x1de   :  { %1921 = vmatmul.mubr.f32.vlgmr.msra.gmra.mrb[4].mxu0 %v7466_v26  ;;  %v405_v48 = vld [vmem:[#allocation5 + $0x9f0] sm:$0xff]  ;;  %v5774_v53 = vpack.c.bf16 %v403_v44, %v387_v41  ;;  %v566_v41 = vld [vmem:[#allocation5 + $0xef8] sm:$0xff] }
 0x1df   :  { %2063 = vmatmul.mubr.f32.vlgmr.msra.gmra.mrb[4].mxu1 %v7466_v26  ;;  %5739 = vmatpush1.bf16.msra.mxu0 %v5738_v57  ;;  %v292_v57 = vld [vmem:[#allocation5 + $0x668] sm:$0xff]  ;;  %v5902_v54 = vpack.c.bf16 %v405_v48, %v389_v45  ;;  %v547_v48 = vld [vmem:[#allocation5 + $0xe60] sm:$0xff] }
 0x1e0   :  { %5867 = vmatpush1.bf16.msra.mxu1 %v5866_v58  ;;  %5741 = vmatprep.subr.bf16.mxu0 %v5740_v59  ;;  %v308_v58 = vld [vmem:[#allocation5 + $0x6e8] sm:$0xff]  ;;  %v294_v59 = vld [vmem:[#allocation5 + $0x678] sm:$0xff] }
 0x1e1   :  { %5869 = vmatprep.subr.bf16.mxu1 %v5868_v0  ;;  %2133 = vmatprep.mubr.f32.mxu0 %v7459_v32  ;;  %v5760_v0 = vpack.c.bf16 %v308_v58, %v292_v57  ;;  %v5888_v4 = vpack.c.bf16 %v310_v60, %v294_v59  ;;  %v435_v57 = vld [vmem:[#allocation5 + $0xae0] sm:$0xff]  ;;  %v421_v58 = vld [vmem:[#allocation5 + $0xa70] sm:$0xff] }
 0x1e2   :  { %2275 = vmatprep.mubr.f32.mxu1 %v7459_v32  ;;  %v5878_v32 = vpack.c.bf16 %v213_v28, %v197_v22  ;;  %v5894_v22 = vpack.c.bf16 %v341_v18, %v325_v16  ;;  %v355_v28 = vld [vmem:[#allocation5 + $0x860] sm:$0xff]  ;;  %v437_v60 = vld [vmem:[#allocation5 + $0xaf0] sm:$0xff]  ;;  %v5778_v2 = vpack.c.bf16 %v435_v57, %v419_v56  ;;  %v598_v56 = vld [vmem:[#allocation5 + $0xff8] sm:$0xff] }
 0x1e3   :  { %5743 = vmatpush1.bf16.msra.mxu0 %v5742_v6  ;;  %v324_v6 = vld [vmem:[#allocation5 + $0x768] sm:$0xff]  ;;  %v5770_v38 = vpack.c.bf16 %v371_v29, %v355_v28  ;;  %v5906_v3 = vpack.c.bf16 %v437_v60, %v421_v58  ;;  %v483_v18 = vld [vmem:[#allocation5 + $0xc60] sm:$0xff]  ;;  %v534_v28 = vld [vmem:[#allocation5 + $0xdf8] sm:$0xff] }
 0x1e4   :  { %5871 = vmatpush1.bf16.msra.mxu1 %v5870_v7  ;;  %5745 = vmatprep.subr.bf16.mxu0 %v5744_v8  ;;  %v340_v7 = vld [vmem:[#allocation5 + $0x7e8] sm:$0xff]  ;;  %v326_v8 = vld [vmem:[#allocation5 + $0x778] sm:$0xff]  ;;  %v579_v60 = vld [vmem:[#allocation5 + $0xf60] sm:$0xff] }
 0x1e5   :  { %5873 = vmatprep.subr.bf16.mxu1 %v5872_v13  ;;  %v5764_v13 = vpack.c.bf16 %v340_v7, %v324_v6  ;;  %v5892_v17 = vpack.c.bf16 %v342_v9, %v326_v8  ;;  %v467_v6 = vld [vmem:[#allocation5 + $0xbe0] sm:$0xff]  ;;  %v453_v7 = vld [vmem:[#allocation5 + $0xb70] sm:$0xff] }
 0x1e6   :  { %v469_v9 = vld [vmem:[#allocation5 + $0xbf0] sm:$0xff]  ;;  %v5782_v15 = vpack.c.bf16 %v467_v6, %v451_v5  ;;  %v630_v5 = vld [vmem:[#allocation5 + $0x10f8] sm:$0xff] }
 0x1e7   :  { %5747 = vmatpush1.bf16.msra.mxu0 %v5746_v19  ;;  %v356_v19 = vld [vmem:[#allocation5 + $0x868] sm:$0xff]  ;;  %v5910_v16 = vpack.c.bf16 %v469_v9, %v453_v7  ;;  %v611_v9 = vld [vmem:[#allocation5 + $0x1060] sm:$0xff] }
 0x1e8   :  { %5875 = vmatpush1.bf16.msra.mxu1 %v5874_v20  ;;  %5749 = vmatprep.subr.bf16.mxu0 %v5748_v21  ;;  %v372_v20 = vld [vmem:[#allocation5 + $0x8e8] sm:$0xff]  ;;  %v358_v21 = vld [vmem:[#allocation5 + $0x878] sm:$0xff] }
 0x1e9   :  { %5877 = vmatprep.subr.bf16.mxu1 %v5876_v27  ;;  %v5768_v27 = vpack.c.bf16 %v372_v20, %v356_v19  ;;  %v5896_v31 = vpack.c.bf16 %v374_v23, %v358_v21  ;;  %v499_v19 = vld [vmem:[#allocation5 + $0xce0] sm:$0xff]  ;;  %v485_v20 = vld [vmem:[#allocation5 + $0xc70] sm:$0xff] }
 0x1ea   :  { %v501_v23 = vld [vmem:[#allocation5 + $0xcf0] sm:$0xff]  ;;  %v5786_v29 = vpack.c.bf16 %v499_v19, %v483_v18  ;;  %v662_v18 = vld [vmem:[#allocation5 + $0x11f8] sm:$0xff] }
 0x1eb   :  { %5751 = vmatpush1.bf16.msra.mxu0 %v5750_v34  ;;  %v388_v34 = vld [vmem:[#allocation5 + $0x968] sm:$0xff]  ;;  %v5914_v30 = vpack.c.bf16 %v501_v23, %v485_v20  ;;  %v643_v23 = vld [vmem:[#allocation5 + $0x1160] sm:$0xff] }
 0x1ec   :  { %5879 = vmatpush1.bf16.msra.mxu1 %v5878_v32  ;;  %5753 = vmatprep.subr.bf16.mxu0 %v5752_v35  ;;  %v404_v32 = vld [vmem:[#allocation5 + $0x9e8] sm:$0xff]  ;;  %v390_v35 = vld [vmem:[#allocation5 + $0x978] sm:$0xff] }
 0x1ed   :  { %5881 = vmatprep.subr.bf16.mxu1 %v5880_v40  ;;  %v5772_v40 = vpack.c.bf16 %v404_v32, %v388_v34  ;;  %v5900_v47 = vpack.c.bf16 %v406_v36, %v390_v35  ;;  %v531_v34 = vld [vmem:[#allocation5 + $0xde0] sm:$0xff]  ;;  %v517_v32 = vld [vmem:[#allocation5 + $0xd70] sm:$0xff] }
 0x1ee   :  { %v533_v36 = vld [vmem:[#allocation5 + $0xdf0] sm:$0xff]  ;;  %v5790_v44 = vpack.c.bf16 %v531_v34, %v515_v33  ;;  %v694_v33 = vld [vmem:[#allocation5 + $0x12f8] sm:$0xff] }
 0x1ef   :  { %5755 = vmatpush1.bf16.msra.mxu0 %v5754_v49  ;;  %v420_v49 = vld [vmem:[#allocation5 + $0xa68] sm:$0xff]  ;;  %v5918_v45 = vpack.c.bf16 %v533_v36, %v517_v32  ;;  %v675_v36 = vld [vmem:[#allocation5 + $0x1260] sm:$0xff] }
 0x1f0   :  { %5883 = vmatpush1.bf16.msra.mxu1 %v5882_v50  ;;  %5757 = vmatprep.subr.bf16.mxu0 %v5756_v51  ;;  %v436_v50 = vld [vmem:[#allocation5 + $0xae8] sm:$0xff]  ;;  %v422_v51 = vld [vmem:[#allocation5 + $0xa78] sm:$0xff] }
 0x1f1   :  { %5885 = vmatprep.subr.bf16.mxu1 %v5884_v55  ;;  %v5776_v55 = vpack.c.bf16 %v436_v50, %v420_v49  ;;  %v5904_v59 = vpack.c.bf16 %v438_v52, %v422_v51  ;;  %v563_v49 = vld [vmem:[#allocation5 + $0xee0] sm:$0xff]  ;;  %v549_v50 = vld [vmem:[#allocation5 + $0xe70] sm:$0xff] }
 0x1f2   :  { %v565_v52 = vld [vmem:[#allocation5 + $0xef0] sm:$0xff]  ;;  %v5794_v57 = vpack.c.bf16 %v563_v49, %v547_v48  ;;  %v726_v48 = vld [vmem:[#allocation5 + $0x13f8] sm:$0xff] }
 0x1f3   :  { %5759 = vmatpush1.bf16.msra.mxu0 %v5758_v62  ;;  %v452_v62 = vld [vmem:[#allocation5 + $0xb68] sm:$0xff]  ;;  %v5922_v58 = vpack.c.bf16 %v565_v52, %v549_v50  ;;  %v723_v52 = vld [vmem:[#allocation5 + $0x13e0] sm:$0xff] }
 0x1f4   :  { %5887 = vmatpush1.bf16.msra.mxu1 %v5886_v63  ;;  %5761 = vmatprep.subr.bf16.mxu0 %v5760_v0  ;;  %v468_v63 = vld [vmem:[#allocation5 + $0xbe8] sm:$0xff]  ;;  %v454_v0 = vld [vmem:[#allocation5 + $0xb78] sm:$0xff] }
 0x1f5   :  { %5889 = vmatprep.subr.bf16.mxu1 %v5888_v4  ;;  %v5780_v4 = vpack.c.bf16 %v468_v63, %v452_v62  ;;  %v5908_v8 = vpack.c.bf16 %v470_v1, %v454_v0  ;;  %v595_v62 = vld [vmem:[#allocation5 + $0xfe0] sm:$0xff]  ;;  %v581_v63 = vld [vmem:[#allocation5 + $0xf70] sm:$0xff] }
 0x1f6   :  { %v597_v1 = vld [vmem:[#allocation5 + $0xff0] sm:$0xff]  ;;  %v5798_v6 = vpack.c.bf16 %v595_v62, %v579_v60 }
 0x1f7   :  { %5763 = vmatpush1.bf16.msra.mxu0 %v5762_v10  ;;  %v484_v10 = vld [vmem:[#allocation5 + $0xc68] sm:$0xff]  ;;  %v5926_v7 = vpack.c.bf16 %v597_v1, %v581_v63  ;;  %v739_v63 = vld [vmem:[#allocation5 + $0x1460] sm:$0xff]  ;;  %v741_v1 = vld [vmem:[#allocation5 + $0x1470] sm:$0xff] }
 0x1f8   :  { %5891 = vmatpush1.bf16.msra.mxu1 %v5890_v12  ;;  %5765 = vmatprep.subr.bf16.mxu0 %v5764_v13  ;;  %v500_v12 = vld [vmem:[#allocation5 + $0xce8] sm:$0xff]  ;;  %v486_v13 = vld [vmem:[#allocation5 + $0xc78] sm:$0xff] }
 0x1f9   :  { %5893 = vmatprep.subr.bf16.mxu1 %v5892_v17  ;;  %v5784_v17 = vpack.c.bf16 %v500_v12, %v484_v10  ;;  %v5912_v21 = vpack.c.bf16 %v502_v14, %v486_v13  ;;  %v627_v10 = vld [vmem:[#allocation5 + $0x10e0] sm:$0xff]  ;;  %v613_v12 = vld [vmem:[#allocation5 + $0x1070] sm:$0xff] }
 0x1fa   :  { %v629_v14 = vld [vmem:[#allocation5 + $0x10f0] sm:$0xff]  ;;  %v5802_v19 = vpack.c.bf16 %v627_v10, %v611_v9 }
 0x1fb   :  { %5767 = vmatpush1.bf16.msra.mxu0 %v5766_v24  ;;  %v516_v24 = vld [vmem:[#allocation5 + $0xd68] sm:$0xff]  ;;  %v5930_v20 = vpack.c.bf16 %v629_v14, %v613_v12  ;;  %v771_v12 = vld [vmem:[#allocation5 + $0x1560] sm:$0xff]  ;;  %v773_v14 = vld [vmem:[#allocation5 + $0x1570] sm:$0xff] }
 0x1fc   :  { %5895 = vmatpush1.bf16.msra.mxu1 %v5894_v22  ;;  %5769 = vmatprep.subr.bf16.mxu0 %v5768_v27  ;;  %v532_v22 = vld [vmem:[#allocation5 + $0xde8] sm:$0xff]  ;;  %v518_v27 = vld [vmem:[#allocation5 + $0xd78] sm:$0xff] }
 0x1fd   :  { %5897 = vmatprep.subr.bf16.mxu1 %v5896_v31  ;;  %v5788_v31 = vpack.c.bf16 %v532_v22, %v516_v24  ;;  %v5916_v35 = vpack.c.bf16 %v534_v28, %v518_v27  ;;  %v659_v24 = vld [vmem:[#allocation5 + $0x11e0] sm:$0xff]  ;;  %v645_v22 = vld [vmem:[#allocation5 + $0x1170] sm:$0xff] }
 0x1fe   :  { %v661_v28 = vld [vmem:[#allocation5 + $0x11f0] sm:$0xff]  ;;  %v5806_v34 = vpack.c.bf16 %v659_v24, %v643_v23 }
 0x1ff   :  { %5771 = vmatpush1.bf16.msra.mxu0 %v5770_v38  ;;  %v548_v38 = vld [vmem:[#allocation5 + $0xe68] sm:$0xff]  ;;  %v5934_v32 = vpack.c.bf16 %v661_v28, %v645_v22  ;;  %v803_v22 = vld [vmem:[#allocation5 + $0x1660] sm:$0xff]  ;;  %v805_v28 = vld [vmem:[#allocation5 + $0x1670] sm:$0xff] }
 0x200   :  { %5899 = vmatpush1.bf16.msra.mxu1 %v5898_v39  ;;  %5773 = vmatprep.subr.bf16.mxu0 %v5772_v40  ;;  %v564_v39 = vld [vmem:[#allocation5 + $0xee8] sm:$0xff]  ;;  %v550_v40 = vld [vmem:[#allocation5 + $0xe78] sm:$0xff] }
 0x201   :  { %5901 = vmatprep.subr.bf16.mxu1 %v5900_v47  ;;  %v5792_v47 = vpack.c.bf16 %v564_v39, %v548_v38  ;;  %v5920_v51 = vpack.c.bf16 %v566_v41, %v550_v40  ;;  %v691_v38 = vld [vmem:[#allocation5 + $0x12e0] sm:$0xff]  ;;  %v677_v39 = vld [vmem:[#allocation5 + $0x1270] sm:$0xff] }
 0x202   :  { %v693_v41 = vld [vmem:[#allocation5 + $0x12f0] sm:$0xff] }
 0x203   :  { %5775 = vmatpush1.bf16.msra.mxu0 %v5774_v53  ;;  %v580_v53 = vld [vmem:[#allocation5 + $0xf68] sm:$0xff]  ;;  %v5938_v49 = vpack.c.bf16 %v693_v41, %v677_v39 }
 0x204   :  { %5903 = vmatpush1.bf16.msra.mxu1 %v5902_v54  ;;  %5777 = vmatprep.subr.bf16.mxu0 %v5776_v55  ;;  %v596_v54 = vld [vmem:[#allocation5 + $0xfe8] sm:$0xff]  ;;  %v582_v55 = vld [vmem:[#allocation5 + $0xf78] sm:$0xff] }
 0x205   :  { %5905 = vmatprep.subr.bf16.mxu1 %v5904_v59  ;;  %v5796_v59 = vpack.c.bf16 %v596_v54, %v580_v53  ;;  %v5924_v0 = vpack.c.bf16 %v598_v56, %v582_v55  ;;  %v709_v53 = vld [vmem:[#allocation5 + $0x1370] sm:$0xff]  ;;  %v740_v56 = vld [vmem:[#allocation5 + $0x1468] sm:$0xff] }
 0x206   :  { %v725_v55 = vld [vmem:[#allocation5 + $0x13f0] sm:$0xff] }
 0x207   :  { %5779 = vmatpush1.bf16.msra.mxu0 %v5778_v2  ;;  %v612_v2 = vld [vmem:[#allocation5 + $0x1068] sm:$0xff] }
 0x208   :  { %5907 = vmatpush1.bf16.msra.mxu1 %v5906_v3  ;;  %5781 = vmatprep.subr.bf16.mxu0 %v5780_v4  ;;  %v628_v3 = vld [vmem:[#allocation5 + $0x10e8] sm:$0xff]  ;;  %v614_v4 = vld [vmem:[#allocation5 + $0x1078] sm:$0xff] }
 0x209   :  { %5909 = vmatprep.subr.bf16.mxu1 %v5908_v8  ;;  %v5800_v8 = vpack.c.bf16 %v628_v3, %v612_v2  ;;  %v5928_v13 = vpack.c.bf16 %v630_v5, %v614_v4  ;;  %v757_v3 = vld [vmem:[#allocation5 + $0x14f0] sm:$0xff]  ;;  %v772_v4 = vld [vmem:[#allocation5 + $0x1568] sm:$0xff] }
 0x20a   :  { %v788_v5 = vld [vmem:[#allocation5 + $0x15e8] sm:$0xff]  ;;  %v5946_v9 = vpack.c.bf16 %v757_v3, %v741_v1  ;;  %v902_v1 = vld [vmem:[#allocation5 + $0x1978] sm:$0xff]  ;;  %v7519_v3 = vld [vmem:[#allocation7] sm:$0xff] }
 0x20b   :  { %5783 = vmatpush1.bf16.msra.mxu0 %v5782_v15  ;;  %v644_v15 = vld [vmem:[#allocation5 + $0x1168] sm:$0xff]  ;;  %v5820_v10 = vpack.c.bf16 %v788_v5, %v772_v4 }
 0x20c   :  { %5911 = vmatpush1.bf16.msra.mxu1 %v5910_v16  ;;  %5785 = vmatprep.subr.bf16.mxu0 %v5784_v17  ;;  %v660_v16 = vld [vmem:[#allocation5 + $0x11e8] sm:$0xff]  ;;  %v646_v17 = vld [vmem:[#allocation5 + $0x1178] sm:$0xff] }
 0x20d   :  { %5913 = vmatprep.subr.bf16.mxu1 %v5912_v21  ;;  %v5804_v21 = vpack.c.bf16 %v660_v16, %v644_v15  ;;  %v5932_v27 = vpack.c.bf16 %v662_v18, %v646_v17  ;;  %v789_v16 = vld [vmem:[#allocation5 + $0x15f0] sm:$0xff]  ;;  %v804_v17 = vld [vmem:[#allocation5 + $0x1668] sm:$0xff] }
 0x20e   :  { %v820_v18 = vld [vmem:[#allocation5 + $0x16e8] sm:$0xff]  ;;  %v5950_v23 = vpack.c.bf16 %v789_v16, %v773_v14  ;;  %v934_v16 = vld [vmem:[#allocation5 + $0x1a78] sm:$0xff] }
 0x20f   :  { %5787 = vmatpush1.bf16.msra.mxu0 %v5786_v29  ;;  %v676_v29 = vld [vmem:[#allocation5 + $0x1268] sm:$0xff]  ;;  %v5824_v24 = vpack.c.bf16 %v820_v18, %v804_v17  ;;  %v950_v17 = vld [vmem:[#allocation5 + $0x1af8] sm:$0xff] }
 0x210   :  { %5915 = vmatpush1.bf16.msra.mxu1 %v5914_v30  ;;  %5789 = vmatprep.subr.bf16.mxu0 %v5788_v31  ;;  %v692_v30 = vld [vmem:[#allocation5 + $0x12e8] sm:$0xff]  ;;  %v678_v31 = vld [vmem:[#allocation5 + $0x1278] sm:$0xff] }
 0x211   :  { %5917 = vmatprep.subr.bf16.mxu1 %v5916_v35  ;;  %v5808_v35 = vpack.c.bf16 %v692_v30, %v676_v29  ;;  %v5936_v40 = vpack.c.bf16 %v694_v33, %v678_v31  ;;  %v821_v31 = vld [vmem:[#allocation5 + $0x16f0] sm:$0xff]  ;;  %v836_v33 = vld [vmem:[#allocation5 + $0x1768] sm:$0xff] }
 0x212   :  { %v5954_v41 = vpack.c.bf16 %v821_v31, %v805_v28  ;;  %v948_v14 = vld [vmem:[#allocation5 + $0x1ae8] sm:$0xff] }
 0x213   :  { %5791 = vmatpush1.bf16.msra.mxu0 %v5790_v44  ;;  %v708_v44 = vld [vmem:[#allocation5 + $0x1368] sm:$0xff] }
 0x214   :  { %5919 = vmatpush1.bf16.msra.mxu1 %v5918_v45  ;;  %5793 = vmatprep.subr.bf16.mxu0 %v5792_v47  ;;  %v724_v45 = vld [vmem:[#allocation5 + $0x13e8] sm:$0xff]  ;;  %v710_v47 = vld [vmem:[#allocation5 + $0x1378] sm:$0xff] }
 0x215   :  { %5921 = vmatprep.subr.bf16.mxu1 %v5920_v51  ;;  %v5812_v50 = vpack.c.bf16 %v724_v45, %v708_v44  ;;  %v707_v51 = vld [vmem:[#allocation5 + $0x1360] sm:$0xff]  ;;  %v5940_v54 = vpack.c.bf16 %v726_v48, %v710_v47  ;;  %v837_v48 = vld [vmem:[#allocation5 + $0x1770] sm:$0xff]  ;;  %v964_v28 = vld [vmem:[#allocation5 + $0x1b68] sm:$0xff] }
 0x216   :  { %v5814_v60 = vpack.c.bf16 %v723_v52, %v707_v51  ;;  %v835_v45 = vld [vmem:[#allocation5 + $0x1760] sm:$0xff]  ;;  %v884_v51 = vld [vmem:[#allocation5 + $0x18e8] sm:$0xff]  ;;  %v870_v52 = vld [vmem:[#allocation5 + $0x1878] sm:$0xff] }
 0x217   :  { %5795 = vmatpush1.bf16.msra.mxu0 %v5794_v57  ;;  %v756_v57 = vld [vmem:[#allocation5 + $0x14e8] sm:$0xff]  ;;  %v851_v47 = vld [vmem:[#allocation5 + $0x17e0] sm:$0xff] }
 0x218   :  { %5923 = vmatpush1.bf16.msra.mxu1 %v5922_v58  ;;  %5797 = vmatprep.subr.bf16.mxu0 %v5796_v59  ;;  %v742_v58 = vld [vmem:[#allocation5 + $0x1478] sm:$0xff]  ;;  %v5816_v62 = vpack.c.bf16 %v756_v57, %v740_v56  ;;  %v867_v57 = vld [vmem:[#allocation5 + $0x1860] sm:$0xff] }
 0x219   :  { %5925 = vmatprep.subr.bf16.mxu1 %v5924_v0  ;;  %v758_v59 = vld [vmem:[#allocation5 + $0x14f8] sm:$0xff]  ;;  %v755_v0 = vld [vmem:[#allocation5 + $0x14e0] sm:$0xff] }
 0x21a   :  { %v5944_v2 = vpack.c.bf16 %v758_v59, %v742_v58  ;;  %v883_v58 = vld [vmem:[#allocation5 + $0x18e0] sm:$0xff]  ;;  %v869_v59 = vld [vmem:[#allocation5 + $0x1870] sm:$0xff] }
 0x21b   :  { %5799 = vmatpush1.bf16.msra.mxu0 %v5798_v6  ;;  %v774_v6 = vld [vmem:[#allocation5 + $0x1578] sm:$0xff]  ;;  %v5834_v4 = vpack.c.bf16 %v883_v58, %v867_v57  ;;  %v997_v57 = vld [vmem:[#allocation5 + $0x1c70] sm:$0xff] }
 0x21c   :  { %5927 = vmatpush1.bf16.msra.mxu1 %v5926_v7  ;;  %5801 = vmatprep.subr.bf16.mxu0 %v5800_v8  ;;  %v790_v7 = vld [vmem:[#allocation5 + $0x15f8] sm:$0xff]  ;;  %v5818_v8 = vpack.c.bf16 %v755_v0, %v739_v63  ;;  %v916_v63 = vld [vmem:[#allocation5 + $0x19e8] sm:$0xff]  ;;  %v7517_v0 = vsub.s32 1, %v7446_v61 }
 0x21d   :  { %5929 = vmatprep.subr.bf16.mxu1 %v5928_v13  ;;  %v787_v13 = vld [vmem:[#allocation5 + $0x15e0] sm:$0xff]  ;;  %v5948_v15 = vpack.c.bf16 %v790_v7, %v774_v6 }
 0x21e   :  { %2134 = vmatmul.mubr.f32.vlgmr.msra.gmra.mrb[6].mxu0 %v7455_v25  ;;  %v899_v7 = vld [vmem:[#allocation5 + $0x1960] sm:$0xff] }
 0x21f   :  { %5803 = vmatpush1.bf16.msra.mxu0 %v5802_v19  ;;  %2276 = vmatmul.mubr.f32.vlgmr.msra.gmra.mrb[6].mxu1 %v7455_v25  ;;  %v5810_v25 = vpack.c.bf16 %v691_v38, %v675_v36  ;;  %v806_v19 = vld [vmem:[#allocation5 + $0x1678] sm:$0xff] }
 0x220   :  { %5931 = vmatpush1.bf16.msra.mxu1 %v5930_v20  ;;  %5805 = vmatprep.subr.bf16.mxu0 %v5804_v21  ;;  %v822_v20 = vld [vmem:[#allocation5 + $0x16f8] sm:$0xff]  ;;  %v5822_v21 = vpack.c.bf16 %v787_v13, %v771_v12  ;;  %v917_v12 = vld [vmem:[#allocation5 + $0x19f0] sm:$0xff]  ;;  %v932_v13 = vld [vmem:[#allocation5 + $0x1a68] sm:$0xff] }
 0x221   :  { %5933 = vmatprep.subr.bf16.mxu1 %v5932_v27  ;;  %2204 = vmatprep.mubr.f32.mxu0 %v7470_v11  ;;  %v819_v27 = vld [vmem:[#allocation5 + $0x16e0] sm:$0xff]  ;;  %v5952_v30 = vpack.c.bf16 %v822_v20, %v806_v19  ;;  %v838_v36 = vld [vmem:[#allocation5 + $0x1778] sm:$0xff]  ;;  %v5840_v20 = vpack.c.bf16 %v948_v14, %v932_v13  ;;  %v1076_v13 = vld [vmem:[#allocation5 + $0x1ee8] sm:$0xff] }
 0x222   :  { %2346 = vmatprep.mubr.f32.mxu1 %v7470_v11  ;;  %v5942_v11 = vpack.c.bf16 %v725_v55, %v709_v53  ;;  %v854_v38 = vld [vmem:[#allocation5 + $0x17f8] sm:$0xff] }
 0x223   :  { %5807 = vmatpush1.bf16.msra.mxu0 %v5806_v34  ;;  %v852_v34 = vld [vmem:[#allocation5 + $0x17e8] sm:$0xff]  ;;  %v886_v53 = vld [vmem:[#allocation5 + $0x18f8] sm:$0xff] }
 0x224   :  { %5935 = vmatpush1.bf16.msra.mxu1 %v5934_v32  ;;  %5809 = vmatprep.subr.bf16.mxu0 %v5808_v35  ;;  %v5828_v44 = vpack.c.bf16 %v852_v34, %v836_v33  ;;  %v966_v33 = vld [vmem:[#allocation5 + $0x1b78] sm:$0xff] }
 0x225   :  { %5937 = vmatprep.subr.bf16.mxu1 %v5936_v40  ;;  %v5826_v40 = vpack.c.bf16 %v819_v27, %v803_v22  ;;  %v5968_v22 = vpack.c.bf16 %v950_v17, %v934_v16  ;;  %v949_v27 = vld [vmem:[#allocation5 + $0x1af0] sm:$0xff]  ;;  %v982_v34 = vld [vmem:[#allocation5 + $0x1bf8] sm:$0xff] }
 0x226   :  { %v1062_v14 = vld [vmem:[#allocation5 + $0x1e78] sm:$0xff] }
 0x227   :  { %5811 = vmatpush1.bf16.msra.mxu0 %v5810_v25  ;;  %v5956_v25 = vpack.c.bf16 %v854_v38, %v838_v36 }
 0x228   :  { %5939 = vmatpush1.bf16.msra.mxu1 %v5938_v49  ;;  %5813 = vmatprep.subr.bf16.mxu0 %v5812_v50  ;;  %v853_v49 = vld [vmem:[#allocation5 + $0x17f0] sm:$0xff]  ;;  %v868_v50 = vld [vmem:[#allocation5 + $0x1868] sm:$0xff] }
 0x229   :  { %5941 = vmatprep.subr.bf16.mxu1 %v5940_v54  ;;  %v5830_v54 = vpack.c.bf16 %v851_v47, %v835_v45  ;;  %v5958_v55 = vpack.c.bf16 %v853_v49, %v837_v48  ;;  %v5832_v56 = vpack.c.bf16 %v884_v51, %v868_v50  ;;  %v965_v45 = vld [vmem:[#allocation5 + $0x1b70] sm:$0xff]  ;;  %v5972_v47 = vpack.c.bf16 %v982_v34, %v966_v33  ;;  %v1012_v49 = vld [vmem:[#allocation5 + $0x1ce8] sm:$0xff]  ;;  %v1014_v51 = vld [vmem:[#allocation5 + $0x1cf8] sm:$0xff] }
 0x22a   :  { %v981_v48 = vld [vmem:[#allocation5 + $0x1bf0] sm:$0xff] }
 0x22b   :  { %5815 = vmatpush1.bf16.msra.mxu0 %v5814_v60  ;;  %v5960_v60 = vpack.c.bf16 %v886_v53, %v870_v52  ;;  %v5974_v53 = vpack.c.bf16 %v981_v48, %v965_v45  ;;  %v1109_v45 = vld [vmem:[#allocation5 + $0x1ff0] sm:$0xff]  ;;  %v2454_v48 = vld [vmem:[#allocation8 + $0x28] sm:$0xff] }
 0x22c   :  { %5943 = vmatpush1.bf16.msra.mxu1 %v5942_v11  ;;  %5817 = vmatprep.subr.bf16.mxu0 %v5816_v62  ;;  %v885_v11 = vld [vmem:[#allocation5 + $0x18f0] sm:$0xff]  ;;  %v900_v62 = vld [vmem:[#allocation5 + $0x1968] sm:$0xff] }
 0x22d   :  { %5945 = vmatprep.subr.bf16.mxu1 %v5944_v2  ;;  %v918_v2 = vld [vmem:[#allocation5 + $0x19f8] sm:$0xff]  ;;  %v5962_v5 = vpack.c.bf16 %v885_v11, %v869_v59  ;;  %v5836_v6 = vpack.c.bf16 %v916_v63, %v900_v62  ;;  %v1013_v59 = vld [vmem:[#allocation5 + $0x1cf0] sm:$0xff]  ;;  %v1044_v11 = vld [vmem:[#allocation5 + $0x1de8] sm:$0xff] }
 0x22e   :  { %v1030_v63 = vld [vmem:[#allocation5 + $0x1d78] sm:$0xff] }
 0x22f   :  { %5819 = vmatpush1.bf16.msra.mxu0 %v5818_v8  ;;  %v915_v8 = vld [vmem:[#allocation5 + $0x19e0] sm:$0xff] }
 0x230   :  { %5947 = vmatpush1.bf16.msra.mxu1 %v5946_v9  ;;  %5821 = vmatprep.subr.bf16.mxu0 %v5820_v10  ;;  %v901_v9 = vld [vmem:[#allocation5 + $0x1970] sm:$0xff]  ;;  %v5964_v10 = vpack.c.bf16 %v918_v2, %v902_v1  ;;  %v5838_v18 = vpack.c.bf16 %v915_v8, %v899_v7  ;;  %v1046_v1 = vld [vmem:[#allocation5 + $0x1df8] sm:$0xff]  ;;  %v1043_v7 = vld [vmem:[#allocation5 + $0x1de0] sm:$0xff] }
 0x231   :  { %v7508_v29 = vpop.f32.mrb[2].mxu0  ;;  %5949 = vmatprep.subr.bf16.mxu1 %v5948_v15  ;;  %v1122_v15 = vrot.slane %v7519_v3, %v7517_v0  ;;  %v5966_v19 = vpack.c.bf16 %v917_v12, %v901_v9  ;;  %v1029_v8 = vld [vmem:[#allocation5 + $0x1d70] sm:$0xff]  ;;  %v5980_v9 = vpack.c.bf16 %v1046_v1, %v1030_v63  ;;  %v1060_v12 = vld [vmem:[#allocation5 + $0x1e68] sm:$0xff] }
 0x232   :  { %v7510_v32 = vpop.f32.mrb[2].mxu1  ;;  %v7512_v35 = vpop.f32.mrb[3].mxu0  ;;  %v2464_v63 = vld [vmem:[#allocation8 + $0x78] sm:$0xff] }
 0x233   :  { %v7514_v39 = vpop.f32.mrb[3].mxu1  ;;  %5823 = vmatpush1.bf16.msra.mxu0 %v5822_v21  ;;  %v931_v21 = vld [vmem:[#allocation5 + $0x1a60] sm:$0xff]  ;;  %v7524_v31 = vadd.f32 %v7496_v43, %v1122_v15  ;;  %v998_v43 = vld [vmem:[#allocation5 + $0x1c78] sm:$0xff] }
 0x234   :  { %5951 = vmatpush1.bf16.msra.mxu1 %v5950_v23  ;;  %5825 = vmatprep.subr.bf16.mxu0 %v5824_v24  ;;  %v947_v23 = vld [vmem:[#allocation5 + $0x1ae0] sm:$0xff]  ;;  %v933_v24 = vld [vmem:[#allocation5 + $0x1a70] sm:$0xff]  ;;  %v5976_v58 = vpack.c.bf16 %v1014_v51, %v998_v43  ;;  %v1078_v15 = vld [vmem:[#allocation5 + $0x1ef8] sm:$0xff] }
 0x235   :  { %5953 = vmatprep.subr.bf16.mxu1 %v5952_v30  ;;  %v980_v30 = vld [vmem:[#allocation5 + $0x1be8] sm:$0xff]  ;;  %v5842_v36 = vpack.c.bf16 %v947_v23, %v931_v21  ;;  %v5970_v38 = vpack.c.bf16 %v949_v27, %v933_v24  ;;  %v2370_v50 = vmin.f32 %v7524_v31, 0.0  ;;  %v1061_v21 = vld [vmem:[#allocation5 + $0x1e70] sm:$0xff]  ;;  %v5984_v23 = vpack.c.bf16 %v1078_v15, %v1062_v14 }
 0x236   :  { %v1077_v24 = vld [vmem:[#allocation5 + $0x1ef0] sm:$0xff]  ;;  %v1108_v27 = vld [vmem:[#allocation5 + $0x1fe8] sm:$0xff]  ;;  %vm2354_vm0 = vcmp.gt.f32.partialorder %v7524_v31, 0.0 }
 0x237   :  { %5827 = vmatpush1.bf16.msra.mxu0 %v5826_v40  ;;  %v5844_v40 = vpack.c.bf16 %v980_v30, %v964_v28  ;;  %v2387_v62 = vmul.f32 1.442695, %v2370_v50  ;;  %v1094_v28 = vld [vmem:[#allocation5 + $0x1f78] sm:$0xff]  ;;  %v5986_v34 = vpack.c.bf16 %v1077_v24, %v1061_v21 }
 0x238   :  { %5955 = vmatpush1.bf16.msra.mxu1 %v5954_v41  ;;  %5829 = vmatprep.subr.bf16.mxu0 %v5828_v44  ;;  %v963_v41 = vld [vmem:[#allocation5 + $0x1b60] sm:$0xff]  ;;  %v1110_v30 = vld [vmem:[#allocation5 + $0x1ff8] sm:$0xff] }
 0x239   :  { %5957 = vmatprep.subr.bf16.mxu1 %v5956_v25  ;;  %v979_v44 = vld [vmem:[#allocation5 + $0x1be0] sm:$0xff]  ;;  %v996_v25 = vld [vmem:[#allocation5 + $0x1c68] sm:$0xff]  ;;  %7156 = vpow2.f32 %v2387_v62  ;;  %v2474_v24 = vld [vmem:[#allocation8 + $0xc8] sm:$0xff] }
 0x23a   :  { %v5846_v52 = vpack.c.bf16 %v979_v44, %v963_v41  ;;  %v1093_v41 = vld [vmem:[#allocation5 + $0x1f70] sm:$0xff]  ;;  %v5988_v44 = vpack.c.bf16 %v1110_v30, %v1094_v28  ;;  %v2460_v62 = vld [vmem:[#allocation8 + $0x58] sm:$0xff] }
 0x23b   :  { %5831 = vmatpush1.bf16.msra.mxu0 %v5830_v54  ;;  %v5848_v54 = vpack.c.bf16 %v1012_v49, %v996_v25  ;;  %v2452_v25 = vld [vmem:[#allocation8 + $0x18] sm:$0xff]  ;;  %v5990_v51 = vpack.c.bf16 %v1109_v45, %v1093_v41  ;;  %v2482_v41 = vld [vmem:[#allocation8 + $0x108] sm:$0xff] }
 0x23c   :  { %5959 = vmatpush1.bf16.msra.mxu1 %v5958_v55  ;;  %5833 = vmatprep.subr.bf16.mxu0 %v5832_v56  ;;  %v995_v55 = vld [vmem:[#allocation5 + $0x1c60] sm:$0xff]  ;;  %v2456_v49 = vld [vmem:[#allocation8 + $0x38] sm:$0xff] }
 0x23d   :  { %5961 = vmatprep.subr.bf16.mxu1 %v5960_v60  ;;  %v1011_v56 = vld [vmem:[#allocation5 + $0x1ce0] sm:$0xff]  ;;  %v1028_v60 = vld [vmem:[#allocation5 + $0x1d68] sm:$0xff] }
 0x23e   :  { %v5850_v2 = vpack.c.bf16 %v1011_v56, %v995_v55  ;;  %v6504_v55 = vpack.c.bf16 %v2456_v49, %v2452_v25  ;;  %v2451_v56 = vld [vmem:[#allocation8 + $0x10] sm:$0xff]  ;;  %v2484_v45 = vld [vmem:[#allocation8 + $0x118] sm:$0xff] }
 0x23f   :  { %5835 = vmatpush1.bf16.msra.mxu0 %v5834_v4  ;;  %v5978_v4 = vpack.c.bf16 %v1013_v59, %v997_v57  ;;  %v2455_v57 = vld [vmem:[#allocation8 + $0x30] sm:$0xff]  ;;  %v2462_v59 = vld [vmem:[#allocation8 + $0x68] sm:$0xff] }
 0x240   :  { %5963 = vmatpush1.bf16.msra.mxu1 %v5962_v5  ;;  %5837 = vmatprep.subr.bf16.mxu0 %v5836_v6  ;;  %v5852_v5 = vpack.c.bf16 %v1044_v11, %v1028_v60  ;;  %v1027_v6 = vld [vmem:[#allocation5 + $0x1d60] sm:$0xff]  ;;  %v6506_v1 = vpack.c.bf16 %v2455_v57, %v2451_v56  ;;  %v2492_v56 = vld [vmem:[#allocation8 + $0x158] sm:$0xff] }
 0x241   :  { %5965 = vmatprep.subr.bf16.mxu1 %v5964_v10  ;;  %v1045_v10 = vld [vmem:[#allocation5 + $0x1df0] sm:$0xff]  ;;  %v5854_v16 = vpack.c.bf16 %v1043_v7, %v1027_v6  ;;  %v2463_v7 = vld [vmem:[#allocation8 + $0x70] sm:$0xff]  ;;  %v2496_v57 = vld [vmem:[#allocation8 + $0x178] sm:$0xff] }
 0x242   :  { %v5982_v17 = vpack.c.bf16 %v1045_v10, %v1029_v8  ;;  %v2466_v8 = vld [vmem:[#allocation8 + $0x88] sm:$0xff]  ;;  %v6508_v10 = vpack.c.bf16 %v2464_v63, %v2460_v62  ;;  %v2493_v62 = vld [vmem:[#allocation8 + $0x160] sm:$0xff]  ;;  %v2491_v63 = vld [vmem:[#allocation8 + $0x150] sm:$0xff] }
 0x243   :  { %5839 = vmatpush1.bf16.msra.mxu0 %v5838_v18  ;;  %v5856_v18 = vpack.c.bf16 %v1076_v13, %v1060_v12  ;;  %v7157_v43 = vpop.eup %7156  ;;  %v2468_v12 = vld [vmem:[#allocation8 + $0x98] sm:$0xff] }
 0x244   :  { %5967 = vmatpush1.bf16.msra.mxu1 %v5966_v19  ;;  %5841 = vmatprep.subr.bf16.mxu0 %v5840_v20  ;;  %v1059_v19 = vld [vmem:[#allocation5 + $0x1e60] sm:$0xff]  ;;  %v4879_v11 = vadd.f32 -1.0, %v7157_v43  ;;  %v2472_v13 = vld [vmem:[#allocation8 + $0xb8] sm:$0xff]  ;;  %v2485_v43 = vld [vmem:[#allocation8 + $0x120] sm:$0xff] }
 0x245   :  { %5969 = vmatprep.subr.bf16.mxu1 %v5968_v22  ;;  %v1075_v20 = vld [vmem:[#allocation5 + $0x1ee0] sm:$0xff]  ;;  %v1092_v22 = vld [vmem:[#allocation5 + $0x1f68] sm:$0xff]  ;;  %v6512_v21 = vpack.c.bf16 %v2472_v13, %v2468_v12  ;;  %v2497_v12 = vld [vmem:[#allocation8 + $0x180] sm:$0xff] }
 0x246   :  { %v5858_v33 = vpack.c.bf16 %v1075_v20, %v1059_v19  ;;  %v2434_v14 = vsel %vm2354_vm0, %v7524_v31, %v4879_v11  ;;  %v2469_v19 = vld [vmem:[#allocation8 + $0xa0] sm:$0xff]  ;;  %v2467_v20 = vld [vmem:[#allocation8 + $0x90] sm:$0xff] }
 0x247   :  { %5843 = vmatpush1.bf16.msra.mxu0 %v5842_v36  ;;  %v5860_v36 = vpack.c.bf16 %v1108_v27, %v1092_v22  ;;  %v2478_v22 = vld [vmem:[#allocation8 + $0xe8] sm:$0xff]  ;;  %v2476_v27 = vld [vmem:[#allocation8 + $0xd8] sm:$0xff]  ;;  %v2489_v11 = vld [vmem:[#allocation8 + $0x140] sm:$0xff] }
 0x248   :  { %5971 = vmatpush1.bf16.msra.mxu1 %v5970_v38  ;;  %5845 = vmatprep.subr.bf16.mxu0 %v5844_v40  ;;  %v1091_v38 = vld [vmem:[#allocation5 + $0x1f60] sm:$0xff]  ;;  %v6004_v30 = vpack.c.bf16 %v2478_v22, %v2474_v24  ;;  %v2501_v13 = vld [vmem:[#allocation8 + $0x1a0] sm:$0xff] }
 0x249   :  { %5973 = vmatprep.subr.bf16.mxu1 %v5972_v47  ;;  %v1107_v40 = vld [vmem:[#allocation5 + $0x1fe0] sm:$0xff]  ;;  %v2450_v47 = vld [vmem:[#allocation8 + $0x8] sm:$0xff]  ;;  %v2505_v22 = vld [vmem:[#allocation8 + $0x1c0] sm:$0xff] }
 0x24a   :  { %v5862_v50 = vpack.c.bf16 %v1107_v40, %v1091_v38  ;;  %v2479_v40 = vld [vmem:[#allocation8 + $0xf0] sm:$0xff] }
 0x24b   :  { %5847 = vmatpush1.bf16.msra.mxu0 %v5846_v52  ;;  %v5992_v52 = vpack.c.bf16 %v2454_v48, %v2450_v47  ;;  %v2488_v47 = vld [vmem:[#allocation8 + $0x138] sm:$0xff] }
 0x24c   :  { %5975 = vmatpush1.bf16.msra.mxu1 %v5974_v53  ;;  %5849 = vmatprep.subr.bf16.mxu0 %v5848_v54  ;;  %v2449_v53 = vld [vmem:[#allocation8] sm:$0xff] }
 0x24d   :  { %5977 = vmatprep.subr.bf16.mxu1 %v5976_v58  ;;  %v2453_v54 = vld [vmem:[#allocation8 + $0x20] sm:$0xff]  ;;  %v2458_v58 = vld [vmem:[#allocation8 + $0x48] sm:$0xff] }
 0x24e   :  { %v5994_v60 = vpack.c.bf16 %v2453_v54, %v2449_v53  ;;  %v5996_v6 = vpack.c.bf16 %v2462_v59, %v2458_v58  ;;  %v2487_v53 = vld [vmem:[#allocation8 + $0x130] sm:$0xff]  ;;  %v2490_v54 = vld [vmem:[#allocation8 + $0x148] sm:$0xff] }
 0x24f   :  { %5851 = vmatpush1.bf16.msra.mxu0 %v5850_v2  ;;  %v2457_v2 = vld [vmem:[#allocation8 + $0x40] sm:$0xff] }
 0x250   :  { %5979 = vmatpush1.bf16.msra.mxu1 %v5978_v4  ;;  %5853 = vmatprep.subr.bf16.mxu0 %v5852_v5  ;;  %v2461_v4 = vld [vmem:[#allocation8 + $0x60] sm:$0xff]  ;;  %v2459_v5 = vld [vmem:[#allocation8 + $0x50] sm:$0xff] }
 0x251   :  { %5981 = vmatprep.subr.bf16.mxu1 %v5980_v9  ;;  %v2470_v9 = vld [vmem:[#allocation8 + $0xa8] sm:$0xff]  ;;  %v5998_v15 = vpack.c.bf16 %v2461_v4, %v2457_v2  ;;  %v2495_v2 = vld [vmem:[#allocation8 + $0x170] sm:$0xff] }
 0x252   :  { %v2498_v4 = vld [vmem:[#allocation8 + $0x188] sm:$0xff] }
 0x253   :  { %5855 = vmatpush1.bf16.msra.mxu0 %v5854_v16  ;;  %v6510_v16 = vpack.c.bf16 %v2463_v7, %v2459_v5  ;;  %v2502_v5 = vld [vmem:[#allocation8 + $0x1a8] sm:$0xff]  ;;  %v2504_v7 = vld [vmem:[#allocation8 + $0x1b8] sm:$0xff] }
 0x254   :  { %5983 = vmatpush1.bf16.msra.mxu1 %v5982_v17  ;;  %5857 = vmatprep.subr.bf16.mxu0 %v5856_v18  ;;  %v6000_v17 = vpack.c.bf16 %v2470_v9, %v2466_v8  ;;  %v2465_v18 = vld [vmem:[#allocation8 + $0x80] sm:$0xff]  ;;  %v6014_v8 = vpack.c.bf16 %v2493_v62, %v2489_v11  ;;  %v6526_v9 = vpack.c.bf16 %v2495_v2, %v2491_v63  ;;  %v2527_v62 = vld [vmem:[#allocation8 + $0x270] sm:$0xff]  ;;  %v2530_v63 = vld [vmem:[#allocation8 + $0x288] sm:$0xff] }
 0x255   :  { %5985 = vmatprep.subr.bf16.mxu1 %v5984_v23  ;;  %v2471_v23 = vld [vmem:[#allocation8 + $0xb0] sm:$0xff]  ;;  %v6002_v28 = vpack.c.bf16 %v2469_v19, %v2465_v18  ;;  %v2510_v18 = vld [vmem:[#allocation8 + $0x1e8] sm:$0xff]  ;;  %v2508_v19 = vld [vmem:[#allocation8 + $0x1d8] sm:$0xff] }
 0x256   :  { %v6514_v31 = vpack.c.bf16 %v2471_v23, %v2467_v20  ;;  %v2512_v20 = vld [vmem:[#allocation8 + $0x1f8] sm:$0xff] }
 0x257   :  { %5859 = vmatpush1.bf16.msra.mxu0 %v5858_v33  ;;  %v2473_v33 = vld [vmem:[#allocation8 + $0xc0] sm:$0xff] }
 0x258   :  { %5987 = vmatpush1.bf16.msra.mxu1 %v5986_v34  ;;  %5861 = vmatprep.subr.bf16.mxu0 %v5860_v36  ;;  %v2477_v34 = vld [vmem:[#allocation8 + $0xe0] sm:$0xff]  ;;  %v2475_v36 = vld [vmem:[#allocation8 + $0xd0] sm:$0xff] }
 0x259   :  { %5989 = vmatprep.subr.bf16.mxu1 %v5988_v44  ;;  %v2486_v44 = vld [vmem:[#allocation8 + $0x128] sm:$0xff]  ;;  %v6006_v48 = vpack.c.bf16 %v2477_v34, %v2473_v33  ;;  %v6518_v25 = vpack.c.bf16 %v2479_v40, %v2475_v36  ;;  %v2516_v34 = vld [vmem:[#allocation8 + $0x218] sm:$0xff]  ;;  %v7532_v40 = vsub.s32 0, %v7446_v61 }
 0x25a   :  { %v6008_v49 = vpack.c.bf16 %v2486_v44, %v2482_v41  ;;  %v2518_v33 = vld [vmem:[#allocation8 + $0x228] sm:$0xff]  ;;  %v2520_v36 = vld [vmem:[#allocation8 + $0x238] sm:$0xff] }
 0x25b   :  { %5863 = vmatpush1.bf16.msra.mxu0 %v5862_v50  ;;  %v2481_v50 = vld [vmem:[#allocation8 + $0x100] sm:$0xff] }
 0x25c   :  { %5991 = vmatpush1.bf16.msra.mxu1 %v5990_v51  ;;  %5993 = vmatprep.subr.bf16.mxu0 %v5992_v52  ;;  %v2483_v51 = vld [vmem:[#allocation8 + $0x110] sm:$0xff]  ;;  %v6520_v52 = vpack.c.bf16 %v2488_v47, %v2484_v45  ;;  %v6010_v58 = vpack.c.bf16 %v2485_v43, %v2481_v50  ;;  %v2513_v45 = vld [vmem:[#allocation8 + $0x200] sm:$0xff]  ;;  %v2522_v50 = vld [vmem:[#allocation8 + $0x248] sm:$0xff] }
 0x25d   :  { %6505 = vmatprep.subr.bf16.mxu1 %v6504_v55  ;;  %v2494_v55 = vld [vmem:[#allocation8 + $0x168] sm:$0xff]  ;;  %v6522_v59 = vpack.c.bf16 %v2487_v53, %v2483_v51  ;;  %v2517_v47 = vld [vmem:[#allocation8 + $0x220] sm:$0xff]  ;;  %v7535_v51 = vsub.s32 3, %v7446_v61  ;;  %v2528_v53 = vld [vmem:[#allocation8 + $0x278] sm:$0xff] }
 0x25e   :  { %2205 = vmatmul.mubr.f32.vlgmr.msra.gmra.mrb[6].mxu0 %v7466_v26  ;;  %v2526_v43 = vld [vmem:[#allocation8 + $0x268] sm:$0xff] }
 0x25f   :  { %2347 = vmatmul.mubr.f32.vlgmr.msra.gmra.mrb[6].mxu1 %v7466_v26  ;;  %5995 = vmatpush1.bf16.msra.mxu0 %v5994_v60  ;;  %v2480_v26 = vld [vmem:[#allocation8 + $0xf8] sm:$0xff]  ;;  %v6012_v60 = vpack.c.bf16 %v2494_v55, %v2490_v54  ;;  %v6026_v54 = vpack.c.bf16 %v2517_v47, %v2513_v45  ;;  %v1118_v55 = vrot.slane %v7519_v3, %v7532_v40  ;;  %v2545_v45 = vld [vmem:[#allocation8 + $0x300] sm:$0xff] }
 0x260   :  { %3559 = vmatprep.mubr.f32.mxu0 %v2434_v14  ;;  %6507 = vmatpush1.bf16.msra.mxu1 %v6506_v1  ;;  %v6516_v38 = vpack.c.bf16 %v2480_v26, %v2476_v27  ;;  %v6524_v1 = vpack.c.bf16 %v2496_v57, %v2492_v56  ;;  %v2509_v27 = vld [vmem:[#allocation8 + $0x1e0] sm:$0xff]  ;;  %v2507_v26 = vld [vmem:[#allocation8 + $0x1d0] sm:$0xff]  ;;  %v6028_v57 = vpack.c.bf16 %v2526_v43, %v2522_v50  ;;  %v2554_v50 = vld [vmem:[#allocation8 + $0x348] sm:$0xff] }
 0x261   :  { %4127 = vmatprep.mubr.f32.mxu1 %v2434_v14  ;;  %5997 = vmatprep.subr.bf16.mxu0 %v5996_v6  ;;  %v2500_v6 = vld [vmem:[#allocation8 + $0x198] sm:$0xff]  ;;  %v2499_v14 = vld [vmem:[#allocation8 + $0x190] sm:$0xff]  ;;  %v1130_v2 = vrot.slane %v7519_v3, %v7535_v51  ;;  %v2549_v47 = vld [vmem:[#allocation8 + $0x320] sm:$0xff] }
 0x262   :  { %6509 = vmatprep.subr.bf16.mxu1 %v6508_v10  ;;  %v6016_v10 = vpack.c.bf16 %v2502_v5, %v2498_v4  ;;  %v2532_v4 = vld [vmem:[#allocation8 + $0x298] sm:$0xff]  ;;  %v2558_v43 = vld [vmem:[#allocation8 + $0x368] sm:$0xff] }
 0x263   :  { %5999 = vmatpush1.bf16.msra.mxu0 %v5998_v15  ;;  %v6528_v15 = vpack.c.bf16 %v2504_v7, %v2500_v6  ;;  %v2536_v5 = vld [vmem:[#allocation8 + $0x2b8] sm:$0xff]  ;;  %v7542_v7 = vadd.f32 %v7492_v37, %v1118_v55  ;;  %v7545_v3 = vadd.f32 %v7498_v46, %v1130_v2  ;;  %v6042_v55 = vpack.c.bf16 %v2549_v47, %v2545_v45 }
 0x264   :  { %6511 = vmatpush1.bf16.msra.mxu1 %v6510_v16  ;;  %6001 = vmatprep.subr.bf16.mxu0 %v6000_v17  ;;  %v2503_v16 = vld [vmem:[#allocation8 + $0x1b0] sm:$0xff]  ;;  %v2506_v17 = vld [vmem:[#allocation8 + $0x1c8] sm:$0xff]  ;;  %v2564_v2 = vld [vmem:[#allocation8 + $0x398] sm:$0xff] }
 0x265   :  { %6513 = vmatprep.subr.bf16.mxu1 %v6512_v21  ;;  %v6018_v21 = vpack.c.bf16 %v2501_v13, %v2497_v12  ;;  %v6530_v23 = vpack.c.bf16 %v2503_v16, %v2499_v14  ;;  %v6020_v24 = vpack.c.bf16 %v2510_v18, %v2506_v17  ;;  %v2533_v12 = vld [vmem:[#allocation8 + $0x2a0] sm:$0xff]  ;;  %v2531_v13 = vld [vmem:[#allocation8 + $0x290] sm:$0xff]  ;;  %v6544_v14 = vpack.c.bf16 %v2536_v5, %v2532_v4  ;;  %v2538_v16 = vld [vmem:[#allocation8 + $0x2c8] sm:$0xff] }
 0x266   :  { %v2542_v17 = vld [vmem:[#allocation8 + $0x2e8] sm:$0xff]  ;;  %v2540_v18 = vld [vmem:[#allocation8 + $0x2d8] sm:$0xff]  ;;  %v2372_v46 = vmin.f32 %v7545_v3, 0.0  ;;  %vm2353_vm1 = vcmp.gt.f32.partialorder %v7542_v7, 0.0  ;;  %vm2356_vm2 = vcmp.gt.f32.partialorder %v7545_v3, 0.0 }
 0x267   :  { %6003 = vmatpush1.bf16.msra.mxu0 %v6002_v28  ;;  %v6532_v28 = vpack.c.bf16 %v2512_v20, %v2508_v19  ;;  %v2544_v19 = vld [vmem:[#allocation8 + $0x2f8] sm:$0xff]  ;;  %v2369_v20 = vmin.f32 %v7542_v7, 0.0 }
 0x268   :  { %6515 = vmatpush1.bf16.msra.mxu1 %v6514_v31  ;;  %6005 = vmatprep.subr.bf16.mxu0 %v6004_v30  ;;  %v2511_v31 = vld [vmem:[#allocation8 + $0x1f0] sm:$0xff]  ;;  %v2514_v30 = vld [vmem:[#allocation8 + $0x208] sm:$0xff]  ;;  %v2568_v4 = vld [vmem:[#allocation8 + $0x3b8] sm:$0xff] }
 0x269   :  { %6517 = vmatprep.subr.bf16.mxu1 %v6516_v38  ;;  %v6022_v38 = vpack.c.bf16 %v2509_v27, %v2505_v22  ;;  %v6534_v41 = vpack.c.bf16 %v2511_v31, %v2507_v26  ;;  %v6024_v44 = vpack.c.bf16 %v2518_v33, %v2514_v30  ;;  %v2541_v22 = vld [vmem:[#allocation8 + $0x2e0] sm:$0xff]  ;;  %v2539_v27 = vld [vmem:[#allocation8 + $0x2d0] sm:$0xff]  ;;  %v6548_v26 = vpack.c.bf16 %v2544_v19, %v2540_v18  ;;  %v2546_v31 = vld [vmem:[#allocation8 + $0x308] sm:$0xff] }
 0x26a   :  { %v2550_v30 = vld [vmem:[#allocation8 + $0x328] sm:$0xff]  ;;  %v2548_v33 = vld [vmem:[#allocation8 + $0x318] sm:$0xff] }
 0x26b   :  { %6007 = vmatpush1.bf16.msra.mxu0 %v6006_v48  ;;  %v2515_v48 = vld [vmem:[#allocation8 + $0x210] sm:$0xff]  ;;  %v2576_v18 = vld [vmem:[#allocation8 + $0x3f8] sm:$0xff] }
 0x26c   :  { %6519 = vmatpush1.bf16.msra.mxu1 %v6518_v25  ;;  %6009 = vmatprep.subr.bf16.mxu0 %v6008_v49  ;;  %v6536_v25 = vpack.c.bf16 %v2520_v36, %v2516_v34  ;;  %v2519_v49 = vld [vmem:[#allocation8 + $0x230] sm:$0xff]  ;;  %v2552_v34 = vld [vmem:[#allocation8 + $0x338] sm:$0xff] }
 0x26d   :  { %6521 = vmatprep.subr.bf16.mxu1 %v6520_v52  ;;  %v2524_v52 = vld [vmem:[#allocation8 + $0x258] sm:$0xff]  ;;  %v6538_v56 = vpack.c.bf16 %v2519_v49, %v2515_v48  ;;  %v2547_v48 = vld [vmem:[#allocation8 + $0x310] sm:$0xff] }
 0x26e   :  { %v6540_v11 = vpack.c.bf16 %v2528_v53, %v2524_v52  ;;  %v2551_v49 = vld [vmem:[#allocation8 + $0x330] sm:$0xff]  ;;  %v2391_v52 = vmul.f32 1.442695, %v2372_v46  ;;  %v2556_v53 = vld [vmem:[#allocation8 + $0x358] sm:$0xff] }
 0x26f   :  { %6011 = vmatpush1.bf16.msra.mxu0 %v6010_v58  ;;  %v2521_v58 = vld [vmem:[#allocation8 + $0x240] sm:$0xff]  ;;  %v2584_v46 = vld [vmem:[#allocation8 + $0x438] sm:$0xff] }
 0x270   :  { %6523 = vmatpush1.bf16.msra.mxu1 %v6522_v59  ;;  %6013 = vmatprep.subr.bf16.mxu0 %v6012_v60  ;;  %v2525_v59 = vld [vmem:[#allocation8 + $0x260] sm:$0xff]  ;;  %v2523_v60 = vld [vmem:[#allocation8 + $0x250] sm:$0xff] }
 0x271   :  { %6525 = vmatprep.subr.bf16.mxu1 %v6524_v1  ;;  %v2534_v1 = vld [vmem:[#allocation8 + $0x2a8] sm:$0xff]  ;;  %v6030_v6 = vpack.c.bf16 %v2525_v59, %v2521_v58  ;;  %v2553_v58 = vld [vmem:[#allocation8 + $0x340] sm:$0xff] }
 0x272   :  { %v2557_v59 = vld [vmem:[#allocation8 + $0x360] sm:$0xff] }
 0x273   :  { %6015 = vmatpush1.bf16.msra.mxu0 %v6014_v8  ;;  %v6542_v8 = vpack.c.bf16 %v2527_v62, %v2523_v60  ;;  %v2555_v60 = vld [vmem:[#allocation8 + $0x350] sm:$0xff]  ;;  %v6046_v5 = vpack.c.bf16 %v2557_v59, %v2553_v58 }
 0x274   :  { %6527 = vmatpush1.bf16.msra.mxu1 %v6526_v9  ;;  %6017 = vmatprep.subr.bf16.mxu0 %v6016_v10  ;;  %v6032_v9 = vpack.c.bf16 %v2534_v1, %v2530_v63  ;;  %v2529_v10 = vld [vmem:[#allocation8 + $0x280] sm:$0xff]  ;;  %v2559_v62 = vld [vmem:[#allocation8 + $0x370] sm:$0xff]  ;;  %v2562_v63 = vld [vmem:[#allocation8 + $0x388] sm:$0xff] }
 0x275   :  { %6529 = vmatprep.subr.bf16.mxu1 %v6528_v15  ;;  %v2535_v15 = vld [vmem:[#allocation8 + $0x2b0] sm:$0xff]  ;;  %v6034_v37 = vpack.c.bf16 %v2533_v12, %v2529_v10  ;;  %v2566_v1 = vld [vmem:[#allocation8 + $0x3a8] sm:$0xff]  ;;  %v2565_v10 = vld [vmem:[#allocation8 + $0x3a0] sm:$0xff] }
 0x276   :  { %v2563_v12 = vld [vmem:[#allocation8 + $0x390] sm:$0xff] }
 0x277   :  { %6019 = vmatpush1.bf16.msra.mxu0 %v6018_v21  ;;  %v6546_v21 = vpack.c.bf16 %v2535_v15, %v2531_v13  ;;  %v6560_v13 = vpack.c.bf16 %v2568_v4, %v2564_v2  ;;  %v2570_v15 = vld [vmem:[#allocation8 + $0x3c8] sm:$0xff]  ;;  %v2587_v58 = vld [vmem:[#allocation8 + $0x450] sm:$0xff]  ;;  %v2596_v2 = vld [vmem:[#allocation8 + $0x498] sm:$0xff] }
 0x278   :  { %6531 = vmatpush1.bf16.msra.mxu1 %v6530_v23  ;;  %6021 = vmatprep.subr.bf16.mxu0 %v6020_v24  ;;  %v6036_v23 = vpack.c.bf16 %v2542_v17, %v2538_v16  ;;  %v2537_v24 = vld [vmem:[#allocation8 + $0x2c0] sm:$0xff]  ;;  %v2574_v16 = vld [vmem:[#allocation8 + $0x3e8] sm:$0xff]  ;;  %v2572_v17 = vld [vmem:[#allocation8 + $0x3d8] sm:$0xff] }
 0x279   :  { %6533 = vmatprep.subr.bf16.mxu1 %v6532_v28  ;;  %v2543_v28 = vld [vmem:[#allocation8 + $0x2f0] sm:$0xff]  ;;  %v6038_v36 = vpack.c.bf16 %v2541_v22, %v2537_v24  ;;  %v6564_v22 = vpack.c.bf16 %v2576_v18, %v2572_v17  ;;  %v2600_v4 = vld [vmem:[#allocation8 + $0x4b8] sm:$0xff] }
 0x27a   :  { %v2571_v24 = vld [vmem:[#allocation8 + $0x3d0] sm:$0xff]  ;;  %v2604_v17 = vld [vmem:[#allocation8 + $0x4d8] sm:$0xff] }
 0x27b   :  { %6023 = vmatpush1.bf16.msra.mxu0 %v6022_v38  ;;  %v2385_v38 = vmul.f32 1.442695, %v2369_v20  ;;  %v6052_v20 = vpack.c.bf16 %v2574_v16, %v2570_v15  ;;  %v2602_v15 = vld [vmem:[#allocation8 + $0x4c8] sm:$0xff]  ;;  %v2608_v18 = vld [vmem:[#allocation8 + $0x4f8] sm:$0xff] }
 0x27c   :  { %6535 = vmatpush1.bf16.msra.mxu1 %v6534_v41  ;;  %6025 = vmatprep.subr.bf16.mxu0 %v6024_v44  ;;  %v6550_v41 = vpack.c.bf16 %v2543_v28, %v2539_v27  ;;  %v6040_v44 = vpack.c.bf16 %v2550_v30, %v2546_v31  ;;  %v2575_v27 = vld [vmem:[#allocation8 + $0x3f0] sm:$0xff]  ;;  %v2582_v28 = vld [vmem:[#allocation8 + $0x428] sm:$0xff]  ;;  %v2580_v30 = vld [vmem:[#allocation8 + $0x418] sm:$0xff] }
 0x27d   :  { %6537 = vmatprep.subr.bf16.mxu1 %v6536_v25  ;;  %v6552_v25 = vpack.c.bf16 %v2552_v34, %v2548_v33  ;;  %7158 = vpow2.f32 %v2385_v38  ;;  %v6568_v47 = vpack.c.bf16 %v2584_v46, %v2580_v30  ;;  %v2606_v16 = vld [vmem:[#allocation8 + $0x4e8] sm:$0xff] }
 0x27e   :  { %7160 = vpow2.f32 %v2391_v52 }
 0x27f   :  { %6027 = vmatpush1.bf16.msra.mxu0 %v6026_v54  ;;  %v2560_v54 = vld [vmem:[#allocation8 + $0x378] sm:$0xff] }
 0x280   :  { %6539 = vmatpush1.bf16.msra.mxu1 %v6538_v56  ;;  %6029 = vmatprep.subr.bf16.mxu0 %v6028_v57  ;;  %v6554_v56 = vpack.c.bf16 %v2551_v49, %v2547_v48  ;;  %v6044_v57 = vpack.c.bf16 %v2558_v43, %v2554_v50  ;;  %v2579_v48 = vld [vmem:[#allocation8 + $0x410] sm:$0xff]  ;;  %v2586_v49 = vld [vmem:[#allocation8 + $0x448] sm:$0xff] }
 0x281   :  { %6541 = vmatprep.subr.bf16.mxu1 %v6540_v11  ;;  %v6556_v11 = vpack.c.bf16 %v2560_v54, %v2556_v53  ;;  %v2590_v50 = vld [vmem:[#allocation8 + $0x468] sm:$0xff]  ;;  %v2588_v53 = vld [vmem:[#allocation8 + $0x458] sm:$0xff] }
 0x282   :  { %v2592_v54 = vld [vmem:[#allocation8 + $0x478] sm:$0xff] }
 0x283   :  { %6031 = vmatpush1.bf16.msra.mxu0 %v6030_v6  ;;  %v6558_v6 = vpack.c.bf16 %v2559_v62, %v2555_v60  ;;  %v6060_v60 = vpack.c.bf16 %v2590_v50, %v2586_v49  ;;  %v2594_v62 = vld [vmem:[#allocation8 + $0x488] sm:$0xff] }
 0x284   :  { %6543 = vmatpush1.bf16.msra.mxu1 %v6542_v8  ;;  %6033 = vmatprep.subr.bf16.mxu0 %v6032_v9  ;;  %v6048_v8 = vpack.c.bf16 %v2566_v1, %v2562_v63  ;;  %v2561_v9 = vld [vmem:[#allocation8 + $0x380] sm:$0xff]  ;;  %v2598_v63 = vld [vmem:[#allocation8 + $0x4a8] sm:$0xff]  ;;  %v6572_v1 = vpack.c.bf16 %v2592_v54, %v2588_v53  ;;  %v2619_v54 = vld [vmem:[#allocation8 + $0x550] sm:$0xff] }
 0x285   :  { %6545 = vmatprep.subr.bf16.mxu1 %v6544_v14  ;;  %v2567_v14 = vld [vmem:[#allocation8 + $0x3b0] sm:$0xff]  ;;  %v6050_v19 = vpack.c.bf16 %v2565_v10, %v2561_v9  ;;  %v2593_v9 = vld [vmem:[#allocation8 + $0x480] sm:$0xff] }
 0x286   :  { %v2597_v10 = vld [vmem:[#allocation8 + $0x4a0] sm:$0xff] }
 0x287   :  { %6035 = vmatpush1.bf16.msra.mxu0 %v6034_v37  ;;  %v6562_v37 = vpack.c.bf16 %v2567_v14, %v2563_v12  ;;  %v7159_v31 = vpop.eup %7158  ;;  %v2595_v12 = vld [vmem:[#allocation8 + $0x490] sm:$0xff]  ;;  %v2621_v53 = vld [vmem:[#allocation8 + $0x560] sm:$0xff] }
 0x288   :  { %6547 = vmatpush1.bf16.msra.mxu1 %v6546_v21  ;;  %6037 = vmatprep.subr.bf16.mxu0 %v6036_v23  ;;  %v2569_v21 = vld [vmem:[#allocation8 + $0x3c0] sm:$0xff]  ;;  %v7161_v34 = vpop.eup %7160  ;;  %v4878_v45 = vadd.f32 -1.0, %v7159_v31  ;;  %v2599_v14 = vld [vmem:[#allocation8 + $0x4b0] sm:$0xff]  ;;  %v2616_v31 = vld [vmem:[#allocation8 + $0x538] sm:$0xff] }
 0x289   :  { %6549 = vmatprep.subr.bf16.mxu1 %v6548_v26  ;;  %v2573_v23 = vld [vmem:[#allocation8 + $0x3e0] sm:$0xff]  ;;  %v2578_v26 = vld [vmem:[#allocation8 + $0x408] sm:$0xff]  ;;  %v4881_v52 = vadd.f32 -1.0, %v7161_v34 }
 0x28a   :  { %v6054_v33 = vpack.c.bf16 %v2573_v23, %v2569_v21  ;;  %v6056_v38 = vpack.c.bf16 %v2582_v28, %v2578_v26  ;;  %v2433_v59 = vsel %vm2353_vm1, %v7542_v7, %v4878_v45  ;;  %v6064_v7 = vpack.c.bf16 %v2598_v63, %v2594_v62  ;;  %v2605_v21 = vld [vmem:[#allocation8 + $0x4e0] sm:$0xff]  ;;  %v2603_v23 = vld [vmem:[#allocation8 + $0x4d0] sm:$0xff]  ;;  %v2614_v26 = vld [vmem:[#allocation8 + $0x528] sm:$0xff] }
 0x28b   :  { %6039 = vmatpush1.bf16.msra.mxu0 %v6038_v36  ;;  %v6566_v36 = vpack.c.bf16 %v2575_v27, %v2571_v24  ;;  %v6580_v24 = vpack.c.bf16 %v2608_v18, %v2604_v17  ;;  %v2610_v27 = vld [vmem:[#allocation8 + $0x508] sm:$0xff]  ;;  %v2612_v28 = vld [vmem:[#allocation8 + $0x518] sm:$0xff]  ;;  %v2609_v34 = vld [vmem:[#allocation8 + $0x500] sm:$0xff] }
 0x28c   :  { %6551 = vmatpush1.bf16.msra.mxu1 %v6550_v41  ;;  %6041 = vmatprep.subr.bf16.mxu0 %v6040_v44  ;;  %v2577_v41 = vld [vmem:[#allocation8 + $0x400] sm:$0xff]  ;;  %v2618_v45 = vld [vmem:[#allocation8 + $0x548] sm:$0xff] }
 0x28d   :  { %6553 = vmatprep.subr.bf16.mxu1 %v6552_v25  ;;  %v2581_v44 = vld [vmem:[#allocation8 + $0x420] sm:$0xff]  ;;  %v2583_v25 = vld [vmem:[#allocation8 + $0x430] sm:$0xff] }
 0x28e   :  { %v6058_v43 = vpack.c.bf16 %v2581_v44, %v2577_v41  ;;  %v6584_v41 = vpack.c.bf16 %v2616_v31, %v2612_v28  ;;  %v2615_v44 = vld [vmem:[#allocation8 + $0x530] sm:$0xff]  ;;  %v7562_v28 = vsub.s32 2, %v7446_v61 }
 0x28f   :  { %6043 = vmatpush1.bf16.msra.mxu0 %v6042_v55  ;;  %v6570_v55 = vpack.c.bf16 %v2583_v25, %v2579_v48  ;;  %v2620_v48 = vld [vmem:[#allocation8 + $0x558] sm:$0xff] }
 0x290   :  { %6555 = vmatpush1.bf16.msra.mxu1 %v6554_v56  ;;  %6045 = vmatprep.subr.bf16.mxu0 %v6044_v57  ;;  %v2585_v56 = vld [vmem:[#allocation8 + $0x440] sm:$0xff]  ;;  %v2624_v25 = vld [vmem:[#allocation8 + $0x578] sm:$0xff] }
 0x291   :  { %6557 = vmatprep.subr.bf16.mxu1 %v6556_v11  ;;  %v2589_v57 = vld [vmem:[#allocation8 + $0x460] sm:$0xff]  ;;  %v2591_v11 = vld [vmem:[#allocation8 + $0x470] sm:$0xff] }
 0x293   :  { %6047 = vmatpush1.bf16.msra.mxu0 %v6046_v5  ;;  %v2436_v5 = vsel %vm2356_vm2, %v7545_v3, %v4881_v52  ;;  %v6578_v3 = vpack.c.bf16 %v2599_v14, %v2595_v12  ;;  %v2617_v52 = vld [vmem:[#allocation8 + $0x540] sm:$0xff]  ;;  %v2640_v14 = vld [vmem:[#allocation8 + $0x5f8] sm:$0xff] }
 0x294   :  { %6559 = vmatpush1.bf16.msra.mxu1 %v6558_v6  ;;  %6049 = vmatprep.subr.bf16.mxu0 %v6048_v8  ;;  %v6062_v6 = vpack.c.bf16 %v2589_v57, %v2585_v56  ;;  %v6574_v8 = vpack.c.bf16 %v2591_v11, %v2587_v58  ;;  %v2623_v56 = vld [vmem:[#allocation8 + $0x570] sm:$0xff]  ;;  %v2626_v57 = vld [vmem:[#allocation8 + $0x588] sm:$0xff]  ;;  %v6078_v11 = vpack.c.bf16 %v2621_v53, %v2617_v52  ;;  %v2649_v53 = vld [vmem:[#allocation8 + $0x640] sm:$0xff] }
 0x295   :  { %6561 = vmatprep.subr.bf16.mxu1 %v6560_v13  ;;  %v6576_v13 = vpack.c.bf16 %v2600_v4, %v2596_v2  ;;  %v2630_v58 = vld [vmem:[#allocation8 + $0x5a8] sm:$0xff]  ;;  %v6590_v62 = vpack.c.bf16 %v2623_v56, %v2619_v54  ;;  %v2629_v2 = vld [vmem:[#allocation8 + $0x5a0] sm:$0xff]  ;;  %v2627_v4 = vld [vmem:[#allocation8 + $0x590] sm:$0xff] }
 0x296   :  { %v6080_v63 = vpack.c.bf16 %v2630_v58, %v2626_v57  ;;  %v2653_v54 = vld [vmem:[#allocation8 + $0x660] sm:$0xff]  ;;  %v2655_v57 = vld [vmem:[#allocation8 + $0x670] sm:$0xff]  ;;  %v2658_v58 = vld [vmem:[#allocation8 + $0x688] sm:$0xff] }
 0x297   :  { %6051 = vmatpush1.bf16.msra.mxu0 %v6050_v19  ;;  %v6066_v19 = vpack.c.bf16 %v2597_v10, %v2593_v9  ;;  %v2638_v9 = vld [vmem:[#allocation8 + $0x5e8] sm:$0xff] }
 0x298   :  { %6563 = vmatpush1.bf16.msra.mxu1 %v6562_v37  ;;  %6053 = vmatprep.subr.bf16.mxu0 %v6052_v20  ;;  %v6068_v37 = vpack.c.bf16 %v2606_v16, %v2602_v15  ;;  %v2601_v20 = vld [vmem:[#allocation8 + $0x4c0] sm:$0xff] }
 0x299   :  { %6565 = vmatprep.subr.bf16.mxu1 %v6564_v22  ;;  %v2607_v22 = vld [vmem:[#allocation8 + $0x4f0] sm:$0xff]  ;;  %v6070_v30 = vpack.c.bf16 %v2605_v21, %v2601_v20 }
 0x29a   :  { %v6582_v46 = vpack.c.bf16 %v2607_v22, %v2603_v23  ;;  %v2639_v21 = vld [vmem:[#allocation8 + $0x5f0] sm:$0xff]  ;;  %v2642_v23 = vld [vmem:[#allocation8 + $0x608] sm:$0xff]  ;;  %v2644_v22 = vld [vmem:[#allocation8 + $0x618] sm:$0xff] }
 0x29b   :  { %6055 = vmatpush1.bf16.msra.mxu0 %v6054_v33  ;;  %v6072_v33 = vpack.c.bf16 %v2614_v26, %v2610_v27  ;;  %v2648_v27 = vld [vmem:[#allocation8 + $0x638] sm:$0xff] }
 0x29c   :  { %6567 = vmatpush1.bf16.msra.mxu1 %v6566_v36  ;;  %6057 = vmatprep.subr.bf16.mxu0 %v6056_v38  ;;  %v2613_v36 = vld [vmem:[#allocation8 + $0x520] sm:$0xff]  ;;  %v2611_v38 = vld [vmem:[#allocation8 + $0x510] sm:$0xff] }
 0x29d   :  { %6569 = vmatprep.subr.bf16.mxu1 %v6568_v47  ;;  %v2622_v47 = vld [vmem:[#allocation8 + $0x568] sm:$0xff]  ;;  %v6074_v49 = vpack.c.bf16 %v2613_v36, %v2609_v34  ;;  %v6586_v50 = vpack.c.bf16 %v2615_v44, %v2611_v38  ;;  %v2643_v34 = vld [vmem:[#allocation8 + $0x610] sm:$0xff]  ;;  %v6600_v36 = vpack.c.bf16 %v2648_v27, %v2644_v22 }
 0x29e   :  { %3560 = vmatmul.mubr.f32.vlgmr.msra.gmra.mrb[8].mxu0 %v2433_v59  ;;  %v2647_v38 = vld [vmem:[#allocation8 + $0x630] sm:$0xff]  ;;  %v2654_v44 = vld [vmem:[#allocation8 + $0x668] sm:$0xff] }
 0x29f   :  { %4128 = vmatmul.mubr.f32.vlgmr.msra.gmra.mrb[8].mxu1 %v2433_v59  ;;  %6059 = vmatpush1.bf16.msra.mxu0 %v6058_v43  ;;  %v6076_v43 = vpack.c.bf16 %v2622_v47, %v2618_v45  ;;  %v2628_v59 = vld [vmem:[#allocation8 + $0x598] sm:$0xff]  ;;  %v1137_v45 = vsub.s32 5, %v7446_v61  ;;  %v2671_v27 = vld [vmem:[#allocation8 + $0x6f0] sm:$0xff] }
 0x2a0   :  { %3630 = vmatprep.mubr.f32.mxu0 %v2436_v5  ;;  %6571 = vmatpush1.bf16.msra.mxu1 %v6570_v55  ;;  %v6588_v55 = vpack.c.bf16 %v2624_v25, %v2620_v48  ;;  %v2652_v47 = vld [vmem:[#allocation8 + $0x658] sm:$0xff] }
 0x2a1   :  { %4198 = vmatprep.mubr.f32.mxu1 %v2436_v5  ;;  %6061 = vmatprep.subr.bf16.mxu0 %v6060_v60  ;;  %v2632_v60 = vld [vmem:[#allocation8 + $0x5b8] sm:$0xff] }
 0x2a2   :  { %6573 = vmatprep.subr.bf16.mxu1 %v6572_v1  ;;  %v2625_v1 = vld [vmem:[#allocation8 + $0x580] sm:$0xff]  ;;  %v2656_v48 = vld [vmem:[#allocation8 + $0x678] sm:$0xff] }
 0x2a3   :  { %6063 = vmatpush1.bf16.msra.mxu0 %v6062_v6  ;;  %v6592_v6 = vpack.c.bf16 %v2632_v60, %v2628_v59  ;;  %v6082_v16 = vpack.c.bf16 %v2629_v2, %v2625_v1  ;;  %v6604_v56 = vpack.c.bf16 %v2656_v48, %v2652_v47  ;;  %v2662_v59 = vld [vmem:[#allocation8 + $0x6a8] sm:$0xff]  ;;  %v2675_v47 = vld [vmem:[#allocation8 + $0x710] sm:$0xff] }
 0x2a4   :  { %6575 = vmatpush1.bf16.msra.mxu1 %v6574_v8  ;;  %6065 = vmatprep.subr.bf16.mxu0 %v6064_v7  ;;  %v2631_v8 = vld [vmem:[#allocation8 + $0x5b0] sm:$0xff]  ;;  %v2634_v7 = vld [vmem:[#allocation8 + $0x5c8] sm:$0xff] }
 0x2a5   :  { %6577 = vmatprep.subr.bf16.mxu1 %v6576_v13  ;;  %v2636_v13 = vld [vmem:[#allocation8 + $0x5d8] sm:$0xff]  ;;  %v6594_v17 = vpack.c.bf16 %v2631_v8, %v2627_v4  ;;  %v6084_v18 = vpack.c.bf16 %v2638_v9, %v2634_v7  ;;  %v6096_v4 = vpack.c.bf16 %v2662_v59, %v2658_v58  ;;  %v2661_v8 = vld [vmem:[#allocation8 + $0x6a0] sm:$0xff]  ;;  %v2659_v7 = vld [vmem:[#allocation8 + $0x690] sm:$0xff] }
 0x2a6   :  { %v6596_v20 = vpack.c.bf16 %v2640_v14, %v2636_v13  ;;  %v2663_v13 = vld [vmem:[#allocation8 + $0x6b0] sm:$0xff]  ;;  %v2666_v14 = vld [vmem:[#allocation8 + $0x6c8] sm:$0xff]  ;;  %v2681_v58 = vld [vmem:[#allocation8 + $0x740] sm:$0xff] }
 0x2a7   :  { %6067 = vmatpush1.bf16.msra.mxu0 %v6066_v19  ;;  %v2633_v19 = vld [vmem:[#allocation8 + $0x5c0] sm:$0xff] }
 0x2a8   :  { %6579 = vmatpush1.bf16.msra.mxu1 %v6578_v3  ;;  %6069 = vmatprep.subr.bf16.mxu0 %v6068_v37  ;;  %v2637_v3 = vld [vmem:[#allocation8 + $0x5e0] sm:$0xff]  ;;  %v2635_v37 = vld [vmem:[#allocation8 + $0x5d0] sm:$0xff] }
 0x2a9   :  { %6581 = vmatprep.subr.bf16.mxu1 %v6580_v24  ;;  %v2646_v24 = vld [vmem:[#allocation8 + $0x628] sm:$0xff]  ;;  %v6086_v26 = vpack.c.bf16 %v2637_v3, %v2633_v19  ;;  %v6598_v31 = vpack.c.bf16 %v2639_v21, %v2635_v37  ;;  %v2672_v19 = vld [vmem:[#allocation8 + $0x6f8] sm:$0xff]  ;;  %v6610_v37 = vpack.c.bf16 %v2663_v13, %v2659_v7  ;;  %v2665_v21 = vld [vmem:[#allocation8 + $0x6c0] sm:$0xff] }
 0x2aa   :  { %v2685_v59 = vld [vmem:[#allocation8 + $0x760] sm:$0xff] }
 0x2ab   :  { %6071 = vmatpush1.bf16.msra.mxu0 %v6070_v30  ;;  %v6088_v30 = vpack.c.bf16 %v2646_v24, %v2642_v23  ;;  %v2669_v23 = vld [vmem:[#allocation8 + $0x6e0] sm:$0xff]  ;;  %v2667_v24 = vld [vmem:[#allocation8 + $0x6d0] sm:$0xff] }
 0x2ac   :  { %6583 = vmatpush1.bf16.msra.mxu1 %v6582_v46  ;;  %6073 = vmatprep.subr.bf16.mxu0 %v6072_v33  ;;  %v2641_v46 = vld [vmem:[#allocation8 + $0x600] sm:$0xff] }
 0x2ad   :  { %6585 = vmatprep.subr.bf16.mxu1 %v6584_v41  ;;  %v2645_v33 = vld [vmem:[#allocation8 + $0x620] sm:$0xff]  ;;  %v2650_v41 = vld [vmem:[#allocation8 + $0x648] sm:$0xff] }
 0x2ae   :  { %v6090_v25 = vpack.c.bf16 %v2645_v33, %v2641_v46  ;;  %v6092_v52 = vpack.c.bf16 %v2654_v44, %v2650_v41  ;;  %v2680_v46 = vld [vmem:[#allocation8 + $0x738] sm:$0xff]  ;;  %v6102_v33 = vpack.c.bf16 %v2669_v23, %v2665_v21  ;;  %v2673_v41 = vld [vmem:[#allocation8 + $0x700] sm:$0xff] }
 0x2af   :  { %6075 = vmatpush1.bf16.msra.mxu0 %v6074_v49  ;;  %v7565_v49 = vld [vmem:[#allocation7] sm:$0xff]  ;;  %v2677_v44 = vld [vmem:[#allocation8 + $0x720] sm:$0xff] }
 0x2b0   :  { %6587 = vmatpush1.bf16.msra.mxu1 %v6586_v50  ;;  %6077 = vmatprep.subr.bf16.mxu0 %v6076_v43  ;;  %v1126_v50 = vrot.slane %v7565_v49, %v7562_v28  ;;  %v6602_v43 = vpack.c.bf16 %v2647_v38, %v2643_v34  ;;  %v1138_v60 = vrot.slane %v7565_v49, %v1137_v45  ;;  %v2689_v13 = vld [vmem:[#allocation8 + $0x780] sm:$0xff] }
 0x2b1   :  { %v7553_v5 = vpop.f32.mrb[4].mxu0  ;;  %6589 = vmatprep.subr.bf16.mxu1 %v6588_v55  ;;  %v2651_v55 = vld [vmem:[#allocation8 + $0x650] sm:$0xff] }
 0x2b2   :  { %v7555_v10 = vpop.f32.mrb[4].mxu1  ;;  %v7557_v12 = vpop.f32.mrb[5].mxu0  ;;  %v7573_v1 = vadd.f32 %v7494_v42, %v1126_v50  ;;  %v6606_v2 = vpack.c.bf16 %v2655_v57, %v2651_v55  ;;  %v2682_v50 = vld [vmem:[#allocation8 + $0x748] sm:$0xff]  ;;  %v6106_v55 = vpack.c.bf16 %v2677_v44, %v2673_v41 }
 0x2b3   :  { %v7559_v15 = vpop.f32.mrb[5].mxu1  ;;  %6079 = vmatpush1.bf16.msra.mxu0 %v6078_v11  ;;  %v2660_v11 = vld [vmem:[#allocation8 + $0x698] sm:$0xff] }
 0x2b4   :  { %6591 = vmatpush1.bf16.msra.mxu1 %v6590_v62  ;;  %6081 = vmatprep.subr.bf16.mxu0 %v6080_v63  ;;  %v2664_v62 = vld [vmem:[#allocation8 + $0x6b8] sm:$0xff]  ;;  %v6094_v63 = vpack.c.bf16 %v2653_v54, %v2649_v53  ;;  %v2371_v3 = vmin.f32 %v7573_v1, 0.0  ;;  %vm2355_vm3 = vcmp.gt.f32.partialorder %v7573_v1, 0.0 }
 0x2b5   :  { %6593 = vmatprep.subr.bf16.mxu1 %v6592_v6  ;;  %v2657_v6 = vld [vmem:[#allocation8 + $0x680] sm:$0xff]  ;;  %v6608_v9 = vpack.c.bf16 %v2664_v62, %v2660_v11  ;;  %v2684_v53 = vld [vmem:[#allocation8 + $0x758] sm:$0xff]  ;;  %v2687_v62 = vld [vmem:[#allocation8 + $0x770] sm:$0xff] }
 0x2b6   :  { %v6098_v42 = vpack.c.bf16 %v2661_v8, %v2657_v6  ;;  %v2389_v34 = vmul.f32 1.442695, %v2371_v3  ;;  %v2688_v54 = vld [vmem:[#allocation8 + $0x778] sm:$0xff]  ;;  %v6110_v8 = vpack.c.bf16 %v2685_v59, %v2681_v58  ;;  %v2702_v3 = vld [vmem:[#allocation8 + $0x7e8] sm:$0xff] }
 0x2b7   :  { %6083 = vmatpush1.bf16.msra.mxu0 %v6082_v16  ;;  %v2670_v16 = vld [vmem:[#allocation8 + $0x6e8] sm:$0xff]  ;;  %v6620_v11 = vpack.c.bf16 %v2688_v54, %v2684_v53  ;;  %v2696_v6 = vld [vmem:[#allocation8 + $0x7b8] sm:$0xff]  ;;  %v2711_v53 = vld [vmem:[#allocation8 + $0x830] sm:$0xff] }
 0x2b8   :  { %6595 = vmatpush1.bf16.msra.mxu1 %v6594_v17  ;;  %6085 = vmatprep.subr.bf16.mxu0 %v6084_v18  ;;  %v7576_v17 = vadd.f32 %v7512_v35, %v1138_v60  ;;  %v2668_v18 = vld [vmem:[#allocation8 + $0x6d8] sm:$0xff]  ;;  %7162 = vpow2.f32 %v2389_v34  ;;  %v2683_v60 = vld [vmem:[#allocation8 + $0x750] sm:$0xff]  ;;  %v2714_v54 = vld [vmem:[#allocation8 + $0x848] sm:$0xff] }
 0x2b9   :  { %6597 = vmatprep.subr.bf16.mxu1 %v6596_v20  ;;  %v6100_v20 = vpack.c.bf16 %v2670_v16, %v2666_v14  ;;  %v6612_v22 = vpack.c.bf16 %v2672_v19, %v2668_v18  ;;  %v6622_v7 = vpack.c.bf16 %v2687_v62, %v2683_v60  ;;  %v2693_v14 = vld [vmem:[#allocation8 + $0x7a0] sm:$0xff]  ;;  %v2691_v16 = vld [vmem:[#allocation8 + $0x790] sm:$0xff]  ;;  %v2708_v34 = vld [vmem:[#allocation8 + $0x818] sm:$0xff] }
 0x2ba   :  { %v2374_v35 = vmin.f32 %v7576_v17, 0.0  ;;  %v2695_v19 = vld [vmem:[#allocation8 + $0x7b0] sm:$0xff]  ;;  %v6114_v21 = vpack.c.bf16 %v2693_v14, %v2689_v13  ;;  %v2716_v58 = vld [vmem:[#allocation8 + $0x858] sm:$0xff]  ;;  %v2717_v62 = vld [vmem:[#allocation8 + $0x860] sm:$0xff]  ;;  %vm2358_vm4 = vcmp.gt.f32.partialorder %v7576_v17, 0.0 }
 0x2bb   :  { %6087 = vmatpush1.bf16.msra.mxu0 %v6086_v26  ;;  %v2674_v26 = vld [vmem:[#allocation8 + $0x708] sm:$0xff]  ;;  %v6626_v23 = vpack.c.bf16 %v2695_v19, %v2691_v16  ;;  %v2720_v59 = vld [vmem:[#allocation8 + $0x878] sm:$0xff] }
 0x2bc   :  { %6599 = vmatpush1.bf16.msra.mxu1 %v6598_v31  ;;  %6089 = vmatprep.subr.bf16.mxu0 %v6088_v30  ;;  %v2678_v31 = vld [vmem:[#allocation8 + $0x728] sm:$0xff]  ;;  %v2676_v30 = vld [vmem:[#allocation8 + $0x718] sm:$0xff] }
 0x2bd   :  { %6601 = vmatprep.subr.bf16.mxu1 %v6600_v36  ;;  %v6614_v36 = vpack.c.bf16 %v2671_v27, %v2667_v24  ;;  %v6104_v38 = vpack.c.bf16 %v2678_v31, %v2674_v26  ;;  %v6616_v48 = vpack.c.bf16 %v2680_v46, %v2676_v30  ;;  %v2701_v27 = vld [vmem:[#allocation8 + $0x7e0] sm:$0xff]  ;;  %v2699_v26 = vld [vmem:[#allocation8 + $0x7d0] sm:$0xff]  ;;  %v2706_v30 = vld [vmem:[#allocation8 + $0x808] sm:$0xff] }
 0x2be   :  { %v2710_v46 = vld [vmem:[#allocation8 + $0x828] sm:$0xff]  ;;  %v2724_v13 = vld [vmem:[#allocation8 + $0x898] sm:$0xff] }
 0x2bf   :  { %6091 = vmatpush1.bf16.msra.mxu0 %v6090_v25  ;;  %v2679_v25 = vld [vmem:[#allocation8 + $0x730] sm:$0xff]  ;;  %v2728_v14 = vld [vmem:[#allocation8 + $0x8b8] sm:$0xff] }
 0x2c0   :  { %6603 = vmatpush1.bf16.msra.mxu1 %v6602_v43  ;;  %6093 = vmatprep.subr.bf16.mxu0 %v6092_v52  ;;  %v2686_v43 = vld [vmem:[#allocation8 + $0x768] sm:$0xff]  ;;  %v2395_v52 = vmul.f32 1.442695, %v2374_v35  ;;  %v2703_v35 = vld [vmem:[#allocation8 + $0x7f0] sm:$0xff] }
 0x2c1   :  { %6605 = vmatprep.subr.bf16.mxu1 %v6604_v56  ;;  %v6618_v56 = vpack.c.bf16 %v2679_v25, %v2675_v47  ;;  %v6108_v57 = vpack.c.bf16 %v2686_v43, %v2682_v50  ;;  %v6630_v44 = vpack.c.bf16 %v2703_v35, %v2699_v26  ;;  %v6120_v47 = vpack.c.bf16 %v2710_v46, %v2706_v30  ;;  %v2709_v25 = vld [vmem:[#allocation8 + $0x820] sm:$0xff]  ;;  %v2731_v46 = vld [vmem:[#allocation8 + $0x8d0] sm:$0xff] }
 0x2c2   :  { %7164 = vpow2.f32 %v2395_v52  ;;  %v2707_v52 = vld [vmem:[#allocation8 + $0x810] sm:$0xff]  ;;  %v2729_v35 = vld [vmem:[#allocation8 + $0x8c0] sm:$0xff] }
 0x2c3   :  { %6095 = vmatpush1.bf16.msra.mxu0 %v6094_v63  ;;  %v2690_v63 = vld [vmem:[#allocation8 + $0x788] sm:$0xff]  ;;  %v6634_v60 = vpack.c.bf16 %v2711_v53, %v2707_v52  ;;  %v2733_v30 = vld [vmem:[#allocation8 + $0x8e0] sm:$0xff]  ;;  %v2739_v52 = vld [vmem:[#allocation8 + $0x910] sm:$0xff] }
 0x2c4   :  { %6607 = vmatpush1.bf16.msra.mxu1 %v6606_v2  ;;  %6097 = vmatprep.subr.bf16.mxu0 %v6096_v4  ;;  %v2694_v2 = vld [vmem:[#allocation8 + $0x7a8] sm:$0xff]  ;;  %v2692_v4 = vld [vmem:[#allocation8 + $0x798] sm:$0xff] }
 0x2c5   :  { %6609 = vmatprep.subr.bf16.mxu1 %v6608_v9  ;;  %v6112_v9 = vpack.c.bf16 %v2694_v2, %v2690_v63  ;;  %v6624_v18 = vpack.c.bf16 %v2696_v6, %v2692_v4  ;;  %v2715_v63 = vld [vmem:[#allocation8 + $0x850] sm:$0xff] }
 0x2c6   :  { %v2719_v6 = vld [vmem:[#allocation8 + $0x870] sm:$0xff] }
 0x2c7   :  { %6099 = vmatpush1.bf16.msra.mxu0 %v6098_v42  ;;  %v2698_v42 = vld [vmem:[#allocation8 + $0x7c8] sm:$0xff]  ;;  %v6638_v19 = vpack.c.bf16 %v2719_v6, %v2715_v63  ;;  %v2749_v63 = vld [vmem:[#allocation8 + $0x960] sm:$0xff]  ;;  %v2751_v6 = vld [vmem:[#allocation8 + $0x970] sm:$0xff] }
 0x2c8   :  { %6611 = vmatpush1.bf16.msra.mxu1 %v6610_v37  ;;  %6101 = vmatprep.subr.bf16.mxu0 %v6100_v20  ;;  %v2700_v37 = vld [vmem:[#allocation8 + $0x7d8] sm:$0xff]  ;;  %v6116_v24 = vpack.c.bf16 %v2702_v3, %v2698_v42  ;;  %v2721_v42 = vld [vmem:[#allocation8 + $0x880] sm:$0xff] }
 0x2c9   :  { %6613 = vmatprep.subr.bf16.mxu1 %v6612_v22  ;;  %v2704_v20 = vld [vmem:[#allocation8 + $0x7f8] sm:$0xff]  ;;  %v2697_v22 = vld [vmem:[#allocation8 + $0x7c0] sm:$0xff] }
 0x2ca   :  { %v6628_v31 = vpack.c.bf16 %v2704_v20, %v2700_v37  ;;  %v2725_v3 = vld [vmem:[#allocation8 + $0x8a0] sm:$0xff]  ;;  %v2723_v37 = vld [vmem:[#allocation8 + $0x890] sm:$0xff]  ;;  %v6640_v20 = vpack.c.bf16 %v2728_v14, %v2724_v13  ;;  %v2760_v13 = vld [vmem:[#allocation8 + $0x9b8] sm:$0xff] }
 0x2cb   :  { %6103 = vmatpush1.bf16.msra.mxu0 %v6102_v33  ;;  %v7163_v33 = vpop.eup %7162  ;;  %v6130_v26 = vpack.c.bf16 %v2725_v3, %v2721_v42  ;;  %v2755_v42 = vld [vmem:[#allocation8 + $0x990] sm:$0xff] }
 0x2cc   :  { %6615 = vmatpush1.bf16.msra.mxu1 %v6614_v36  ;;  %6105 = vmatprep.subr.bf16.mxu0 %v6104_v38  ;;  %v2712_v36 = vld [vmem:[#allocation8 + $0x838] sm:$0xff]  ;;  %v6118_v38 = vpack.c.bf16 %v2701_v27, %v2697_v22  ;;  %v7165_v41 = vpop.eup %7164  ;;  %v4880_v50 = vadd.f32 -1.0, %v7163_v33 }
 0x2cd   :  { %6617 = vmatprep.subr.bf16.mxu1 %v6616_v48  ;;  %v2705_v48 = vld [vmem:[#allocation8 + $0x800] sm:$0xff]  ;;  %v6632_v43 = vpack.c.bf16 %v2712_v36, %v2708_v34  ;;  %v2732_v22 = vld [vmem:[#allocation8 + $0x8d8] sm:$0xff]  ;;  %v2735_v34 = vld [vmem:[#allocation8 + $0x8f0] sm:$0xff] }
 0x2ce   :  { %v2435_v2 = vsel %vm2355_vm3, %v7573_v1, %v4880_v50  ;;  %v2736_v27 = vld [vmem:[#allocation8 + $0x8f8] sm:$0xff]  ;;  %v2738_v36 = vld [vmem:[#allocation8 + $0x908] sm:$0xff]  ;;  %v2737_v50 = vld [vmem:[#allocation8 + $0x900] sm:$0xff] }
 0x2cf   :  { %6107 = vmatpush1.bf16.msra.mxu0 %v6106_v55  ;;  %v2718_v55 = vld [vmem:[#allocation8 + $0x868] sm:$0xff]  ;;  %v6644_v33 = vpack.c.bf16 %v2736_v27, %v2732_v22 }
 0x2d0   :  { %6619 = vmatpush1.bf16.msra.mxu1 %v6618_v56  ;;  %6109 = vmatprep.subr.bf16.mxu0 %v6108_v57  ;;  %v6122_v56 = vpack.c.bf16 %v2709_v25, %v2705_v48  ;;  %v4883_v57 = vadd.f32 -1.0, %v7165_v41  ;;  %v6124_v4 = vpack.c.bf16 %v2718_v55, %v2714_v54  ;;  %v2740_v41 = vld [vmem:[#allocation8 + $0x918] sm:$0xff]  ;;  %v6646_v48 = vpack.c.bf16 %v2735_v34, %v2731_v46  ;;  %v2743_v54 = vld [vmem:[#allocation8 + $0x930] sm:$0xff]  ;;  %v2746_v55 = vld [vmem:[#allocation8 + $0x948] sm:$0xff] }
 0x2d1   :  { %6621 = vmatprep.subr.bf16.mxu1 %v6620_v11  ;;  %v2713_v11 = vld [vmem:[#allocation8 + $0x840] sm:$0xff]  ;;  %v2767_v46 = vld [vmem:[#allocation8 + $0x9f0] sm:$0xff]  ;;  %v2774_v34 = vld [vmem:[#allocation8 + $0xa28] sm:$0xff] }
 0x2d2   :  { %v2438_v16 = vsel %vm2358_vm4, %v7576_v17, %v4883_v57  ;;  %v2748_v57 = vld [vmem:[#allocation8 + $0x958] sm:$0xff]  ;;  %vm4859_vm4 = vcmask 517120  }
 0x2d3   :  { %6111 = vmatpush1.bf16.msra.mxu0 %v6110_v8  ;;  %v2722_v8 = vld [vmem:[#allocation8 + $0x888] sm:$0xff] }
 0x2d4   :  { %6623 = vmatpush1.bf16.msra.mxu1 %v6622_v7  ;;  %6113 = vmatprep.subr.bf16.mxu0 %v6112_v9  ;;  %v2726_v7 = vld [vmem:[#allocation8 + $0x8a8] sm:$0xff]  ;;  %v6636_v9 = vpack.c.bf16 %v2720_v59, %v2716_v58  ;;  %v2752_v58 = vld [vmem:[#allocation8 + $0x978] sm:$0xff] }
 0x2d5   :  { %6625 = vmatprep.subr.bf16.mxu1 %v6624_v18  ;;  %v6126_v18 = vpack.c.bf16 %v2717_v62, %v2713_v11  ;;  %v6128_v1 = vpack.c.bf16 %v2726_v7, %v2722_v8  ;;  %v2745_v62 = vld [vmem:[#allocation8 + $0x940] sm:$0xff]  ;;  %v2754_v8 = vld [vmem:[#allocation8 + $0x988] sm:$0xff] }
 0x2d6   :  { %v2758_v7 = vld [vmem:[#allocation8 + $0x9a8] sm:$0xff]  ;;  %v6142_v14 = vpack.c.bf16 %v2749_v63, %v2745_v62  ;;  %v2777_v63 = vld [vmem:[#allocation8 + $0xa40] sm:$0xff] }
 0x2d7   :  { %6115 = vmatpush1.bf16.msra.mxu0 %v6114_v21  ;;  %v2727_v21 = vld [vmem:[#allocation8 + $0x8b0] sm:$0xff] }
 0x2d8   :  { %6627 = vmatpush1.bf16.msra.mxu1 %v6626_v23  ;;  %6117 = vmatprep.subr.bf16.mxu0 %v6116_v24  ;;  %v2730_v23 = vld [vmem:[#allocation8 + $0x8c8] sm:$0xff]  ;;  %v6642_v17 = vpack.c.bf16 %v2727_v21, %v2723_v37  ;;  %v2759_v37 = vld [vmem:[#allocation8 + $0x9b0] sm:$0xff] }
 0x2d9   :  { %6629 = vmatprep.subr.bf16.mxu1 %v6628_v31  ;;  %v2734_v24 = vld [vmem:[#allocation8 + $0x8e8] sm:$0xff]  ;;  %v6658_v27 = vpack.c.bf16 %v2759_v37, %v2755_v42  ;;  %v2789_v37 = vld [vmem:[#allocation8 + $0xaa0] sm:$0xff] }
 0x2da   :  { %v6132_v31 = vpack.c.bf16 %v2734_v24, %v2730_v23  ;;  %v2766_v21 = vld [vmem:[#allocation8 + $0x9e8] sm:$0xff]  ;;  %v2764_v23 = vld [vmem:[#allocation8 + $0x9d8] sm:$0xff] }
 0x2db   :  { %6119 = vmatpush1.bf16.msra.mxu0 %v6118_v38  ;;  %v2742_v38 = vld [vmem:[#allocation8 + $0x928] sm:$0xff]  ;;  %v2768_v24 = vld [vmem:[#allocation8 + $0x9f8] sm:$0xff] }
 0x2dc   :  { %6631 = vmatpush1.bf16.msra.mxu1 %v6630_v44  ;;  %6121 = vmatprep.subr.bf16.mxu0 %v6120_v47  ;;  %v2744_v44 = vld [vmem:[#allocation8 + $0x938] sm:$0xff]  ;;  %v6134_v47 = vpack.c.bf16 %v2733_v30, %v2729_v35  ;;  %v6136_v25 = vpack.c.bf16 %v2742_v38, %v2738_v36  ;;  %v2763_v35 = vld [vmem:[#allocation8 + $0x9d0] sm:$0xff]  ;;  %v6660_v30 = vpack.c.bf16 %v2768_v24, %v2764_v23  ;;  %v2794_v24 = vld [vmem:[#allocation8 + $0xac8] sm:$0xff] }
 0x2dd   :  { %6633 = vmatprep.subr.bf16.mxu1 %v6632_v43  ;;  %v2741_v43 = vld [vmem:[#allocation8 + $0x920] sm:$0xff]  ;;  %v6648_v53 = vpack.c.bf16 %v2744_v44, %v2740_v41  ;;  %v2772_v36 = vld [vmem:[#allocation8 + $0xa18] sm:$0xff]  ;;  %v1133_v44 = vsub.s32 4, %v7446_v61  ;;  %v2791_v23 = vld [vmem:[#allocation8 + $0xab0] sm:$0xff] }
 0x2de   :  { %3631 = vmatmul.mubr.f32.vlgmr.msra.gmra.mrb[8].mxu0 %v2435_v2  ;;  %v6138_v59 = vpack.c.bf16 %v2741_v43, %v2737_v50  ;;  %v2776_v38 = vld [vmem:[#allocation8 + $0xa38] sm:$0xff]  ;;  %v2773_v50 = vld [vmem:[#allocation8 + $0xa20] sm:$0xff]  ;;  %v2771_v43 = vld [vmem:[#allocation8 + $0xa10] sm:$0xff] }
 0x2df   :  { %4199 = vmatmul.mubr.f32.vlgmr.msra.gmra.mrb[8].mxu1 %v2435_v2  ;;  %6123 = vmatpush1.bf16.msra.mxu0 %v6122_v56  ;;  %v2750_v56 = vld [vmem:[#allocation8 + $0x968] sm:$0xff]  ;;  %v2747_v2 = vld [vmem:[#allocation8 + $0x950] sm:$0xff] }
 0x2e0   :  { %3701 = vmatprep.mubr.f32.mxu0 %v2438_v16  ;;  %6635 = vmatpush1.bf16.msra.mxu1 %v6634_v60  ;;  %v6650_v60 = vpack.c.bf16 %v2743_v54, %v2739_v52  ;;  %v6140_v11 = vpack.c.bf16 %v2750_v56, %v2746_v55  ;;  %v6664_v52 = vpack.c.bf16 %v2776_v38, %v2772_v36  ;;  %v2778_v54 = vld [vmem:[#allocation8 + $0xa48] sm:$0xff]  ;;  %v1145_v56 = vsub.s32 7, %v7446_v61  ;;  %v2799_v36 = vld [vmem:[#allocation8 + $0xaf0] sm:$0xff] }
 0x2e1   :  { %4269 = vmatprep.mubr.f32.mxu1 %v2438_v16  ;;  %6125 = vmatprep.subr.bf16.mxu0 %v6124_v4  ;;  %v6652_v4 = vpack.c.bf16 %v2752_v58, %v2748_v57  ;;  %v6654_v16 = vpack.c.bf16 %v2751_v6, %v2747_v2  ;;  %v2782_v55 = vld [vmem:[#allocation8 + $0xa68] sm:$0xff]  ;;  %v2780_v57 = vld [vmem:[#allocation8 + $0xa58] sm:$0xff]  ;;  %v2781_v2 = vld [vmem:[#allocation8 + $0xa60] sm:$0xff] }
 0x2e2   :  { %6637 = vmatprep.subr.bf16.mxu1 %v6636_v9  ;;  %v2756_v9 = vld [vmem:[#allocation8 + $0x998] sm:$0xff]  ;;  %v6156_v62 = vpack.c.bf16 %v2782_v55, %v2778_v54  ;;  %v2802_v38 = vld [vmem:[#allocation8 + $0xb08] sm:$0xff]  ;;  %v2805_v54 = vld [vmem:[#allocation8 + $0xb20] sm:$0xff] }
 0x2e3   :  { %6127 = vmatpush1.bf16.msra.mxu0 %v6126_v18  ;;  %v6144_v18 = vpack.c.bf16 %v2758_v7, %v2754_v8  ;;  %v6656_v3 = vpack.c.bf16 %v2760_v13, %v2756_v9  ;;  %v2784_v58 = vld [vmem:[#allocation8 + $0xa78] sm:$0xff]  ;;  %v2783_v8 = vld [vmem:[#allocation8 + $0xa70] sm:$0xff]  ;;  %v2786_v7 = vld [vmem:[#allocation8 + $0xa88] sm:$0xff]  ;;  %v1146_v13 = vrot.slane %v7565_v49, %v1145_v56 }
 0x2e4   :  { %6639 = vmatpush1.bf16.msra.mxu1 %v6638_v19  ;;  %6129 = vmatprep.subr.bf16.mxu0 %v6128_v1  ;;  %v2753_v19 = vld [vmem:[#allocation8 + $0x980] sm:$0xff]  ;;  %v6668_v6 = vpack.c.bf16 %v2784_v58, %v2780_v57  ;;  %v2790_v9 = vld [vmem:[#allocation8 + $0xaa8] sm:$0xff]  ;;  %v2803_v55 = vld [vmem:[#allocation8 + $0xb10] sm:$0xff] }
 0x2e5   :  { %6641 = vmatprep.subr.bf16.mxu1 %v6640_v20  ;;  %v2757_v1 = vld [vmem:[#allocation8 + $0x9a0] sm:$0xff]  ;;  %v2762_v20 = vld [vmem:[#allocation8 + $0x9c8] sm:$0xff]  ;;  %v6160_v42 = vpack.c.bf16 %v2790_v9, %v2786_v7  ;;  %v2807_v58 = vld [vmem:[#allocation8 + $0xb30] sm:$0xff] }
 0x2e6   :  { %v6146_v22 = vpack.c.bf16 %v2757_v1, %v2753_v19  ;;  %v2813_v7 = vld [vmem:[#allocation8 + $0xb60] sm:$0xff]  ;;  %v2811_v9 = vld [vmem:[#allocation8 + $0xb50] sm:$0xff] }
 0x2e7   :  { %6131 = vmatpush1.bf16.msra.mxu0 %v6130_v26  ;;  %v6148_v26 = vpack.c.bf16 %v2766_v21, %v2762_v20  ;;  %v2787_v20 = vld [vmem:[#allocation8 + $0xa90] sm:$0xff] }
 0x2e8   :  { %6643 = vmatpush1.bf16.msra.mxu1 %v6642_v17  ;;  %6133 = vmatprep.subr.bf16.mxu0 %v6132_v31  ;;  %v2761_v17 = vld [vmem:[#allocation8 + $0x9c0] sm:$0xff] }
 0x2e9   :  { %6645 = vmatprep.subr.bf16.mxu1 %v6644_v33  ;;  %v2765_v31 = vld [vmem:[#allocation8 + $0x9e0] sm:$0xff]  ;;  %v2770_v33 = vld [vmem:[#allocation8 + $0xa08] sm:$0xff] }
 0x2ea   :  { %v6150_v41 = vpack.c.bf16 %v2765_v31, %v2761_v17  ;;  %v6674_v31 = vpack.c.bf16 %v2791_v23, %v2787_v20  ;;  %v2821_v23 = vld [vmem:[#allocation8 + $0xba0] sm:$0xff] }
 0x2eb   :  { %6135 = vmatpush1.bf16.msra.mxu0 %v6134_v47  ;;  %v6662_v47 = vpack.c.bf16 %v2767_v46, %v2763_v35  ;;  %v2797_v46 = vld [vmem:[#allocation8 + $0xae0] sm:$0xff] }
 0x2ec   :  { %6647 = vmatpush1.bf16.msra.mxu1 %v6646_v48  ;;  %6137 = vmatprep.subr.bf16.mxu0 %v6136_v25  ;;  %v6152_v48 = vpack.c.bf16 %v2774_v34, %v2770_v33  ;;  %v2769_v25 = vld [vmem:[#allocation8 + $0xa00] sm:$0xff]  ;;  %v2795_v33 = vld [vmem:[#allocation8 + $0xad0] sm:$0xff] }
 0x2ed   :  { %6649 = vmatprep.subr.bf16.mxu1 %v6648_v53  ;;  %v2775_v53 = vld [vmem:[#allocation8 + $0xa30] sm:$0xff] }
 0x2ef   :  { %6139 = vmatpush1.bf16.msra.mxu0 %v6138_v59  ;;  %v6154_v59 = vpack.c.bf16 %v2773_v50, %v2769_v25 }
 0x2f0   :  { %6651 = vmatpush1.bf16.msra.mxu1 %v6650_v60  ;;  %6141 = vmatprep.subr.bf16.mxu0 %v6140_v11  ;;  %v1134_v60 = vrot.slane %v7565_v49, %v1133_v44  ;;  %v6666_v11 = vpack.c.bf16 %v2775_v53, %v2771_v43  ;;  %v7596_v49 = vadd.f32 %v7514_v39, %v1146_v13  ;;  %v2801_v53 = vld [vmem:[#allocation8 + $0xb00] sm:$0xff] }
 0x2f1   :  { %6653 = vmatprep.subr.bf16.mxu1 %v6652_v4  ;;  %v2779_v4 = vld [vmem:[#allocation8 + $0xa50] sm:$0xff]  ;;  %v6678_v43 = vpack.c.bf16 %v2799_v36, %v2795_v33  ;;  %v2825_v33 = vld [vmem:[#allocation8 + $0xbc0] sm:$0xff] }
 0x2f2   :  { %v7593_v19 = vadd.f32 %v7508_v29, %v1134_v60  ;;  %v6670_v1 = vpack.c.bf16 %v2783_v8, %v2779_v4  ;;  %v2376_v39 = vmin.f32 %v7596_v49, 0.0  ;;  %v2814_v60 = vld [vmem:[#allocation8 + $0xb68] sm:$0xff]  ;;  %v6682_v4 = vpack.c.bf16 %v2807_v58, %v2803_v55  ;;  %v2809_v8 = vld [vmem:[#allocation8 + $0xb40] sm:$0xff]  ;;  %v2827_v36 = vld [vmem:[#allocation8 + $0xbd0] sm:$0xff] }
 0x2f3   :  { %6143 = vmatpush1.bf16.msra.mxu0 %v6142_v14  ;;  %v2788_v14 = vld [vmem:[#allocation8 + $0xa98] sm:$0xff]  ;;  %v2833_v55 = vld [vmem:[#allocation8 + $0xc00] sm:$0xff]  ;;  %vm2360_vm6 = vcmp.gt.f32.partialorder %v7596_v49, 0.0 }
 0x2f4   :  { %6655 = vmatpush1.bf16.msra.mxu1 %v6654_v16  ;;  %6145 = vmatprep.subr.bf16.mxu0 %v6144_v18  ;;  %v2792_v16 = vld [vmem:[#allocation8 + $0xab8] sm:$0xff]  ;;  %v6158_v18 = vpack.c.bf16 %v2781_v2, %v2777_v63  ;;  %v2373_v17 = vmin.f32 %v7593_v19, 0.0  ;;  %v6170_v2 = vpack.c.bf16 %v2805_v54, %v2801_v53  ;;  %vm2357_vm5 = vcmp.gt.f32.partialorder %v7593_v19, 0.0 }
 0x2f5   :  { %6657 = vmatprep.subr.bf16.mxu1 %v6656_v3  ;;  %v2785_v3 = vld [vmem:[#allocation8 + $0xa80] sm:$0xff]  ;;  %v6672_v21 = vpack.c.bf16 %v2792_v16, %v2788_v14  ;;  %v2816_v63 = vld [vmem:[#allocation8 + $0xb78] sm:$0xff]  ;;  %v2815_v14 = vld [vmem:[#allocation8 + $0xb70] sm:$0xff] }
 0x2f6   :  { %v6162_v29 = vpack.c.bf16 %v2789_v37, %v2785_v3  ;;  %v2393_v50 = vmul.f32 1.442695, %v2373_v17  ;;  %v2818_v16 = vld [vmem:[#allocation8 + $0xb88] sm:$0xff]  ;;  %v6174_v3 = vpack.c.bf16 %v2813_v7, %v2809_v8  ;;  %v6686_v37 = vpack.c.bf16 %v2815_v14, %v2811_v9  ;;  %v2828_v17 = vld [vmem:[#allocation8 + $0xbd8] sm:$0xff]  ;;  %v2841_v9 = vld [vmem:[#allocation8 + $0xc40] sm:$0xff] }
 0x2f7   :  { %6147 = vmatpush1.bf16.msra.mxu0 %v6146_v22  ;;  %v2798_v22 = vld [vmem:[#allocation8 + $0xae8] sm:$0xff]  ;;  %v2848_v8 = vld [vmem:[#allocation8 + $0xc78] sm:$0xff]  ;;  %v2843_v14 = vld [vmem:[#allocation8 + $0xc50] sm:$0xff] }
 0x2f8   :  { %6659 = vmatpush1.bf16.msra.mxu1 %v6658_v27  ;;  %6149 = vmatprep.subr.bf16.mxu0 %v6148_v26  ;;  %v2796_v27 = vld [vmem:[#allocation8 + $0xad8] sm:$0xff]  ;;  %v6164_v35 = vpack.c.bf16 %v2798_v22, %v2794_v24  ;;  %7166 = vpow2.f32 %v2393_v50  ;;  %v2819_v24 = vld [vmem:[#allocation8 + $0xb90] sm:$0xff] }
 0x2f9   :  { %6661 = vmatprep.subr.bf16.mxu1 %v6660_v30  ;;  %v2800_v26 = vld [vmem:[#allocation8 + $0xaf8] sm:$0xff]  ;;  %v2793_v30 = vld [vmem:[#allocation8 + $0xac0] sm:$0xff] }
 0x2fa   :  { %v6676_v34 = vpack.c.bf16 %v2800_v26, %v2796_v27  ;;  %v6166_v25 = vpack.c.bf16 %v2797_v46, %v2793_v30  ;;  %v2823_v27 = vld [vmem:[#allocation8 + $0xbb0] sm:$0xff]  ;;  %v2826_v26 = vld [vmem:[#allocation8 + $0xbc8] sm:$0xff]  ;;  %v2840_v50 = vld [vmem:[#allocation8 + $0xc38] sm:$0xff] }
 0x2fb   :  { %6151 = vmatpush1.bf16.msra.mxu0 %v6150_v41  ;;  %v2806_v41 = vld [vmem:[#allocation8 + $0xb28] sm:$0xff]  ;;  %v6690_v30 = vpack.c.bf16 %v2823_v27, %v2819_v24  ;;  %v2849_v27 = vld [vmem:[#allocation8 + $0xc80] sm:$0xff] }
 0x2fc   :  { %6663 = vmatpush1.bf16.msra.mxu1 %v6662_v47  ;;  %6153 = vmatprep.subr.bf16.mxu0 %v6152_v48  ;;  %v2804_v47 = vld [vmem:[#allocation8 + $0xb18] sm:$0xff] }
 0x2fd   :  { %6665 = vmatprep.subr.bf16.mxu1 %v6664_v52  ;;  %v2808_v48 = vld [vmem:[#allocation8 + $0xb38] sm:$0xff]  ;;  %v6168_v52 = vpack.c.bf16 %v2806_v41, %v2802_v38  ;;  %v2831_v41 = vld [vmem:[#allocation8 + $0xbf0] sm:$0xff] }
 0x2fe   :  { %v6680_v57 = vpack.c.bf16 %v2808_v48, %v2804_v47  ;;  %v2838_v47 = vld [vmem:[#allocation8 + $0xc28] sm:$0xff]  ;;  %v6694_v53 = vpack.c.bf16 %v2831_v41, %v2827_v36  ;;  %v2861_v41 = vld [vmem:[#allocation8 + $0xce0] sm:$0xff] }
 0x2ff   :  { %6155 = vmatpush1.bf16.msra.mxu0 %v6154_v59  ;;  %v2810_v59 = vld [vmem:[#allocation8 + $0xb48] sm:$0xff] }
 0x300   :  { %6667 = vmatpush1.bf16.msra.mxu1 %v6666_v11  ;;  %6157 = vmatprep.subr.bf16.mxu0 %v6156_v62  ;;  %v2399_v11 = vmul.f32 1.442695, %v2376_v39  ;;  %v2812_v62 = vld [vmem:[#allocation8 + $0xb58] sm:$0xff]  ;;  %v2834_v39 = vld [vmem:[#allocation8 + $0xc08] sm:$0xff] }
 0x301   :  { %6669 = vmatprep.subr.bf16.mxu1 %v6668_v6  ;;  %v6172_v6 = vpack.c.bf16 %v2814_v60, %v2810_v59  ;;  %v6684_v13 = vpack.c.bf16 %v2816_v63, %v2812_v62  ;;  %v6184_v54 = vpack.c.bf16 %v2838_v47, %v2834_v39  ;;  %v2835_v60 = vld [vmem:[#allocation8 + $0xc10] sm:$0xff]  ;;  %v2842_v62 = vld [vmem:[#allocation8 + $0xc48] sm:$0xff] }
 0x302   :  { %7168 = vpow2.f32 %v2399_v11  ;;  %v7167_v48 = vpop.eup %7166  ;;  %v2839_v11 = vld [vmem:[#allocation8 + $0xc30] sm:$0xff]  ;;  %v2846_v63 = vld [vmem:[#allocation8 + $0xc68] sm:$0xff] }
 0x303   :  { %6159 = vmatpush1.bf16.msra.mxu0 %v6158_v18  ;;  %v2822_v18 = vld [vmem:[#allocation8 + $0xba8] sm:$0xff]  ;;  %v4882_v58 = vadd.f32 -1.0, %v7167_v48  ;;  %v6698_v7 = vpack.c.bf16 %v2839_v11, %v2835_v60  ;;  %v2859_v39 = vld [vmem:[#allocation8 + $0xcd0] sm:$0xff] }
 0x304   :  { %6671 = vmatpush1.bf16.msra.mxu1 %v6670_v1  ;;  %6161 = vmatprep.subr.bf16.mxu0 %v6160_v42  ;;  %v2820_v1 = vld [vmem:[#allocation8 + $0xb98] sm:$0xff]  ;;  %v6176_v20 = vpack.c.bf16 %v2822_v18, %v2818_v16  ;;  %v6188_v18 = vpack.c.bf16 %v2846_v63, %v2842_v62  ;;  %v2863_v48 = vld [vmem:[#allocation8 + $0xcf0] sm:$0xff]  ;;  %v2874_v62 = vld [vmem:[#allocation8 + $0xd48] sm:$0xff] }
 0x305   :  { %6673 = vmatprep.subr.bf16.mxu1 %v6672_v21  ;;  %v2824_v42 = vld [vmem:[#allocation8 + $0xbb8] sm:$0xff]  ;;  %v2817_v21 = vld [vmem:[#allocation8 + $0xb80] sm:$0xff]  ;;  %v2437_v16 = vsel %vm2357_vm5, %v7593_v19, %v4882_v58  ;;  %v2871_v11 = vld [vmem:[#allocation8 + $0xd30] sm:$0xff] }
 0x306   :  { %v6688_v22 = vpack.c.bf16 %v2824_v42, %v2820_v1  ;;  %v2847_v1 = vld [vmem:[#allocation8 + $0xc70] sm:$0xff]  ;;  %v2850_v42 = vld [vmem:[#allocation8 + $0xc88] sm:$0xff]  ;;  %v2869_v58 = vld [vmem:[#allocation8 + $0xd20] sm:$0xff] }
 0x307   :  { %6163 = vmatpush1.bf16.msra.mxu0 %v6162_v29  ;;  %v2830_v29 = vld [vmem:[#allocation8 + $0xbe8] sm:$0xff] }
 0x308   :  { %6675 = vmatpush1.bf16.msra.mxu1 %v6674_v31  ;;  %6165 = vmatprep.subr.bf16.mxu0 %v6164_v35  ;;  %v2832_v31 = vld [vmem:[#allocation8 + $0xbf8] sm:$0xff]  ;;  %v6178_v35 = vpack.c.bf16 %v2821_v23, %v2817_v21  ;;  %v6180_v46 = vpack.c.bf16 %v2830_v29, %v2826_v26  ;;  %v2853_v26 = vld [vmem:[#allocation8 + $0xca0] sm:$0xff]  ;;  %v2851_v29 = vld [vmem:[#allocation8 + $0xc90] sm:$0xff] }
 0x309   :  { %6677 = vmatprep.subr.bf16.mxu1 %v6676_v34  ;;  %v2829_v34 = vld [vmem:[#allocation8 + $0xbe0] sm:$0xff]  ;;  %v6692_v38 = vpack.c.bf16 %v2832_v31, %v2828_v17  ;;  %v2856_v21 = vld [vmem:[#allocation8 + $0xcb8] sm:$0xff]  ;;  %v2855_v31 = vld [vmem:[#allocation8 + $0xcb0] sm:$0xff] }
 0x30a   :  { %v2878_v63 = vld [vmem:[#allocation8 + $0xd68] sm:$0xff] }
 0x30b   :  { %6167 = vmatpush1.bf16.msra.mxu0 %v6166_v25  ;;  %v2836_v25 = vld [vmem:[#allocation8 + $0xc18] sm:$0xff] }
 0x30c   :  { %6679 = vmatpush1.bf16.msra.mxu1 %v6678_v43  ;;  %6169 = vmatprep.subr.bf16.mxu0 %v6168_v52  ;;  %v6182_v43 = vpack.c.bf16 %v2829_v34, %v2825_v33  ;;  %v7169_v52 = vpop.eup %7168  ;;  %v6696_v59 = vpack.c.bf16 %v2840_v50, %v2836_v25  ;;  %v2864_v33 = vld [vmem:[#allocation8 + $0xcf8] sm:$0xff]  ;;  %v6194_v34 = vpack.c.bf16 %v2853_v26, %v2849_v27  ;;  %v2866_v25 = vld [vmem:[#allocation8 + $0xd08] sm:$0xff] }
 0x30d   :  { %6681 = vmatprep.subr.bf16.mxu1 %v6680_v57  ;;  %v2837_v57 = vld [vmem:[#allocation8 + $0xc20] sm:$0xff]  ;;  %v2870_v50 = vld [vmem:[#allocation8 + $0xd28] sm:$0xff] }
 0x30f   :  { %6171 = vmatpush1.bf16.msra.mxu0 %v6170_v2  ;;  %v6186_v2 = vpack.c.bf16 %v2837_v57, %v2833_v55  ;;  %v6200_v55 = vpack.c.bf16 %v2870_v50, %v2866_v25  ;;  %v2865_v57 = vld [vmem:[#allocation8 + $0xd00] sm:$0xff]  ;;  %v2895_v25 = vld [vmem:[#allocation8 + $0xdf0] sm:$0xff]  ;;  %v2898_v50 = vld [vmem:[#allocation8 + $0xe08] sm:$0xff] }
 0x310   :  { %6683 = vmatpush1.bf16.msra.mxu1 %v6682_v4  ;;  %6173 = vmatprep.subr.bf16.mxu0 %v6172_v6  ;;  %v4885_v4 = vadd.f32 -1.0, %v7169_v52  ;;  %v2844_v6 = vld [vmem:[#allocation8 + $0xc58] sm:$0xff] }
 0x311   :  { %6685 = vmatprep.subr.bf16.mxu1 %v6684_v13  ;;  %v2845_v13 = vld [vmem:[#allocation8 + $0xc60] sm:$0xff]  ;;  %v2872_v52 = vld [vmem:[#allocation8 + $0xd38] sm:$0xff] }
 0x312   :  { %v2440_v23 = vsel %vm2360_vm6, %v7596_v49, %v4885_v4  ;;  %v6190_v24 = vpack.c.bf16 %v2845_v13, %v2841_v9  ;;  %v6706_v49 = vpack.c.bf16 %v2855_v31, %v2851_v29  ;;  %v2880_v4 = vld [vmem:[#allocation8 + $0xd78] sm:$0xff]  ;;  %v2873_v9 = vld [vmem:[#allocation8 + $0xd40] sm:$0xff]  ;;  %v2887_v29 = vld [vmem:[#allocation8 + $0xdb0] sm:$0xff] }
 0x313   :  { %6175 = vmatpush1.bf16.msra.mxu0 %v6174_v3  ;;  %v2854_v3 = vld [vmem:[#allocation8 + $0xca8] sm:$0xff]  ;;  %v2877_v13 = vld [vmem:[#allocation8 + $0xd60] sm:$0xff] }
 0x314   :  { %6687 = vmatpush1.bf16.msra.mxu1 %v6686_v37  ;;  %6177 = vmatprep.subr.bf16.mxu0 %v6176_v20  ;;  %v6700_v37 = vpack.c.bf16 %v2848_v8, %v2844_v6  ;;  %v2852_v20 = vld [vmem:[#allocation8 + $0xc98] sm:$0xff]  ;;  %v6192_v19 = vpack.c.bf16 %v2854_v3, %v2850_v42  ;;  %v6202_v6 = vpack.c.bf16 %v2869_v58, %v2865_v57  ;;  %v2886_v42 = vld [vmem:[#allocation8 + $0xda8] sm:$0xff] }
 0x315   :  { %6689 = vmatprep.subr.bf16.mxu1 %v6688_v22  ;;  %v6702_v22 = vpack.c.bf16 %v2847_v1, %v2843_v14  ;;  %v6704_v17 = vpack.c.bf16 %v2856_v21, %v2852_v20  ;;  %v2875_v14 = vld [vmem:[#allocation8 + $0xd50] sm:$0xff]  ;;  %v2882_v1 = vld [vmem:[#allocation8 + $0xd88] sm:$0xff]  ;;  %v2884_v3 = vld [vmem:[#allocation8 + $0xd98] sm:$0xff]  ;;  %v6206_v20 = vpack.c.bf16 %v2877_v13, %v2873_v9 }
 0x316   :  { %v2894_v31 = vld [vmem:[#allocation8 + $0xde8] sm:$0xff]  ;;  %v7197_v13 = vld [vmem:[#allocation7] sm:$0xff] }
 0x317   :  { %6179 = vmatpush1.bf16.msra.mxu0 %v6178_v35  ;;  %v2858_v35 = vld [vmem:[#allocation8 + $0xcc8] sm:$0xff] }
 0x318   :  { %6691 = vmatpush1.bf16.msra.mxu1 %v6690_v30  ;;  %6181 = vmatprep.subr.bf16.mxu0 %v6180_v46  ;;  %v2862_v30 = vld [vmem:[#allocation8 + $0xce8] sm:$0xff]  ;;  %v2860_v46 = vld [vmem:[#allocation8 + $0xcd8] sm:$0xff] }
 0x319   :  { %6693 = vmatprep.subr.bf16.mxu1 %v6692_v38  ;;  %v6196_v36 = vpack.c.bf16 %v2862_v30, %v2858_v35  ;;  %v2857_v38 = vld [vmem:[#allocation8 + $0xcc0] sm:$0xff]  ;;  %v6708_v47 = vpack.c.bf16 %v2864_v33, %v2860_v46  ;;  %v2892_v46 = vld [vmem:[#allocation8 + $0xdd8] sm:$0xff] }
 0x31a   :  { %v2896_v33 = vld [vmem:[#allocation8 + $0xdf8] sm:$0xff] }
 0x31b   :  { %6183 = vmatpush1.bf16.msra.mxu0 %v6182_v43  ;;  %v2868_v43 = vld [vmem:[#allocation8 + $0xd18] sm:$0xff] }
 0x31c   :  { %6695 = vmatpush1.bf16.msra.mxu1 %v6694_v53  ;;  %6185 = vmatprep.subr.bf16.mxu0 %v6184_v54  ;;  %v6198_v53 = vpack.c.bf16 %v2861_v41, %v2857_v38  ;;  %v6710_v54 = vpack.c.bf16 %v2863_v48, %v2859_v39  ;;  %v6712_v60 = vpack.c.bf16 %v2872_v52, %v2868_v43  ;;  %v2889_v41 = vld [vmem:[#allocation8 + $0xdc0] sm:$0xff]  ;;  %v2902_v43 = vld [vmem:[#allocation8 + $0xe28] sm:$0xff]  ;;  %v2900_v52 = vld [vmem:[#allocation8 + $0xe18] sm:$0xff] }
 0x31d   :  { %6697 = vmatprep.subr.bf16.mxu1 %v6696_v59  ;;  %v2867_v59 = vld [vmem:[#allocation8 + $0xd10] sm:$0xff]  ;;  %v2893_v39 = vld [vmem:[#allocation8 + $0xde0] sm:$0xff]  ;;  %v6724_v48 = vpack.c.bf16 %v2896_v33, %v2892_v46  ;;  %v6216_v58 = vpack.c.bf16 %v2902_v43, %v2898_v50 }
 0x31e   :  { %3702 = vmatmul.mubr.f32.vlgmr.msra.gmra.mrb[8].mxu0 %v2437_v16  ;;  %v6714_v8 = vpack.c.bf16 %v2871_v11, %v2867_v59  ;;  %v2897_v59 = vld [vmem:[#allocation8 + $0xe00] sm:$0xff]  ;;  %v2899_v11 = vld [vmem:[#allocation8 + $0xe10] sm:$0xff] }
 0x31f   :  { %4270 = vmatmul.mubr.f32.vlgmr.msra.gmra.mrb[8].mxu1 %v2437_v16  ;;  %6187 = vmatpush1.bf16.msra.mxu0 %v6186_v2  ;;  %v2876_v2 = vld [vmem:[#allocation8 + $0xd58] sm:$0xff]  ;;  %v2913_v46 = vld [vmem:[#allocation8 + $0xe80] sm:$0xff] }
 0x320   :  { %3772 = vmatprep.mubr.f32.mxu0 %v2440_v23  ;;  %6699 = vmatpush1.bf16.msra.mxu1 %v6698_v7  ;;  %v6204_v7 = vpack.c.bf16 %v2878_v63, %v2874_v62  ;;  %v6716_v16 = vpack.c.bf16 %v2880_v4, %v2876_v2  ;;  %v2903_v63 = vld [vmem:[#allocation8 + $0xe30] sm:$0xff]  ;;  %v2906_v2 = vld [vmem:[#allocation8 + $0xe48] sm:$0xff]  ;;  %v2917_v33 = vld [vmem:[#allocation8 + $0xea0] sm:$0xff] }
 0x321   :  { %4340 = vmatprep.mubr.f32.mxu1 %v2440_v23  ;;  %6189 = vmatprep.subr.bf16.mxu0 %v6188_v18  ;;  %v2879_v18 = vld [vmem:[#allocation8 + $0xd70] sm:$0xff]  ;;  %v6208_v23 = vpack.c.bf16 %v2886_v42, %v2882_v1  ;;  %v2910_v4 = vld [vmem:[#allocation8 + $0xe68] sm:$0xff]  ;;  %v2905_v1 = vld [vmem:[#allocation8 + $0xe40] sm:$0xff] }
 0x322   :  { %6701 = vmatprep.subr.bf16.mxu1 %v6700_v37  ;;  %v2888_v37 = vld [vmem:[#allocation8 + $0xdb8] sm:$0xff]  ;;  %v6718_v21 = vpack.c.bf16 %v2879_v18, %v2875_v14  ;;  %v6220_v18 = vpack.c.bf16 %v2910_v4, %v2906_v2  ;;  %v2909_v42 = vld [vmem:[#allocation8 + $0xe60] sm:$0xff] }
 0x323   :  { %6191 = vmatpush1.bf16.msra.mxu0 %v6190_v24  ;;  %v2881_v24 = vld [vmem:[#allocation8 + $0xd80] sm:$0xff]  ;;  %v6720_v26 = vpack.c.bf16 %v2888_v37, %v2884_v3  ;;  %v2907_v3 = vld [vmem:[#allocation8 + $0xe50] sm:$0xff] }
 0x324   :  { %6703 = vmatpush1.bf16.msra.mxu1 %v6702_v22  ;;  %6193 = vmatprep.subr.bf16.mxu0 %v6192_v19  ;;  %v2885_v22 = vld [vmem:[#allocation8 + $0xda0] sm:$0xff]  ;;  %v2883_v19 = vld [vmem:[#allocation8 + $0xd90] sm:$0xff] }
 0x325   :  { %6705 = vmatprep.subr.bf16.mxu1 %v6704_v17  ;;  %v2890_v17 = vld [vmem:[#allocation8 + $0xdc8] sm:$0xff] }
 0x326   :  { %v6212_v38 = vpack.c.bf16 %v2894_v31, %v2890_v17 }
 0x327   :  { %6195 = vmatpush1.bf16.msra.mxu0 %v6194_v34 }
 0x328   :  { %6707 = vmatpush1.bf16.msra.mxu1 %v6706_v49  ;;  %6197 = vmatprep.subr.bf16.mxu0 %v6196_v36  ;;  %v6210_v49 = vpack.c.bf16 %v2885_v22, %v2881_v24  ;;  %v6722_v36 = vpack.c.bf16 %v2887_v29, %v2883_v19  ;;  %v2916_v22 = vld [vmem:[#allocation8 + $0xe98] sm:$0xff] }
 0x329   :  { %6709 = vmatprep.subr.bf16.mxu1 %v6708_v47  ;;  %v2891_v47 = vld [vmem:[#allocation8 + $0xdd0] sm:$0xff]  ;;  %v2920_v19 = vld [vmem:[#allocation8 + $0xeb8] sm:$0xff] }
 0x32a   :  { %v6726_v57 = vpack.c.bf16 %v2895_v25, %v2891_v47  ;;  %v2928_v25 = vld [vmem:[#allocation8 + $0xef8] sm:$0xff] }
 0x32b   :  { %6199 = vmatpush1.bf16.msra.mxu0 %v6198_v53  ;;  %v2904_v53 = vld [vmem:[#allocation8 + $0xe38] sm:$0xff] }
 0x32c   :  { %6711 = vmatpush1.bf16.msra.mxu1 %v6710_v54  ;;  %6201 = vmatprep.subr.bf16.mxu0 %v6200_v55  ;;  %v6214_v54 = vpack.c.bf16 %v2893_v39, %v2889_v41  ;;  %v1141_v55 = vsub.s32 6, %v7446_v61  ;;  %v6728_v62 = vpack.c.bf16 %v2904_v53, %v2900_v52  ;;  %v2922_v41 = vld [vmem:[#allocation8 + $0xec8] sm:$0xff]  ;;  %v2921_v53 = vld [vmem:[#allocation8 + $0xec0] sm:$0xff] }
 0x32d   :  { %6713 = vmatprep.subr.bf16.mxu1 %v6712_v60  ;;  %v2901_v60 = vld [vmem:[#allocation8 + $0xe20] sm:$0xff]  ;;  %v2926_v39 = vld [vmem:[#allocation8 + $0xee8] sm:$0xff] }
 0x32e   :  { %v6218_v9 = vpack.c.bf16 %v2901_v60, %v2897_v59  ;;  %v1142_v14 = vrot.slane %v7197_v13, %v1141_v55  ;;  %v6228_v52 = vpack.c.bf16 %v2926_v39, %v2922_v41  ;;  %v2927_v59 = vld [vmem:[#allocation8 + $0xef0] sm:$0xff]  ;;  %v2930_v60 = vld [vmem:[#allocation8 + $0xf08] sm:$0xff]  ;;  %v2933_v13 = vld [vmem:[#allocation8 + $0xf20] sm:$0xff] }
 0x32f   :  { %6203 = vmatpush1.bf16.msra.mxu0 %v6202_v6  ;;  %v2908_v6 = vld [vmem:[#allocation8 + $0xe58] sm:$0xff] }
 0x330   :  { %6715 = vmatpush1.bf16.msra.mxu1 %v6714_v8  ;;  %6205 = vmatprep.subr.bf16.mxu0 %v6204_v7  ;;  %v2912_v8 = vld [vmem:[#allocation8 + $0xe78] sm:$0xff]  ;;  %v7620_v29 = vadd.f32 %v7510_v32, %v1142_v14  ;;  %v6226_v32 = vpack.c.bf16 %v2917_v33, %v2913_v46  ;;  %v2931_v14 = vld [vmem:[#allocation8 + $0xf10] sm:$0xff]  ;;  %v2946_v46 = vld [vmem:[#allocation8 + $0xf88] sm:$0xff] }
 0x331   :  { %v7604_v27 = vpop.f32.mrb[6].mxu0  ;;  %6717 = vmatprep.subr.bf16.mxu1 %v6716_v16  ;;  %v7613_v7 = vld [vmem:[#allocation7 + $0x8] sm:$0xff]  ;;  %v6730_v16 = vpack.c.bf16 %v2903_v63, %v2899_v11  ;;  %v6732_v37 = vpack.c.bf16 %v2912_v8, %v2908_v6  ;;  %v2934_v11 = vld [vmem:[#allocation8 + $0xf28] sm:$0xff] }
 0x332   :  { %v7606_v35 = vpop.f32.mrb[6].mxu1  ;;  %v7608_v30 = vpop.f32.mrb[7].mxu0  ;;  %v1154_v24 = vrot.slane %v7613_v7, %v7517_v0  ;;  %v2375_v50 = vmin.f32 %v7620_v29, 0.0  ;;  %v2936_v63 = vld [vmem:[#allocation8 + $0xf38] sm:$0xff]  ;;  %v6232_v8 = vpack.c.bf16 %v2934_v11, %v2930_v60  ;;  %v2950_v33 = vld [vmem:[#allocation8 + $0xfa8] sm:$0xff]  ;;  %v2953_v11 = vld [vmem:[#allocation8 + $0xfc0] sm:$0xff] }
 0x333   :  { %v7610_v34 = vpop.f32.mrb[7].mxu1  ;;  %6207 = vmatpush1.bf16.msra.mxu0 %v6206_v20  ;;  %v2911_v20 = vld [vmem:[#allocation8 + $0xe70] sm:$0xff]  ;;  %v6240_v39 = vpack.c.bf16 %v2950_v33, %v2946_v46  ;;  %vm2359_vm7 = vcmp.gt.f32.partialorder %v7620_v29, 0.0  ;;  %v2969_v33 = vld [vmem:[#allocation8 + $0x1040] sm:$0xff] }
 0x334   :  { %6719 = vmatpush1.bf16.msra.mxu1 %v6718_v21  ;;  %6209 = vmatprep.subr.bf16.mxu0 %v6208_v23  ;;  %v2914_v21 = vld [vmem:[#allocation8 + $0xe88] sm:$0xff]  ;;  %v6734_v17 = vpack.c.bf16 %v2911_v20, %v2907_v3  ;;  %v7623_v47 = vadd.f32 %v7557_v12, %v1154_v24  ;;  %v2397_v4 = vmul.f32 1.442695, %v2375_v50  ;;  %v2944_v20 = vld [vmem:[#allocation8 + $0xf78] sm:$0xff] }
 0x335   :  { %6721 = vmatprep.subr.bf16.mxu1 %v6720_v26  ;;  %v2918_v23 = vld [vmem:[#allocation8 + $0xea8] sm:$0xff]  ;;  %v6222_v26 = vpack.c.bf16 %v2909_v42, %v2905_v1 }
 0x336   :  { %v6224_v31 = vpack.c.bf16 %v2918_v23, %v2914_v21  ;;  %v2378_v12 = vmin.f32 %v7623_v47, 0.0  ;;  %v2938_v1 = vld [vmem:[#allocation8 + $0xf48] sm:$0xff]  ;;  %7170 = vpow2.f32 %v2397_v4  ;;  %vm2362_vm8 = vcmp.gt.f32.partialorder %v7623_v47, 0.0 }
 0x337   :  { %6211 = vmatpush1.bf16.msra.mxu0 %v6210_v49  ;;  %v2915_v49 = vld [vmem:[#allocation8 + $0xe90] sm:$0xff]  ;;  %v2942_v42 = vld [vmem:[#allocation8 + $0xf68] sm:$0xff] }
 0x338   :  { %6723 = vmatpush1.bf16.msra.mxu1 %v6722_v36  ;;  %6213 = vmatprep.subr.bf16.mxu0 %v6212_v38  ;;  %v6736_v36 = vpack.c.bf16 %v2920_v19, %v2916_v22  ;;  %v2919_v38 = vld [vmem:[#allocation8 + $0xeb0] sm:$0xff]  ;;  %v2403_v3 = vmul.f32 1.442695, %v2378_v12  ;;  %v6236_v24 = vpack.c.bf16 %v2942_v42, %v2938_v1  ;;  %v2937_v22 = vld [vmem:[#allocation8 + $0xf40] sm:$0xff]  ;;  %v2962_v4 = vld [vmem:[#allocation8 + $0x1008] sm:$0xff] }
 0x339   :  { %6725 = vmatprep.subr.bf16.mxu1 %v6724_v48  ;;  %v2924_v48 = vld [vmem:[#allocation8 + $0xed8] sm:$0xff]  ;;  %v6738_v43 = vpack.c.bf16 %v2919_v38, %v2915_v49  ;;  %v2941_v19 = vld [vmem:[#allocation8 + $0xf60] sm:$0xff] }
 0x33a   :  { %7172 = vpow2.f32 %v2403_v3  ;;  %v2948_v49 = vld [vmem:[#allocation8 + $0xf98] sm:$0xff]  ;;  %v6238_v38 = vpack.c.bf16 %v2941_v19, %v2937_v22  ;;  %v2957_v12 = vld [vmem:[#allocation8 + $0xfe0] sm:$0xff]  ;;  %v2974_v22 = vld [vmem:[#allocation8 + $0x1068] sm:$0xff] }
 0x33b   :  { %6215 = vmatpush1.bf16.msra.mxu0 %v6214_v54  ;;  %v2925_v54 = vld [vmem:[#allocation8 + $0xee0] sm:$0xff] }
 0x33c   :  { %6727 = vmatpush1.bf16.msra.mxu1 %v6726_v57  ;;  %6217 = vmatprep.subr.bf16.mxu0 %v6216_v58  ;;  %v2923_v57 = vld [vmem:[#allocation8 + $0xed0] sm:$0xff]  ;;  %v6740_v58 = vpack.c.bf16 %v2928_v25, %v2924_v48  ;;  %v6230_v2 = vpack.c.bf16 %v2925_v54, %v2921_v53  ;;  %v2945_v48 = vld [vmem:[#allocation8 + $0xf80] sm:$0xff]  ;;  %v2958_v53 = vld [vmem:[#allocation8 + $0xfe8] sm:$0xff] }
 0x33d   :  { %6729 = vmatprep.subr.bf16.mxu1 %v6728_v62  ;;  %v2932_v62 = vld [vmem:[#allocation8 + $0xf18] sm:$0xff]  ;;  %v6742_v6 = vpack.c.bf16 %v2927_v59, %v2923_v57  ;;  %v2949_v25 = vld [vmem:[#allocation8 + $0xfa0] sm:$0xff] }
 0x33e   :  { %v2956_v54 = vld [vmem:[#allocation8 + $0xfd8] sm:$0xff]  ;;  %v2961_v42 = vld [vmem:[#allocation8 + $0x1000] sm:$0xff] }
 0x33f   :  { %6219 = vmatpush1.bf16.msra.mxu0 %v6218_v9  ;;  %v2929_v9 = vld [vmem:[#allocation8 + $0xf00] sm:$0xff]  ;;  %v2960_v57 = vld [vmem:[#allocation8 + $0xff8] sm:$0xff] }
 0x340   :  { %6731 = vmatpush1.bf16.msra.mxu1 %v6730_v16  ;;  %6221 = vmatprep.subr.bf16.mxu0 %v6220_v18  ;;  %v6744_v16 = vpack.c.bf16 %v2936_v63, %v2932_v62  ;;  %v2935_v18 = vld [vmem:[#allocation8 + $0xf30] sm:$0xff]  ;;  %v6234_v21 = vpack.c.bf16 %v2933_v13, %v2929_v9  ;;  %v6756_v63 = vpack.c.bf16 %v2960_v57, %v2956_v54  ;;  %v2964_v9 = vld [vmem:[#allocation8 + $0x1018] sm:$0xff]  ;;  %v2965_v3 = vld [vmem:[#allocation8 + $0x1020] sm:$0xff] }
 0x341   :  { %6733 = vmatprep.subr.bf16.mxu1 %v6732_v37  ;;  %v2940_v37 = vld [vmem:[#allocation8 + $0xf58] sm:$0xff]  ;;  %v6746_v23 = vpack.c.bf16 %v2935_v18, %v2931_v14  ;;  %v2955_v62 = vld [vmem:[#allocation8 + $0xfd0] sm:$0xff]  ;;  %v6246_v14 = vpack.c.bf16 %v2957_v12, %v2953_v11  ;;  %v6250_v19 = vpack.c.bf16 %v2965_v3, %v2961_v42  ;;  %v2977_v57 = vld [vmem:[#allocation8 + $0x1080] sm:$0xff] }
 0x342   :  { %v2968_v13 = vld [vmem:[#allocation8 + $0x1038] sm:$0xff]  ;;  %v2983_v11 = vld [vmem:[#allocation8 + $0x10b0] sm:$0xff]  ;;  %v2986_v12 = vld [vmem:[#allocation8 + $0x10c8] sm:$0xff] }
 0x343   :  { %6223 = vmatpush1.bf16.msra.mxu0 %v6222_v26  ;;  %v2939_v26 = vld [vmem:[#allocation8 + $0xf50] sm:$0xff]  ;;  %v2996_v42 = vld [vmem:[#allocation8 + $0x1118] sm:$0xff] }
 0x344   :  { %6735 = vmatpush1.bf16.msra.mxu1 %v6734_v17  ;;  %6225 = vmatprep.subr.bf16.mxu0 %v6224_v31  ;;  %v6748_v17 = vpack.c.bf16 %v2944_v20, %v2940_v37  ;;  %v2943_v31 = vld [vmem:[#allocation8 + $0xf70] sm:$0xff]  ;;  %v6760_v20 = vpack.c.bf16 %v2968_v13, %v2964_v9  ;;  %v2989_v9 = vld [vmem:[#allocation8 + $0x10e0] sm:$0xff]  ;;  %v3000_v3 = vld [vmem:[#allocation8 + $0x1138] sm:$0xff] }
 0x345   :  { %6737 = vmatprep.subr.bf16.mxu1 %v6736_v36  ;;  %v2952_v36 = vld [vmem:[#allocation8 + $0xfb8] sm:$0xff]  ;;  %v6750_v41 = vpack.c.bf16 %v2943_v31, %v2939_v26  ;;  %v2987_v13 = vld [vmem:[#allocation8 + $0x10d0] sm:$0xff] }
 0x346   :  { %v6752_v50 = vpack.c.bf16 %v2952_v36, %v2948_v49  ;;  %v2976_v31 = vld [vmem:[#allocation8 + $0x1078] sm:$0xff]  ;;  %v2973_v49 = vld [vmem:[#allocation8 + $0x1060] sm:$0xff]  ;;  %v2971_v36 = vld [vmem:[#allocation8 + $0x1050] sm:$0xff] }
 0x347   :  { %6227 = vmatpush1.bf16.msra.mxu0 %v6226_v32  ;;  %v2947_v32 = vld [vmem:[#allocation8 + $0xf90] sm:$0xff] }
 0x348   :  { %6739 = vmatpush1.bf16.msra.mxu1 %v6738_v43  ;;  %6229 = vmatprep.subr.bf16.mxu0 %v6228_v52  ;;  %v2951_v43 = vld [vmem:[#allocation8 + $0xfb0] sm:$0xff]  ;;  %v2954_v52 = vld [vmem:[#allocation8 + $0xfc8] sm:$0xff] }
 0x349   :  { %6741 = vmatprep.subr.bf16.mxu1 %v6740_v58  ;;  %v6242_v58 = vpack.c.bf16 %v2949_v25, %v2945_v48  ;;  %v6754_v59 = vpack.c.bf16 %v2951_v43, %v2947_v32  ;;  %v6244_v60 = vpack.c.bf16 %v2958_v53, %v2954_v52  ;;  %v2978_v48 = vld [vmem:[#allocation8 + $0x1088] sm:$0xff]  ;;  %v2984_v43 = vld [vmem:[#allocation8 + $0x10b8] sm:$0xff]  ;;  %v6254_v53 = vpack.c.bf16 %v2973_v49, %v2969_v33 }
 0x34a   :  { %v2982_v25 = vld [vmem:[#allocation8 + $0x10a8] sm:$0xff]  ;;  %v3008_v33 = vld [vmem:[#allocation8 + $0x1178] sm:$0xff] }
 0x34b   :  { %6231 = vmatpush1.bf16.msra.mxu0 %v6230_v2  ;;  %v2959_v2 = vld [vmem:[#allocation8 + $0xff0] sm:$0xff] }
 0x34c   :  { %6743 = vmatpush1.bf16.msra.mxu1 %v6742_v6  ;;  %6233 = vmatprep.subr.bf16.mxu0 %v6232_v8  ;;  %v2966_v6 = vld [vmem:[#allocation8 + $0x1028] sm:$0xff]  ;;  %v7171_v8 = vpop.eup %7170  ;;  %v6758_v18 = vpack.c.bf16 %v2959_v2, %v2955_v62  ;;  %v2992_v2 = vld [vmem:[#allocation8 + $0x10f8] sm:$0xff] }
 0x34d   :  { %6745 = vmatprep.subr.bf16.mxu1 %v6744_v16  ;;  %v7173_v16 = vpop.eup %7172  ;;  %v6248_v1 = vpack.c.bf16 %v2966_v6, %v2962_v4  ;;  %v4884_v37 = vadd.f32 -1.0, %v7171_v8  ;;  %v2990_v62 = vld [vmem:[#allocation8 + $0x10e8] sm:$0xff]  ;;  %v2985_v8 = vld [vmem:[#allocation8 + $0x10c0] sm:$0xff] }
 0x34e   :  { %v4887_v26 = vadd.f32 -1.0, %v7173_v16  ;;  %v6260_v6 = vpack.c.bf16 %v2990_v62, %v2986_v12  ;;  %v2991_v16 = vld [vmem:[#allocation8 + $0x10f0] sm:$0xff]  ;;  %v3018_v62 = vld [vmem:[#allocation8 + $0x11c8] sm:$0xff] }
 0x34f   :  { %6235 = vmatpush1.bf16.msra.mxu0 %v6234_v21  ;;  %v2963_v21 = vld [vmem:[#allocation8 + $0x1010] sm:$0xff] }
 0x350   :  { %6747 = vmatpush1.bf16.msra.mxu1 %v6746_v23  ;;  %6237 = vmatprep.subr.bf16.mxu0 %v6236_v24  ;;  %v2967_v23 = vld [vmem:[#allocation8 + $0x1030] sm:$0xff]  ;;  %v2970_v24 = vld [vmem:[#allocation8 + $0x1048] sm:$0xff]  ;;  %v2442_v52 = vsel %vm2362_vm8, %v7623_v47, %v4887_v26 }
 0x351   :  { %6749 = vmatprep.subr.bf16.mxu1 %v6748_v17  ;;  %v2972_v17 = vld [vmem:[#allocation8 + $0x1058] sm:$0xff]  ;;  %v6762_v46 = vpack.c.bf16 %v2967_v23, %v2963_v21  ;;  %v2993_v23 = vld [vmem:[#allocation8 + $0x1100] sm:$0xff]  ;;  %v2999_v26 = vld [vmem:[#allocation8 + $0x1130] sm:$0xff] }
 0x352   :  { %v6764_v32 = vpack.c.bf16 %v2976_v31, %v2972_v17  ;;  %v3002_v17 = vld [vmem:[#allocation8 + $0x1148] sm:$0xff]  ;;  %v3015_v12 = vld [vmem:[#allocation8 + $0x11b0] sm:$0xff] }
 0x353   :  { %6239 = vmatpush1.bf16.msra.mxu0 %v6238_v38  ;;  %v2439_v38 = vsel %vm2359_vm7, %v7620_v29, %v4884_v37  ;;  %v6256_v29 = vpack.c.bf16 %v2982_v25, %v2978_v48  ;;  %v6262_v37 = vpack.c.bf16 %v2989_v9, %v2985_v8  ;;  %v3006_v31 = vld [vmem:[#allocation8 + $0x1168] sm:$0xff]  ;;  %v3003_v48 = vld [vmem:[#allocation8 + $0x1150] sm:$0xff]  ;;  %v3017_v9 = vld [vmem:[#allocation8 + $0x11c0] sm:$0xff] }
 0x354   :  { %6751 = vmatpush1.bf16.msra.mxu1 %v6750_v41  ;;  %6241 = vmatprep.subr.bf16.mxu0 %v6240_v39  ;;  %v6252_v41 = vpack.c.bf16 %v2974_v22, %v2970_v24  ;;  %v2975_v39 = vld [vmem:[#allocation8 + $0x1070] sm:$0xff]  ;;  %v2997_v24 = vld [vmem:[#allocation8 + $0x1120] sm:$0xff] }
 0x355   :  { %6753 = vmatprep.subr.bf16.mxu1 %v6752_v50  ;;  %v2980_v50 = vld [vmem:[#allocation8 + $0x1098] sm:$0xff]  ;;  %v6766_v54 = vpack.c.bf16 %v2975_v39, %v2971_v36  ;;  %v2995_v22 = vld [vmem:[#allocation8 + $0x1110] sm:$0xff]  ;;  %v6266_v49 = vpack.c.bf16 %v2997_v24, %v2993_v23  ;;  %v3005_v39 = vld [vmem:[#allocation8 + $0x1160] sm:$0xff] }
 0x356   :  { %v6778_v36 = vpack.c.bf16 %v2999_v26, %v2995_v22  ;;  %v3025_v24 = vld [vmem:[#allocation8 + $0x1200] sm:$0xff] }
 0x357   :  { %6243 = vmatpush1.bf16.msra.mxu0 %v6242_v58  ;;  %v2981_v58 = vld [vmem:[#allocation8 + $0x10a0] sm:$0xff] }
 0x358   :  { %6755 = vmatpush1.bf16.msra.mxu1 %v6754_v59  ;;  %6245 = vmatprep.subr.bf16.mxu0 %v6244_v60  ;;  %v2979_v59 = vld [vmem:[#allocation8 + $0x1090] sm:$0xff]  ;;  %v6768_v60 = vpack.c.bf16 %v2984_v43, %v2980_v50  ;;  %v6258_v4 = vpack.c.bf16 %v2981_v58, %v2977_v57  ;;  %v3010_v50 = vld [vmem:[#allocation8 + $0x1188] sm:$0xff]  ;;  %v3009_v58 = vld [vmem:[#allocation8 + $0x1180] sm:$0xff] }
 0x359   :  { %6757 = vmatprep.subr.bf16.mxu1 %v6756_v63  ;;  %v2988_v63 = vld [vmem:[#allocation8 + $0x10d8] sm:$0xff]  ;;  %v6770_v47 = vpack.c.bf16 %v2983_v11, %v2979_v59  ;;  %v3014_v43 = vld [vmem:[#allocation8 + $0x11a8] sm:$0xff]  ;;  %v3013_v59 = vld [vmem:[#allocation8 + $0x11a0] sm:$0xff] }
 0x35a   :  { %v6272_v57 = vpack.c.bf16 %v3014_v43, %v3010_v50  ;;  %v3029_v22 = vld [vmem:[#allocation8 + $0x1220] sm:$0xff]  ;;  %v3039_v43 = vld [vmem:[#allocation8 + $0x1270] sm:$0xff] }
 0x35b   :  { %6247 = vmatpush1.bf16.msra.mxu0 %v6246_v14  ;;  %v6772_v14 = vpack.c.bf16 %v2992_v2, %v2988_v63  ;;  %v3022_v63 = vld [vmem:[#allocation8 + $0x11e8] sm:$0xff]  ;;  %v3020_v2 = vld [vmem:[#allocation8 + $0x11d8] sm:$0xff] }
 0x35c   :  { %6759 = vmatpush1.bf16.msra.mxu1 %v6758_v18  ;;  %6249 = vmatprep.subr.bf16.mxu0 %v6248_v1  ;;  %v2994_v18 = vld [vmem:[#allocation8 + $0x1108] sm:$0xff]  ;;  %v6276_v8 = vpack.c.bf16 %v3022_v63, %v3018_v62  ;;  %v3045_v62 = vld [vmem:[#allocation8 + $0x12a0] sm:$0xff]  ;;  %v3043_v63 = vld [vmem:[#allocation8 + $0x1290] sm:$0xff] }
 0x35d   :  { %6761 = vmatprep.subr.bf16.mxu1 %v6760_v20  ;;  %v2998_v1 = vld [vmem:[#allocation8 + $0x1128] sm:$0xff]  ;;  %v6774_v20 = vpack.c.bf16 %v2991_v16, %v2987_v13  ;;  %v3021_v13 = vld [vmem:[#allocation8 + $0x11e0] sm:$0xff] }
 0x35e   :  { %3773 = vmatmul.mubr.f32.vlgmr.msra.gmra.mrb[8].mxu0 %v2439_v38  ;;  %v6264_v21 = vpack.c.bf16 %v2998_v1, %v2994_v18  ;;  %v3023_v18 = vld [vmem:[#allocation8 + $0x11f0] sm:$0xff]  ;;  %v3026_v1 = vld [vmem:[#allocation8 + $0x1208] sm:$0xff] }
 0x35f   :  { %4341 = vmatmul.mubr.f32.vlgmr.msra.gmra.mrb[8].mxu1 %v2439_v38  ;;  %6251 = vmatpush1.bf16.msra.mxu0 %v6250_v19  ;;  %v6776_v19 = vpack.c.bf16 %v3000_v3, %v2996_v42  ;;  %v6268_v38 = vpack.c.bf16 %v3006_v31, %v3002_v17  ;;  %v3030_v42 = vld [vmem:[#allocation8 + $0x1228] sm:$0xff]  ;;  %v3028_v3 = vld [vmem:[#allocation8 + $0x1218] sm:$0xff]  ;;  %v3031_v17 = vld [vmem:[#allocation8 + $0x1230] sm:$0xff] }
 0x360   :  { %3843 = vmatprep.mubr.f32.mxu0 %v2442_v52  ;;  %6763 = vmatpush1.bf16.msra.mxu1 %v6762_v46  ;;  %v3004_v46 = vld [vmem:[#allocation8 + $0x1158] sm:$0xff]  ;;  %v6280_v23 = vpack.c.bf16 %v3030_v42, %v3026_v1  ;;  %v3034_v31 = vld [vmem:[#allocation8 + $0x1248] sm:$0xff]  ;;  %v3053_v1 = vld [vmem:[#allocation8 + $0x12e0] sm:$0xff] }
 0x361   :  { %4411 = vmatprep.mubr.f32.mxu1 %v2442_v52  ;;  %6253 = vmatprep.subr.bf16.mxu0 %v6252_v41  ;;  %v3001_v41 = vld [vmem:[#allocation8 + $0x1140] sm:$0xff]  ;;  %v6780_v25 = vpack.c.bf16 %v3008_v33, %v3004_v46  ;;  %v3012_v52 = vld [vmem:[#allocation8 + $0x1198] sm:$0xff]  ;;  %v3038_v46 = vld [vmem:[#allocation8 + $0x1268] sm:$0xff] }
 0x362   :  { %6765 = vmatprep.subr.bf16.mxu1 %v6764_v32  ;;  %v3007_v32 = vld [vmem:[#allocation8 + $0x1170] sm:$0xff]  ;;  %v3036_v33 = vld [vmem:[#allocation8 + $0x1258] sm:$0xff] }
 0x363   :  { %6255 = vmatpush1.bf16.msra.mxu0 %v6254_v53  ;;  %v3016_v53 = vld [vmem:[#allocation8 + $0x11b8] sm:$0xff]  ;;  %v3051_v42 = vld [vmem:[#allocation8 + $0x12d0] sm:$0xff] }
 0x364   :  { %6767 = vmatpush1.bf16.msra.mxu1 %v6766_v54  ;;  %6257 = vmatprep.subr.bf16.mxu0 %v6256_v29  ;;  %v6270_v54 = vpack.c.bf16 %v3005_v39, %v3001_v41  ;;  %v6782_v29 = vpack.c.bf16 %v3007_v32, %v3003_v48  ;;  %v6784_v11 = vpack.c.bf16 %v3016_v53, %v3012_v52  ;;  %v3033_v48 = vld [vmem:[#allocation8 + $0x1240] sm:$0xff]  ;;  %v3035_v32 = vld [vmem:[#allocation8 + $0x1250] sm:$0xff]  ;;  %v3042_v52 = vld [vmem:[#allocation8 + $0x1288] sm:$0xff] }
 0x365   :  { %6769 = vmatprep.subr.bf16.mxu1 %v6768_v60  ;;  %v3011_v60 = vld [vmem:[#allocation8 + $0x1190] sm:$0xff]  ;;  %v6284_v39 = vpack.c.bf16 %v3038_v46, %v3034_v31  ;;  %v3046_v53 = vld [vmem:[#allocation8 + $0x12a8] sm:$0xff]  ;;  %v3057_v31 = vld [vmem:[#allocation8 + $0x1300] sm:$0xff] }
 0x366   :  { %v3061_v46 = vld [vmem:[#allocation8 + $0x1320] sm:$0xff] }
 0x367   :  { %6259 = vmatpush1.bf16.msra.mxu0 %v6258_v4  ;;  %v3024_v4 = vld [vmem:[#allocation8 + $0x11f8] sm:$0xff] }
 0x368   :  { %6771 = vmatpush1.bf16.msra.mxu1 %v6770_v47  ;;  %6261 = vmatprep.subr.bf16.mxu0 %v6260_v6  ;;  %v6274_v47 = vpack.c.bf16 %v3013_v59, %v3009_v58  ;;  %v6786_v6 = vpack.c.bf16 %v3015_v12, %v3011_v60  ;;  %v6788_v16 = vpack.c.bf16 %v3024_v4, %v3020_v2  ;;  %v3041_v12 = vld [vmem:[#allocation8 + $0x1280] sm:$0xff]  ;;  %v3047_v4 = vld [vmem:[#allocation8 + $0x12b0] sm:$0xff] }
 0x369   :  { %6773 = vmatprep.subr.bf16.mxu1 %v6772_v14  ;;  %v3019_v14 = vld [vmem:[#allocation8 + $0x11d0] sm:$0xff]  ;;  %v6798_v60 = vpack.c.bf16 %v3039_v43, %v3035_v32  ;;  %v6298_v32 = vpack.c.bf16 %v3061_v46, %v3057_v31 }
 0x36b   :  { %6263 = vmatpush1.bf16.msra.mxu0 %v6262_v37  ;;  %v3032_v37 = vld [vmem:[#allocation8 + $0x1238] sm:$0xff] }
 0x36c   :  { %6775 = vmatpush1.bf16.msra.mxu1 %v6774_v20  ;;  %6265 = vmatprep.subr.bf16.mxu0 %v6264_v21  ;;  %v6278_v20 = vpack.c.bf16 %v3021_v13, %v3017_v9  ;;  %v6790_v21 = vpack.c.bf16 %v3023_v18, %v3019_v14  ;;  %v6792_v26 = vpack.c.bf16 %v3032_v37, %v3028_v3  ;;  %v3056_v9 = vld [vmem:[#allocation8 + $0x12f8] sm:$0xff]  ;;  %v3049_v18 = vld [vmem:[#allocation8 + $0x12c0] sm:$0xff]  ;;  %v3055_v37 = vld [vmem:[#allocation8 + $0x12f0] sm:$0xff] }
 0x36d   :  { %6777 = vmatprep.subr.bf16.mxu1 %v6776_v19  ;;  %v3027_v19 = vld [vmem:[#allocation8 + $0x1210] sm:$0xff]  ;;  %v6802_v14 = vpack.c.bf16 %v3047_v4, %v3043_v63  ;;  %v3073_v4 = vld [vmem:[#allocation8 + $0x1380] sm:$0xff] }
 0x36e   :  { %v6794_v41 = vpack.c.bf16 %v3031_v17, %v3027_v19 }
 0x36f   :  { %6267 = vmatpush1.bf16.msra.mxu0 %v6266_v49  ;;  %v3040_v49 = vld [vmem:[#allocation8 + $0x1278] sm:$0xff] }
 0x370   :  { %6779 = vmatpush1.bf16.msra.mxu1 %v6778_v36  ;;  %6269 = vmatprep.subr.bf16.mxu0 %v6268_v38  ;;  %v6282_v36 = vpack.c.bf16 %v3029_v22, %v3025_v24  ;;  %v1150_v38 = vrot.slane %v7613_v7, %v7532_v40  ;;  %v6796_v50 = vpack.c.bf16 %v3040_v49, %v3036_v33  ;;  %v3064_v24 = vld [vmem:[#allocation8 + $0x1338] sm:$0xff]  ;;  %v3059_v33 = vld [vmem:[#allocation8 + $0x1310] sm:$0xff] }
 0x371   :  { %6781 = vmatprep.subr.bf16.mxu1 %v6780_v25  ;;  %v3037_v25 = vld [vmem:[#allocation8 + $0x1260] sm:$0xff]  ;;  %v6294_v22 = vpack.c.bf16 %v3053_v1, %v3049_v18 }
 0x372   :  { %v6286_v58 = vpack.c.bf16 %v3037_v25, %v3033_v48  ;;  %v7636_v59 = vadd.f32 %v7553_v5, %v1150_v38  ;;  %v6290_v5 = vpack.c.bf16 %v3045_v62, %v3041_v12  ;;  %v3066_v38 = vld [vmem:[#allocation8 + $0x1348] sm:$0xff]  ;;  %v3068_v48 = vld [vmem:[#allocation8 + $0x1358] sm:$0xff] }
 0x373   :  { %6271 = vmatpush1.bf16.msra.mxu0 %v6270_v54  ;;  %v1162_v54 = vrot.slane %v7613_v7, %v7535_v51  ;;  %v3072_v25 = vld [vmem:[#allocation8 + $0x1378] sm:$0xff] }
 0x374   :  { %6783 = vmatpush1.bf16.msra.mxu1 %v6782_v29  ;;  %6273 = vmatprep.subr.bf16.mxu0 %v6272_v57  ;;  %v3044_v29 = vld [vmem:[#allocation8 + $0x1298] sm:$0xff]  ;;  %v2377_v13 = vmin.f32 %v7636_v59, 0.0  ;;  %vm2361_vm9 = vcmp.gt.f32.partialorder %v7636_v59, 0.0 }
 0x375   :  { %6785 = vmatprep.subr.bf16.mxu1 %v6784_v11  ;;  %v3048_v57 = vld [vmem:[#allocation8 + $0x12b8] sm:$0xff]  ;;  %v6288_v11 = vpack.c.bf16 %v3046_v53, %v3042_v52  ;;  %v7639_v7 = vadd.f32 %v7559_v15, %v1162_v54  ;;  %v3065_v52 = vld [vmem:[#allocation8 + $0x1340] sm:$0xff]  ;;  %v3067_v54 = vld [vmem:[#allocation8 + $0x1350] sm:$0xff] }
 0x376   :  { %v6800_v2 = vpack.c.bf16 %v3048_v57, %v3044_v29  ;;  %v2401_v19 = vmul.f32 1.442695, %v2377_v13  ;;  %v3069_v53 = vld [vmem:[#allocation8 + $0x1360] sm:$0xff]  ;;  %v6812_v29 = vpack.c.bf16 %v3072_v25, %v3068_v48  ;;  %v3071_v57 = vld [vmem:[#allocation8 + $0x1370] sm:$0xff]  ;;  %v3080_v12 = vld [vmem:[#allocation8 + $0x13b8] sm:$0xff] }
 0x377   :  { %6275 = vmatpush1.bf16.msra.mxu0 %v6274_v47  ;;  %v3050_v47 = vld [vmem:[#allocation8 + $0x12c8] sm:$0xff]  ;;  %v2380_v15 = vmin.f32 %v7639_v7, 0.0  ;;  %v6302_v62 = vpack.c.bf16 %v3069_v53, %v3065_v52  ;;  %v6814_v63 = vpack.c.bf16 %v3071_v57, %v3067_v54  ;;  %v3095_v48 = vld [vmem:[#allocation8 + $0x1430] sm:$0xff]  ;;  %v3100_v52 = vld [vmem:[#allocation8 + $0x1458] sm:$0xff]  ;;  %vm2364_vm10 = vcmp.gt.f32.partialorder %v7639_v7, 0.0 }
 0x378   :  { %6787 = vmatpush1.bf16.msra.mxu1 %v6786_v6  ;;  %6277 = vmatprep.subr.bf16.mxu0 %v6276_v8  ;;  %v3054_v6 = vld [vmem:[#allocation8 + $0x12e8] sm:$0xff]  ;;  %v3052_v8 = vld [vmem:[#allocation8 + $0x12d8] sm:$0xff]  ;;  %7174 = vpow2.f32 %v2401_v19  ;;  %v3101_v57 = vld [vmem:[#allocation8 + $0x1460] sm:$0xff] }
 0x379   :  { %6789 = vmatprep.subr.bf16.mxu1 %v6788_v16  ;;  %v6292_v16 = vpack.c.bf16 %v3054_v6, %v3050_v47  ;;  %v6804_v3 = vpack.c.bf16 %v3056_v9, %v3052_v8  ;;  %v3077_v47 = vld [vmem:[#allocation8 + $0x13a0] sm:$0xff]  ;;  %v3075_v6 = vld [vmem:[#allocation8 + $0x1390] sm:$0xff]  ;;  %v3086_v13 = vld [vmem:[#allocation8 + $0x13e8] sm:$0xff] }
 0x37a   :  { %v3079_v9 = vld [vmem:[#allocation8 + $0x13b0] sm:$0xff]  ;;  %v6306_v18 = vpack.c.bf16 %v3077_v47, %v3073_v4  ;;  %v3092_v19 = vld [vmem:[#allocation8 + $0x1418] sm:$0xff]  ;;  %v3098_v25 = vld [vmem:[#allocation8 + $0x1448] sm:$0xff] }
 0x37b   :  { %6279 = vmatpush1.bf16.msra.mxu0 %v6278_v20  ;;  %v3058_v20 = vld [vmem:[#allocation8 + $0x1308] sm:$0xff]  ;;  %v6818_v1 = vpack.c.bf16 %v3079_v9, %v3075_v6  ;;  %v3104_v53 = vld [vmem:[#allocation8 + $0x1478] sm:$0xff] }
 0x37c   :  { %6791 = vmatpush1.bf16.msra.mxu1 %v6790_v21  ;;  %6281 = vmatprep.subr.bf16.mxu0 %v6280_v23  ;;  %v3062_v21 = vld [vmem:[#allocation8 + $0x1328] sm:$0xff]  ;;  %v3060_v23 = vld [vmem:[#allocation8 + $0x1318] sm:$0xff] }
 0x37d   :  { %6793 = vmatprep.subr.bf16.mxu1 %v6792_v26  ;;  %v6806_v26 = vpack.c.bf16 %v3055_v37, %v3051_v42  ;;  %v6296_v17 = vpack.c.bf16 %v3062_v21, %v3058_v20  ;;  %v6808_v49 = vpack.c.bf16 %v3064_v24, %v3060_v23  ;;  %v3085_v37 = vld [vmem:[#allocation8 + $0x13e0] sm:$0xff]  ;;  %v3083_v20 = vld [vmem:[#allocation8 + $0x13d0] sm:$0xff]  ;;  %v3090_v23 = vld [vmem:[#allocation8 + $0x1408] sm:$0xff] }
 0x37e   :  { %v3094_v24 = vld [vmem:[#allocation8 + $0x1428] sm:$0xff]  ;;  %v3108_v4 = vld [vmem:[#allocation8 + $0x1498] sm:$0xff] }
 0x37f   :  { %6283 = vmatpush1.bf16.msra.mxu0 %v6282_v36  ;;  %v3063_v36 = vld [vmem:[#allocation8 + $0x1330] sm:$0xff]  ;;  %v3112_v47 = vld [vmem:[#allocation8 + $0x14b8] sm:$0xff] }
 0x380   :  { %6795 = vmatpush1.bf16.msra.mxu1 %v6794_v41  ;;  %6285 = vmatprep.subr.bf16.mxu0 %v6284_v39  ;;  %v3070_v41 = vld [vmem:[#allocation8 + $0x1368] sm:$0xff]  ;;  %v2407_v39 = vmul.f32 1.442695, %v2380_v15  ;;  %v3087_v15 = vld [vmem:[#allocation8 + $0x13f0] sm:$0xff] }
 0x381   :  { %6797 = vmatprep.subr.bf16.mxu1 %v6796_v50  ;;  %v6810_v50 = vpack.c.bf16 %v3063_v36, %v3059_v33  ;;  %v6300_v43 = vpack.c.bf16 %v3070_v41, %v3066_v38  ;;  %v6822_v46 = vpack.c.bf16 %v3087_v15, %v3083_v20  ;;  %v6312_v33 = vpack.c.bf16 %v3094_v24, %v3090_v23  ;;  %v3093_v36 = vld [vmem:[#allocation8 + $0x1420] sm:$0xff]  ;;  %v3115_v24 = vld [vmem:[#allocation8 + $0x14d0] sm:$0xff] }
 0x382   :  { %7176 = vpow2.f32 %v2407_v39  ;;  %v3091_v39 = vld [vmem:[#allocation8 + $0x1410] sm:$0xff]  ;;  %v3113_v15 = vld [vmem:[#allocation8 + $0x14c0] sm:$0xff] }
 0x383   :  { %6287 = vmatpush1.bf16.msra.mxu0 %v6286_v58  ;;  %v3074_v58 = vld [vmem:[#allocation8 + $0x1388] sm:$0xff]  ;;  %v6826_v54 = vpack.c.bf16 %v3095_v48, %v3091_v39  ;;  %v3117_v23 = vld [vmem:[#allocation8 + $0x14e0] sm:$0xff]  ;;  %v3123_v39 = vld [vmem:[#allocation8 + $0x1510] sm:$0xff] }
 0x384   :  { %6799 = vmatpush1.bf16.msra.mxu1 %v6798_v60  ;;  %6289 = vmatprep.subr.bf16.mxu0 %v6288_v11  ;;  %v3078_v60 = vld [vmem:[#allocation8 + $0x13a8] sm:$0xff]  ;;  %v3076_v11 = vld [vmem:[#allocation8 + $0x1398] sm:$0xff] }
 0x385   :  { %6801 = vmatprep.subr.bf16.mxu1 %v6800_v2  ;;  %v6304_v2 = vpack.c.bf16 %v3078_v60, %v3074_v58  ;;  %v6816_v8 = vpack.c.bf16 %v3080_v12, %v3076_v11  ;;  %v3099_v58 = vld [vmem:[#allocation8 + $0x1450] sm:$0xff] }
 0x386   :  { %v3103_v12 = vld [vmem:[#allocation8 + $0x1470] sm:$0xff] }
 0x387   :  { %6291 = vmatpush1.bf16.msra.mxu0 %v6290_v5  ;;  %v3082_v5 = vld [vmem:[#allocation8 + $0x13c8] sm:$0xff]  ;;  %v6830_v9 = vpack.c.bf16 %v3103_v12, %v3099_v58  ;;  %v3133_v58 = vld [vmem:[#allocation8 + $0x1560] sm:$0xff]  ;;  %v3135_v12 = vld [vmem:[#allocation8 + $0x1570] sm:$0xff] }
 0x388   :  { %6803 = vmatpush1.bf16.msra.mxu1 %v6802_v14  ;;  %6293 = vmatprep.subr.bf16.mxu0 %v6292_v16  ;;  %v3084_v14 = vld [vmem:[#allocation8 + $0x13d8] sm:$0xff]  ;;  %v6308_v42 = vpack.c.bf16 %v3086_v13, %v3082_v5  ;;  %v3105_v5 = vld [vmem:[#allocation8 + $0x1480] sm:$0xff] }
 0x389   :  { %6805 = vmatprep.subr.bf16.mxu1 %v6804_v3  ;;  %v3088_v16 = vld [vmem:[#allocation8 + $0x13f8] sm:$0xff]  ;;  %v3081_v3 = vld [vmem:[#allocation8 + $0x13c0] sm:$0xff] }
 0x38a   :  { %v6820_v21 = vpack.c.bf16 %v3088_v16, %v3084_v14  ;;  %v3109_v13 = vld [vmem:[#allocation8 + $0x14a0] sm:$0xff]  ;;  %v3107_v14 = vld [vmem:[#allocation8 + $0x1490] sm:$0xff]  ;;  %v6832_v16 = vpack.c.bf16 %v3112_v47, %v3108_v4  ;;  %v3144_v4 = vld [vmem:[#allocation8 + $0x15b8] sm:$0xff] }
 0x38b   :  { %6295 = vmatpush1.bf16.msra.mxu0 %v6294_v22  ;;  %v7175_v22 = vpop.eup %7174  ;;  %v6322_v20 = vpack.c.bf16 %v3109_v13, %v3105_v5  ;;  %v3139_v5 = vld [vmem:[#allocation8 + $0x1590] sm:$0xff] }
 0x38c   :  { %6807 = vmatpush1.bf16.msra.mxu1 %v6806_v26  ;;  %6297 = vmatprep.subr.bf16.mxu0 %v6296_v17  ;;  %v3096_v26 = vld [vmem:[#allocation8 + $0x1438] sm:$0xff]  ;;  %v6310_v17 = vpack.c.bf16 %v3085_v37, %v3081_v3  ;;  %v7177_v31 = vpop.eup %7176  ;;  %v4886_v38 = vadd.f32 -1.0, %v7175_v22 }
 0x38d   :  { %6809 = vmatprep.subr.bf16.mxu1 %v6808_v49  ;;  %v3089_v49 = vld [vmem:[#allocation8 + $0x1400] sm:$0xff]  ;;  %v6824_v41 = vpack.c.bf16 %v3096_v26, %v3092_v19  ;;  %v3116_v3 = vld [vmem:[#allocation8 + $0x14d8] sm:$0xff]  ;;  %v3119_v19 = vld [vmem:[#allocation8 + $0x14f0] sm:$0xff] }
 0x38e   :  { %v2441_v60 = vsel %vm2361_vm9, %v7636_v59, %v4886_v38  ;;  %v3120_v37 = vld [vmem:[#allocation8 + $0x14f8] sm:$0xff]  ;;  %v3122_v26 = vld [vmem:[#allocation8 + $0x1508] sm:$0xff]  ;;  %v3121_v38 = vld [vmem:[#allocation8 + $0x1500] sm:$0xff] }
 0x38f   :  { %6299 = vmatpush1.bf16.msra.mxu0 %v6298_v32  ;;  %v3102_v32 = vld [vmem:[#allocation8 + $0x1468] sm:$0xff]  ;;  %v6836_v22 = vpack.c.bf16 %v3120_v37, %v3116_v3 }
 0x390   :  { %6811 = vmatpush1.bf16.msra.mxu1 %v6810_v50  ;;  %6301 = vmatprep.subr.bf16.mxu0 %v6300_v43  ;;  %v6314_v50 = vpack.c.bf16 %v3093_v36, %v3089_v49  ;;  %v4889_v43 = vadd.f32 -1.0, %v7177_v31  ;;  %v6316_v11 = vpack.c.bf16 %v3102_v32, %v3098_v25  ;;  %v3124_v31 = vld [vmem:[#allocation8 + $0x1518] sm:$0xff]  ;;  %v6838_v49 = vpack.c.bf16 %v3119_v19, %v3115_v24  ;;  %v3127_v25 = vld [vmem:[#allocation8 + $0x1530] sm:$0xff]  ;;  %v3130_v32 = vld [vmem:[#allocation8 + $0x1548] sm:$0xff] }
 0x391   :  { %6813 = vmatprep.subr.bf16.mxu1 %v6812_v29  ;;  %v3097_v29 = vld [vmem:[#allocation8 + $0x1440] sm:$0xff]  ;;  %v3151_v24 = vld [vmem:[#allocation8 + $0x15f0] sm:$0xff]  ;;  %v3158_v19 = vld [vmem:[#allocation8 + $0x1628] sm:$0xff] }
 0x392   :  { %v2444_v6 = vsel %vm2364_vm10, %v7639_v7, %v4889_v43  ;;  %v3132_v43 = vld [vmem:[#allocation8 + $0x1558] sm:$0xff] }
 0x393   :  { %6303 = vmatpush1.bf16.msra.mxu0 %v6302_v62  ;;  %v3106_v62 = vld [vmem:[#allocation8 + $0x1488] sm:$0xff] }
 0x394   :  { %6815 = vmatpush1.bf16.msra.mxu1 %v6814_v63  ;;  %6305 = vmatprep.subr.bf16.mxu0 %v6304_v2  ;;  %v3110_v63 = vld [vmem:[#allocation8 + $0x14a8] sm:$0xff]  ;;  %v6828_v2 = vpack.c.bf16 %v3104_v53, %v3100_v52  ;;  %v3136_v52 = vld [vmem:[#allocation8 + $0x1578] sm:$0xff] }
 0x395   :  { %6817 = vmatprep.subr.bf16.mxu1 %v6816_v8  ;;  %v6318_v8 = vpack.c.bf16 %v3101_v57, %v3097_v29  ;;  %v6320_v59 = vpack.c.bf16 %v3110_v63, %v3106_v62  ;;  %v3129_v57 = vld [vmem:[#allocation8 + $0x1540] sm:$0xff]  ;;  %v3138_v62 = vld [vmem:[#allocation8 + $0x1588] sm:$0xff] }
 0x396   :  { %v3142_v63 = vld [vmem:[#allocation8 + $0x15a8] sm:$0xff]  ;;  %v6334_v47 = vpack.c.bf16 %v3133_v58, %v3129_v57  ;;  %v3161_v57 = vld [vmem:[#allocation8 + $0x1640] sm:$0xff] }
 0x397   :  { %6307 = vmatpush1.bf16.msra.mxu0 %v6306_v18  ;;  %v3111_v18 = vld [vmem:[#allocation8 + $0x14b0] sm:$0xff]  ;;  %v3165_v58 = vld [vmem:[#allocation8 + $0x1660] sm:$0xff] }
 0x398   :  { %6819 = vmatpush1.bf16.msra.mxu1 %v6818_v1  ;;  %6309 = vmatprep.subr.bf16.mxu0 %v6308_v42  ;;  %v3114_v1 = vld [vmem:[#allocation8 + $0x14c8] sm:$0xff]  ;;  %v6834_v7 = vpack.c.bf16 %v3111_v18, %v3107_v14  ;;  %v3143_v14 = vld [vmem:[#allocation8 + $0x15b0] sm:$0xff] }
 0x399   :  { %6821 = vmatprep.subr.bf16.mxu1 %v6820_v21  ;;  %v3118_v42 = vld [vmem:[#allocation8 + $0x14e8] sm:$0xff]  ;;  %v6850_v37 = vpack.c.bf16 %v3143_v14, %v3139_v5  ;;  %v3169_v5 = vld [vmem:[#allocation8 + $0x1680] sm:$0xff]  ;;  %v3171_v14 = vld [vmem:[#allocation8 + $0x1690] sm:$0xff] }
 0x39a   :  { %v6324_v21 = vpack.c.bf16 %v3118_v42, %v3114_v1  ;;  %v3150_v18 = vld [vmem:[#allocation8 + $0x15e8] sm:$0xff]  ;;  %v3148_v1 = vld [vmem:[#allocation8 + $0x15d8] sm:$0xff] }
 0x39b   :  { %6311 = vmatpush1.bf16.msra.mxu0 %v6310_v17  ;;  %v3126_v17 = vld [vmem:[#allocation8 + $0x1528] sm:$0xff]  ;;  %v3152_v42 = vld [vmem:[#allocation8 + $0x15f8] sm:$0xff] }
 0x39c   :  { %6823 = vmatpush1.bf16.msra.mxu1 %v6822_v46  ;;  %6313 = vmatprep.subr.bf16.mxu0 %v6312_v33  ;;  %v3128_v46 = vld [vmem:[#allocation8 + $0x1538] sm:$0xff]  ;;  %v6326_v33 = vpack.c.bf16 %v3117_v23, %v3113_v15  ;;  %v6328_v36 = vpack.c.bf16 %v3126_v17, %v3122_v26  ;;  %v3147_v15 = vld [vmem:[#allocation8 + $0x15d0] sm:$0xff]  ;;  %v6852_v23 = vpack.c.bf16 %v3152_v42, %v3148_v1  ;;  %v3178_v1 = vld [vmem:[#allocation8 + $0x16c8] sm:$0xff] }
 0x39d   :  { %6825 = vmatprep.subr.bf16.mxu1 %v6824_v41  ;;  %v3125_v41 = vld [vmem:[#allocation8 + $0x1520] sm:$0xff]  ;;  %v6840_v48 = vpack.c.bf16 %v3128_v46, %v3124_v31  ;;  %v3156_v26 = vld [vmem:[#allocation8 + $0x1618] sm:$0xff]  ;;  %v6854_v46 = vpack.c.bf16 %v3151_v24, %v3147_v15  ;;  %v3182_v42 = vld [vmem:[#allocation8 + $0x16e8] sm:$0xff] }
 0x39e   :  { %3844 = vmatmul.mubr.f32.vlgmr.msra.gmra.mrb[8].mxu0 %v2441_v60  ;;  %v6330_v53 = vpack.c.bf16 %v3125_v41, %v3121_v38  ;;  %v3160_v17 = vld [vmem:[#allocation8 + $0x1638] sm:$0xff]  ;;  %v3155_v38 = vld [vmem:[#allocation8 + $0x1610] sm:$0xff]  ;;  %v3177_v15 = vld [vmem:[#allocation8 + $0x16c0] sm:$0xff] }
 0x39f   :  { %4412 = vmatmul.mubr.f32.vlgmr.msra.gmra.mrb[8].mxu1 %v2441_v60  ;;  %6315 = vmatpush1.bf16.msra.mxu0 %v6314_v50  ;;  %v3134_v50 = vld [vmem:[#allocation8 + $0x1568] sm:$0xff]  ;;  %v3131_v60 = vld [vmem:[#allocation8 + $0x1550] sm:$0xff]  ;;  %v6856_v41 = vpack.c.bf16 %v3160_v17, %v3156_v26 }
 0x3a0   :  { %3914 = vmatprep.mubr.f32.mxu0 %v2444_v6  ;;  %6827 = vmatpush1.bf16.msra.mxu1 %v6826_v54  ;;  %v6842_v54 = vpack.c.bf16 %v3127_v25, %v3123_v39  ;;  %v6332_v29 = vpack.c.bf16 %v3134_v50, %v3130_v32  ;;  %v3159_v39 = vld [vmem:[#allocation8 + $0x1630] sm:$0xff]  ;;  %v3166_v25 = vld [vmem:[#allocation8 + $0x1668] sm:$0xff]  ;;  %v3164_v32 = vld [vmem:[#allocation8 + $0x1658] sm:$0xff] }
 0x3a1   :  { %4482 = vmatprep.mubr.f32.mxu1 %v2444_v6  ;;  %6317 = vmatprep.subr.bf16.mxu0 %v6316_v11  ;;  %v6844_v11 = vpack.c.bf16 %v3136_v52, %v3132_v43  ;;  %v6846_v6 = vpack.c.bf16 %v3135_v12, %v3131_v60  ;;  %v3168_v50 = vld [vmem:[#allocation8 + $0x1678] sm:$0xff]  ;;  %v3163_v60 = vld [vmem:[#allocation8 + $0x1650] sm:$0xff]  ;;  %v3186_v26 = vld [vmem:[#allocation8 + $0x1708] sm:$0xff] }
 0x3a2   :  { %6829 = vmatprep.subr.bf16.mxu1 %v6828_v2  ;;  %v3140_v2 = vld [vmem:[#allocation8 + $0x1598] sm:$0xff]  ;;  %v3167_v12 = vld [vmem:[#allocation8 + $0x1670] sm:$0xff]  ;;  %v3190_v17 = vld [vmem:[#allocation8 + $0x1728] sm:$0xff] }
 0x3a3   :  { %6319 = vmatpush1.bf16.msra.mxu0 %v6318_v8  ;;  %v6336_v8 = vpack.c.bf16 %v3142_v63, %v3138_v62  ;;  %v6848_v13 = vpack.c.bf16 %v3144_v4, %v3140_v2  ;;  %v7647_v52 = vld [vmem:[#allocation7 + $0x8] sm:$0xff]  ;;  %v3170_v62 = vld [vmem:[#allocation8 + $0x1688] sm:$0xff]  ;;  %v3179_v24 = vld [vmem:[#allocation8 + $0x16d0] sm:$0xff] }
 0x3a4   :  { %6831 = vmatpush1.bf16.msra.mxu1 %v6830_v9  ;;  %6321 = vmatprep.subr.bf16.mxu0 %v6320_v59  ;;  %v3137_v9 = vld [vmem:[#allocation8 + $0x1580] sm:$0xff]  ;;  %v3174_v63 = vld [vmem:[#allocation8 + $0x16a8] sm:$0xff]  ;;  %v1170_v2 = vrot.slane %v7647_v52, %v1137_v45  ;;  %v3172_v4 = vld [vmem:[#allocation8 + $0x1698] sm:$0xff] }
 0x3a5   :  { %6833 = vmatprep.subr.bf16.mxu1 %v6832_v16  ;;  %v3141_v59 = vld [vmem:[#allocation8 + $0x15a0] sm:$0xff]  ;;  %v3146_v16 = vld [vmem:[#allocation8 + $0x15c8] sm:$0xff] }
 0x3a6   :  { %v6338_v3 = vpack.c.bf16 %v3141_v59, %v3137_v9  ;;  %v6862_v9 = vpack.c.bf16 %v3167_v12, %v3163_v60  ;;  %v6352_v59 = vpack.c.bf16 %v3174_v63, %v3170_v62  ;;  %v7658_v45 = vadd.f32 %v7608_v30, %v1170_v2  ;;  %v3197_v12 = vld [vmem:[#allocation8 + $0x1760] sm:$0xff]  ;;  %v3195_v62 = vld [vmem:[#allocation8 + $0x1750] sm:$0xff] }
 0x3a7   :  { %6323 = vmatpush1.bf16.msra.mxu0 %v6322_v20  ;;  %v6340_v20 = vpack.c.bf16 %v3150_v18, %v3146_v16  ;;  %v3175_v18 = vld [vmem:[#allocation8 + $0x16b0] sm:$0xff] }
 0x3a8   :  { %6835 = vmatpush1.bf16.msra.mxu1 %v6834_v7  ;;  %6325 = vmatprep.subr.bf16.mxu0 %v6324_v21  ;;  %v3145_v7 = vld [vmem:[#allocation8 + $0x15c0] sm:$0xff]  ;;  %v2382_v30 = vmin.f32 %v7658_v45, 0.0  ;;  %v3199_v2 = vld [vmem:[#allocation8 + $0x1770] sm:$0xff]  ;;  %vm2366_vm12 = vcmp.gt.f32.partialorder %v7658_v45, 0.0 }
 0x3a9   :  { %6837 = vmatprep.subr.bf16.mxu1 %v6836_v22  ;;  %v3149_v21 = vld [vmem:[#allocation8 + $0x15e0] sm:$0xff]  ;;  %v3154_v22 = vld [vmem:[#allocation8 + $0x1608] sm:$0xff] }
 0x3aa   :  { %v6342_v31 = vpack.c.bf16 %v3149_v21, %v3145_v7  ;;  %v6866_v7 = vpack.c.bf16 %v3175_v18, %v3171_v14  ;;  %v6356_v21 = vpack.c.bf16 %v3182_v42, %v3178_v1  ;;  %v3201_v14 = vld [vmem:[#allocation8 + $0x1780] sm:$0xff]  ;;  %v3203_v18 = vld [vmem:[#allocation8 + $0x1790] sm:$0xff] }
 0x3ab   :  { %6327 = vmatpush1.bf16.msra.mxu0 %v6326_v33  ;;  %v6344_v33 = vpack.c.bf16 %v3158_v19, %v3154_v22  ;;  %v3183_v19 = vld [vmem:[#allocation8 + $0x16f0] sm:$0xff] }
 0x3ac   :  { %6839 = vmatpush1.bf16.msra.mxu1 %v6838_v49  ;;  %6329 = vmatprep.subr.bf16.mxu0 %v6328_v36  ;;  %v3153_v49 = vld [vmem:[#allocation8 + $0x1600] sm:$0xff]  ;;  %v3207_v42 = vld [vmem:[#allocation8 + $0x17b0] sm:$0xff] }
 0x3ad   :  { %6841 = vmatprep.subr.bf16.mxu1 %v6840_v48  ;;  %v3157_v36 = vld [vmem:[#allocation8 + $0x1620] sm:$0xff]  ;;  %v3162_v48 = vld [vmem:[#allocation8 + $0x1648] sm:$0xff] }
 0x3ae   :  { %v6346_v43 = vpack.c.bf16 %v3157_v36, %v3153_v49  ;;  %v6870_v36 = vpack.c.bf16 %v3183_v19, %v3179_v24  ;;  %v3213_v24 = vld [vmem:[#allocation8 + $0x17e0] sm:$0xff] }
 0x3af   :  { %6331 = vmatpush1.bf16.msra.mxu0 %v6330_v53  ;;  %v1158_v53 = vrot.slane %v7647_v52, %v7562_v28 }
 0x3b0   :  { %6843 = vmatpush1.bf16.msra.mxu1 %v6842_v54  ;;  %6333 = vmatprep.subr.bf16.mxu0 %v6332_v29  ;;  %v6858_v54 = vpack.c.bf16 %v3159_v39, %v3155_v38  ;;  %v6348_v29 = vpack.c.bf16 %v3166_v25, %v3162_v48  ;;  %v6360_v38 = vpack.c.bf16 %v3190_v17, %v3186_v26  ;;  %v3189_v39 = vld [vmem:[#allocation8 + $0x1720] sm:$0xff]  ;;  %v3187_v48 = vld [vmem:[#allocation8 + $0x1710] sm:$0xff]  ;;  %v3218_v17 = vld [vmem:[#allocation8 + $0x1808] sm:$0xff] }
 0x3b1   :  { %6845 = vmatprep.subr.bf16.mxu1 %v6844_v11  ;;  %v6860_v11 = vpack.c.bf16 %v3168_v50, %v3164_v32  ;;  %v3191_v32 = vld [vmem:[#allocation8 + $0x1730] sm:$0xff]  ;;  %v3194_v50 = vld [vmem:[#allocation8 + $0x1748] sm:$0xff] }
 0x3b2   :  { %v3215_v26 = vld [vmem:[#allocation8 + $0x17f0] sm:$0xff] }
 0x3b3   :  { %6335 = vmatpush1.bf16.msra.mxu0 %v6334_v47  ;;  %v3176_v47 = vld [vmem:[#allocation8 + $0x16b8] sm:$0xff] }
 0x3b4   :  { %6847 = vmatpush1.bf16.msra.mxu1 %v6846_v6  ;;  %6337 = vmatprep.subr.bf16.mxu0 %v6336_v8  ;;  %v6350_v6 = vpack.c.bf16 %v3165_v58, %v3161_v57  ;;  %v7655_v8 = vadd.f32 %v7555_v10, %v1158_v53  ;;  %v6864_v16 = vpack.c.bf16 %v3176_v47, %v3172_v4  ;;  %v2411_v53 = vmul.f32 1.442695, %v2382_v30  ;;  %v3202_v4 = vld [vmem:[#allocation8 + $0x1788] sm:$0xff] }
 0x3b5   :  { %6849 = vmatprep.subr.bf16.mxu1 %v6848_v13  ;;  %v3173_v13 = vld [vmem:[#allocation8 + $0x16a0] sm:$0xff]  ;;  %v6874_v58 = vpack.c.bf16 %v3191_v32, %v3187_v48  ;;  %v3206_v47 = vld [vmem:[#allocation8 + $0x17a8] sm:$0xff] }
 0x3b6   :  { %v6354_v10 = vpack.c.bf16 %v3173_v13, %v3169_v5  ;;  %v6878_v5 = vpack.c.bf16 %v3199_v2, %v3195_v62  ;;  %v6368_v13 = vpack.c.bf16 %v3206_v47, %v3202_v4  ;;  %v3222_v30 = vld [vmem:[#allocation8 + $0x1828] sm:$0xff]  ;;  %v3221_v48 = vld [vmem:[#allocation8 + $0x1820] sm:$0xff]  ;;  %vm2363_vm11 = vcmp.gt.f32.partialorder %v7655_v8, 0.0  ;;  %v3231_v47 = vld [vmem:[#allocation8 + $0x1870] sm:$0xff] }
 0x3b7   :  { %6339 = vmatpush1.bf16.msra.mxu0 %v6338_v3  ;;  %v3180_v3 = vld [vmem:[#allocation8 + $0x16d8] sm:$0xff]  ;;  %v3229_v62 = vld [vmem:[#allocation8 + $0x1860] sm:$0xff] }
 0x3b8   :  { %6851 = vmatpush1.bf16.msra.mxu1 %v6850_v37  ;;  %6341 = vmatprep.subr.bf16.mxu0 %v6340_v20  ;;  %v3184_v37 = vld [vmem:[#allocation8 + $0x16f8] sm:$0xff]  ;;  %v2379_v20 = vmin.f32 %v7655_v8, 0.0 }
 0x3b9   :  { %6853 = vmatprep.subr.bf16.mxu1 %v6852_v23  ;;  %v3181_v23 = vld [vmem:[#allocation8 + $0x16e0] sm:$0xff]  ;;  %v6868_v22 = vpack.c.bf16 %v3184_v37, %v3180_v3  ;;  %v3210_v3 = vld [vmem:[#allocation8 + $0x17c8] sm:$0xff] }
 0x3ba   :  { %v2405_v49 = vmul.f32 1.442695, %v2379_v20  ;;  %v3214_v37 = vld [vmem:[#allocation8 + $0x17e8] sm:$0xff]  ;;  %v3216_v20 = vld [vmem:[#allocation8 + $0x17f8] sm:$0xff] }
 0x3bb   :  { %6343 = vmatpush1.bf16.msra.mxu0 %v6342_v31  ;;  %v3188_v31 = vld [vmem:[#allocation8 + $0x1718] sm:$0xff] }
 0x3bc   :  { %6855 = vmatpush1.bf16.msra.mxu1 %v6854_v46  ;;  %6345 = vmatprep.subr.bf16.mxu0 %v6344_v33  ;;  %v3192_v46 = vld [vmem:[#allocation8 + $0x1738] sm:$0xff]  ;;  %v6358_v33 = vpack.c.bf16 %v3181_v23, %v3177_v15  ;;  %7178 = vpow2.f32 %v2405_v49  ;;  %v6372_v15 = vpack.c.bf16 %v3214_v37, %v3210_v3  ;;  %v3209_v23 = vld [vmem:[#allocation8 + $0x17c0] sm:$0xff]  ;;  %v3235_v3 = vld [vmem:[#allocation8 + $0x1890] sm:$0xff] }
 0x3bd   :  { %6857 = vmatprep.subr.bf16.mxu1 %v6856_v41  ;;  %v3185_v41 = vld [vmem:[#allocation8 + $0x1700] sm:$0xff]  ;;  %v6872_v25 = vpack.c.bf16 %v3192_v46, %v3188_v31  ;;  %7180 = vpow2.f32 %v2411_v53  ;;  %v3220_v46 = vld [vmem:[#allocation8 + $0x1818] sm:$0xff]  ;;  %v6374_v49 = vpack.c.bf16 %v3213_v24, %v3209_v23  ;;  %v3226_v53 = vld [vmem:[#allocation8 + $0x1848] sm:$0xff] }
 0x3be   :  { %v6362_v57 = vpack.c.bf16 %v3189_v39, %v3185_v41  ;;  %v6376_v41 = vpack.c.bf16 %v3222_v30, %v3218_v17  ;;  %v3217_v39 = vld [vmem:[#allocation8 + $0x1800] sm:$0xff]  ;;  %v3247_v30 = vld [vmem:[#allocation8 + $0x18f0] sm:$0xff] }
 0x3bf   :  { %6347 = vmatpush1.bf16.msra.mxu0 %v6346_v43  ;;  %v3198_v43 = vld [vmem:[#allocation8 + $0x1768] sm:$0xff] }
 0x3c0   :  { %6859 = vmatpush1.bf16.msra.mxu1 %v6858_v54  ;;  %6349 = vmatprep.subr.bf16.mxu0 %v6348_v29  ;;  %v3196_v54 = vld [vmem:[#allocation8 + $0x1758] sm:$0xff]  ;;  %v6364_v60 = vpack.c.bf16 %v3198_v43, %v3194_v50  ;;  %v3219_v50 = vld [vmem:[#allocation8 + $0x1810] sm:$0xff] }
 0x3c1   :  { %6861 = vmatprep.subr.bf16.mxu1 %v6860_v11  ;;  %v3200_v29 = vld [vmem:[#allocation8 + $0x1778] sm:$0xff]  ;;  %v3193_v11 = vld [vmem:[#allocation8 + $0x1740] sm:$0xff]  ;;  %v3223_v43 = vld [vmem:[#allocation8 + $0x1830] sm:$0xff] }
 0x3c2   :  { %v6876_v63 = vpack.c.bf16 %v3200_v29, %v3196_v54  ;;  %v3230_v54 = vld [vmem:[#allocation8 + $0x1868] sm:$0xff]  ;;  %v6378_v29 = vpack.c.bf16 %v3221_v48, %v3217_v39  ;;  %v3249_v39 = vld [vmem:[#allocation8 + $0x1900] sm:$0xff] }
 0x3c3   :  { %6351 = vmatpush1.bf16.msra.mxu0 %v6350_v6  ;;  %v3204_v6 = vld [vmem:[#allocation8 + $0x1798] sm:$0xff]  ;;  %v6380_v4 = vpack.c.bf16 %v3230_v54, %v3226_v53  ;;  %v3253_v48 = vld [vmem:[#allocation8 + $0x1920] sm:$0xff]  ;;  %v3262_v53 = vld [vmem:[#allocation8 + $0x1968] sm:$0xff] }
 0x3c4   :  { %6863 = vmatpush1.bf16.msra.mxu1 %v6862_v9  ;;  %6353 = vmatprep.subr.bf16.mxu0 %v6352_v59  ;;  %v3208_v9 = vld [vmem:[#allocation8 + $0x17b8] sm:$0xff]  ;;  %v6366_v59 = vpack.c.bf16 %v3197_v12, %v3193_v11  ;;  %v6890_v11 = vpack.c.bf16 %v3223_v43, %v3219_v50  ;;  %v3225_v12 = vld [vmem:[#allocation8 + $0x1840] sm:$0xff]  ;;  %v3255_v50 = vld [vmem:[#allocation8 + $0x1930] sm:$0xff] }
 0x3c5   :  { %6865 = vmatprep.subr.bf16.mxu1 %v6864_v16  ;;  %v3205_v16 = vld [vmem:[#allocation8 + $0x17a0] sm:$0xff]  ;;  %v6880_v1 = vpack.c.bf16 %v3208_v9, %v3204_v6  ;;  %v3234_v6 = vld [vmem:[#allocation8 + $0x1888] sm:$0xff]  ;;  %v3260_v54 = vld [vmem:[#allocation8 + $0x1958] sm:$0xff] }
 0x3c6   :  { %v7179_v31 = vpop.eup %7178  ;;  %v3238_v9 = vld [vmem:[#allocation8 + $0x18a8] sm:$0xff] }
 0x3c7   :  { %6355 = vmatpush1.bf16.msra.mxu0 %v6354_v10  ;;  %v3212_v10 = vld [vmem:[#allocation8 + $0x17d8] sm:$0xff]  ;;  %v3258_v43 = vld [vmem:[#allocation8 + $0x1948] sm:$0xff] }
 0x3c8   :  { %6867 = vmatpush1.bf16.msra.mxu1 %v6866_v7  ;;  %6357 = vmatprep.subr.bf16.mxu0 %v6356_v21  ;;  %v6370_v7 = vpack.c.bf16 %v3205_v16, %v3201_v14  ;;  %v6882_v21 = vpack.c.bf16 %v3207_v42, %v3203_v18  ;;  %v6884_v19 = vpack.c.bf16 %v3216_v20, %v3212_v10  ;;  %v3237_v42 = vld [vmem:[#allocation8 + $0x18a0] sm:$0xff]  ;;  %v3239_v10 = vld [vmem:[#allocation8 + $0x18b0] sm:$0xff]  ;;  %v3242_v20 = vld [vmem:[#allocation8 + $0x18c8] sm:$0xff] }
 0x3c9   :  { %6869 = vmatprep.subr.bf16.mxu1 %v6868_v22  ;;  %v3211_v22 = vld [vmem:[#allocation8 + $0x17d0] sm:$0xff]  ;;  %v6382_v16 = vpack.c.bf16 %v3229_v62, %v3225_v12  ;;  %v3261_v12 = vld [vmem:[#allocation8 + $0x1960] sm:$0xff] }
 0x3ca   :  { %v3259_v62 = vld [vmem:[#allocation8 + $0x1950] sm:$0xff] }
 0x3cb   :  { %6359 = vmatpush1.bf16.msra.mxu0 %v6358_v33  ;;  %v3224_v33 = vld [vmem:[#allocation8 + $0x1838] sm:$0xff] }
 0x3cc   :  { %6871 = vmatpush1.bf16.msra.mxu1 %v6870_v36  ;;  %6361 = vmatprep.subr.bf16.mxu0 %v6360_v38  ;;  %v7181_v36 = vpop.eup %7180  ;;  %v6886_v38 = vpack.c.bf16 %v3215_v26, %v3211_v22  ;;  %v6888_v32 = vpack.c.bf16 %v3224_v33, %v3220_v46  ;;  %v3241_v22 = vld [vmem:[#allocation8 + $0x18c0] sm:$0xff]  ;;  %v3243_v26 = vld [vmem:[#allocation8 + $0x18d0] sm:$0xff]  ;;  %v3254_v46 = vld [vmem:[#allocation8 + $0x1928] sm:$0xff] }
 0x3cd   :  { %6873 = vmatprep.subr.bf16.mxu1 %v6872_v25  ;;  %v4888_v25 = vadd.f32 -1.0, %v7179_v31  ;;  %v3250_v31 = vld [vmem:[#allocation8 + $0x1908] sm:$0xff]  ;;  %v3252_v33 = vld [vmem:[#allocation8 + $0x1918] sm:$0xff] }
 0x3cf   :  { %6363 = vmatpush1.bf16.msra.mxu0 %v6362_v57  ;;  %v4891_v57 = vadd.f32 -1.0, %v7181_v36  ;;  %v2443_v2 = vsel %vm2363_vm11, %v7655_v8, %v4888_v25  ;;  %v6384_v8 = vpack.c.bf16 %v3238_v9, %v3234_v6  ;;  %v3251_v25 = vld [vmem:[#allocation8 + $0x1910] sm:$0xff]  ;;  %v3268_v6 = vld [vmem:[#allocation8 + $0x1998] sm:$0xff] }
 0x3d0   :  { %6875 = vmatpush1.bf16.msra.mxu1 %v6874_v58  ;;  %6365 = vmatprep.subr.bf16.mxu0 %v6364_v60  ;;  %v3228_v58 = vld [vmem:[#allocation8 + $0x1858] sm:$0xff] }
 0x3d1   :  { %6877 = vmatprep.subr.bf16.mxu1 %v6876_v63  ;;  %v3232_v60 = vld [vmem:[#allocation8 + $0x1878] sm:$0xff]  ;;  %v3227_v63 = vld [vmem:[#allocation8 + $0x1850] sm:$0xff]  ;;  %v2446_v14 = vsel %vm2366_vm12, %v7658_v45, %v4891_v57  ;;  %v6898_v45 = vpack.c.bf16 %v3239_v10, %v3235_v3  ;;  %v6394_v57 = vpack.c.bf16 %v3253_v48, %v3249_v39  ;;  %v3278_v3 = vld [vmem:[#allocation8 + $0x19e8] sm:$0xff] }
 0x3d2   :  { %v6894_v18 = vpack.c.bf16 %v3231_v47, %v3227_v63  ;;  %v3270_v47 = vld [vmem:[#allocation8 + $0x19a8] sm:$0xff]  ;;  %v3272_v9 = vld [vmem:[#allocation8 + $0x19b8] sm:$0xff]  ;;  %v3287_v39 = vld [vmem:[#allocation8 + $0x1a30] sm:$0xff] }
 0x3d3   :  { %6367 = vmatpush1.bf16.msra.mxu0 %v6366_v59  ;;  %v6892_v59 = vpack.c.bf16 %v3232_v60, %v3228_v58  ;;  %v6906_v58 = vpack.c.bf16 %v3255_v50, %v3251_v25  ;;  %v6396_v60 = vpack.c.bf16 %v3262_v53, %v3258_v43  ;;  %v3280_v10 = vld [vmem:[#allocation8 + $0x19f8] sm:$0xff]  ;;  %v3290_v48 = vld [vmem:[#allocation8 + $0x1a48] sm:$0xff]  ;;  %v1166_v53 = vrot.slane %v7647_v52, %v1133_v44 }
 0x3d4   :  { %6879 = vmatpush1.bf16.msra.mxu1 %v6878_v5  ;;  %6369 = vmatprep.subr.bf16.mxu0 %v6368_v13  ;;  %v3236_v5 = vld [vmem:[#allocation8 + $0x1898] sm:$0xff]  ;;  %v3294_v25 = vld [vmem:[#allocation8 + $0x1a68] sm:$0xff] }
 0x3d5   :  { %6881 = vmatprep.subr.bf16.mxu1 %v6880_v1  ;;  %v3240_v13 = vld [vmem:[#allocation8 + $0x18b8] sm:$0xff]  ;;  %v3233_v1 = vld [vmem:[#allocation8 + $0x1880] sm:$0xff] }
 0x3d6   :  { %v6896_v37 = vpack.c.bf16 %v3240_v13, %v3236_v5  ;;  %v6386_v23 = vpack.c.bf16 %v3237_v42, %v3233_v1  ;;  %v3271_v1 = vld [vmem:[#allocation8 + $0x19b0] sm:$0xff]  ;;  %v3274_v42 = vld [vmem:[#allocation8 + $0x19c8] sm:$0xff]  ;;  %v3296_v50 = vld [vmem:[#allocation8 + $0x1a78] sm:$0xff] }
 0x3d7   :  { %6371 = vmatpush1.bf16.msra.mxu0 %v6370_v7  ;;  %v3246_v7 = vld [vmem:[#allocation8 + $0x18e8] sm:$0xff] }
 0x3d8   :  { %6883 = vmatpush1.bf16.msra.mxu1 %v6882_v21  ;;  %6373 = vmatprep.subr.bf16.mxu0 %v6372_v15  ;;  %v3244_v21 = vld [vmem:[#allocation8 + $0x18d8] sm:$0xff]  ;;  %v6388_v24 = vpack.c.bf16 %v3246_v7, %v3242_v20 }
 0x3d9   :  { %6885 = vmatprep.subr.bf16.mxu1 %v6884_v19  ;;  %v3248_v15 = vld [vmem:[#allocation8 + $0x18f8] sm:$0xff]  ;;  %v3245_v19 = vld [vmem:[#allocation8 + $0x18e0] sm:$0xff] }
 0x3da   :  { %v6900_v17 = vpack.c.bf16 %v3248_v15, %v3244_v21  ;;  %v6390_v36 = vpack.c.bf16 %v3245_v19, %v3241_v22  ;;  %v6404_v21 = vpack.c.bf16 %v3278_v3, %v3274_v42  ;;  %v3273_v15 = vld [vmem:[#allocation8 + $0x19c0] sm:$0xff]  ;;  %v3279_v22 = vld [vmem:[#allocation8 + $0x19f0] sm:$0xff]  ;;  %v3282_v19 = vld [vmem:[#allocation8 + $0x1a08] sm:$0xff] }
 0x3db   :  { %6375 = vmatpush1.bf16.msra.mxu0 %v6374_v49  ;;  %v3256_v49 = vld [vmem:[#allocation8 + $0x1938] sm:$0xff] }
 0x3dc   :  { %6887 = vmatpush1.bf16.msra.mxu1 %v6886_v38  ;;  %6377 = vmatprep.subr.bf16.mxu0 %v6376_v41  ;;  %v6902_v38 = vpack.c.bf16 %v3247_v30, %v3243_v26  ;;  %v6392_v41 = vpack.c.bf16 %v3254_v46, %v3250_v31  ;;  %v3286_v26 = vld [vmem:[#allocation8 + $0x1a28] sm:$0xff]  ;;  %v3288_v30 = vld [vmem:[#allocation8 + $0x1a38] sm:$0xff] }
 0x3dd   :  { %6889 = vmatprep.subr.bf16.mxu1 %v6888_v32  ;;  %v6904_v32 = vpack.c.bf16 %v3256_v49, %v3252_v33  ;;  %v6408_v33 = vpack.c.bf16 %v3286_v26, %v3282_v19  ;;  %v3281_v49 = vld [vmem:[#allocation8 + $0x1a00] sm:$0xff]  ;;  %v3312_v42 = vld [vmem:[#allocation8 + $0x1af8] sm:$0xff] }
 0x3de   :  { %3915 = vmatmul.mubr.f32.vlgmr.msra.gmra.mrb[8].mxu0 %v2443_v2  ;;  %v3320_v19 = vld [vmem:[#allocation8 + $0x1b38] sm:$0xff] }
 0x3df   :  { %4483 = vmatmul.mubr.f32.vlgmr.msra.gmra.mrb[8].mxu1 %v2443_v2  ;;  %6379 = vmatpush1.bf16.msra.mxu0 %v6378_v29  ;;  %v3264_v29 = vld [vmem:[#allocation8 + $0x1978] sm:$0xff]  ;;  %v3263_v2 = vld [vmem:[#allocation8 + $0x1970] sm:$0xff] }
 0x3e0   :  { %3985 = vmatprep.mubr.f32.mxu0 %v2446_v14  ;;  %6891 = vmatpush1.bf16.msra.mxu1 %v6890_v11  ;;  %v3257_v11 = vld [vmem:[#allocation8 + $0x1940] sm:$0xff]  ;;  %v6908_v63 = vpack.c.bf16 %v3264_v29, %v3260_v54  ;;  %v6910_v5 = vpack.c.bf16 %v3263_v2, %v3259_v62  ;;  %v6412_v29 = vpack.c.bf16 %v3294_v25, %v3290_v48  ;;  %v3298_v62 = vld [vmem:[#allocation8 + $0x1a88] sm:$0xff]  ;;  %v3324_v25 = vld [vmem:[#allocation8 + $0x1b58] sm:$0xff] }
 0x3e1   :  { %4553 = vmatprep.mubr.f32.mxu1 %v2446_v14  ;;  %6381 = vmatprep.subr.bf16.mxu0 %v6380_v4  ;;  %v3266_v4 = vld [vmem:[#allocation8 + $0x1988] sm:$0xff]  ;;  %v3265_v14 = vld [vmem:[#allocation8 + $0x1980] sm:$0xff]  ;;  %v1178_v2 = vrot.slane %v7647_v52, %v1145_v56  ;;  %v3308_v52 = vld [vmem:[#allocation8 + $0x1ad8] sm:$0xff] }
 0x3e2   :  { %6893 = vmatprep.subr.bf16.mxu1 %v6892_v59  ;;  %v6398_v59 = vpack.c.bf16 %v3261_v12, %v3257_v11  ;;  %v6400_v13 = vpack.c.bf16 %v3270_v47, %v3266_v4  ;;  %v3295_v12 = vld [vmem:[#allocation8 + $0x1a70] sm:$0xff]  ;;  %v3300_v4 = vld [vmem:[#allocation8 + $0x1a98] sm:$0xff] }
 0x3e3   :  { %6383 = vmatpush1.bf16.msra.mxu0 %v6382_v16  ;;  %v3269_v16 = vld [vmem:[#allocation8 + $0x19a0] sm:$0xff]  ;;  %v3304_v47 = vld [vmem:[#allocation8 + $0x1ab8] sm:$0xff]  ;;  %v7676_v56 = vadd.f32 %v7610_v34, %v1178_v2 }
 0x3e4   :  { %6895 = vmatpush1.bf16.msra.mxu1 %v6894_v18  ;;  %6385 = vmatprep.subr.bf16.mxu0 %v6384_v8  ;;  %v3267_v18 = vld [vmem:[#allocation8 + $0x1990] sm:$0xff]  ;;  %v6912_v8 = vpack.c.bf16 %v3272_v9, %v3268_v6  ;;  %v6402_v20 = vpack.c.bf16 %v3269_v16, %v3265_v14  ;;  %v7673_v6 = vadd.f32 %v7604_v27, %v1166_v53 }
 0x3e5   :  { %6897 = vmatprep.subr.bf16.mxu1 %v6896_v37  ;;  %v3276_v37 = vld [vmem:[#allocation8 + $0x19d8] sm:$0xff]  ;;  %v6914_v7 = vpack.c.bf16 %v3271_v1, %v3267_v18  ;;  %v3299_v14 = vld [vmem:[#allocation8 + $0x1a90] sm:$0xff]  ;;  %v6928_v16 = vpack.c.bf16 %v3304_v47, %v3300_v4  ;;  %v3310_v1 = vld [vmem:[#allocation8 + $0x1ae8] sm:$0xff]  ;;  %v2384_v34 = vmin.f32 %v7676_v56, 0.0  ;;  %vm2368_vm14 = vcmp.gt.f32.partialorder %v7676_v56, 0.0 }
 0x3e6   :  { %v3303_v18 = vld [vmem:[#allocation8 + $0x1ab0] sm:$0xff]  ;;  %v2381_v3 = vmin.f32 %v7673_v6, 0.0  ;;  %vm2365_vm13 = vcmp.gt.f32.partialorder %v7673_v6, 0.0 }
 0x3e7   :  { %6387 = vmatpush1.bf16.msra.mxu0 %v6386_v23  ;;  %v3277_v23 = vld [vmem:[#allocation8 + $0x19e0] sm:$0xff]  ;;  %v2415_v48 = vmul.f32 1.442695, %v2384_v34 }
 0x3e8   :  { %6899 = vmatpush1.bf16.msra.mxu1 %v6898_v45  ;;  %6389 = vmatprep.subr.bf16.mxu0 %v6388_v24  ;;  %v3275_v45 = vld [vmem:[#allocation8 + $0x19d0] sm:$0xff]  ;;  %v6916_v24 = vpack.c.bf16 %v3280_v10, %v3276_v37  ;;  %v6406_v31 = vpack.c.bf16 %v3277_v23, %v3273_v15  ;;  %v6930_v37 = vpack.c.bf16 %v3303_v18, %v3299_v14  ;;  %v3338_v14 = vld [vmem:[#allocation8 + $0x1bc8] sm:$0xff]  ;;  %v3340_v18 = vld [vmem:[#allocation8 + $0x1bd8] sm:$0xff] }
 0x3e9   :  { %6901 = vmatprep.subr.bf16.mxu1 %v6900_v17  ;;  %v3284_v17 = vld [vmem:[#allocation8 + $0x1a18] sm:$0xff]  ;;  %v6918_v46 = vpack.c.bf16 %v3279_v22, %v3275_v45  ;;  %v6932_v15 = vpack.c.bf16 %v3312_v42, %v3308_v52  ;;  %v3311_v23 = vld [vmem:[#allocation8 + $0x1af0] sm:$0xff]  ;;  %v3314_v45 = vld [vmem:[#allocation8 + $0x1b08] sm:$0xff] }
 0x3ea   :  { %v3316_v22 = vld [vmem:[#allocation8 + $0x1b18] sm:$0xff] }
 0x3eb   :  { %6391 = vmatpush1.bf16.msra.mxu0 %v6390_v36  ;;  %v3285_v36 = vld [vmem:[#allocation8 + $0x1a20] sm:$0xff] }
 0x3ec   :  { %6903 = vmatpush1.bf16.msra.mxu1 %v6902_v38  ;;  %6393 = vmatprep.subr.bf16.mxu0 %v6392_v41  ;;  %v3283_v38 = vld [vmem:[#allocation8 + $0x1a10] sm:$0xff]  ;;  %v6920_v41 = vpack.c.bf16 %v3288_v30, %v3284_v17  ;;  %v6410_v43 = vpack.c.bf16 %v3285_v36, %v3281_v49  ;;  %v2409_v17 = vmul.f32 1.442695, %v2381_v3  ;;  %v6936_v36 = vpack.c.bf16 %v3320_v19, %v3316_v22  ;;  %v3341_v3 = vld [vmem:[#allocation8 + $0x1be0] sm:$0xff] }
 0x3ed   :  { %6905 = vmatprep.subr.bf16.mxu1 %v6904_v32  ;;  %v3292_v32 = vld [vmem:[#allocation8 + $0x1a58] sm:$0xff]  ;;  %v6922_v54 = vpack.c.bf16 %v3287_v39, %v3283_v38  ;;  %v3315_v49 = vld [vmem:[#allocation8 + $0x1b10] sm:$0xff]  ;;  %v3326_v39 = vld [vmem:[#allocation8 + $0x1b68] sm:$0xff] }
 0x3ee   :  { %v6924_v11 = vpack.c.bf16 %v3296_v50, %v3292_v32  ;;  %v3319_v38 = vld [vmem:[#allocation8 + $0x1b30] sm:$0xff]  ;;  %v3328_v32 = vld [vmem:[#allocation8 + $0x1b78] sm:$0xff]  ;;  %7182 = vpow2.f32 %v2409_v17  ;;  %v3349_v17 = vld [vmem:[#allocation8 + $0x1c20] sm:$0xff] }
 0x3ef   :  { %6395 = vmatpush1.bf16.msra.mxu0 %v6394_v57  ;;  %v3289_v57 = vld [vmem:[#allocation8 + $0x1a40] sm:$0xff]  ;;  %7184 = vpow2.f32 %v2415_v48  ;;  %v3360_v48 = vld [vmem:[#allocation8 + $0x1c78] sm:$0xff] }
 0x3f0   :  { %6907 = vmatpush1.bf16.msra.mxu1 %v6906_v58  ;;  %6397 = vmatprep.subr.bf16.mxu0 %v6396_v60  ;;  %v3293_v58 = vld [vmem:[#allocation8 + $0x1a60] sm:$0xff]  ;;  %v3291_v60 = vld [vmem:[#allocation8 + $0x1a50] sm:$0xff] }
 0x3f1   :  { %6909 = vmatprep.subr.bf16.mxu1 %v6908_v63  ;;  %v3302_v63 = vld [vmem:[#allocation8 + $0x1aa8] sm:$0xff]  ;;  %v6414_v44 = vpack.c.bf16 %v3293_v58, %v3289_v57  ;;  %v6926_v9 = vpack.c.bf16 %v3295_v12, %v3291_v60  ;;  %v3323_v57 = vld [vmem:[#allocation8 + $0x1b50] sm:$0xff]  ;;  %v6940_v58 = vpack.c.bf16 %v3328_v32, %v3324_v25  ;;  %v3353_v32 = vld [vmem:[#allocation8 + $0x1c40] sm:$0xff] }
 0x3f2   :  { %v3327_v60 = vld [vmem:[#allocation8 + $0x1b70] sm:$0xff]  ;;  %v3334_v12 = vld [vmem:[#allocation8 + $0x1ba8] sm:$0xff] }
 0x3f3   :  { %6399 = vmatpush1.bf16.msra.mxu0 %v6398_v59  ;;  %v6416_v59 = vpack.c.bf16 %v3302_v63, %v3298_v62  ;;  %v3332_v62 = vld [vmem:[#allocation8 + $0x1b98] sm:$0xff]  ;;  %v6942_v4 = vpack.c.bf16 %v3327_v60, %v3323_v57  ;;  %v3362_v57 = vld [vmem:[#allocation8 + $0x1c88] sm:$0xff] }
 0x3f4   :  { %6911 = vmatpush1.bf16.msra.mxu1 %v6910_v5  ;;  %6401 = vmatprep.subr.bf16.mxu0 %v6400_v13  ;;  %v3297_v5 = vld [vmem:[#allocation8 + $0x1a80] sm:$0xff]  ;;  %v3336_v63 = vld [vmem:[#allocation8 + $0x1bb8] sm:$0xff] }
 0x3f5   :  { %6913 = vmatprep.subr.bf16.mxu1 %v6912_v8  ;;  %v3301_v13 = vld [vmem:[#allocation8 + $0x1aa0] sm:$0xff]  ;;  %v3306_v8 = vld [vmem:[#allocation8 + $0x1ac8] sm:$0xff] }
 0x3f6   :  { %v6418_v27 = vpack.c.bf16 %v3301_v13, %v3297_v5  ;;  %v6420_v10 = vpack.c.bf16 %v3310_v1, %v3306_v8  ;;  %v6944_v5 = vpack.c.bf16 %v3336_v63, %v3332_v62  ;;  %v3335_v13 = vld [vmem:[#allocation8 + $0x1bb0] sm:$0xff]  ;;  %v3344_v8 = vld [vmem:[#allocation8 + $0x1bf8] sm:$0xff] }
 0x3f7   :  { %6403 = vmatpush1.bf16.msra.mxu0 %v6402_v20  ;;  %v3305_v20 = vld [vmem:[#allocation8 + $0x1ac0] sm:$0xff] }
 0x3f8   :  { %6915 = vmatpush1.bf16.msra.mxu1 %v6914_v7  ;;  %6405 = vmatprep.subr.bf16.mxu0 %v6404_v21  ;;  %v3309_v7 = vld [vmem:[#allocation8 + $0x1ae0] sm:$0xff]  ;;  %v3307_v21 = vld [vmem:[#allocation8 + $0x1ad0] sm:$0xff] }
 0x3f9   :  { %6917 = vmatprep.subr.bf16.mxu1 %v6916_v24  ;;  %v3318_v24 = vld [vmem:[#allocation8 + $0x1b28] sm:$0xff]  ;;  %v6422_v26 = vpack.c.bf16 %v3309_v7, %v3305_v20  ;;  %v6934_v30 = vpack.c.bf16 %v3311_v23, %v3307_v21  ;;  %v3343_v20 = vld [vmem:[#allocation8 + $0x1bf0] sm:$0xff]  ;;  %v3348_v23 = vld [vmem:[#allocation8 + $0x1c18] sm:$0xff] }
 0x3fa   :  { %v3346_v7 = vld [vmem:[#allocation8 + $0x1c08] sm:$0xff] }
 0x3fb   :  { %6407 = vmatpush1.bf16.msra.mxu0 %v6406_v31  ;;  %v6424_v31 = vpack.c.bf16 %v3318_v24, %v3314_v45  ;;  %v3350_v21 = vld [vmem:[#allocation8 + $0x1c28] sm:$0xff]  ;;  %v3352_v45 = vld [vmem:[#allocation8 + $0x1c38] sm:$0xff] }
 0x3fc   :  { %6919 = vmatpush1.bf16.msra.mxu1 %v6918_v46  ;;  %6409 = vmatprep.subr.bf16.mxu0 %v6408_v33  ;;  %v3313_v46 = vld [vmem:[#allocation8 + $0x1b00] sm:$0xff]  ;;  %v6440_v19 = vpack.c.bf16 %v3350_v21, %v3346_v7  ;;  %v3384_v7 = vld [vmem:[#allocation8 + $0x1d38] sm:$0xff] }
 0x3fd   :  { %6921 = vmatprep.subr.bf16.mxu1 %v6920_v41  ;;  %v3317_v33 = vld [vmem:[#allocation8 + $0x1b20] sm:$0xff]  ;;  %v3322_v41 = vld [vmem:[#allocation8 + $0x1b48] sm:$0xff] }
 0x3fe   :  { %v6426_v50 = vpack.c.bf16 %v3317_v33, %v3313_v46  ;;  %v6428_v53 = vpack.c.bf16 %v3326_v39, %v3322_v41  ;;  %v3347_v46 = vld [vmem:[#allocation8 + $0x1c10] sm:$0xff]  ;;  %v3356_v39 = vld [vmem:[#allocation8 + $0x1c58] sm:$0xff] }
 0x3ff   :  { %6411 = vmatpush1.bf16.msra.mxu0 %v6410_v43  ;;  %v6938_v43 = vpack.c.bf16 %v3319_v38, %v3315_v49  ;;  %v3351_v33 = vld [vmem:[#allocation8 + $0x1c30] sm:$0xff]  ;;  %v3354_v49 = vld [vmem:[#allocation8 + $0x1c48] sm:$0xff]  ;;  %v6956_v60 = vpack.c.bf16 %v3360_v48, %v3356_v39 }
 0x400   :  { %6923 = vmatpush1.bf16.msra.mxu1 %v6922_v54  ;;  %6413 = vmatprep.subr.bf16.mxu0 %v6412_v29  ;;  %v3321_v54 = vld [vmem:[#allocation8 + $0x1b40] sm:$0xff]  ;;  %v6954_v25 = vpack.c.bf16 %v3351_v33, %v3347_v46  ;;  %v3391_v48 = vld [vmem:[#allocation8 + $0x1d70] sm:$0xff] }
 0x401   :  { %6925 = vmatprep.subr.bf16.mxu1 %v6924_v11  ;;  %v3325_v29 = vld [vmem:[#allocation8 + $0x1b60] sm:$0xff]  ;;  %v3330_v11 = vld [vmem:[#allocation8 + $0x1b88] sm:$0xff] }
 0x402   :  { %v6430_v2 = vpack.c.bf16 %v3325_v29, %v3321_v54  ;;  %v6432_v47 = vpack.c.bf16 %v3334_v12, %v3330_v11  ;;  %v3359_v29 = vld [vmem:[#allocation8 + $0x1c70] sm:$0xff]  ;;  %v3364_v11 = vld [vmem:[#allocation8 + $0x1c98] sm:$0xff] }
 0x403   :  { %6415 = vmatpush1.bf16.msra.mxu0 %v6414_v44  ;;  %v3329_v44 = vld [vmem:[#allocation8 + $0x1b80] sm:$0xff]  ;;  %v3368_v12 = vld [vmem:[#allocation8 + $0x1cb8] sm:$0xff] }
 0x404   :  { %6927 = vmatpush1.bf16.msra.mxu1 %v6926_v9  ;;  %6417 = vmatprep.subr.bf16.mxu0 %v6416_v59  ;;  %v3333_v9 = vld [vmem:[#allocation8 + $0x1ba0] sm:$0xff]  ;;  %v3331_v59 = vld [vmem:[#allocation8 + $0x1b90] sm:$0xff] }
 0x405   :  { %6929 = vmatprep.subr.bf16.mxu1 %v6928_v16  ;;  %v3342_v16 = vld [vmem:[#allocation8 + $0x1be8] sm:$0xff]  ;;  %v6434_v1 = vpack.c.bf16 %v3333_v9, %v3329_v44  ;;  %v6946_v52 = vpack.c.bf16 %v3335_v13, %v3331_v59  ;;  %v3363_v44 = vld [vmem:[#allocation8 + $0x1c90] sm:$0xff]  ;;  %v6960_v9 = vpack.c.bf16 %v3368_v12, %v3364_v11 }
 0x406   :  { %v6436_v42 = vpack.c.bf16 %v3342_v16, %v3338_v14  ;;  %v3367_v59 = vld [vmem:[#allocation8 + $0x1cb0] sm:$0xff]  ;;  %v3374_v13 = vld [vmem:[#allocation8 + $0x1ce8] sm:$0xff]  ;;  %v3372_v14 = vld [vmem:[#allocation8 + $0x1cd8] sm:$0xff] }
 0x407   :  { %6419 = vmatpush1.bf16.msra.mxu0 %v6418_v27  ;;  %v3337_v27 = vld [vmem:[#allocation8 + $0x1bc0] sm:$0xff]  ;;  %v3376_v16 = vld [vmem:[#allocation8 + $0x1cf8] sm:$0xff]  ;;  %v3399_v12 = vld [vmem:[#allocation8 + $0x1db0] sm:$0xff] }
 0x408   :  { %6931 = vmatpush1.bf16.msra.mxu1 %v6930_v37  ;;  %6421 = vmatprep.subr.bf16.mxu0 %v6420_v10  ;;  %v3339_v37 = vld [vmem:[#allocation8 + $0x1bd0] sm:$0xff]  ;;  %v6948_v10 = vpack.c.bf16 %v3344_v8, %v3340_v18  ;;  %v6438_v24 = vpack.c.bf16 %v3341_v3, %v3337_v27  ;;  %v6964_v27 = vpack.c.bf16 %v3376_v16, %v3372_v14  ;;  %v3410_v16 = vld [vmem:[#allocation8 + $0x1e08] sm:$0xff] }
 0x409   :  { %6933 = vmatprep.subr.bf16.mxu1 %v6932_v15  ;;  %v7183_v15 = vpop.eup %7182  ;;  %v6950_v22 = vpack.c.bf16 %v3343_v20, %v3339_v37  ;;  %v3375_v3 = vld [vmem:[#allocation8 + $0x1cf0] sm:$0xff]  ;;  %v3378_v37 = vld [vmem:[#allocation8 + $0x1d08] sm:$0xff]  ;;  %v3380_v20 = vld [vmem:[#allocation8 + $0x1d18] sm:$0xff] }
 0x40a   :  { %v7185_v34 = vpop.eup %7184  ;;  %v3407_v14 = vld [vmem:[#allocation8 + $0x1df0] sm:$0xff] }
 0x40b   :  { %6423 = vmatpush1.bf16.msra.mxu0 %v6422_v26  ;;  %v3345_v26 = vld [vmem:[#allocation8 + $0x1c00] sm:$0xff]  ;;  %v4893_v41 = vadd.f32 -1.0, %v7185_v34  ;;  %v3379_v34 = vld [vmem:[#allocation8 + $0x1d10] sm:$0xff] }
 0x40c   :  { %6935 = vmatpush1.bf16.msra.mxu1 %v6934_v30  ;;  %6425 = vmatprep.subr.bf16.mxu0 %v6424_v31  ;;  %v4890_v30 = vadd.f32 -1.0, %v7183_v15  ;;  %v6952_v31 = vpack.c.bf16 %v3352_v45, %v3348_v23  ;;  %v6442_v38 = vpack.c.bf16 %v3349_v17, %v3345_v26  ;;  %v3377_v45 = vld [vmem:[#allocation8 + $0x1d00] sm:$0xff]  ;;  %v3386_v26 = vld [vmem:[#allocation8 + $0x1d48] sm:$0xff] }
 0x40d   :  { %6937 = vmatprep.subr.bf16.mxu1 %v6936_v36  ;;  %v3358_v36 = vld [vmem:[#allocation8 + $0x1c68] sm:$0xff]  ;;  %v2448_v62 = vsel %vm2368_vm14, %v7676_v56, %v4893_v41  ;;  %v6962_v56 = vpack.c.bf16 %v3367_v59, %v3363_v44  ;;  %v3387_v41 = vld [vmem:[#allocation8 + $0x1d50] sm:$0xff]  ;;  %v3405_v59 = vld [vmem:[#allocation8 + $0x1de0] sm:$0xff] }
 0x40e   :  { %v6444_v54 = vpack.c.bf16 %v3358_v36, %v3354_v49  ;;  %v3390_v17 = vld [vmem:[#allocation8 + $0x1d68] sm:$0xff]  ;;  %v3385_v36 = vld [vmem:[#allocation8 + $0x1d40] sm:$0xff] }
 0x40f   :  { %6427 = vmatpush1.bf16.msra.mxu0 %v6426_v50  ;;  %v3357_v50 = vld [vmem:[#allocation8 + $0x1c60] sm:$0xff]  ;;  %v6460_v49 = vpack.c.bf16 %v3390_v17, %v3386_v26 }
 0x410   :  { %6939 = vmatpush1.bf16.msra.mxu1 %v6938_v43  ;;  %6429 = vmatprep.subr.bf16.mxu0 %v6428_v53  ;;  %v3355_v43 = vld [vmem:[#allocation8 + $0x1c50] sm:$0xff]  ;;  %v2445_v53 = vsel %vm2365_vm13, %v7673_v6, %v4890_v30  ;;  %v6446_v63 = vpack.c.bf16 %v3357_v50, %v3353_v32  ;;  %v3388_v30 = vld [vmem:[#allocation8 + $0x1d58] sm:$0xff]  ;;  %v3398_v32 = vld [vmem:[#allocation8 + $0x1da8] sm:$0xff] }
 0x411   :  { %6941 = vmatprep.subr.bf16.mxu1 %v6940_v58  ;;  %v3366_v58 = vld [vmem:[#allocation8 + $0x1ca8] sm:$0xff]  ;;  %v3396_v50 = vld [vmem:[#allocation8 + $0x1d98] sm:$0xff]  ;;  %v3417_v26 = vld [vmem:[#allocation8 + $0x1e40] sm:$0xff] }
 0x412   :  { %v6448_v6 = vpack.c.bf16 %v3366_v58, %v3362_v57  ;;  %v3393_v57 = vld [vmem:[#allocation8 + $0x1d80] sm:$0xff] }
 0x413   :  { %6431 = vmatpush1.bf16.msra.mxu0 %v6430_v2  ;;  %v6958_v2 = vpack.c.bf16 %v3359_v29, %v3355_v43  ;;  %v3400_v43 = vld [vmem:[#allocation8 + $0x1db8] sm:$0xff]  ;;  %v3397_v58 = vld [vmem:[#allocation8 + $0x1da0] sm:$0xff] }
 0x414   :  { %6943 = vmatpush1.bf16.msra.mxu1 %v6942_v4  ;;  %6433 = vmatprep.subr.bf16.mxu0 %v6432_v47  ;;  %v3361_v4 = vld [vmem:[#allocation8 + $0x1c80] sm:$0xff]  ;;  %v6976_v11 = vpack.c.bf16 %v3400_v43, %v3396_v50  ;;  %v3431_v43 = vld [vmem:[#allocation8 + $0x1eb0] sm:$0xff] }
 0x415   :  { %6945 = vmatprep.subr.bf16.mxu1 %v6944_v5  ;;  %v3365_v47 = vld [vmem:[#allocation8 + $0x1ca0] sm:$0xff]  ;;  %v3370_v5 = vld [vmem:[#allocation8 + $0x1cc8] sm:$0xff] }
 0x416   :  { %v6450_v18 = vpack.c.bf16 %v3365_v47, %v3361_v4  ;;  %v6452_v8 = vpack.c.bf16 %v3374_v13, %v3370_v5  ;;  %v6466_v4 = vpack.c.bf16 %v3397_v58, %v3393_v57  ;;  %v3403_v5 = vld [vmem:[#allocation8 + $0x1dd0] sm:$0xff]  ;;  %v3421_v17 = vld [vmem:[#allocation8 + $0x1e60] sm:$0xff]  ;;  %v3440_v57 = vld [vmem:[#allocation8 + $0x1ef8] sm:$0xff] }
 0x417   :  { %6435 = vmatpush1.bf16.msra.mxu0 %v6434_v1  ;;  %v3369_v1 = vld [vmem:[#allocation8 + $0x1cc0] sm:$0xff] }
 0x418   :  { %6947 = vmatpush1.bf16.msra.mxu1 %v6946_v52  ;;  %6437 = vmatprep.subr.bf16.mxu0 %v6436_v42  ;;  %v3373_v52 = vld [vmem:[#allocation8 + $0x1ce0] sm:$0xff]  ;;  %v3371_v42 = vld [vmem:[#allocation8 + $0x1cd0] sm:$0xff] }
 0x419   :  { %6949 = vmatprep.subr.bf16.mxu1 %v6948_v10  ;;  %v3382_v10 = vld [vmem:[#allocation8 + $0x1d28] sm:$0xff]  ;;  %v6454_v21 = vpack.c.bf16 %v3373_v52, %v3369_v1  ;;  %v6966_v15 = vpack.c.bf16 %v3375_v3, %v3371_v42  ;;  %v6982_v52 = vpack.c.bf16 %v3407_v14, %v3403_v5  ;;  %v3413_v3 = vld [vmem:[#allocation8 + $0x1e20] sm:$0xff] }
 0x41a   :  { %v6456_v23 = vpack.c.bf16 %v3382_v10, %v3378_v37  ;;  %v3411_v37 = vld [vmem:[#allocation8 + $0x1e10] sm:$0xff] }
 0x41b   :  { %6439 = vmatpush1.bf16.msra.mxu0 %v6438_v24  ;;  %v3381_v24 = vld [vmem:[#allocation8 + $0x1d20] sm:$0xff] }
 0x41c   :  { %6951 = vmatpush1.bf16.msra.mxu1 %v6950_v22  ;;  %6441 = vmatprep.subr.bf16.mxu0 %v6440_v19  ;;  %v6968_v22 = vpack.c.bf16 %v3384_v7, %v3380_v20  ;;  %v3383_v19 = vld [vmem:[#allocation8 + $0x1d30] sm:$0xff]  ;;  %v6458_v46 = vpack.c.bf16 %v3381_v24, %v3377_v45  ;;  %v3418_v7 = vld [vmem:[#allocation8 + $0x1e48] sm:$0xff]  ;;  %v7199_v24 = vld [vmem:[#allocation7 + $0x8] sm:$0xff] }
 0x41d   :  { %6953 = vmatprep.subr.bf16.mxu1 %v6952_v31  ;;  %v3392_v31 = vld [vmem:[#allocation8 + $0x1d78] sm:$0xff]  ;;  %v6970_v33 = vpack.c.bf16 %v3383_v19, %v3379_v34  ;;  %v3415_v20 = vld [vmem:[#allocation8 + $0x1e30] sm:$0xff]  ;;  %v1174_v34 = vrot.slane %v7199_v24, %v1141_v55  ;;  %v3458_v24 = vld [vmem:[#allocation8 + $0x1f88] sm:$0xff] }
 0x41e   :  { %3986 = vmatmul.mubr.f32.vlgmr.msra.gmra.mrb[8].mxu0 %v2445_v53  ;;  %v6972_v39 = vpack.c.bf16 %v3392_v31, %v3388_v30  ;;  %v3419_v30 = vld [vmem:[#allocation8 + $0x1e50] sm:$0xff] }
 0x41f   :  { %4554 = vmatmul.mubr.f32.vlgmr.msra.gmra.mrb[8].mxu1 %v2445_v53  ;;  %6443 = vmatpush1.bf16.msra.mxu0 %v6442_v38  ;;  %v3389_v38 = vld [vmem:[#allocation8 + $0x1d60] sm:$0xff] }
 0x420   :  { %4056 = vmatprep.mubr.f32.mxu0 %v2448_v62  ;;  %6955 = vmatpush1.bf16.msra.mxu1 %v6954_v25  ;;  %v3394_v25 = vld [vmem:[#allocation8 + $0x1d88] sm:$0xff]  ;;  %v6462_v53 = vpack.c.bf16 %v3389_v38, %v3385_v36  ;;  %v3428_v36 = vld [vmem:[#allocation8 + $0x1e98] sm:$0xff] }
 0x421   :  { %4624 = vmatprep.mubr.f32.mxu1 %v2448_v62  ;;  %6445 = vmatprep.subr.bf16.mxu0 %v6444_v54  ;;  %v6974_v54 = vpack.c.bf16 %v3391_v48, %v3387_v41  ;;  %v6464_v29 = vpack.c.bf16 %v3398_v32, %v3394_v25  ;;  %v3402_v62 = vld [vmem:[#allocation8 + $0x1dc8] sm:$0xff]  ;;  %v3432_v38 = vld [vmem:[#allocation8 + $0x1eb8] sm:$0xff]  ;;  %v6478_v41 = vpack.c.bf16 %v3421_v17, %v3417_v26  ;;  %v3425_v48 = vld [vmem:[#allocation8 + $0x1e80] sm:$0xff] }
 0x422   :  { %6957 = vmatprep.subr.bf16.mxu1 %v6956_v60  ;;  %v3395_v60 = vld [vmem:[#allocation8 + $0x1d90] sm:$0xff]  ;;  %v3429_v25 = vld [vmem:[#allocation8 + $0x1ea0] sm:$0xff]  ;;  %v6992_v50 = vpack.c.bf16 %v3432_v38, %v3428_v36  ;;  %v3466_v38 = vld [vmem:[#allocation8 + $0x1fc8] sm:$0xff] }
 0x423   :  { %6447 = vmatpush1.bf16.msra.mxu0 %v6446_v63  ;;  %v3406_v63 = vld [vmem:[#allocation8 + $0x1de8] sm:$0xff]  ;;  %v6978_v47 = vpack.c.bf16 %v3399_v12, %v3395_v60  ;;  %v3427_v32 = vld [vmem:[#allocation8 + $0x1e90] sm:$0xff]  ;;  %v6482_v58 = vpack.c.bf16 %v3429_v25, %v3425_v48  ;;  %v3433_v12 = vld [vmem:[#allocation8 + $0x1ec0] sm:$0xff] }
 0x424   :  { %6959 = vmatpush1.bf16.msra.mxu1 %v6958_v2  ;;  %6449 = vmatprep.subr.bf16.mxu0 %v6448_v6  ;;  %v3404_v2 = vld [vmem:[#allocation8 + $0x1dd8] sm:$0xff]  ;;  %v6468_v44 = vpack.c.bf16 %v3406_v63, %v3402_v62  ;;  %v3437_v62 = vld [vmem:[#allocation8 + $0x1ee0] sm:$0xff]  ;;  %v3435_v63 = vld [vmem:[#allocation8 + $0x1ed0] sm:$0xff] }
 0x425   :  { %6961 = vmatprep.subr.bf16.mxu1 %v6960_v9  ;;  %v3408_v6 = vld [vmem:[#allocation8 + $0x1df8] sm:$0xff]  ;;  %v3401_v9 = vld [vmem:[#allocation8 + $0x1dc0] sm:$0xff]  ;;  %v3463_v36 = vld [vmem:[#allocation8 + $0x1fb0] sm:$0xff] }
 0x426   :  { %v6980_v13 = vpack.c.bf16 %v3408_v6, %v3404_v2  ;;  %v6470_v1 = vpack.c.bf16 %v3405_v59, %v3401_v9  ;;  %v3439_v6 = vld [vmem:[#allocation8 + $0x1ef0] sm:$0xff]  ;;  %v3448_v9 = vld [vmem:[#allocation8 + $0x1f38] sm:$0xff]  ;;  %v6486_v59 = vpack.c.bf16 %v3437_v62, %v3433_v12 }
 0x427   :  { %6451 = vmatpush1.bf16.msra.mxu0 %v6450_v18  ;;  %v3414_v18 = vld [vmem:[#allocation8 + $0x1e28] sm:$0xff] }
 0x428   :  { %6963 = vmatpush1.bf16.msra.mxu1 %v6962_v56  ;;  %6453 = vmatprep.subr.bf16.mxu0 %v6452_v8  ;;  %v3412_v56 = vld [vmem:[#allocation8 + $0x1e18] sm:$0xff]  ;;  %v6472_v42 = vpack.c.bf16 %v3414_v18, %v3410_v16  ;;  %v3441_v16 = vld [vmem:[#allocation8 + $0x1f00] sm:$0xff] }
 0x429   :  { %6965 = vmatprep.subr.bf16.mxu1 %v6964_v27  ;;  %v3416_v8 = vld [vmem:[#allocation8 + $0x1e38] sm:$0xff]  ;;  %v3409_v27 = vld [vmem:[#allocation8 + $0x1e00] sm:$0xff] }
 0x42a   :  { %v6984_v10 = vpack.c.bf16 %v3416_v8, %v3412_v56  ;;  %v6474_v45 = vpack.c.bf16 %v3413_v3, %v3409_v27  ;;  %v3445_v18 = vld [vmem:[#allocation8 + $0x1f20] sm:$0xff]  ;;  %v3443_v56 = vld [vmem:[#allocation8 + $0x1f10] sm:$0xff]  ;;  %v3452_v27 = vld [vmem:[#allocation8 + $0x1f58] sm:$0xff] }
 0x42b   :  { %6455 = vmatpush1.bf16.msra.mxu0 %v6454_v21  ;;  %v3422_v21 = vld [vmem:[#allocation8 + $0x1e68] sm:$0xff]  ;;  %v3456_v3 = vld [vmem:[#allocation8 + $0x1f78] sm:$0xff] }
 0x42c   :  { %6967 = vmatpush1.bf16.msra.mxu1 %v6966_v15  ;;  %6457 = vmatprep.subr.bf16.mxu0 %v6456_v23  ;;  %v3420_v15 = vld [vmem:[#allocation8 + $0x1e58] sm:$0xff]  ;;  %v6476_v19 = vpack.c.bf16 %v3422_v21, %v3418_v7  ;;  %v3449_v7 = vld [vmem:[#allocation8 + $0x1f40] sm:$0xff] }
 0x42d   :  { %6969 = vmatprep.subr.bf16.mxu1 %v6968_v22  ;;  %v3424_v23 = vld [vmem:[#allocation8 + $0x1e78] sm:$0xff]  ;;  %v6986_v22 = vpack.c.bf16 %v3415_v20, %v3411_v37  ;;  %v6490_v37 = vpack.c.bf16 %v3445_v18, %v3441_v16  ;;  %v3453_v21 = vld [vmem:[#allocation8 + $0x1f60] sm:$0xff] }
 0x42e   :  { %v6988_v31 = vpack.c.bf16 %v3424_v23, %v3420_v15  ;;  %v3451_v15 = vld [vmem:[#allocation8 + $0x1f50] sm:$0xff]  ;;  %v7004_v23 = vpack.c.bf16 %v3456_v3, %v3452_v27  ;;  %v6494_v26 = vpack.c.bf16 %v3453_v21, %v3449_v7  ;;  %v4690_v3 = vld [vmem:[%s7905_s5 + $0x118] sm:$0xff] }
 0x42f   :  { %6459 = vmatpush1.bf16.msra.mxu0 %v6458_v46  ;;  %v3423_v46 = vld [vmem:[#allocation8 + $0x1e70] sm:$0xff] }
 0x430   :  { %6971 = vmatpush1.bf16.msra.mxu1 %v6970_v33  ;;  %6461 = vmatprep.subr.bf16.mxu0 %v6460_v49  ;;  %v3426_v33 = vld [vmem:[#allocation8 + $0x1e88] sm:$0xff]  ;;  %v6990_v61 = vpack.c.bf16 %v3423_v46, %v3419_v30  ;;  %v3461_v46 = vld [vmem:[#allocation8 + $0x1fa0] sm:$0xff] }
 0x431   :  { %6973 = vmatprep.subr.bf16.mxu1 %v6972_v39  ;;  %v3430_v49 = vld [vmem:[#allocation8 + $0x1ea8] sm:$0xff]  ;;  %v7687_v39 = vadd.f32 %v7606_v35, %v1174_v34  ;;  %v6994_v35 = vpack.c.bf16 %v3431_v43, %v3427_v32  ;;  %v3469_v43 = vld [vmem:[#allocation8 + $0x1fe0] sm:$0xff] }
 0x432   :  { %v6480_v55 = vpack.c.bf16 %v3430_v49, %v3426_v33  ;;  %v3462_v34 = vld [vmem:[#allocation8 + $0x1fa8] sm:$0xff]  ;;  %v3459_v33 = vld [vmem:[#allocation8 + $0x1f90] sm:$0xff] }
 0x433   :  { %6463 = vmatpush1.bf16.msra.mxu0 %v6462_v53  ;;  %v3434_v53 = vld [vmem:[#allocation8 + $0x1ec8] sm:$0xff]  ;;  %v2383_v60 = vmin.f32 %v7687_v39, 0.0  ;;  %v6496_v30 = vpack.c.bf16 %v3462_v34, %v3458_v24  ;;  %v7010_v25 = vpack.c.bf16 %v3463_v36, %v3459_v33  ;;  %vm2367_vm15 = vcmp.gt.f32.partialorder %v7687_v39, 0.0  ;;  %v4660_v24 = vld [vmem:[%s7905_s5 + $0x28] sm:$0xff]  ;;  %v4710_v33 = vld [vmem:[%s7905_s5 + $0x1b8] sm:$0xff] }
 0x434   :  { %6975 = vmatpush1.bf16.msra.mxu1 %v6974_v54  ;;  %6465 = vmatprep.subr.bf16.mxu0 %v6464_v29  ;;  %v3438_v54 = vld [vmem:[#allocation8 + $0x1ee8] sm:$0xff]  ;;  %v3436_v29 = vld [vmem:[#allocation8 + $0x1ed8] sm:$0xff]  ;;  %v4662_v36 = vld [vmem:[%s7905_s5 + $0x38] sm:$0xff] }
 0x435   :  { %6977 = vmatprep.subr.bf16.mxu1 %v6976_v11  ;;  %v6484_v11 = vpack.c.bf16 %v3438_v54, %v3434_v53  ;;  %v6996_v2 = vpack.c.bf16 %v3440_v57, %v3436_v29  ;;  %v2413_v5 = vmul.f32 1.442695, %v2383_v60  ;;  %v3467_v53 = vld [vmem:[#allocation8 + $0x1fd0] sm:$0xff]  ;;  %v4671_v57 = vld [vmem:[%s7905_s5 + $0x80] sm:$0xff] }
 0x436   :  { %v3471_v29 = vld [vmem:[#allocation8 + $0x1ff0] sm:$0xff]  ;;  %v4691_v34 = vld [vmem:[%s7905_s5 + $0x120] sm:$0xff] }
 0x437   :  { %6467 = vmatpush1.bf16.msra.mxu0 %v6466_v4  ;;  %v3442_v4 = vld [vmem:[#allocation8 + $0x1f08] sm:$0xff]  ;;  %7186 = vpow2.f32 %v2413_v5  ;;  %v7014_v62 = vpack.c.bf16 %v3471_v29, %v3467_v53  ;;  %v4674_v5 = vld [vmem:[%s7905_s5 + $0x98] sm:$0xff]  ;;  %v4712_v53 = vld [vmem:[%s7905_s5 + $0x1c8] sm:$0xff] }
 0x438   :  { %6979 = vmatpush1.bf16.msra.mxu1 %v6978_v47  ;;  %6469 = vmatprep.subr.bf16.mxu0 %v6468_v44  ;;  %v3446_v47 = vld [vmem:[#allocation8 + $0x1f28] sm:$0xff]  ;;  %v3444_v44 = vld [vmem:[#allocation8 + $0x1f18] sm:$0xff]  ;;  %v4664_v29 = vld [vmem:[%s7905_s5 + $0x48] sm:$0xff] }
 0x439   :  { %6981 = vmatprep.subr.bf16.mxu1 %v6980_v13  ;;  %v6998_v13 = vpack.c.bf16 %v3439_v6, %v3435_v63  ;;  %v6488_v14 = vpack.c.bf16 %v3446_v47, %v3442_v4  ;;  %v7000_v8 = vpack.c.bf16 %v3448_v9, %v3444_v44  ;;  %v4656_v6 = vld [vmem:[%s7905_s5 + $0x8] sm:$0xff]  ;;  %v4687_v4 = vld [vmem:[%s7905_s5 + $0x100] sm:$0xff] }
 0x43a   :  { %v4688_v9 = vld [vmem:[%s7905_s5 + $0x108] sm:$0xff] }
 0x43b   :  { %6471 = vmatpush1.bf16.msra.mxu0 %v6470_v1  ;;  %v3447_v1 = vld [vmem:[#allocation8 + $0x1f30] sm:$0xff]  ;;  %v7050_v18 = vpack.c.bf16 %v4688_v9, %v4687_v4  ;;  %v4697_v9 = vld [vmem:[%s7905_s5 + $0x150] sm:$0xff] }
 0x43c   :  { %6983 = vmatpush1.bf16.msra.mxu1 %v6982_v52  ;;  %6473 = vmatprep.subr.bf16.mxu0 %v6472_v42  ;;  %v3450_v52 = vld [vmem:[#allocation8 + $0x1f48] sm:$0xff] }
 0x43d   :  { %6985 = vmatprep.subr.bf16.mxu1 %v6984_v10  ;;  %v3454_v42 = vld [vmem:[#allocation8 + $0x1f68] sm:$0xff]  ;;  %v7002_v10 = vpack.c.bf16 %v3447_v1, %v3443_v56  ;;  %v4658_v1 = vld [vmem:[%s7905_s5 + $0x18] sm:$0xff] }
 0x43e   :  { %v6492_v20 = vpack.c.bf16 %v3454_v42, %v3450_v52  ;;  %v4689_v52 = vld [vmem:[%s7905_s5 + $0x110] sm:$0xff] }
 0x43f   :  { %6475 = vmatpush1.bf16.msra.mxu0 %v6474_v45  ;;  %v3455_v45 = vld [vmem:[#allocation8 + $0x1f70] sm:$0xff]  ;;  %v7054_v21 = vpack.c.bf16 %v4690_v3, %v4689_v52 }
 0x440   :  { %6987 = vmatpush1.bf16.msra.mxu1 %v6986_v22  ;;  %6477 = vmatprep.subr.bf16.mxu0 %v6476_v19  ;;  %v3460_v22 = vld [vmem:[#allocation8 + $0x1f98] sm:$0xff]  ;;  %v7006_v17 = vpack.c.bf16 %v3455_v45, %v3451_v15  ;;  %v4659_v45 = vld [vmem:[%s7905_s5 + $0x20] sm:$0xff]  ;;  %v4700_v3 = vld [vmem:[%s7905_s5 + $0x168] sm:$0xff] }
 0x441   :  { %6989 = vmatprep.subr.bf16.mxu1 %v6988_v31  ;;  %v3464_v19 = vld [vmem:[#allocation8 + $0x1fb8] sm:$0xff]  ;;  %v3457_v31 = vld [vmem:[#allocation8 + $0x1f80] sm:$0xff]  ;;  %v7187_v60 = vpop.eup %7186 }
 0x442   :  { %v7008_v49 = vpack.c.bf16 %v3464_v19, %v3460_v22  ;;  %v6498_v48 = vpack.c.bf16 %v3461_v46, %v3457_v31  ;;  %v4892_v47 = vadd.f32 -1.0, %v7187_v60  ;;  %v7026_v22 = vpack.c.bf16 %v4660_v24, %v4659_v45  ;;  %v4692_v19 = vld [vmem:[%s7905_s5 + $0x128] sm:$0xff]  ;;  %v4709_v31 = vld [vmem:[%s7905_s5 + $0x1b0] sm:$0xff]  ;;  %v4695_v60 = vld [vmem:[%s7905_s5 + $0x140] sm:$0xff] }
 0x443   :  { %6479 = vmatpush1.bf16.msra.mxu0 %v6478_v41  ;;  %v3470_v41 = vld [vmem:[#allocation8 + $0x1fe8] sm:$0xff]  ;;  %v4670_v45 = vld [vmem:[%s7905_s5 + $0x78] sm:$0xff] }
 0x444   :  { %6991 = vmatpush1.bf16.msra.mxu1 %v6990_v61  ;;  %6481 = vmatprep.subr.bf16.mxu0 %v6480_v55  ;;  %v3468_v61 = vld [vmem:[#allocation8 + $0x1fd8] sm:$0xff]  ;;  %v6500_v32 = vpack.c.bf16 %v3470_v41, %v3466_v38  ;;  %v2447_v42 = vsel %vm2367_vm15, %v7687_v39, %v4892_v47  ;;  %v4708_v39 = vld [vmem:[%s7905_s5 + $0x1a8] sm:$0xff]  ;;  %v7060_v38 = vpack.c.bf16 %v4710_v33, %v4709_v31 }
 0x445   :  { %6993 = vmatprep.subr.bf16.mxu1 %v6992_v50  ;;  %v3472_v55 = vld [vmem:[#allocation8 + $0x1ff8] sm:$0xff]  ;;  %v3465_v50 = vld [vmem:[#allocation8 + $0x1fc0] sm:$0xff] }
 0x446   :  { %v7012_v54 = vpack.c.bf16 %v3472_v55, %v3468_v61  ;;  %v6502_v12 = vpack.c.bf16 %v3469_v43, %v3465_v50  ;;  %v4693_v61 = vld [vmem:[%s7905_s5 + $0x130] sm:$0xff]  ;;  %v4694_v55 = vld [vmem:[%s7905_s5 + $0x138] sm:$0xff]  ;;  %v4711_v50 = vld [vmem:[%s7905_s5 + $0x1c0] sm:$0xff] }
 0x447   :  { %6483 = vmatpush1.bf16.msra.mxu0 %v6482_v58  ;;  %v4672_v58 = vld [vmem:[%s7905_s5 + $0x88] sm:$0xff]  ;;  %v4665_v47 = vld [vmem:[%s7905_s5 + $0x50] sm:$0xff] }
 0x448   :  { %6995 = vmatpush1.bf16.msra.mxu1 %v6994_v35  ;;  %6485 = vmatprep.subr.bf16.mxu0 %v6484_v11  ;;  %v4703_v35 = vld [vmem:[%s7905_s5 + $0x180] sm:$0xff]  ;;  %v4704_v11 = vld [vmem:[%s7905_s5 + $0x188] sm:$0xff]  ;;  %v7016_v63 = vpack.c.bf16 %v4672_v58, %v4671_v57  ;;  %v7064_v57 = vpack.c.bf16 %v4712_v53, %v4711_v50 }
 0x449   :  { %6997 = vmatprep.subr.bf16.mxu1 %v6996_v2  ;;  %v4655_v2 = vld [vmem:[%s7905_s5] sm:$0xff]  ;;  %v7048_v44 = vpack.c.bf16 %v4704_v11, %v4703_v35  ;;  %v4696_v35 = vld [vmem:[%s7905_s5 + $0x148] sm:$0xff]  ;;  %v4681_v11 = vld [vmem:[%s7905_s5 + $0xd0] sm:$0xff] }
 0x44a   :  { %v7018_v16 = vpack.c.bf16 %v4656_v6, %v4655_v2  ;;  %v4714_v2 = vld [vmem:[%s7905_s5 + $0x1d8] sm:$0xff] }
 0x44b   :  { %6487 = vmatpush1.bf16.msra.mxu0 %v6486_v59  ;;  %v4673_v59 = vld [vmem:[%s7905_s5 + $0x90] sm:$0xff] }
 0x44c   :  { %6999 = vmatpush1.bf16.msra.mxu1 %v6998_v13  ;;  %6489 = vmatprep.subr.bf16.mxu0 %v6488_v14  ;;  %v4705_v13 = vld [vmem:[%s7905_s5 + $0x190] sm:$0xff]  ;;  %v4706_v14 = vld [vmem:[%s7905_s5 + $0x198] sm:$0xff]  ;;  %v7020_v56 = vpack.c.bf16 %v4674_v5, %v4673_v59 }
 0x44d   :  { %7001 = vmatprep.subr.bf16.mxu1 %v7000_v8  ;;  %v4657_v8 = vld [vmem:[%s7905_s5 + $0x10] sm:$0xff]  ;;  %v7052_v27 = vpack.c.bf16 %v4706_v14, %v4705_v13  ;;  %v4698_v5 = vld [vmem:[%s7905_s5 + $0x158] sm:$0xff]  ;;  %v4683_v13 = vld [vmem:[%s7905_s5 + $0xe0] sm:$0xff] }
 0x44e   :  { %v7022_v7 = vpack.c.bf16 %v4658_v1, %v4657_v8  ;;  %v4684_v14 = vld [vmem:[%s7905_s5 + $0xe8] sm:$0xff]  ;;  %v4667_v1 = vld [vmem:[%s7905_s5 + $0x60] sm:$0xff] }
 0x44f   :  { %6491 = vmatpush1.bf16.msra.mxu0 %v6490_v37  ;;  %v4675_v37 = vld [vmem:[%s7905_s5 + $0xa0] sm:$0xff]  ;;  %v4716_v8 = vld [vmem:[%s7905_s5 + $0x1e8] sm:$0xff] }
 0x450   :  { %7003 = vmatpush1.bf16.msra.mxu1 %v7002_v10  ;;  %6493 = vmatprep.subr.bf16.mxu0 %v6492_v20  ;;  %v4676_v10 = vld [vmem:[%s7905_s5 + $0xa8] sm:$0xff]  ;;  %v4707_v20 = vld [vmem:[%s7905_s5 + $0x1a0] sm:$0xff] }
 0x451   :  { %7005 = vmatprep.subr.bf16.mxu1 %v7004_v23  ;;  %v7024_v15 = vpack.c.bf16 %v4676_v10, %v4675_v37  ;;  %v7056_v23 = vpack.c.bf16 %v4708_v39, %v4707_v20  ;;  %v4685_v10 = vld [vmem:[%s7905_s5 + $0xf0] sm:$0xff]  ;;  %v4686_v20 = vld [vmem:[%s7905_s5 + $0xf8] sm:$0xff] }
 0x452   :  { %v4717_v39 = vld [vmem:[%s7905_s5 + $0x1f0] sm:$0xff] }
 0x453   :  { %6495 = vmatpush1.bf16.msra.mxu0 %v6494_v26  ;;  %v7058_v26 = vpack.c.bf16 %v4692_v19, %v4691_v34  ;;  %v4701_v34 = vld [vmem:[%s7905_s5 + $0x170] sm:$0xff] }
 0x454   :  { %7007 = vmatpush1.bf16.msra.mxu1 %v7006_v17  ;;  %6497 = vmatprep.subr.bf16.mxu0 %v6496_v30  ;;  %v4677_v17 = vld [vmem:[%s7905_s5 + $0xb0] sm:$0xff]  ;;  %v4678_v30 = vld [vmem:[%s7905_s5 + $0xb8] sm:$0xff] }
 0x455   :  { %7009 = vmatprep.subr.bf16.mxu1 %v7008_v49  ;;  %v7028_v46 = vpack.c.bf16 %v4678_v30, %v4677_v17  ;;  %v4661_v49 = vld [vmem:[%s7905_s5 + $0x30] sm:$0xff]  ;;  %v3473_v17 = vld [vmem:[#allocation10] sm:$0xf] }
 0x456   :  { %v7030_v41 = vpack.c.bf16 %v4662_v36, %v4661_v49  ;;  %v3478_v30 = vrot.slane %v3473_v17, %v7532_v40  ;;  %v3486_v31 = vrot.slane %v3473_v17, %v7562_v28  ;;  %v3490_v33 = vrot.slane %v3473_v17, %v7535_v51 }
 0x457   :  { %6499 = vmatpush1.bf16.msra.mxu0 %v6498_v48  ;;  %v7062_v48 = vpack.c.bf16 %v4694_v55, %v4693_v61 }
 0x458   :  { %7011 = vmatpush1.bf16.msra.mxu1 %v7010_v25  ;;  %6501 = vmatprep.subr.bf16.mxu0 %v6500_v32  ;;  %v4679_v25 = vld [vmem:[%s7905_s5 + $0xc0] sm:$0xff]  ;;  %v4680_v32 = vld [vmem:[%s7905_s5 + $0xc8] sm:$0xff] }
 0x459   :  { %7013 = vmatprep.subr.bf16.mxu1 %v7012_v54  ;;  %v7032_v43 = vpack.c.bf16 %v4680_v32, %v4679_v25  ;;  %v4663_v54 = vld [vmem:[%s7905_s5 + $0x40] sm:$0xff] }
 0x45a   :  { %v7034_v58 = vpack.c.bf16 %v4664_v29, %v4663_v54 }
 0x45b   :  { %6503 = vmatpush1.bf16.msra.mxu0 %v6502_v12  ;;  %v7066_v12 = vpack.c.bf16 %v4696_v35, %v4695_v60 }
 0x45c   :  { %7015 = vmatpush1.bf16.msra.mxu1 %v7014_v62  ;;  %7017 = vmatprep.subr.bf16.mxu0 %v7016_v63  ;;  %v4682_v62 = vld [vmem:[%s7905_s5 + $0xd8] sm:$0xff]  ;;  %v4713_v63 = vld [vmem:[%s7905_s5 + $0x1d0] sm:$0xff] }
 0x45d   :  { %7049 = vmatprep.subr.bf16.mxu1 %v7048_v44  ;;  %v7036_v6 = vpack.c.bf16 %v4682_v62, %v4681_v11  ;;  %v7068_v4 = vpack.c.bf16 %v4714_v2, %v4713_v63  ;;  %v4666_v44 = vld [vmem:[%s7905_s5 + $0x58] sm:$0xff] }
 0x45e   :  { %4057 = vmatmul.mubr.f32.vlgmr.msra.gmra.mrb[8].mxu0 %v2447_v42  ;;  %v7038_v59 = vpack.c.bf16 %v4666_v44, %v4665_v47 }
 0x45f   :  { %4625 = vmatmul.mubr.f32.vlgmr.msra.gmra.mrb[8].mxu1 %v2447_v42  ;;  %7019 = vmatpush3.bf16.msra.mxu0 %v7018_v16  ;;  %v7070_v16 = vpack.c.bf16 %v4698_v5, %v4697_v9  ;;  %v4668_v42 = vld [vmem:[%s7905_s5 + $0x68] sm:$0xff] }
 0x460   :  { %7051 = vmatpush3.bf16.msra.mxu1 %v7050_v18  ;;  %7021 = vmatprep.subr.bf16.mxu0 %v7020_v56  ;;  %v7040_v18 = vpack.c.bf16 %v4684_v14, %v4683_v13  ;;  %v4715_v56 = vld [vmem:[%s7905_s5 + $0x1e0] sm:$0xff]  ;;  %v7042_v37 = vpack.c.bf16 %v4668_v42, %v4667_v1 }
 0x461   :  { %7053 = vmatprep.subr.bf16.mxu1 %v7052_v27  ;;  %v7072_v52 = vpack.c.bf16 %v4716_v8, %v4715_v56  ;;  %v4699_v27 = vld [vmem:[%s7905_s5 + $0x160] sm:$0xff] }
 0x463   :  { %7023 = vmatpush3.bf16.msra.mxu0 %v7022_v7  ;;  %v7074_v7 = vpack.c.bf16 %v4700_v3, %v4699_v27 }
 0x464   :  { %7055 = vmatpush3.bf16.msra.mxu1 %v7054_v21  ;;  %7025 = vmatprep.subr.bf16.mxu0 %v7024_v15  ;;  %v7044_v21 = vpack.c.bf16 %v4686_v20, %v4685_v10  ;;  %v4718_v15 = vld [vmem:[%s7905_s5 + $0x1f8] sm:$0xff] }
 0x465   :  { %7057 = vmatprep.subr.bf16.mxu1 %v7056_v23  ;;  %v4669_v23 = vld [vmem:[%s7905_s5 + $0x70] sm:$0xff]  ;;  %v7076_v24 = vpack.c.bf16 %v4718_v15, %v4717_v39 }
 0x466   :  { %v7046_v19 = vpack.c.bf16 %v4670_v45, %v4669_v23 }
 0x467   :  { %7027 = vmatpush3.bf16.msra.mxu0 %v7026_v22  ;;  %v4702_v22 = vld [vmem:[%s7905_s5 + $0x178] sm:$0xff]  ;;  %s7350_s5 = smov [#allocation11]  }
 0x468   :  { %7059 = vmatpush3.bf16.msra.mxu1 %v7058_v26  ;;  %7029 = vmatprep.subr.bf16.mxu0 %v7028_v46  ;;  %v7078_v26 = vpack.c.bf16 %v4702_v22, %v4701_v34  ;;  %v3482_v46 = vrot.slane %v3473_v17, %v7517_v0  ;;  %s4867_s18 = sshll.u32 %s7350_s5, 4  ;;  %s4868_s18 = int_to_ptr.vmem [resolvable:$true] %s4867_s18 }
 0x469   :  { %7061 = vmatprep.subr.bf16.mxu1 %v7060_v38  ;;  %s7310_s19 = scalar_lea.vmem %s4868_s18, 32  ;;  %p7315_p13 = scmp.lt.s32.totalorder %s4868_s18, %s4868_s18 }
 0x46a   :  { %p7311_p12 = scmp.ne.s32.totalorder %s4868_s18, %s7310_s19  ;;  %p7316_p0 = scmp.lt.s32.totalorder %s7310_s19, %s7310_s19 }
 0x46b   :  { %7031 = vmatpush3.bf16.msra.mxu0 %v7030_v41 }
 0x46c   :  { %7063 = vmatpush3.bf16.msra.mxu1 %v7062_v48  ;;  %7033 = vmatprep.subr.bf16.mxu0 %v7032_v43  ;;  %p7317_p1 = por %p7316_p0, %p7315_p13 }
 0x46d   :  { %7065 = vmatprep.subr.bf16.mxu1 %v7064_v57 }
 0x46e   :  { %p7318_p2 = pnand %p7317_p1, %p7311_p12 }
 0x46f   :  { %7035 = vmatpush3.bf16.msra.mxu0 %v7034_v58 }
 0x470   :  { %7067 = vmatpush3.bf16.msra.mxu1 %v7066_v12  ;;  %7037 = vmatprep.subr.bf16.mxu0 %v7036_v6 }
 0x471   :  { %7069 = vmatprep.subr.bf16.mxu1 %v7068_v4 }
 0x473   :  { %7039 = vmatpush3.bf16.msra.mxu0 %v7038_v59 }
 0x474   :  { %7071 = vmatpush3.bf16.msra.mxu1 %v7070_v16  ;;  %7041 = vmatprep.subr.bf16.mxu0 %v7040_v18 }
 0x475   :  { %7073 = vmatprep.subr.bf16.mxu1 %v7072_v52 }
 0x477   :  { %7043 = vmatpush3.bf16.msra.mxu0 %v7042_v37 }
 0x478   :  { %7075 = vmatpush3.bf16.msra.mxu1 %v7074_v7  ;;  %7045 = vmatprep.subr.bf16.mxu0 %v7044_v21 }
 0x479   :  { %7077 = vmatprep.subr.bf16.mxu1 %v7076_v24 }
 0x47b   :  { %7047 = vmatpush3.bf16.msra.mxu0 %v7046_v19 }
 0x47c   :  { %7079 = vmatpush3.bf16.msra.mxu1 %v7078_v26 }
 0x531   :  { %v4058_v49 = vpop.f32.mrb[8].mxu0 }
 0x532   :  { %v7096_v36 = vadd.f32 %v4058_v49, %v3478_v30  ;;  %v4626_v38 = vpop.f32.mrb[8].mxu1  ;;  %v4060_v41 = vpop.f32.mrb[9].mxu0 }
 0x533   :  { %v7098_v61 = vadd.f32 %v4626_v38, %v3486_v31  ;;  %v7097_v55 = vadd.f32 %v4060_v41, %v3482_v46  ;;  %v4628_v48 = vpop.f32.mrb[9].mxu1 }
 0x534   :  { %v4635_v25 = vmin.f32 %v7096_v36, 0.0  ;;  %v7099_v32 = vadd.f32 %v4628_v48, %v3490_v33  ;;  %vm4631_vm1 = vcmp.gt.f32.partialorder %v7096_v36, 0.0 }
 0x535   :  { %v4637_v50 = vmin.f32 %v7098_v61, 0.0  ;;  %v4636_v43 = vmin.f32 %v7097_v55, 0.0  ;;  %vm4632_vm0 = vcmp.gt.f32.partialorder %v7097_v55, 0.0  ;;  %vm4633_vm3 = vcmp.gt.f32.partialorder %v7098_v61, 0.0 }
 0x536   :  { %v4639_v53 = vmul.f32 1.442695, %v4635_v25  ;;  %v4638_v54 = vmin.f32 %v7099_v32, 0.0  ;;  %vm4634_vm2 = vcmp.gt.f32.partialorder %v7099_v32, 0.0 }
 0x537   :  { %v4643_v40 = vmul.f32 1.442695, %v4637_v50  ;;  %v4641_v29 = vmul.f32 1.442695, %v4636_v43 }
 0x538   :  { %7188 = vpow2.f32 %v4639_v53  ;;  %v4645_v28 = vmul.f32 1.442695, %v4638_v54 }
 0x539   :  { %7190 = vpow2.f32 %v4643_v40 }
 0x53a   :  { %7192 = vpow2.f32 %v4641_v29 }
 0x53b   :  { %7194 = vpow2.f32 %v4645_v28 }
 0x542   :  { %v7189_v0 = vpop.eup %7188 }
 0x543   :  { %v7191_v51 = vpop.eup %7190  ;;  %v4894_v58 = vadd.f32 -1.0, %v7189_v0 }
 0x544   :  { %v7193_v57 = vpop.eup %7192  ;;  %v4896_v11 = vadd.f32 -1.0, %v7191_v51 }
 0x545   :  { %v7195_v60 = vpop.eup %7194  ;;  %v4895_v35 = vadd.f32 -1.0, %v7193_v57  ;;  %v4651_v2 = vsel %vm4631_vm1, %v7096_v36, %v4894_v58 }
 0x546   :  { %v4897_v12 = vadd.f32 -1.0, %v7195_v60  ;;  %v4653_v6 = vsel %vm4633_vm3, %v7098_v61, %v4896_v11 }
 0x547   :  { %v4652_v62 = vsel %vm4632_vm0, %v7097_v55, %v4895_v35 }
 0x548   :  { %4783 = vmatprep.mubr.f32.mxu0 %v4652_v62  ;;  %v4654_v63 = vsel %vm4634_vm2, %v7099_v32, %v4897_v12 }
 0x549   :  { %4853 = vmatprep.mubr.f32.mxu1 %v4654_v63  ;;  %4784 = vmatmul.mubr.f32.vlgmr.msra.gmra.mrb[10].mxu0 %v4651_v2 }
 0x54a   :  { %4854 = vmatmul.mubr.f32.vlgmr.msra.gmra.mrb[10].mxu1 %v4653_v6 }
 0x61c   :  { %v4930_v4 = vpop.f32.mrb[10].mxu0 }
 0x61d   :  { %v4965_v47 = vpop.f32.mrb[10].mxu1  ;;  %v4931_v44 = vpop.f32.mrb[11].mxu0 }
 0x61e   :  { %v4932_v9 = vadd.f32 %v4931_v44, %v4930_v4  ;;  %v4966_v59 = vpop.f32.mrb[11].mxu1 }
 0x61f   :  { %v4967_v5 = vadd.f32 %v4966_v59, %v4965_v47 }
 0x621   :  { %v4856_v13 = vadd.f32 %v4967_v5, %v4932_v9 }
 0x623   :  { %4860 = vst.msk [vmem:[#allocation11] sm:$0x3] %vm4859_vm4, %v4856_v13 }
 0x624   :  { %7321 = shalt.err (!%p7318_p2)
}
 0x625   :  { %s7322_s1 = scalar_lea.hbm %s7906_s6, 32 }
 0x626   :  { %p7323_p3 = scmp.ne.s32.totalorder %s7906_s6, %s7322_s1  ;;  %p7326_p4 = scmp.lt.u32.totalorder %s7322_s1, %s7906_s6 }
 0x628   :  { %p7328_p5 = pnand %p7326_p4, %p7323_p3 }
 0x62a   :  { %7331 = shalt.err (!%p7328_p5)
}
 0x62b   :  { %4870 = dma.vmem_to_hbm [thread:$0]  %s4868_s18, 32, %s7906_s6, [#allocation4]  }
 0x62c   :  { %7338 = dma.done.wait [#allocation4], 32  }
 0x62d   :  { %7339 = vsyncadd [#allocation4], 4294967264 }
 0x62e   :  { %4874 = vsyncpa [#allocation3], 1 }
 0x62f   :  { %4875 = vsyncpa [#allocation6], 1 }
 0x630   :  { %4876 = vsyncpa [#allocation9], 1 }
 0x631   :  { %4877 = vsyncpa [#allocation4], 1 }

</bundles_post_ra>
